<compile_context>
chip_gen: v7x
topology: tpu7x:2x2x1
jax: 0.10.0
libtpu: 0.0.40
codegen_flags: <defaults>
</compile_context>

<pallas_src>
import functools
import math

import numpy as np
import jax
import jax.numpy as jnp
from jax.experimental import pallas as pl
from jax.experimental.pallas import tpu as pltpu

F32 = jnp.float32

# ---------------- small config consistent with CTMixer.__init__ ----------------
BATCH = 2
IMAGE_SIZE = 8           # h = w
CHANNELS = 5             # spectral bands before replication pad
DIM = 32                 # token embedding dim
NUM_LAYER = 1
NUM_CLASSES = 5
PATCH_SIZE = 1
NUM_HEAD = 4
HIDDEN_DIM = 32          # transformer MLP hidden dim
GROUPS = 2
GROUPS_WIDTH = 4
CNNB_HIDDEN = 64         # CNNB default hidden_dim=64

NEW_CHANNELS = math.ceil(CHANNELS / GROUPS) * GROUPS        # 6
PAD_SIZE = NEW_CHANNELS - CHANNELS                          # 1
NEW_PATCH_DIM = GROUPS * GROUPS_WIDTH                       # 8
PATCH_DIM = NEW_PATCH_DIM * PATCH_SIZE * PATCH_SIZE         # 8
NUM_PATCHES = (IMAGE_SIZE // PATCH_SIZE) ** 2               # 64
HEAD_DIM = DIM // NUM_HEAD                                  # 8
GPRB_MID = NEW_PATCH_DIM + 32                               # 40 (gr1 || c1 outputs)
BN_EPS = 1e-5
LN_EPS = 1e-5

H = W = IMAGE_SIZE
N_TOK = NUM_PATCHES          # tokens per batch element (64)
ROWS = BATCH * N_TOK         # flattened rows (128)
OUT_ROWS_PER_BATCH = 8       # sublane-padded logits rows per batch (tiling-friendly)

# Tap s = (di+1)*3 + (dj+1) reads x[h+di, w+dj] (PyTorch cross-correlation order).
TAP_OFFSETS = tuple(di * W + dj for di in (-1, 0, 1) for dj in (-1, 0, 1))


# ============================= constant builders =============================

def build_tap_masks():
    """(9, 64, 1) f32: mask[s, h*W+w] = 1 iff (h+di, w+dj) is inside the 8x8 patch."""
    m = np.zeros((9, N_TOK, 1), np.float32)
    for s in range(9):
        di, dj = s // 3 - 1, s % 3 - 1
        for hh in range(H):
            for ww in range(W):
                if 0 <= hh + di < H and 0 <= ww + dj < W:
                    m[s, hh * W + ww, 0] = 1.0
    return jnp.asarray(m)


def group_mask(cin, cout, groups):
    gin = np.arange(cin) // (cin // groups)
    gout = np.arange(cout) // (cout // groups)
    return jnp.asarray((gin[:, None] == gout[None, :]).astype(np.float32))


# ============================= in-kernel helpers =============================

def _ln(x, g, b):
    mu = jnp.mean(x, axis=-1, keepdims=True)
    var = jnp.mean((x - mu) * (x - mu), axis=-1, keepdims=True)
    return (x - mu) * jax.lax.rsqrt(var + LN_EPS) * g + b


def _gelu_tanh(x):
    return 0.5 * x * (1.0 + jnp.tanh(0.7978845608028654 * (x + 0.044715 * x * x * x)))


def _tap_shift(x, off):
    """out[r] = x[r + off] (mod N_TOK); boundary zeroing is done by the caller's mask."""
    if off == 0:
        return x
    return pltpu.roll(x, (-off) % N_TOK, 0)      # sublane rotation (XLU)


def _im2col3x3(x, mask_ref):
    """(N_TOK, C) -> (N_TOK, 9*C): 9 shifted+masked copies stacked along lanes."""
    cols = []
    for s, off in enumerate(TAP_OFFSETS):
        cols.append(_tap_shift(x, off) * mask_ref[s])
    return jnp.concatenate(cols, axis=-1)


# ============================= the fused kernel =============================

def ctmixer_kernel(x_ref, mask_ref,
                   stem_w_ref, stem_b_ref,
                   g1_w_ref, g1_b_ref, g2_w_ref, g2_b_ref,
                   patch_w_ref, patch_b_ref, pos_ref,
                   ln1_g_ref, ln1_b_ref, wqkv_ref, bqkv_ref, wproj_ref, bproj_ref,
                   ln2_g_ref, ln2_b_ref, fc1_w_ref, fc1_b_ref, fc2_w_ref, fc2_b_ref,
                   bn1_s_ref, bn1_t_ref, c1_w_ref, c1_b_ref,
                   bn2_s_ref, bn2_t_ref, dw_w_ref, dw_b_ref,
                   bn3_s_ref, bn3_t_ref, c3_w_ref, c3_b_ref,
                   lnc_g_ref, lnc_b_ref, cls_w_ref, cls_b_ref,
                   out_ref, *, num_layer, num_head):
    # ---- stem: grouped 1x1 conv (+folded BN) + ReLU ------------------- (64, 8)
    t = jnp.maximum(
        jnp.dot(x_ref[...], stem_w_ref[...], preferred_element_type=F32)
        + stem_b_ref[...], 0.0)

    # ---- GPRB level 1: GrConv1(+bn1) || conv1(+bn3) merged, ReLU ------ (64, 40)
    yz = jnp.maximum(
        jnp.dot(_im2col3x3(t, mask_ref), g1_w_ref[...],
                preferred_element_type=F32) + g1_b_ref[...], 0.0)

    # ---- GPRB level 2: GrConv2(+bn2) + conv2(+bn4) merged; relu(x+y+z)  (64, 8)
    g = jnp.maximum(
        t + jnp.dot(_im2col3x3(yz, mask_ref), g2_w_ref[...],
                    preferred_element_type=F32) + g2_b_ref[...], 0.0)

    # ---- patch embedding (patch_size=1 -> Linear) + positional embedding
    x4 = jnp.dot(g, patch_w_ref[...], preferred_element_type=F32) + patch_b_ref[...]
    x = x4 + pos_ref[...]                                            # (64, 32)

    # ---- transformer: pre-LN MHSA + GELU MLP (dropout = identity, eval mode)
    for l in range(num_layer):
        h1 = _ln(x, ln1_g_ref[l], ln1_b_ref[l])
        # fused QKV; 1/sqrt(head_dim) already folded into the Q columns/bias
        qkv = jnp.dot(h1, wqkv_ref[l], preferred_element_type=F32) + bqkv_ref[l]
        heads = []
        for i in range(num_head):
            q = qkv[:, i * HEAD_DIM:(i + 1) * HEAD_DIM]
            k = qkv[:, DIM + i * HEAD_DIM:DIM + (i + 1) * HEAD_DIM]
            v = qkv[:, 2 * DIM + i * HEAD_DIM:2 * DIM + (i + 1) * HEAD_DIM]
            sc = jax.lax.dot_general(q, k, (((1,), (1,)), ((), ())),
                                     preferred_element_type=F32)     # (64, 64)
            m = jnp.max(sc, axis=-1, keepdims=True)
            p = jnp.exp(sc - m)
            p = p * pl.reciprocal(jnp.sum(p, axis=-1, keepdims=True), approx=True)
            heads.append(jnp.dot(p, v, preferred_element_type=F32))  # (64, 8)
        o = jnp.concatenate(heads, axis=-1)                          # (64, 32)
        x = x + jnp.dot(o, wproj_ref[l], preferred_element_type=F32) + bproj_ref[l]
        h2 = _ln(x, ln2_g_ref[l], ln2_b_ref[l])
        h2 = jnp.dot(h2, fc1_w_ref[l], preferred_element_type=F32) + fc1_b_ref[l]
        h2 = _gelu_tanh(h2)
        h2 = jnp.dot(h2, fc2_w_ref[l], preferred_element_type=F32) + fc2_b_ref[l]
        x = x + h2
    res1 = x

    # ---- CNNB branch on x4: conv1(relu(bn1(x)))
    y = jnp.maximum(x4 * bn1_s_ref[...] + bn1_t_ref[...], 0.0)
    y = jnp.dot(y, c1_w_ref[...], preferred_element_type=F32) + c1_b_ref[...]   # (64, 64)
    # depthwise 3x3 of relu(bn2(y)): roll + mask + per-channel weight (pure VPU)
    z = jnp.maximum(y * bn2_s_ref[...] + bn2_t_ref[...], 0.0)
    taps = [_tap_shift(z, off) * mask_ref[s] * dw_w_ref[s]
            for s, off in enumerate(TAP_OFFSETS)]
    while len(taps) > 1:                          # pairwise tree accumulate
        nxt = [taps[i] + taps[i + 1] for i in range(0, len(taps) - 1, 2)]
        if len(taps) % 2:
            nxt.append(taps[-1])
        taps = nxt
    z = taps[0] + dw_b_ref[...]                                       # (64, 64)
    # conv3(relu(bn3(z)))
    o = jnp.maximum(z * bn3_s_ref[...] + bn3_t_ref[...], 0.0)
    o = jnp.dot(o, c3_w_ref[...], preferred_element_type=F32) + c3_b_ref[...]   # (64, 32)

    # ---- residual add (dropout = identity), per-batch mean pool, classifier
    pooled = jnp.mean(res1 + o, axis=0, keepdims=True)                # (1, 32)
    pooled = _ln(pooled, lnc_g_ref[...], lnc_b_ref[...])
    logits = jnp.dot(pooled, cls_w_ref[...], preferred_element_type=F32) + cls_b_ref[...]
    # write a sublane-padded (8, num_classes) block; wrapper takes row 0 per batch
    out_ref[...] = jnp.broadcast_to(logits, (OUT_ROWS_PER_BATCH, NUM_CLASSES))


def _fused_call(pp, x_flat):
    batch_in = pl.BlockSpec((N_TOK, NEW_CHANNELS), lambda b: (b, 0))
    out_spec = pl.BlockSpec((OUT_ROWS_PER_BATCH, NUM_CLASSES), lambda b: (b, 0))
    full = lambda s: pl.BlockSpec(s, lambda b, n=len(s): (0,) * n)
    r, c = pp["rbb"], pp["cls"]
    kernel = functools.partial(ctmixer_kernel, num_layer=NUM_LAYER, num_head=NUM_HEAD)
    return pl.pallas_call(
        kernel,
        grid=(BATCH,),
        in_specs=[batch_in,
                  full((9, N_TOK, 1)),
                  full((NEW_CHANNELS, NEW_PATCH_DIM)), full((1, NEW_PATCH_DIM)),
                  full((9 * NEW_PATCH_DIM, GPRB_MID)), full((1, GPRB_MID)),
                  full((9 * GPRB_MID, NEW_PATCH_DIM)), full((1, NEW_PATCH_DIM)),
                  full((PATCH_DIM, DIM)), full((1, DIM)), full((N_TOK, DIM)),
                  full((NUM_LAYER, 1, DIM)), full((NUM_LAYER, 1, DIM)),
                  full((NUM_LAYER, DIM, 3 * DIM)), full((NUM_LAYER, 1, 3 * DIM)),
                  full((NUM_LAYER, DIM, DIM)), full((NUM_LAYER, 1, DIM)),
                  full((NUM_LAYER, 1, DIM)), full((NUM_LAYER, 1, DIM)),
                  full((NUM_LAYER, DIM, HIDDEN_DIM)), full((NUM_LAYER, 1, HIDDEN_DIM)),
                  full((NUM_LAYER, HIDDEN_DIM, DIM)), full((NUM_LAYER, 1, DIM)),
                  full((1, DIM)), full((1, DIM)),
                  full((DIM, CNNB_HIDDEN)), full((1, CNNB_HIDDEN)),
                  full((1, CNNB_HIDDEN)), full((1, CNNB_HIDDEN)),
                  full((9, 1, CNNB_HIDDEN)), full((1, CNNB_HIDDEN)),
                  full((1, CNNB_HIDDEN)), full((1, CNNB_HIDDEN)),
                  full((CNNB_HIDDEN, DIM)), full((1, DIM)),
                  full((1, DIM)), full((1, DIM)),
                  full((DIM, NUM_CLASSES)), full((1, NUM_CLASSES))],
        out_specs=out_spec,
        out_shape=jax.ShapeDtypeStruct((BATCH * OUT_ROWS_PER_BATCH, NUM_CLASSES), F32),
        compiler_params=pltpu.CompilerParams(dimension_semantics=("parallel",)),
    )(x_flat, pp["tap_mask"],
      pp["stem_w"], pp["stem_b"],
      pp["gprb1_w"], pp["gprb1_b"], pp["gprb2_w"], pp["gprb2_b"],
      pp["patch_w"], pp["patch_b"], pp["pos"],
      pp["ln1_g"], pp["ln1_b"], pp["wqkv"], pp["bqkv"], pp["wproj"], pp["bproj"],
      pp["ln2_g"], pp["ln2_b"], pp["fc1_w"], pp["fc1_b"], pp["fc2_w"], pp["fc2_b"],
      r["bn1_s"], r["bn1_t"], r["c1_w"], r["c1_b"],
      r["bn2_s"], r["bn2_t"], r["dw_w"], r["dw_b"],
      r["bn3_s"], r["bn3_t"], r["c3_w"], r["c3_b"],
      c["ln_g"], c["ln_b"], c["w"], c["b"])


# ============================= parameter init & preparation =============================

def init_params(key):
    keys = iter(jax.random.split(key, 64))

    def nrm(shape, scale=0.05):
        return scale * jax.random.normal(next(keys), shape, dtype=F32)

    def bn(c):
        return dict(g=1.0 + nrm((c,), 0.02), b=nrm((c,), 0.02),
                    m=jnp.zeros((c,), F32), v=jnp.ones((c,), F32))

    def conv1x1(cin, cout, groups=1, scale=0.1):
        return dict(w=nrm((cin, cout), scale) * group_mask(cin, cout, groups),
                    b=nrm((cout,), 0.02))

    def conv3x3(cin, cout, groups=1, scale=0.1):
        # per-tap matmul form: (9, Cin, Cout); grouping enforced by a zero mask
        return dict(w=nrm((9, cin, cout), scale) * group_mask(cin, cout, groups)[None],
                    b=nrm((cout,), 0.02))

    p = {}
    p["conv1"] = conv1x1(NEW_CHANNELS, NEW_PATCH_DIM, groups=GROUPS)
    p["bn1"] = bn(NEW_PATCH_DIM)
    p["gprb"] = dict(
        gr1=conv3x3(NEW_PATCH_DIM, NEW_PATCH_DIM, groups=GROUPS), bn1=bn(NEW_PATCH_DIM),
        gr2=conv3x3(NEW_PATCH_DIM, NEW_PATCH_DIM, groups=GROUPS), bn2=bn(NEW_PATCH_DIM),
        c1=conv3x3(NEW_PATCH_DIM, 32), bn3=bn(32),
        c2=conv3x3(32, NEW_PATCH_DIM), bn4=bn(NEW_PATCH_DIM),
    )
    p["patch"] = dict(w=nrm((PATCH_DIM, DIM), 0.1), b=nrm((DIM,), 0.02))
    p["pos"] = nrm((1, NUM_PATCHES, DIM), 0.05)
    layers = []
    for _ in range(NUM_LAYER):
        layers.append(dict(
            ln1_g=1.0 + nrm((DIM,), 0.02), ln1_b=nrm((DIM,), 0.02),
            qkv_w=nrm((DIM, 3 * DIM), 0.1), qkv_b=nrm((3 * DIM,), 0.02),
            proj_w=nrm((DIM, DIM), 0.1), proj_b=nrm((DIM,), 0.02),
            ln2_g=1.0 + nrm((DIM,), 0.02), ln2_b=nrm((DIM,), 0.02),
            fc1_w=nrm((DIM, HIDDEN_DIM), 0.1), fc1_b=nrm((HIDDEN_DIM,), 0.02),
            fc2_w=nrm((HIDDEN_DIM, DIM), 0.1), fc2_b=nrm((DIM,), 0.02),
        ))
    p["transformer"] = dict(layers=layers)
    p["rbb"] = dict(
        bn1=bn(DIM), c1=conv1x1(DIM, CNNB_HIDDEN),
        bn2=bn(CNNB_HIDDEN),
        dw=dict(w=nrm((9, 1, CNNB_HIDDEN), 0.1), b=nrm((CNNB_HIDDEN,), 0.02)),
        bn3=bn(CNNB_HIDDEN), c3=conv1x1(CNNB_HIDDEN, DIM),
    )
    p["cls"] = dict(ln_g=1.0 + nrm((DIM,), 0.02), ln_b=nrm((DIM,), 0.02),
                    w=nrm((DIM, NUM_CLASSES), 0.1), b=nrm((NUM_CLASSES,), 0.02))
    return p


def fold_bn_after(w, b, bn):
    """conv (matmul form, last axis = Cout) followed by eval-mode BatchNorm."""
    scale = bn["g"] / jnp.sqrt(bn["v"] + BN_EPS)
    shift = bn["b"] - bn["m"] * scale
    return w * scale, b * scale + shift


def bn_affine(bn):
    scale = bn["g"] / jnp.sqrt(bn["v"] + BN_EPS)
    shift = bn["b"] - bn["m"] * scale
    return scale, shift


def prepare_params(p):
    """Fold BN into conv weights, merge GPRB branches, stack the 9 conv taps along
    K (im2col weights), fold the attention scale into the Q columns, stack
    transformer layers, and precompute the 3x3 boundary masks.  Done once."""
    pp = {}
    # stem conv1 + bn1 (ReLU fused in kernel)
    w, b = fold_bn_after(p["conv1"]["w"], p["conv1"]["b"], p["bn1"])
    pp["stem_w"], pp["stem_b"] = w, b.reshape(1, -1)
    # GPRB level 1: GrConv1(+bn1) || conv1(+bn3) merged along Cout -> (9*8, 40)
    g = p["gprb"]
    w_gr1, b_gr1 = fold_bn_after(g["gr1"]["w"], g["gr1"]["b"], g["bn1"])
    w_c1, b_c1 = fold_bn_after(g["c1"]["w"], g["c1"]["b"], g["bn3"])
    pp["gprb1_w"] = jnp.concatenate([w_gr1, w_c1], axis=2).reshape(
        9 * NEW_PATCH_DIM, GPRB_MID)
    pp["gprb1_b"] = jnp.concatenate([b_gr1, b_c1]).reshape(1, -1)
    # GPRB level 2: GrConv2(+bn2) reads ch 0:8, conv2(+bn4) reads ch 8:40 -> (9*40, 8)
    w_gr2, b_gr2 = fold_bn_after(g["gr2"]["w"], g["gr2"]["b"], g["bn2"])
    w_c2, b_c2 = fold_bn_after(g["c2"]["w"], g["c2"]["b"], g["bn4"])
    pp["gprb2_w"] = jnp.concatenate([w_gr2, w_c2], axis=1).reshape(
        9 * GPRB_MID, NEW_PATCH_DIM)
    pp["gprb2_b"] = (b_gr2 + b_c2).reshape(1, -1)
    # patch + positional embedding
    pp["patch_w"] = p["patch"]["w"]
    pp["patch_b"] = p["patch"]["b"].reshape(1, -1)
    pp["pos"] = p["pos"].reshape(NUM_PATCHES, DIM)
    # transformer: fused QKV (columns = [Q heads | K heads | V heads]); fold the
    # softmax scale into the Q columns/bias; stack layers along a leading axis.
    qscale = jnp.concatenate([jnp.full((DIM,), 1.0 / math.sqrt(HEAD_DIM), F32),
                              jnp.ones((2 * DIM,), F32)])
    L = p["transformer"]["layers"]
    pp["ln1_g"] = jnp.stack([l["ln1_g"].reshape(1, DIM) for l in L])
    pp["ln1_b"] = jnp.stack([l["ln1_b"].reshape(1, DIM) for l in L])
    pp["wqkv"] = jnp.stack([l["qkv_w"] * qscale[None, :] for l in L])
    pp["bqkv"] = jnp.stack([(l["qkv_b"] * qscale).reshape(1, 3 * DIM) for l in L])
    pp["wproj"] = jnp.stack([l["proj_w"] for l in L])
    pp["bproj"] = jnp.stack([l["proj_b"].reshape(1, DIM) for l in L])
    pp["ln2_g"] = jnp.stack([l["ln2_g"].reshape(1, DIM) for l in L])
    pp["ln2_b"] = jnp.stack([l["ln2_b"].reshape(1, DIM) for l in L])
    pp["fc1_w"] = jnp.stack([l["fc1_w"] for l in L])
    pp["fc1_b"] = jnp.stack([l["fc1_b"].reshape(1, HIDDEN_DIM) for l in L])
    pp["fc2_w"] = jnp.stack([l["fc2_w"] for l in L])
    pp["fc2_b"] = jnp.stack([l["fc2_b"].reshape(1, DIM) for l in L])
    # CNNB branch (BN precedes ReLU+conv, so keep it as in-kernel affine)
    r = p["rbb"]
    s1, t1 = bn_affine(r["bn1"]); s2, t2 = bn_affine(r["bn2"]); s3, t3 = bn_affine(r["bn3"])
    pp["rbb"] = dict(
        bn1_s=s1.reshape(1, DIM), bn1_t=t1.reshape(1, DIM),
        c1_w=r["c1"]["w"], c1_b=r["c1"]["b"].reshape(1, CNNB_HIDDEN),
        bn2_s=s2.reshape(1, CNNB_HIDDEN), bn2_t=t2.reshape(1, CNNB_HIDDEN),
        dw_w=r["dw"]["w"], dw_b=r["dw"]["b"].reshape(1, CNNB_HIDDEN),
        bn3_s=s3.reshape(1, CNNB_HIDDEN), bn3_t=t3.reshape(1, CNNB_HIDDEN),
        c3_w=r["c3"]["w"], c3_b=r["c3"]["b"].reshape(1, DIM),
    )
    pp["cls"] = dict(ln_g=p["cls"]["ln_g"].reshape(1, DIM),
                     ln_b=p["cls"]["ln_b"].reshape(1, DIM),
                     w=p["cls"]["w"], b=p["cls"]["b"].reshape(1, NUM_CLASSES))
    # 3x3-conv boundary masks (replaces the old 0/1 shift matrices)
    pp["tap_mask"] = build_tap_masks()           # (9, 64, 1)
    return pp


# ============================= CTMixer forward =============================

def ctmixer_forward(pp, x):
    """x: (B, 1, channels, h, w) float32 — matches the PyTorch module input."""
    B = x.shape[0]
    # ReplicationPad3d((0,0,0,0,0,pad_size)) -> replicate last spectral slice
    if PAD_SIZE > 0:
        x = jnp.concatenate([x, jnp.repeat(x[:, :, -1:], PAD_SIZE, axis=2)], axis=2)
    # 'b y c h w -> b (y c) h w', then NCHW -> NHWC, flatten rows (r = b*64 + h*8 + w)
    x = x.reshape(B, NEW_CHANNELS, H, W)
    x = jnp.transpose(x, (0, 2, 3, 1)).reshape(B * H * W, NEW_CHANNELS)
    # single fused kernel: stem + GPRB + embeddings + transformer + CNNB + pool + classify
    out = _fused_call(pp, x)                               # (B*8, NUM_CLASSES)
    return out.reshape(B, OUT_ROWS_PER_BATCH, NUM_CLASSES)[:, 0, :]


# ============================= main =============================

if __name__ == "__main__":
    key = jax.random.PRNGKey(0)
    pkey, xkey = jax.random.split(key)
    raw_params = init_params(pkey)
    params = prepare_params(raw_params)

    x = jax.random.normal(xkey, (BATCH, 1, CHANNELS, IMAGE_SIZE, IMAGE_SIZE), dtype=F32)

    fwd = jax.jit(ctmixer_forward)
    out = jax.block_until_ready(fwd(params, x))

    assert out.shape == (BATCH, NUM_CLASSES), out.shape
    assert bool(jnp.all(jnp.isfinite(out)))
    print("KERNEL_OK")
</pallas_src>

<mosaic_0001>
module attributes {stable_mosaic.version = 11 : i64} {
  func.func @ctmixer_kernel(%arg0: i32, %arg1: memref<64x6xf32, #tpu.memory_space<vmem>>, %arg2: memref<9x64x1xf32, #tpu.memory_space<vmem>>, %arg3: memref<6x8xf32, #tpu.memory_space<vmem>>, %arg4: memref<1x8xf32, #tpu.memory_space<vmem>>, %arg5: memref<72x40xf32, #tpu.memory_space<vmem>>, %arg6: memref<1x40xf32, #tpu.memory_space<vmem>>, %arg7: memref<360x8xf32, #tpu.memory_space<vmem>>, %arg8: memref<1x8xf32, #tpu.memory_space<vmem>>, %arg9: memref<8x32xf32, #tpu.memory_space<vmem>>, %arg10: memref<1x32xf32, #tpu.memory_space<vmem>>, %arg11: memref<64x32xf32, #tpu.memory_space<vmem>>, %arg12: memref<1x1x32xf32, #tpu.memory_space<vmem>>, %arg13: memref<1x1x32xf32, #tpu.memory_space<vmem>>, %arg14: memref<1x32x96xf32, #tpu.memory_space<vmem>>, %arg15: memref<1x1x96xf32, #tpu.memory_space<vmem>>, %arg16: memref<1x32x32xf32, #tpu.memory_space<vmem>>, %arg17: memref<1x1x32xf32, #tpu.memory_space<vmem>>, %arg18: memref<1x1x32xf32, #tpu.memory_space<vmem>>, %arg19: memref<1x1x32xf32, #tpu.memory_space<vmem>>, %arg20: memref<1x32x32xf32, #tpu.memory_space<vmem>>, %arg21: memref<1x1x32xf32, #tpu.memory_space<vmem>>, %arg22: memref<1x32x32xf32, #tpu.memory_space<vmem>>, %arg23: memref<1x1x32xf32, #tpu.memory_space<vmem>>, %arg24: memref<1x32xf32, #tpu.memory_space<vmem>>, %arg25: memref<1x32xf32, #tpu.memory_space<vmem>>, %arg26: memref<32x64xf32, #tpu.memory_space<vmem>>, %arg27: memref<1x64xf32, #tpu.memory_space<vmem>>, %arg28: memref<1x64xf32, #tpu.memory_space<vmem>>, %arg29: memref<1x64xf32, #tpu.memory_space<vmem>>, %arg30: memref<9x1x64xf32, #tpu.memory_space<vmem>>, %arg31: memref<1x64xf32, #tpu.memory_space<vmem>>, %arg32: memref<1x64xf32, #tpu.memory_space<vmem>>, %arg33: memref<1x64xf32, #tpu.memory_space<vmem>>, %arg34: memref<64x32xf32, #tpu.memory_space<vmem>>, %arg35: memref<1x32xf32, #tpu.memory_space<vmem>>, %arg36: memref<1x32xf32, #tpu.memory_space<vmem>>, %arg37: memref<1x32xf32, #tpu.memory_space<vmem>>, %arg38: memref<32x5xf32, #tpu.memory_space<vmem>>, %arg39: memref<1x5xf32, #tpu.memory_space<vmem>>, %arg40: memref<8x5xf32, #tpu.memory_space<vmem>>) attributes {dimension_semantics = [#tpu.dimension_semantics<parallel>], iteration_bounds = array<i64: 2>, scalar_prefetch = 0 : i64, scratch_operands = 0 : i64, tpu.core_type = #tpu.core_type<tc>, window_params = [{transform_indices = @transform_0, window_bounds = array<i64: 64, 6>}, {pipeline_mode = #tpu.pipeline_mode<synchronous>, transform_indices = @transform_1, window_bounds = array<i64: 9, 64, 1>}, {pipeline_mode = #tpu.pipeline_mode<synchronous>, transform_indices = @transform_2, window_bounds = array<i64: 6, 8>}, {pipeline_mode = #tpu.pipeline_mode<synchronous>, transform_indices = @transform_3, window_bounds = array<i64: 1, 8>}, {pipeline_mode = #tpu.pipeline_mode<synchronous>, transform_indices = @transform_4, window_bounds = array<i64: 72, 40>}, {pipeline_mode = #tpu.pipeline_mode<synchronous>, transform_indices = @transform_5, window_bounds = array<i64: 1, 40>}, {pipeline_mode = #tpu.pipeline_mode<synchronous>, transform_indices = @transform_6, window_bounds = array<i64: 360, 8>}, {pipeline_mode = #tpu.pipeline_mode<synchronous>, transform_indices = @transform_7, window_bounds = array<i64: 1, 8>}, {pipeline_mode = #tpu.pipeline_mode<synchronous>, transform_indices = @transform_8, window_bounds = array<i64: 8, 32>}, {pipeline_mode = #tpu.pipeline_mode<synchronous>, transform_indices = @transform_9, window_bounds = array<i64: 1, 32>}, {pipeline_mode = #tpu.pipeline_mode<synchronous>, transform_indices = @transform_10, window_bounds = array<i64: 64, 32>}, {pipeline_mode = #tpu.pipeline_mode<synchronous>, transform_indices = @transform_11, window_bounds = array<i64: 1, 1, 32>}, {pipeline_mode = #tpu.pipeline_mode<synchronous>, transform_indices = @transform_12, window_bounds = array<i64: 1, 1, 32>}, {pipeline_mode = #tpu.pipeline_mode<synchronous>, transform_indices = @transform_13, window_bounds = array<i64: 1, 32, 96>}, {pipeline_mode = #tpu.pipeline_mode<synchronous>, transform_indices = @transform_14, window_bounds = array<i64: 1, 1, 96>}, {pipeline_mode = #tpu.pipeline_mode<synchronous>, transform_indices = @transform_15, window_bounds = array<i64: 1, 32, 32>}, {pipeline_mode = #tpu.pipeline_mode<synchronous>, transform_indices = @transform_16, window_bounds = array<i64: 1, 1, 32>}, {pipeline_mode = #tpu.pipeline_mode<synchronous>, transform_indices = @transform_17, window_bounds = array<i64: 1, 1, 32>}, {pipeline_mode = #tpu.pipeline_mode<synchronous>, transform_indices = @transform_18, window_bounds = array<i64: 1, 1, 32>}, {pipeline_mode = #tpu.pipeline_mode<synchronous>, transform_indices = @transform_19, window_bounds = array<i64: 1, 32, 32>}, {pipeline_mode = #tpu.pipeline_mode<synchronous>, transform_indices = @transform_20, window_bounds = array<i64: 1, 1, 32>}, {pipeline_mode = #tpu.pipeline_mode<synchronous>, transform_indices = @transform_21, window_bounds = array<i64: 1, 32, 32>}, {pipeline_mode = #tpu.pipeline_mode<synchronous>, transform_indices = @transform_22, window_bounds = array<i64: 1, 1, 32>}, {pipeline_mode = #tpu.pipeline_mode<synchronous>, transform_indices = @transform_23, window_bounds = array<i64: 1, 32>}, {pipeline_mode = #tpu.pipeline_mode<synchronous>, transform_indices = @transform_24, window_bounds = array<i64: 1, 32>}, {pipeline_mode = #tpu.pipeline_mode<synchronous>, transform_indices = @transform_25, window_bounds = array<i64: 32, 64>}, {pipeline_mode = #tpu.pipeline_mode<synchronous>, transform_indices = @transform_26, window_bounds = array<i64: 1, 64>}, {pipeline_mode = #tpu.pipeline_mode<synchronous>, transform_indices = @transform_27, window_bounds = array<i64: 1, 64>}, {pipeline_mode = #tpu.pipeline_mode<synchronous>, transform_indices = @transform_28, window_bounds = array<i64: 1, 64>}, {pipeline_mode = #tpu.pipeline_mode<synchronous>, transform_indices = @transform_29, window_bounds = array<i64: 9, 1, 64>}, {pipeline_mode = #tpu.pipeline_mode<synchronous>, transform_indices = @transform_30, window_bounds = array<i64: 1, 64>}, {pipeline_mode = #tpu.pipeline_mode<synchronous>, transform_indices = @transform_31, window_bounds = array<i64: 1, 64>}, {pipeline_mode = #tpu.pipeline_mode<synchronous>, transform_indices = @transform_32, window_bounds = array<i64: 1, 64>}, {pipeline_mode = #tpu.pipeline_mode<synchronous>, transform_indices = @transform_33, window_bounds = array<i64: 64, 32>}, {pipeline_mode = #tpu.pipeline_mode<synchronous>, transform_indices = @transform_34, window_bounds = array<i64: 1, 32>}, {pipeline_mode = #tpu.pipeline_mode<synchronous>, transform_indices = @transform_35, window_bounds = array<i64: 1, 32>}, {pipeline_mode = #tpu.pipeline_mode<synchronous>, transform_indices = @transform_36, window_bounds = array<i64: 1, 32>}, {pipeline_mode = #tpu.pipeline_mode<synchronous>, transform_indices = @transform_37, window_bounds = array<i64: 32, 5>}, {pipeline_mode = #tpu.pipeline_mode<synchronous>, transform_indices = @transform_38, window_bounds = array<i64: 1, 5>}, {transform_indices = @transform_39, window_bounds = array<i64: 8, 5>}]} {
    %c0 = arith.constant 0 : index
    %c0_0 = arith.constant 0 : index
    %0 = vector.load %arg1[%c0, %c0_0] : memref<64x6xf32, #tpu.memory_space<vmem>>, vector<64x6xf32>
    %c0_1 = arith.constant 0 : index
    %c0_2 = arith.constant 0 : index
    %1 = vector.load %arg3[%c0_1, %c0_2] : memref<6x8xf32, #tpu.memory_space<vmem>>, vector<6x8xf32>
    %cst = arith.constant dense<0.000000e+00> : vector<64x8xf32>
    %2 = tpu.matmul %0, %1, %cst {dimension_numbers = #tpu.dot_dimension_numbers<[1], [0], [0], [1], [0, 0, 1, 1], [], []>} : vector<64x6xf32>, vector<6x8xf32>, vector<64x8xf32> -> vector<64x8xf32>
    %c0_3 = arith.constant 0 : index
    %c0_4 = arith.constant 0 : index
    %3 = vector.load %arg4[%c0_3, %c0_4] : memref<1x8xf32, #tpu.memory_space<vmem>>, vector<1x8xf32>
    %4 = vector.broadcast %3 : vector<1x8xf32> to vector<64x8xf32>
    %5 = arith.addf %2, %4 : vector<64x8xf32>
    %cst_5 = arith.constant 0.000000e+00 : f32
    %6 = vector.broadcast %cst_5 : f32 to vector<64x8xf32>
    %7 = arith.maximumf %5, %6 : vector<64x8xf32>
    %c9_i32 = arith.constant 9 : i32
    %8 = tpu.dynamic_rotate %7 by %c9_i32 dim 0 : vector<64x8xf32>, i32 -> vector<64x8xf32>
    %c0_6 = arith.constant 0 : index
    %c0_7 = arith.constant 0 : index
    %c0_8 = arith.constant 0 : index
    %9 = vector.load %arg2[%c0_6, %c0_7, %c0_8] : memref<9x64x1xf32, #tpu.memory_space<vmem>>, vector<1x64x1xf32>
    %10 = vector.shape_cast %9 : vector<1x64x1xf32> to vector<64x1xf32>
    %11 = vector.broadcast %10 : vector<64x1xf32> to vector<64x8xf32>
    %12 = arith.mulf %8, %11 : vector<64x8xf32>
    %c8_i32 = arith.constant 8 : i32
    %13 = tpu.dynamic_rotate %7 by %c8_i32 dim 0 : vector<64x8xf32>, i32 -> vector<64x8xf32>
    %c1 = arith.constant 1 : index
    %c0_9 = arith.constant 0 : index
    %c0_10 = arith.constant 0 : index
    %14 = vector.load %arg2[%c1, %c0_9, %c0_10] : memref<9x64x1xf32, #tpu.memory_space<vmem>>, vector<1x64x1xf32>
    %15 = vector.shape_cast %14 : vector<1x64x1xf32> to vector<64x1xf32>
    %16 = vector.broadcast %15 : vector<64x1xf32> to vector<64x8xf32>
    %17 = arith.mulf %13, %16 : vector<64x8xf32>
    %c7_i32 = arith.constant 7 : i32
    %18 = tpu.dynamic_rotate %7 by %c7_i32 dim 0 : vector<64x8xf32>, i32 -> vector<64x8xf32>
    %c2 = arith.constant 2 : index
    %c0_11 = arith.constant 0 : index
    %c0_12 = arith.constant 0 : index
    %19 = vector.load %arg2[%c2, %c0_11, %c0_12] : memref<9x64x1xf32, #tpu.memory_space<vmem>>, vector<1x64x1xf32>
    %20 = vector.shape_cast %19 : vector<1x64x1xf32> to vector<64x1xf32>
    %21 = vector.broadcast %20 : vector<64x1xf32> to vector<64x8xf32>
    %22 = arith.mulf %18, %21 : vector<64x8xf32>
    %c1_i32 = arith.constant 1 : i32
    %23 = tpu.dynamic_rotate %7 by %c1_i32 dim 0 : vector<64x8xf32>, i32 -> vector<64x8xf32>
    %c3 = arith.constant 3 : index
    %c0_13 = arith.constant 0 : index
    %c0_14 = arith.constant 0 : index
    %24 = vector.load %arg2[%c3, %c0_13, %c0_14] : memref<9x64x1xf32, #tpu.memory_space<vmem>>, vector<1x64x1xf32>
    %25 = vector.shape_cast %24 : vector<1x64x1xf32> to vector<64x1xf32>
    %26 = vector.broadcast %25 : vector<64x1xf32> to vector<64x8xf32>
    %27 = arith.mulf %23, %26 : vector<64x8xf32>
    %c4 = arith.constant 4 : index
    %c0_15 = arith.constant 0 : index
    %c0_16 = arith.constant 0 : index
    %28 = vector.load %arg2[%c4, %c0_15, %c0_16] : memref<9x64x1xf32, #tpu.memory_space<vmem>>, vector<1x64x1xf32>
    %29 = vector.shape_cast %28 : vector<1x64x1xf32> to vector<64x1xf32>
    %30 = vector.broadcast %29 : vector<64x1xf32> to vector<64x8xf32>
    %31 = arith.mulf %7, %30 : vector<64x8xf32>
    %c63_i32 = arith.constant 63 : i32
    %32 = tpu.dynamic_rotate %7 by %c63_i32 dim 0 : vector<64x8xf32>, i32 -> vector<64x8xf32>
    %c5 = arith.constant 5 : index
    %c0_17 = arith.constant 0 : index
    %c0_18 = arith.constant 0 : index
    %33 = vector.load %arg2[%c5, %c0_17, %c0_18] : memref<9x64x1xf32, #tpu.memory_space<vmem>>, vector<1x64x1xf32>
    %34 = vector.shape_cast %33 : vector<1x64x1xf32> to vector<64x1xf32>
    %35 = vector.broadcast %34 : vector<64x1xf32> to vector<64x8xf32>
    %36 = arith.mulf %32, %35 : vector<64x8xf32>
    %c57_i32 = arith.constant 57 : i32
    %37 = tpu.dynamic_rotate %7 by %c57_i32 dim 0 : vector<64x8xf32>, i32 -> vector<64x8xf32>
    %c6 = arith.constant 6 : index
    %c0_19 = arith.constant 0 : index
    %c0_20 = arith.constant 0 : index
    %38 = vector.load %arg2[%c6, %c0_19, %c0_20] : memref<9x64x1xf32, #tpu.memory_space<vmem>>, vector<1x64x1xf32>
    %39 = vector.shape_cast %38 : vector<1x64x1xf32> to vector<64x1xf32>
    %40 = vector.broadcast %39 : vector<64x1xf32> to vector<64x8xf32>
    %41 = arith.mulf %37, %40 : vector<64x8xf32>
    %c56_i32 = arith.constant 56 : i32
    %42 = tpu.dynamic_rotate %7 by %c56_i32 dim 0 : vector<64x8xf32>, i32 -> vector<64x8xf32>
    %c7 = arith.constant 7 : index
    %c0_21 = arith.constant 0 : index
    %c0_22 = arith.constant 0 : index
    %43 = vector.load %arg2[%c7, %c0_21, %c0_22] : memref<9x64x1xf32, #tpu.memory_space<vmem>>, vector<1x64x1xf32>
    %44 = vector.shape_cast %43 : vector<1x64x1xf32> to vector<64x1xf32>
    %45 = vector.broadcast %44 : vector<64x1xf32> to vector<64x8xf32>
    %46 = arith.mulf %42, %45 : vector<64x8xf32>
    %c55_i32 = arith.constant 55 : i32
    %47 = tpu.dynamic_rotate %7 by %c55_i32 dim 0 : vector<64x8xf32>, i32 -> vector<64x8xf32>
    %c8 = arith.constant 8 : index
    %c0_23 = arith.constant 0 : index
    %c0_24 = arith.constant 0 : index
    %48 = vector.load %arg2[%c8, %c0_23, %c0_24] : memref<9x64x1xf32, #tpu.memory_space<vmem>>, vector<1x64x1xf32>
    %49 = vector.shape_cast %48 : vector<1x64x1xf32> to vector<64x1xf32>
    %50 = vector.broadcast %49 : vector<64x1xf32> to vector<64x8xf32>
    %51 = arith.mulf %47, %50 : vector<64x8xf32>
    %52 = tpu.concatenate %12, %17, %22, %27, %31, %36, %41, %46, %51 in 1 : vector<64x8xf32>, vector<64x8xf32>, vector<64x8xf32>, vector<64x8xf32>, vector<64x8xf32>, vector<64x8xf32>, vector<64x8xf32>, vector<64x8xf32>, vector<64x8xf32> -> vector<64x72xf32>
    %c0_25 = arith.constant 0 : index
    %c0_26 = arith.constant 0 : index
    %53 = vector.load %arg5[%c0_25, %c0_26] : memref<72x40xf32, #tpu.memory_space<vmem>>, vector<72x40xf32>
    %cst_27 = arith.constant dense<0.000000e+00> : vector<64x40xf32>
    %54 = tpu.matmul %52, %53, %cst_27 {dimension_numbers = #tpu.dot_dimension_numbers<[1], [0], [0], [1], [0, 0, 1, 1], [], []>} : vector<64x72xf32>, vector<72x40xf32>, vector<64x40xf32> -> vector<64x40xf32>
    %c0_28 = arith.constant 0 : index
    %c0_29 = arith.constant 0 : index
    %55 = vector.load %arg6[%c0_28, %c0_29] : memref<1x40xf32, #tpu.memory_space<vmem>>, vector<1x40xf32>
    %56 = vector.broadcast %55 : vector<1x40xf32> to vector<64x40xf32>
    %57 = arith.addf %54, %56 : vector<64x40xf32>
    %cst_30 = arith.constant 0.000000e+00 : f32
    %58 = vector.broadcast %cst_30 : f32 to vector<64x40xf32>
    %59 = arith.maximumf %57, %58 : vector<64x40xf32>
    %c9_i32_31 = arith.constant 9 : i32
    %60 = tpu.dynamic_rotate %59 by %c9_i32_31 dim 0 : vector<64x40xf32>, i32 -> vector<64x40xf32>
    %c0_32 = arith.constant 0 : index
    %c0_33 = arith.constant 0 : index
    %c0_34 = arith.constant 0 : index
    %61 = vector.load %arg2[%c0_32, %c0_33, %c0_34] : memref<9x64x1xf32, #tpu.memory_space<vmem>>, vector<1x64x1xf32>
    %62 = vector.shape_cast %61 : vector<1x64x1xf32> to vector<64x1xf32>
    %63 = vector.broadcast %62 : vector<64x1xf32> to vector<64x40xf32>
    %64 = arith.mulf %60, %63 : vector<64x40xf32>
    %c8_i32_35 = arith.constant 8 : i32
    %65 = tpu.dynamic_rotate %59 by %c8_i32_35 dim 0 : vector<64x40xf32>, i32 -> vector<64x40xf32>
    %c1_36 = arith.constant 1 : index
    %c0_37 = arith.constant 0 : index
    %c0_38 = arith.constant 0 : index
    %66 = vector.load %arg2[%c1_36, %c0_37, %c0_38] : memref<9x64x1xf32, #tpu.memory_space<vmem>>, vector<1x64x1xf32>
    %67 = vector.shape_cast %66 : vector<1x64x1xf32> to vector<64x1xf32>
    %68 = vector.broadcast %67 : vector<64x1xf32> to vector<64x40xf32>
    %69 = arith.mulf %65, %68 : vector<64x40xf32>
    %c7_i32_39 = arith.constant 7 : i32
    %70 = tpu.dynamic_rotate %59 by %c7_i32_39 dim 0 : vector<64x40xf32>, i32 -> vector<64x40xf32>
    %c2_40 = arith.constant 2 : index
    %c0_41 = arith.constant 0 : index
    %c0_42 = arith.constant 0 : index
    %71 = vector.load %arg2[%c2_40, %c0_41, %c0_42] : memref<9x64x1xf32, #tpu.memory_space<vmem>>, vector<1x64x1xf32>
    %72 = vector.shape_cast %71 : vector<1x64x1xf32> to vector<64x1xf32>
    %73 = vector.broadcast %72 : vector<64x1xf32> to vector<64x40xf32>
    %74 = arith.mulf %70, %73 : vector<64x40xf32>
    %c1_i32_43 = arith.constant 1 : i32
    %75 = tpu.dynamic_rotate %59 by %c1_i32_43 dim 0 : vector<64x40xf32>, i32 -> vector<64x40xf32>
    %c3_44 = arith.constant 3 : index
    %c0_45 = arith.constant 0 : index
    %c0_46 = arith.constant 0 : index
    %76 = vector.load %arg2[%c3_44, %c0_45, %c0_46] : memref<9x64x1xf32, #tpu.memory_space<vmem>>, vector<1x64x1xf32>
    %77 = vector.shape_cast %76 : vector<1x64x1xf32> to vector<64x1xf32>
    %78 = vector.broadcast %77 : vector<64x1xf32> to vector<64x40xf32>
    %79 = arith.mulf %75, %78 : vector<64x40xf32>
    %c4_47 = arith.constant 4 : index
    %c0_48 = arith.constant 0 : index
    %c0_49 = arith.constant 0 : index
    %80 = vector.load %arg2[%c4_47, %c0_48, %c0_49] : memref<9x64x1xf32, #tpu.memory_space<vmem>>, vector<1x64x1xf32>
    %81 = vector.shape_cast %80 : vector<1x64x1xf32> to vector<64x1xf32>
    %82 = vector.broadcast %81 : vector<64x1xf32> to vector<64x40xf32>
    %83 = arith.mulf %59, %82 : vector<64x40xf32>
    %c63_i32_50 = arith.constant 63 : i32
    %84 = tpu.dynamic_rotate %59 by %c63_i32_50 dim 0 : vector<64x40xf32>, i32 -> vector<64x40xf32>
    %c5_51 = arith.constant 5 : index
    %c0_52 = arith.constant 0 : index
    %c0_53 = arith.constant 0 : index
    %85 = vector.load %arg2[%c5_51, %c0_52, %c0_53] : memref<9x64x1xf32, #tpu.memory_space<vmem>>, vector<1x64x1xf32>
    %86 = vector.shape_cast %85 : vector<1x64x1xf32> to vector<64x1xf32>
    %87 = vector.broadcast %86 : vector<64x1xf32> to vector<64x40xf32>
    %88 = arith.mulf %84, %87 : vector<64x40xf32>
    %c57_i32_54 = arith.constant 57 : i32
    %89 = tpu.dynamic_rotate %59 by %c57_i32_54 dim 0 : vector<64x40xf32>, i32 -> vector<64x40xf32>
    %c6_55 = arith.constant 6 : index
    %c0_56 = arith.constant 0 : index
    %c0_57 = arith.constant 0 : index
    %90 = vector.load %arg2[%c6_55, %c0_56, %c0_57] : memref<9x64x1xf32, #tpu.memory_space<vmem>>, vector<1x64x1xf32>
    %91 = vector.shape_cast %90 : vector<1x64x1xf32> to vector<64x1xf32>
    %92 = vector.broadcast %91 : vector<64x1xf32> to vector<64x40xf32>
    %93 = arith.mulf %89, %92 : vector<64x40xf32>
    %c56_i32_58 = arith.constant 56 : i32
    %94 = tpu.dynamic_rotate %59 by %c56_i32_58 dim 0 : vector<64x40xf32>, i32 -> vector<64x40xf32>
    %c7_59 = arith.constant 7 : index
    %c0_60 = arith.constant 0 : index
    %c0_61 = arith.constant 0 : index
    %95 = vector.load %arg2[%c7_59, %c0_60, %c0_61] : memref<9x64x1xf32, #tpu.memory_space<vmem>>, vector<1x64x1xf32>
    %96 = vector.shape_cast %95 : vector<1x64x1xf32> to vector<64x1xf32>
    %97 = vector.broadcast %96 : vector<64x1xf32> to vector<64x40xf32>
    %98 = arith.mulf %94, %97 : vector<64x40xf32>
    %c55_i32_62 = arith.constant 55 : i32
    %99 = tpu.dynamic_rotate %59 by %c55_i32_62 dim 0 : vector<64x40xf32>, i32 -> vector<64x40xf32>
    %c8_63 = arith.constant 8 : index
    %c0_64 = arith.constant 0 : index
    %c0_65 = arith.constant 0 : index
    %100 = vector.load %arg2[%c8_63, %c0_64, %c0_65] : memref<9x64x1xf32, #tpu.memory_space<vmem>>, vector<1x64x1xf32>
    %101 = vector.shape_cast %100 : vector<1x64x1xf32> to vector<64x1xf32>
    %102 = vector.broadcast %101 : vector<64x1xf32> to vector<64x40xf32>
    %103 = arith.mulf %99, %102 : vector<64x40xf32>
    %104 = tpu.concatenate %64, %69, %74, %79, %83, %88, %93, %98, %103 in 1 : vector<64x40xf32>, vector<64x40xf32>, vector<64x40xf32>, vector<64x40xf32>, vector<64x40xf32>, vector<64x40xf32>, vector<64x40xf32>, vector<64x40xf32>, vector<64x40xf32> -> vector<64x360xf32>
    %c0_66 = arith.constant 0 : index
    %c0_67 = arith.constant 0 : index
    %105 = vector.load %arg7[%c0_66, %c0_67] : memref<360x8xf32, #tpu.memory_space<vmem>>, vector<360x8xf32>
    %cst_68 = arith.constant dense<0.000000e+00> : vector<64x8xf32>
    %106 = tpu.matmul %104, %105, %cst_68 {dimension_numbers = #tpu.dot_dimension_numbers<[1], [0], [0], [1], [0, 0, 1, 1], [], []>} : vector<64x360xf32>, vector<360x8xf32>, vector<64x8xf32> -> vector<64x8xf32>
    %107 = arith.addf %7, %106 : vector<64x8xf32>
    %c0_69 = arith.constant 0 : index
    %c0_70 = arith.constant 0 : index
    %108 = vector.load %arg8[%c0_69, %c0_70] : memref<1x8xf32, #tpu.memory_space<vmem>>, vector<1x8xf32>
    %109 = vector.broadcast %108 : vector<1x8xf32> to vector<64x8xf32>
    %110 = arith.addf %107, %109 : vector<64x8xf32>
    %cst_71 = arith.constant 0.000000e+00 : f32
    %111 = vector.broadcast %cst_71 : f32 to vector<64x8xf32>
    %112 = arith.maximumf %110, %111 : vector<64x8xf32>
    %c0_72 = arith.constant 0 : index
    %c0_73 = arith.constant 0 : index
    %113 = vector.load %arg9[%c0_72, %c0_73] : memref<8x32xf32, #tpu.memory_space<vmem>>, vector<8x32xf32>
    %cst_74 = arith.constant dense<0.000000e+00> : vector<64x32xf32>
    %114 = tpu.matmul %112, %113, %cst_74 {dimension_numbers = #tpu.dot_dimension_numbers<[1], [0], [0], [1], [0, 0, 1, 1], [], []>} : vector<64x8xf32>, vector<8x32xf32>, vector<64x32xf32> -> vector<64x32xf32>
    %c0_75 = arith.constant 0 : index
    %c0_76 = arith.constant 0 : index
    %115 = vector.load %arg10[%c0_75, %c0_76] : memref<1x32xf32, #tpu.memory_space<vmem>>, vector<1x32xf32>
    %116 = vector.broadcast %115 : vector<1x32xf32> to vector<64x32xf32>
    %117 = arith.addf %114, %116 : vector<64x32xf32>
    %c0_77 = arith.constant 0 : index
    %c0_78 = arith.constant 0 : index
    %118 = vector.load %arg11[%c0_77, %c0_78] : memref<64x32xf32, #tpu.memory_space<vmem>>, vector<64x32xf32>
    %119 = arith.addf %117, %118 : vector<64x32xf32>
    %c0_79 = arith.constant 0 : index
    %c0_80 = arith.constant 0 : index
    %c0_81 = arith.constant 0 : index
    %120 = vector.load %arg12[%c0_79, %c0_80, %c0_81] : memref<1x1x32xf32, #tpu.memory_space<vmem>>, vector<1x1x32xf32>
    %121 = vector.shape_cast %120 : vector<1x1x32xf32> to vector<1x32xf32>
    %c0_82 = arith.constant 0 : index
    %c0_83 = arith.constant 0 : index
    %c0_84 = arith.constant 0 : index
    %122 = vector.load %arg13[%c0_82, %c0_83, %c0_84] : memref<1x1x32xf32, #tpu.memory_space<vmem>>, vector<1x1x32xf32>
    %123 = vector.shape_cast %122 : vector<1x1x32xf32> to vector<1x32xf32>
    %cst_85 = arith.constant dense<0.000000e+00> : vector<64xf32>
    %124 = vector.multi_reduction <add>, %119, %cst_85 [1] : vector<64x32xf32> to vector<64xf32>
    %125 = vector.shape_cast %124 : vector<64xf32> to vector<64x1xf32>
    %cst_86 = arith.constant 3.200000e+01 : f32
    %126 = vector.broadcast %cst_86 : f32 to vector<64x1xf32>
    %127 = arith.divf %125, %126 : vector<64x1xf32>
    %128 = vector.broadcast %127 : vector<64x1xf32> to vector<64x32xf32>
    %129 = arith.subf %119, %128 : vector<64x32xf32>
    %130 = vector.broadcast %127 : vector<64x1xf32> to vector<64x32xf32>
    %131 = arith.subf %119, %130 : vector<64x32xf32>
    %132 = arith.mulf %129, %131 : vector<64x32xf32>
    %cst_87 = arith.constant dense<0.000000e+00> : vector<64xf32>
    %133 = vector.multi_reduction <add>, %132, %cst_87 [1] : vector<64x32xf32> to vector<64xf32>
    %134 = vector.shape_cast %133 : vector<64xf32> to vector<64x1xf32>
    %cst_88 = arith.constant 3.200000e+01 : f32
    %135 = vector.broadcast %cst_88 : f32 to vector<64x1xf32>
    %136 = arith.divf %134, %135 : vector<64x1xf32>
    %137 = vector.broadcast %127 : vector<64x1xf32> to vector<64x32xf32>
    %138 = arith.subf %119, %137 : vector<64x32xf32>
    %cst_89 = arith.constant 9.99999974E-6 : f32
    %139 = vector.broadcast %cst_89 : f32 to vector<64x1xf32>
    %140 = arith.addf %136, %139 : vector<64x1xf32>
    %141 = math.rsqrt %140 : vector<64x1xf32>
    %142 = vector.broadcast %141 : vector<64x1xf32> to vector<64x32xf32>
    %143 = arith.mulf %138, %142 : vector<64x32xf32>
    %144 = vector.broadcast %121 : vector<1x32xf32> to vector<64x32xf32>
    %145 = arith.mulf %143, %144 : vector<64x32xf32>
    %146 = vector.broadcast %123 : vector<1x32xf32> to vector<64x32xf32>
    %147 = arith.addf %145, %146 : vector<64x32xf32>
    %c0_90 = arith.constant 0 : index
    %c0_91 = arith.constant 0 : index
    %c0_92 = arith.constant 0 : index
    %148 = vector.load %arg14[%c0_90, %c0_91, %c0_92] : memref<1x32x96xf32, #tpu.memory_space<vmem>>, vector<1x32x96xf32>
    %149 = vector.shape_cast %148 : vector<1x32x96xf32> to vector<32x96xf32>
    %cst_93 = arith.constant dense<0.000000e+00> : vector<64x96xf32>
    %150 = tpu.matmul %147, %149, %cst_93 {dimension_numbers = #tpu.dot_dimension_numbers<[1], [0], [0], [1], [0, 0, 1, 1], [], []>} : vector<64x32xf32>, vector<32x96xf32>, vector<64x96xf32> -> vector<64x96xf32>
    %c0_94 = arith.constant 0 : index
    %c0_95 = arith.constant 0 : index
    %c0_96 = arith.constant 0 : index
    %151 = vector.load %arg15[%c0_94, %c0_95, %c0_96] : memref<1x1x96xf32, #tpu.memory_space<vmem>>, vector<1x1x96xf32>
    %152 = vector.shape_cast %151 : vector<1x1x96xf32> to vector<1x96xf32>
    %153 = vector.broadcast %152 : vector<1x96xf32> to vector<64x96xf32>
    %154 = arith.addf %150, %153 : vector<64x96xf32>
    %155 = vector.extract_strided_slice %154 {offsets = [0, 0], sizes = [64, 8], strides = [1, 1]} : vector<64x96xf32> to vector<64x8xf32>
    %156 = vector.extract_strided_slice %154 {offsets = [0, 32], sizes = [64, 8], strides = [1, 1]} : vector<64x96xf32> to vector<64x8xf32>
    %157 = vector.extract_strided_slice %154 {offsets = [0, 64], sizes = [64, 8], strides = [1, 1]} : vector<64x96xf32> to vector<64x8xf32>
    %cst_97 = arith.constant dense<0.000000e+00> : vector<64x64xf32>
    %158 = tpu.matmul %155, %156, %cst_97 {dimension_numbers = #tpu.dot_dimension_numbers<[1], [1], [0], [0], [0, 0, 1, 0], [], []>} : vector<64x8xf32>, vector<64x8xf32>, vector<64x64xf32> -> vector<64x64xf32>
    %cst_98 = arith.constant dense<0xFF800000> : vector<64xf32>
    %159 = vector.multi_reduction <maximumf>, %158, %cst_98 [1] : vector<64x64xf32> to vector<64xf32>
    %160 = vector.shape_cast %159 : vector<64xf32> to vector<64x1xf32>
    %161 = vector.broadcast %160 : vector<64x1xf32> to vector<64x64xf32>
    %162 = arith.subf %158, %161 : vector<64x64xf32>
    %163 = math.exp %162 : vector<64x64xf32>
    %cst_99 = arith.constant dense<0.000000e+00> : vector<64xf32>
    %164 = vector.multi_reduction <add>, %163, %cst_99 [1] : vector<64x64xf32> to vector<64xf32>
    %165 = vector.shape_cast %164 : vector<64xf32> to vector<64x1xf32>
    %166 = tpu.reciprocal %165 {approx = true} : vector<64x1xf32> -> vector<64x1xf32>
    %167 = vector.broadcast %166 : vector<64x1xf32> to vector<64x64xf32>
    %168 = arith.mulf %163, %167 : vector<64x64xf32>
    %cst_100 = arith.constant dense<0.000000e+00> : vector<64x8xf32>
    %169 = tpu.matmul %168, %157, %cst_100 {dimension_numbers = #tpu.dot_dimension_numbers<[1], [0], [0], [1], [0, 0, 1, 1], [], []>} : vector<64x64xf32>, vector<64x8xf32>, vector<64x8xf32> -> vector<64x8xf32>
    %170 = vector.extract_strided_slice %154 {offsets = [0, 8], sizes = [64, 8], strides = [1, 1]} : vector<64x96xf32> to vector<64x8xf32>
    %171 = vector.extract_strided_slice %154 {offsets = [0, 40], sizes = [64, 8], strides = [1, 1]} : vector<64x96xf32> to vector<64x8xf32>
    %172 = vector.extract_strided_slice %154 {offsets = [0, 72], sizes = [64, 8], strides = [1, 1]} : vector<64x96xf32> to vector<64x8xf32>
    %cst_101 = arith.constant dense<0.000000e+00> : vector<64x64xf32>
    %173 = tpu.matmul %170, %171, %cst_101 {dimension_numbers = #tpu.dot_dimension_numbers<[1], [1], [0], [0], [0, 0, 1, 0], [], []>} : vector<64x8xf32>, vector<64x8xf32>, vector<64x64xf32> -> vector<64x64xf32>
    %cst_102 = arith.constant dense<0xFF800000> : vector<64xf32>
    %174 = vector.multi_reduction <maximumf>, %173, %cst_102 [1] : vector<64x64xf32> to vector<64xf32>
    %175 = vector.shape_cast %174 : vector<64xf32> to vector<64x1xf32>
    %176 = vector.broadcast %175 : vector<64x1xf32> to vector<64x64xf32>
    %177 = arith.subf %173, %176 : vector<64x64xf32>
    %178 = math.exp %177 : vector<64x64xf32>
    %cst_103 = arith.constant dense<0.000000e+00> : vector<64xf32>
    %179 = vector.multi_reduction <add>, %178, %cst_103 [1] : vector<64x64xf32> to vector<64xf32>
    %180 = vector.shape_cast %179 : vector<64xf32> to vector<64x1xf32>
    %181 = tpu.reciprocal %180 {approx = true} : vector<64x1xf32> -> vector<64x1xf32>
    %182 = vector.broadcast %181 : vector<64x1xf32> to vector<64x64xf32>
    %183 = arith.mulf %178, %182 : vector<64x64xf32>
    %cst_104 = arith.constant dense<0.000000e+00> : vector<64x8xf32>
    %184 = tpu.matmul %183, %172, %cst_104 {dimension_numbers = #tpu.dot_dimension_numbers<[1], [0], [0], [1], [0, 0, 1, 1], [], []>} : vector<64x64xf32>, vector<64x8xf32>, vector<64x8xf32> -> vector<64x8xf32>
    %185 = vector.extract_strided_slice %154 {offsets = [0, 16], sizes = [64, 8], strides = [1, 1]} : vector<64x96xf32> to vector<64x8xf32>
    %186 = vector.extract_strided_slice %154 {offsets = [0, 48], sizes = [64, 8], strides = [1, 1]} : vector<64x96xf32> to vector<64x8xf32>
    %187 = vector.extract_strided_slice %154 {offsets = [0, 80], sizes = [64, 8], strides = [1, 1]} : vector<64x96xf32> to vector<64x8xf32>
    %cst_105 = arith.constant dense<0.000000e+00> : vector<64x64xf32>
    %188 = tpu.matmul %185, %186, %cst_105 {dimension_numbers = #tpu.dot_dimension_numbers<[1], [1], [0], [0], [0, 0, 1, 0], [], []>} : vector<64x8xf32>, vector<64x8xf32>, vector<64x64xf32> -> vector<64x64xf32>
    %cst_106 = arith.constant dense<0xFF800000> : vector<64xf32>
    %189 = vector.multi_reduction <maximumf>, %188, %cst_106 [1] : vector<64x64xf32> to vector<64xf32>
    %190 = vector.shape_cast %189 : vector<64xf32> to vector<64x1xf32>
    %191 = vector.broadcast %190 : vector<64x1xf32> to vector<64x64xf32>
    %192 = arith.subf %188, %191 : vector<64x64xf32>
    %193 = math.exp %192 : vector<64x64xf32>
    %cst_107 = arith.constant dense<0.000000e+00> : vector<64xf32>
    %194 = vector.multi_reduction <add>, %193, %cst_107 [1] : vector<64x64xf32> to vector<64xf32>
    %195 = vector.shape_cast %194 : vector<64xf32> to vector<64x1xf32>
    %196 = tpu.reciprocal %195 {approx = true} : vector<64x1xf32> -> vector<64x1xf32>
    %197 = vector.broadcast %196 : vector<64x1xf32> to vector<64x64xf32>
    %198 = arith.mulf %193, %197 : vector<64x64xf32>
    %cst_108 = arith.constant dense<0.000000e+00> : vector<64x8xf32>
    %199 = tpu.matmul %198, %187, %cst_108 {dimension_numbers = #tpu.dot_dimension_numbers<[1], [0], [0], [1], [0, 0, 1, 1], [], []>} : vector<64x64xf32>, vector<64x8xf32>, vector<64x8xf32> -> vector<64x8xf32>
    %200 = vector.extract_strided_slice %154 {offsets = [0, 24], sizes = [64, 8], strides = [1, 1]} : vector<64x96xf32> to vector<64x8xf32>
    %201 = vector.extract_strided_slice %154 {offsets = [0, 56], sizes = [64, 8], strides = [1, 1]} : vector<64x96xf32> to vector<64x8xf32>
    %202 = vector.extract_strided_slice %154 {offsets = [0, 88], sizes = [64, 8], strides = [1, 1]} : vector<64x96xf32> to vector<64x8xf32>
    %cst_109 = arith.constant dense<0.000000e+00> : vector<64x64xf32>
    %203 = tpu.matmul %200, %201, %cst_109 {dimension_numbers = #tpu.dot_dimension_numbers<[1], [1], [0], [0], [0, 0, 1, 0], [], []>} : vector<64x8xf32>, vector<64x8xf32>, vector<64x64xf32> -> vector<64x64xf32>
    %cst_110 = arith.constant dense<0xFF800000> : vector<64xf32>
    %204 = vector.multi_reduction <maximumf>, %203, %cst_110 [1] : vector<64x64xf32> to vector<64xf32>
    %205 = vector.shape_cast %204 : vector<64xf32> to vector<64x1xf32>
    %206 = vector.broadcast %205 : vector<64x1xf32> to vector<64x64xf32>
    %207 = arith.subf %203, %206 : vector<64x64xf32>
    %208 = math.exp %207 : vector<64x64xf32>
    %cst_111 = arith.constant dense<0.000000e+00> : vector<64xf32>
    %209 = vector.multi_reduction <add>, %208, %cst_111 [1] : vector<64x64xf32> to vector<64xf32>
    %210 = vector.shape_cast %209 : vector<64xf32> to vector<64x1xf32>
    %211 = tpu.reciprocal %210 {approx = true} : vector<64x1xf32> -> vector<64x1xf32>
    %212 = vector.broadcast %211 : vector<64x1xf32> to vector<64x64xf32>
    %213 = arith.mulf %208, %212 : vector<64x64xf32>
    %cst_112 = arith.constant dense<0.000000e+00> : vector<64x8xf32>
    %214 = tpu.matmul %213, %202, %cst_112 {dimension_numbers = #tpu.dot_dimension_numbers<[1], [0], [0], [1], [0, 0, 1, 1], [], []>} : vector<64x64xf32>, vector<64x8xf32>, vector<64x8xf32> -> vector<64x8xf32>
    %215 = tpu.concatenate %169, %184, %199, %214 in 1 : vector<64x8xf32>, vector<64x8xf32>, vector<64x8xf32>, vector<64x8xf32> -> vector<64x32xf32>
    %c0_113 = arith.constant 0 : index
    %c0_114 = arith.constant 0 : index
    %c0_115 = arith.constant 0 : index
    %216 = vector.load %arg16[%c0_113, %c0_114, %c0_115] : memref<1x32x32xf32, #tpu.memory_space<vmem>>, vector<1x32x32xf32>
    %217 = vector.shape_cast %216 : vector<1x32x32xf32> to vector<32x32xf32>
    %cst_116 = arith.constant dense<0.000000e+00> : vector<64x32xf32>
    %218 = tpu.matmul %215, %217, %cst_116 {dimension_numbers = #tpu.dot_dimension_numbers<[1], [0], [0], [1], [0, 0, 1, 1], [], []>} : vector<64x32xf32>, vector<32x32xf32>, vector<64x32xf32> -> vector<64x32xf32>
    %219 = arith.addf %119, %218 : vector<64x32xf32>
    %c0_117 = arith.constant 0 : index
    %c0_118 = arith.constant 0 : index
    %c0_119 = arith.constant 0 : index
    %220 = vector.load %arg17[%c0_117, %c0_118, %c0_119] : memref<1x1x32xf32, #tpu.memory_space<vmem>>, vector<1x1x32xf32>
    %221 = vector.shape_cast %220 : vector<1x1x32xf32> to vector<1x32xf32>
    %222 = vector.broadcast %221 : vector<1x32xf32> to vector<64x32xf32>
    %223 = arith.addf %219, %222 : vector<64x32xf32>
    %c0_120 = arith.constant 0 : index
    %c0_121 = arith.constant 0 : index
    %c0_122 = arith.constant 0 : index
    %224 = vector.load %arg18[%c0_120, %c0_121, %c0_122] : memref<1x1x32xf32, #tpu.memory_space<vmem>>, vector<1x1x32xf32>
    %225 = vector.shape_cast %224 : vector<1x1x32xf32> to vector<1x32xf32>
    %c0_123 = arith.constant 0 : index
    %c0_124 = arith.constant 0 : index
    %c0_125 = arith.constant 0 : index
    %226 = vector.load %arg19[%c0_123, %c0_124, %c0_125] : memref<1x1x32xf32, #tpu.memory_space<vmem>>, vector<1x1x32xf32>
    %227 = vector.shape_cast %226 : vector<1x1x32xf32> to vector<1x32xf32>
    %cst_126 = arith.constant dense<0.000000e+00> : vector<64xf32>
    %228 = vector.multi_reduction <add>, %223, %cst_126 [1] : vector<64x32xf32> to vector<64xf32>
    %229 = vector.shape_cast %228 : vector<64xf32> to vector<64x1xf32>
    %cst_127 = arith.constant 3.200000e+01 : f32
    %230 = vector.broadcast %cst_127 : f32 to vector<64x1xf32>
    %231 = arith.divf %229, %230 : vector<64x1xf32>
    %232 = vector.broadcast %231 : vector<64x1xf32> to vector<64x32xf32>
    %233 = arith.subf %223, %232 : vector<64x32xf32>
    %234 = vector.broadcast %231 : vector<64x1xf32> to vector<64x32xf32>
    %235 = arith.subf %223, %234 : vector<64x32xf32>
    %236 = arith.mulf %233, %235 : vector<64x32xf32>
    %cst_128 = arith.constant dense<0.000000e+00> : vector<64xf32>
    %237 = vector.multi_reduction <add>, %236, %cst_128 [1] : vector<64x32xf32> to vector<64xf32>
    %238 = vector.shape_cast %237 : vector<64xf32> to vector<64x1xf32>
    %cst_129 = arith.constant 3.200000e+01 : f32
    %239 = vector.broadcast %cst_129 : f32 to vector<64x1xf32>
    %240 = arith.divf %238, %239 : vector<64x1xf32>
    %241 = vector.broadcast %231 : vector<64x1xf32> to vector<64x32xf32>
    %242 = arith.subf %223, %241 : vector<64x32xf32>
    %cst_130 = arith.constant 9.99999974E-6 : f32
    %243 = vector.broadcast %cst_130 : f32 to vector<64x1xf32>
    %244 = arith.addf %240, %243 : vector<64x1xf32>
    %245 = math.rsqrt %244 : vector<64x1xf32>
    %246 = vector.broadcast %245 : vector<64x1xf32> to vector<64x32xf32>
    %247 = arith.mulf %242, %246 : vector<64x32xf32>
    %248 = vector.broadcast %225 : vector<1x32xf32> to vector<64x32xf32>
    %249 = arith.mulf %247, %248 : vector<64x32xf32>
    %250 = vector.broadcast %227 : vector<1x32xf32> to vector<64x32xf32>
    %251 = arith.addf %249, %250 : vector<64x32xf32>
    %c0_131 = arith.constant 0 : index
    %c0_132 = arith.constant 0 : index
    %c0_133 = arith.constant 0 : index
    %252 = vector.load %arg20[%c0_131, %c0_132, %c0_133] : memref<1x32x32xf32, #tpu.memory_space<vmem>>, vector<1x32x32xf32>
    %253 = vector.shape_cast %252 : vector<1x32x32xf32> to vector<32x32xf32>
    %cst_134 = arith.constant dense<0.000000e+00> : vector<64x32xf32>
    %254 = tpu.matmul %251, %253, %cst_134 {dimension_numbers = #tpu.dot_dimension_numbers<[1], [0], [0], [1], [0, 0, 1, 1], [], []>} : vector<64x32xf32>, vector<32x32xf32>, vector<64x32xf32> -> vector<64x32xf32>
    %c0_135 = arith.constant 0 : index
    %c0_136 = arith.constant 0 : index
    %c0_137 = arith.constant 0 : index
    %255 = vector.load %arg21[%c0_135, %c0_136, %c0_137] : memref<1x1x32xf32, #tpu.memory_space<vmem>>, vector<1x1x32xf32>
    %256 = vector.shape_cast %255 : vector<1x1x32xf32> to vector<1x32xf32>
    %257 = vector.broadcast %256 : vector<1x32xf32> to vector<64x32xf32>
    %258 = arith.addf %254, %257 : vector<64x32xf32>
    %cst_138 = arith.constant 5.000000e-01 : f32
    %259 = vector.broadcast %cst_138 : f32 to vector<64x32xf32>
    %260 = arith.mulf %259, %258 : vector<64x32xf32>
    %cst_139 = arith.constant 4.471500e-02 : f32
    %261 = vector.broadcast %cst_139 : f32 to vector<64x32xf32>
    %262 = arith.mulf %261, %258 : vector<64x32xf32>
    %263 = arith.mulf %262, %258 : vector<64x32xf32>
    %264 = arith.mulf %263, %258 : vector<64x32xf32>
    %265 = arith.addf %258, %264 : vector<64x32xf32>
    %cst_140 = arith.constant 0.797884583 : f32
    %266 = vector.broadcast %cst_140 : f32 to vector<64x32xf32>
    %267 = arith.mulf %266, %265 : vector<64x32xf32>
    %268 = math.tanh %267 : vector<64x32xf32>
    %cst_141 = arith.constant 1.000000e+00 : f32
    %269 = vector.broadcast %cst_141 : f32 to vector<64x32xf32>
    %270 = arith.addf %269, %268 : vector<64x32xf32>
    %271 = arith.mulf %260, %270 : vector<64x32xf32>
    %c0_142 = arith.constant 0 : index
    %c0_143 = arith.constant 0 : index
    %c0_144 = arith.constant 0 : index
    %272 = vector.load %arg22[%c0_142, %c0_143, %c0_144] : memref<1x32x32xf32, #tpu.memory_space<vmem>>, vector<1x32x32xf32>
    %273 = vector.shape_cast %272 : vector<1x32x32xf32> to vector<32x32xf32>
    %cst_145 = arith.constant dense<0.000000e+00> : vector<64x32xf32>
    %274 = tpu.matmul %271, %273, %cst_145 {dimension_numbers = #tpu.dot_dimension_numbers<[1], [0], [0], [1], [0, 0, 1, 1], [], []>} : vector<64x32xf32>, vector<32x32xf32>, vector<64x32xf32> -> vector<64x32xf32>
    %c0_146 = arith.constant 0 : index
    %c0_147 = arith.constant 0 : index
    %c0_148 = arith.constant 0 : index
    %275 = vector.load %arg23[%c0_146, %c0_147, %c0_148] : memref<1x1x32xf32, #tpu.memory_space<vmem>>, vector<1x1x32xf32>
    %276 = vector.shape_cast %275 : vector<1x1x32xf32> to vector<1x32xf32>
    %277 = vector.broadcast %276 : vector<1x32xf32> to vector<64x32xf32>
    %278 = arith.addf %274, %277 : vector<64x32xf32>
    %279 = arith.addf %223, %278 : vector<64x32xf32>
    %c0_149 = arith.constant 0 : index
    %c0_150 = arith.constant 0 : index
    %280 = vector.load %arg24[%c0_149, %c0_150] : memref<1x32xf32, #tpu.memory_space<vmem>>, vector<1x32xf32>
    %281 = vector.broadcast %280 : vector<1x32xf32> to vector<64x32xf32>
    %282 = arith.mulf %117, %281 : vector<64x32xf32>
    %c0_151 = arith.constant 0 : index
    %c0_152 = arith.constant 0 : index
    %283 = vector.load %arg25[%c0_151, %c0_152] : memref<1x32xf32, #tpu.memory_space<vmem>>, vector<1x32xf32>
    %284 = vector.broadcast %283 : vector<1x32xf32> to vector<64x32xf32>
    %285 = arith.addf %282, %284 : vector<64x32xf32>
    %cst_153 = arith.constant 0.000000e+00 : f32
    %286 = vector.broadcast %cst_153 : f32 to vector<64x32xf32>
    %287 = arith.maximumf %285, %286 : vector<64x32xf32>
    %c0_154 = arith.constant 0 : index
    %c0_155 = arith.constant 0 : index
    %288 = vector.load %arg26[%c0_154, %c0_155] : memref<32x64xf32, #tpu.memory_space<vmem>>, vector<32x64xf32>
    %cst_156 = arith.constant dense<0.000000e+00> : vector<64x64xf32>
    %289 = tpu.matmul %287, %288, %cst_156 {dimension_numbers = #tpu.dot_dimension_numbers<[1], [0], [0], [1], [0, 0, 1, 1], [], []>} : vector<64x32xf32>, vector<32x64xf32>, vector<64x64xf32> -> vector<64x64xf32>
    %c0_157 = arith.constant 0 : index
    %c0_158 = arith.constant 0 : index
    %290 = vector.load %arg27[%c0_157, %c0_158] : memref<1x64xf32, #tpu.memory_space<vmem>>, vector<1x64xf32>
    %291 = vector.broadcast %290 : vector<1x64xf32> to vector<64x64xf32>
    %292 = arith.addf %289, %291 : vector<64x64xf32>
    %c0_159 = arith.constant 0 : index
    %c0_160 = arith.constant 0 : index
    %293 = vector.load %arg28[%c0_159, %c0_160] : memref<1x64xf32, #tpu.memory_space<vmem>>, vector<1x64xf32>
    %294 = vector.broadcast %293 : vector<1x64xf32> to vector<64x64xf32>
    %295 = arith.mulf %292, %294 : vector<64x64xf32>
    %c0_161 = arith.constant 0 : index
    %c0_162 = arith.constant 0 : index
    %296 = vector.load %arg29[%c0_161, %c0_162] : memref<1x64xf32, #tpu.memory_space<vmem>>, vector<1x64xf32>
    %297 = vector.broadcast %296 : vector<1x64xf32> to vector<64x64xf32>
    %298 = arith.addf %295, %297 : vector<64x64xf32>
    %cst_163 = arith.constant 0.000000e+00 : f32
    %299 = vector.broadcast %cst_163 : f32 to vector<64x64xf32>
    %300 = arith.maximumf %298, %299 : vector<64x64xf32>
    %c9_i32_164 = arith.constant 9 : i32
    %301 = tpu.dynamic_rotate %300 by %c9_i32_164 dim 0 : vector<64x64xf32>, i32 -> vector<64x64xf32>
    %c0_165 = arith.constant 0 : index
    %c0_166 = arith.constant 0 : index
    %c0_167 = arith.constant 0 : index
    %302 = vector.load %arg2[%c0_165, %c0_166, %c0_167] : memref<9x64x1xf32, #tpu.memory_space<vmem>>, vector<1x64x1xf32>
    %303 = vector.shape_cast %302 : vector<1x64x1xf32> to vector<64x1xf32>
    %304 = vector.broadcast %303 : vector<64x1xf32> to vector<64x64xf32>
    %305 = arith.mulf %301, %304 : vector<64x64xf32>
    %c0_168 = arith.constant 0 : index
    %c0_169 = arith.constant 0 : index
    %c0_170 = arith.constant 0 : index
    %306 = vector.load %arg30[%c0_168, %c0_169, %c0_170] : memref<9x1x64xf32, #tpu.memory_space<vmem>>, vector<1x1x64xf32>
    %307 = vector.shape_cast %306 : vector<1x1x64xf32> to vector<1x64xf32>
    %308 = vector.broadcast %307 : vector<1x64xf32> to vector<64x64xf32>
    %309 = arith.mulf %305, %308 : vector<64x64xf32>
    %c8_i32_171 = arith.constant 8 : i32
    %310 = tpu.dynamic_rotate %300 by %c8_i32_171 dim 0 : vector<64x64xf32>, i32 -> vector<64x64xf32>
    %c1_172 = arith.constant 1 : index
    %c0_173 = arith.constant 0 : index
    %c0_174 = arith.constant 0 : index
    %311 = vector.load %arg2[%c1_172, %c0_173, %c0_174] : memref<9x64x1xf32, #tpu.memory_space<vmem>>, vector<1x64x1xf32>
    %312 = vector.shape_cast %311 : vector<1x64x1xf32> to vector<64x1xf32>
    %313 = vector.broadcast %312 : vector<64x1xf32> to vector<64x64xf32>
    %314 = arith.mulf %310, %313 : vector<64x64xf32>
    %c1_175 = arith.constant 1 : index
    %c0_176 = arith.constant 0 : index
    %c0_177 = arith.constant 0 : index
    %315 = vector.load %arg30[%c1_175, %c0_176, %c0_177] : memref<9x1x64xf32, #tpu.memory_space<vmem>>, vector<1x1x64xf32>
    %316 = vector.shape_cast %315 : vector<1x1x64xf32> to vector<1x64xf32>
    %317 = vector.broadcast %316 : vector<1x64xf32> to vector<64x64xf32>
    %318 = arith.mulf %314, %317 : vector<64x64xf32>
    %c7_i32_178 = arith.constant 7 : i32
    %319 = tpu.dynamic_rotate %300 by %c7_i32_178 dim 0 : vector<64x64xf32>, i32 -> vector<64x64xf32>
    %c2_179 = arith.constant 2 : index
    %c0_180 = arith.constant 0 : index
    %c0_181 = arith.constant 0 : index
    %320 = vector.load %arg2[%c2_179, %c0_180, %c0_181] : memref<9x64x1xf32, #tpu.memory_space<vmem>>, vector<1x64x1xf32>
    %321 = vector.shape_cast %320 : vector<1x64x1xf32> to vector<64x1xf32>
    %322 = vector.broadcast %321 : vector<64x1xf32> to vector<64x64xf32>
    %323 = arith.mulf %319, %322 : vector<64x64xf32>
    %c2_182 = arith.constant 2 : index
    %c0_183 = arith.constant 0 : index
    %c0_184 = arith.constant 0 : index
    %324 = vector.load %arg30[%c2_182, %c0_183, %c0_184] : memref<9x1x64xf32, #tpu.memory_space<vmem>>, vector<1x1x64xf32>
    %325 = vector.shape_cast %324 : vector<1x1x64xf32> to vector<1x64xf32>
    %326 = vector.broadcast %325 : vector<1x64xf32> to vector<64x64xf32>
    %327 = arith.mulf %323, %326 : vector<64x64xf32>
    %c1_i32_185 = arith.constant 1 : i32
    %328 = tpu.dynamic_rotate %300 by %c1_i32_185 dim 0 : vector<64x64xf32>, i32 -> vector<64x64xf32>
    %c3_186 = arith.constant 3 : index
    %c0_187 = arith.constant 0 : index
    %c0_188 = arith.constant 0 : index
    %329 = vector.load %arg2[%c3_186, %c0_187, %c0_188] : memref<9x64x1xf32, #tpu.memory_space<vmem>>, vector<1x64x1xf32>
    %330 = vector.shape_cast %329 : vector<1x64x1xf32> to vector<64x1xf32>
    %331 = vector.broadcast %330 : vector<64x1xf32> to vector<64x64xf32>
    %332 = arith.mulf %328, %331 : vector<64x64xf32>
    %c3_189 = arith.constant 3 : index
    %c0_190 = arith.constant 0 : index
    %c0_191 = arith.constant 0 : index
    %333 = vector.load %arg30[%c3_189, %c0_190, %c0_191] : memref<9x1x64xf32, #tpu.memory_space<vmem>>, vector<1x1x64xf32>
    %334 = vector.shape_cast %333 : vector<1x1x64xf32> to vector<1x64xf32>
    %335 = vector.broadcast %334 : vector<1x64xf32> to vector<64x64xf32>
    %336 = arith.mulf %332, %335 : vector<64x64xf32>
    %c4_192 = arith.constant 4 : index
    %c0_193 = arith.constant 0 : index
    %c0_194 = arith.constant 0 : index
    %337 = vector.load %arg2[%c4_192, %c0_193, %c0_194] : memref<9x64x1xf32, #tpu.memory_space<vmem>>, vector<1x64x1xf32>
    %338 = vector.shape_cast %337 : vector<1x64x1xf32> to vector<64x1xf32>
    %339 = vector.broadcast %338 : vector<64x1xf32> to vector<64x64xf32>
    %340 = arith.mulf %300, %339 : vector<64x64xf32>
    %c4_195 = arith.constant 4 : index
    %c0_196 = arith.constant 0 : index
    %c0_197 = arith.constant 0 : index
    %341 = vector.load %arg30[%c4_195, %c0_196, %c0_197] : memref<9x1x64xf32, #tpu.memory_space<vmem>>, vector<1x1x64xf32>
    %342 = vector.shape_cast %341 : vector<1x1x64xf32> to vector<1x64xf32>
    %343 = vector.broadcast %342 : vector<1x64xf32> to vector<64x64xf32>
    %344 = arith.mulf %340, %343 : vector<64x64xf32>
    %c63_i32_198 = arith.constant 63 : i32
    %345 = tpu.dynamic_rotate %300 by %c63_i32_198 dim 0 : vector<64x64xf32>, i32 -> vector<64x64xf32>
    %c5_199 = arith.constant 5 : index
    %c0_200 = arith.constant 0 : index
    %c0_201 = arith.constant 0 : index
    %346 = vector.load %arg2[%c5_199, %c0_200, %c0_201] : memref<9x64x1xf32, #tpu.memory_space<vmem>>, vector<1x64x1xf32>
    %347 = vector.shape_cast %346 : vector<1x64x1xf32> to vector<64x1xf32>
    %348 = vector.broadcast %347 : vector<64x1xf32> to vector<64x64xf32>
    %349 = arith.mulf %345, %348 : vector<64x64xf32>
    %c5_202 = arith.constant 5 : index
    %c0_203 = arith.constant 0 : index
    %c0_204 = arith.constant 0 : index
    %350 = vector.load %arg30[%c5_202, %c0_203, %c0_204] : memref<9x1x64xf32, #tpu.memory_space<vmem>>, vector<1x1x64xf32>
    %351 = vector.shape_cast %350 : vector<1x1x64xf32> to vector<1x64xf32>
    %352 = vector.broadcast %351 : vector<1x64xf32> to vector<64x64xf32>
    %353 = arith.mulf %349, %352 : vector<64x64xf32>
    %c57_i32_205 = arith.constant 57 : i32
    %354 = tpu.dynamic_rotate %300 by %c57_i32_205 dim 0 : vector<64x64xf32>, i32 -> vector<64x64xf32>
    %c6_206 = arith.constant 6 : index
    %c0_207 = arith.constant 0 : index
    %c0_208 = arith.constant 0 : index
    %355 = vector.load %arg2[%c6_206, %c0_207, %c0_208] : memref<9x64x1xf32, #tpu.memory_space<vmem>>, vector<1x64x1xf32>
    %356 = vector.shape_cast %355 : vector<1x64x1xf32> to vector<64x1xf32>
    %357 = vector.broadcast %356 : vector<64x1xf32> to vector<64x64xf32>
    %358 = arith.mulf %354, %357 : vector<64x64xf32>
    %c6_209 = arith.constant 6 : index
    %c0_210 = arith.constant 0 : index
    %c0_211 = arith.constant 0 : index
    %359 = vector.load %arg30[%c6_209, %c0_210, %c0_211] : memref<9x1x64xf32, #tpu.memory_space<vmem>>, vector<1x1x64xf32>
    %360 = vector.shape_cast %359 : vector<1x1x64xf32> to vector<1x64xf32>
    %361 = vector.broadcast %360 : vector<1x64xf32> to vector<64x64xf32>
    %362 = arith.mulf %358, %361 : vector<64x64xf32>
    %c56_i32_212 = arith.constant 56 : i32
    %363 = tpu.dynamic_rotate %300 by %c56_i32_212 dim 0 : vector<64x64xf32>, i32 -> vector<64x64xf32>
    %c7_213 = arith.constant 7 : index
    %c0_214 = arith.constant 0 : index
    %c0_215 = arith.constant 0 : index
    %364 = vector.load %arg2[%c7_213, %c0_214, %c0_215] : memref<9x64x1xf32, #tpu.memory_space<vmem>>, vector<1x64x1xf32>
    %365 = vector.shape_cast %364 : vector<1x64x1xf32> to vector<64x1xf32>
    %366 = vector.broadcast %365 : vector<64x1xf32> to vector<64x64xf32>
    %367 = arith.mulf %363, %366 : vector<64x64xf32>
    %c7_216 = arith.constant 7 : index
    %c0_217 = arith.constant 0 : index
    %c0_218 = arith.constant 0 : index
    %368 = vector.load %arg30[%c7_216, %c0_217, %c0_218] : memref<9x1x64xf32, #tpu.memory_space<vmem>>, vector<1x1x64xf32>
    %369 = vector.shape_cast %368 : vector<1x1x64xf32> to vector<1x64xf32>
    %370 = vector.broadcast %369 : vector<1x64xf32> to vector<64x64xf32>
    %371 = arith.mulf %367, %370 : vector<64x64xf32>
    %c55_i32_219 = arith.constant 55 : i32
    %372 = tpu.dynamic_rotate %300 by %c55_i32_219 dim 0 : vector<64x64xf32>, i32 -> vector<64x64xf32>
    %c8_220 = arith.constant 8 : index
    %c0_221 = arith.constant 0 : index
    %c0_222 = arith.constant 0 : index
    %373 = vector.load %arg2[%c8_220, %c0_221, %c0_222] : memref<9x64x1xf32, #tpu.memory_space<vmem>>, vector<1x64x1xf32>
    %374 = vector.shape_cast %373 : vector<1x64x1xf32> to vector<64x1xf32>
    %375 = vector.broadcast %374 : vector<64x1xf32> to vector<64x64xf32>
    %376 = arith.mulf %372, %375 : vector<64x64xf32>
    %c8_223 = arith.constant 8 : index
    %c0_224 = arith.constant 0 : index
    %c0_225 = arith.constant 0 : index
    %377 = vector.load %arg30[%c8_223, %c0_224, %c0_225] : memref<9x1x64xf32, #tpu.memory_space<vmem>>, vector<1x1x64xf32>
    %378 = vector.shape_cast %377 : vector<1x1x64xf32> to vector<1x64xf32>
    %379 = vector.broadcast %378 : vector<1x64xf32> to vector<64x64xf32>
    %380 = arith.mulf %376, %379 : vector<64x64xf32>
    %381 = arith.addf %309, %318 : vector<64x64xf32>
    %382 = arith.addf %327, %336 : vector<64x64xf32>
    %383 = arith.addf %344, %353 : vector<64x64xf32>
    %384 = arith.addf %362, %371 : vector<64x64xf32>
    %385 = arith.addf %381, %382 : vector<64x64xf32>
    %386 = arith.addf %383, %384 : vector<64x64xf32>
    %387 = arith.addf %385, %386 : vector<64x64xf32>
    %388 = arith.addf %387, %380 : vector<64x64xf32>
    %c0_226 = arith.constant 0 : index
    %c0_227 = arith.constant 0 : index
    %389 = vector.load %arg31[%c0_226, %c0_227] : memref<1x64xf32, #tpu.memory_space<vmem>>, vector<1x64xf32>
    %390 = vector.broadcast %389 : vector<1x64xf32> to vector<64x64xf32>
    %391 = arith.addf %388, %390 : vector<64x64xf32>
    %c0_228 = arith.constant 0 : index
    %c0_229 = arith.constant 0 : index
    %392 = vector.load %arg32[%c0_228, %c0_229] : memref<1x64xf32, #tpu.memory_space<vmem>>, vector<1x64xf32>
    %393 = vector.broadcast %392 : vector<1x64xf32> to vector<64x64xf32>
    %394 = arith.mulf %391, %393 : vector<64x64xf32>
    %c0_230 = arith.constant 0 : index
    %c0_231 = arith.constant 0 : index
    %395 = vector.load %arg33[%c0_230, %c0_231] : memref<1x64xf32, #tpu.memory_space<vmem>>, vector<1x64xf32>
    %396 = vector.broadcast %395 : vector<1x64xf32> to vector<64x64xf32>
    %397 = arith.addf %394, %396 : vector<64x64xf32>
    %cst_232 = arith.constant 0.000000e+00 : f32
    %398 = vector.broadcast %cst_232 : f32 to vector<64x64xf32>
    %399 = arith.maximumf %397, %398 : vector<64x64xf32>
    %c0_233 = arith.constant 0 : index
    %c0_234 = arith.constant 0 : index
    %400 = vector.load %arg34[%c0_233, %c0_234] : memref<64x32xf32, #tpu.memory_space<vmem>>, vector<64x32xf32>
    %cst_235 = arith.constant dense<0.000000e+00> : vector<64x32xf32>
    %401 = tpu.matmul %399, %400, %cst_235 {dimension_numbers = #tpu.dot_dimension_numbers<[1], [0], [0], [1], [0, 0, 1, 1], [], []>} : vector<64x64xf32>, vector<64x32xf32>, vector<64x32xf32> -> vector<64x32xf32>
    %c0_236 = arith.constant 0 : index
    %c0_237 = arith.constant 0 : index
    %402 = vector.load %arg35[%c0_236, %c0_237] : memref<1x32xf32, #tpu.memory_space<vmem>>, vector<1x32xf32>
    %403 = vector.broadcast %402 : vector<1x32xf32> to vector<64x32xf32>
    %404 = arith.addf %401, %403 : vector<64x32xf32>
    %405 = arith.addf %279, %404 : vector<64x32xf32>
    %cst_238 = arith.constant dense<0.000000e+00> : vector<32xf32>
    %406 = vector.multi_reduction <add>, %405, %cst_238 [0] : vector<64x32xf32> to vector<32xf32>
    %407 = vector.shape_cast %406 : vector<32xf32> to vector<1x32xf32>
    %cst_239 = arith.constant 6.400000e+01 : f32
    %408 = vector.broadcast %cst_239 : f32 to vector<1x32xf32>
    %409 = arith.divf %407, %408 : vector<1x32xf32>
    %c0_240 = arith.constant 0 : index
    %c0_241 = arith.constant 0 : index
    %410 = vector.load %arg36[%c0_240, %c0_241] : memref<1x32xf32, #tpu.memory_space<vmem>>, vector<1x32xf32>
    %c0_242 = arith.constant 0 : index
    %c0_243 = arith.constant 0 : index
    %411 = vector.load %arg37[%c0_242, %c0_243] : memref<1x32xf32, #tpu.memory_space<vmem>>, vector<1x32xf32>
    %cst_244 = arith.constant dense<0.000000e+00> : vector<1xf32>
    %412 = vector.multi_reduction <add>, %409, %cst_244 [1] : vector<1x32xf32> to vector<1xf32>
    %413 = vector.shape_cast %412 : vector<1xf32> to vector<1x1xf32>
    %cst_245 = arith.constant 3.200000e+01 : f32
    %414 = vector.broadcast %cst_245 : f32 to vector<1x1xf32>
    %415 = arith.divf %413, %414 : vector<1x1xf32>
    %416 = vector.broadcast %415 : vector<1x1xf32> to vector<1x32xf32>
    %417 = arith.subf %409, %416 : vector<1x32xf32>
    %418 = vector.broadcast %415 : vector<1x1xf32> to vector<1x32xf32>
    %419 = arith.subf %409, %418 : vector<1x32xf32>
    %420 = arith.mulf %417, %419 : vector<1x32xf32>
    %cst_246 = arith.constant dense<0.000000e+00> : vector<1xf32>
    %421 = vector.multi_reduction <add>, %420, %cst_246 [1] : vector<1x32xf32> to vector<1xf32>
    %422 = vector.shape_cast %421 : vector<1xf32> to vector<1x1xf32>
    %cst_247 = arith.constant 3.200000e+01 : f32
    %423 = vector.broadcast %cst_247 : f32 to vector<1x1xf32>
    %424 = arith.divf %422, %423 : vector<1x1xf32>
    %425 = vector.broadcast %415 : vector<1x1xf32> to vector<1x32xf32>
    %426 = arith.subf %409, %425 : vector<1x32xf32>
    %cst_248 = arith.constant 9.99999974E-6 : f32
    %427 = vector.broadcast %cst_248 : f32 to vector<1x1xf32>
    %428 = arith.addf %424, %427 : vector<1x1xf32>
    %429 = math.rsqrt %428 : vector<1x1xf32>
    %430 = vector.broadcast %429 : vector<1x1xf32> to vector<1x32xf32>
    %431 = arith.mulf %426, %430 : vector<1x32xf32>
    %432 = arith.mulf %431, %410 : vector<1x32xf32>
    %433 = arith.addf %432, %411 : vector<1x32xf32>
    %c0_249 = arith.constant 0 : index
    %c0_250 = arith.constant 0 : index
    %434 = vector.load %arg38[%c0_249, %c0_250] : memref<32x5xf32, #tpu.memory_space<vmem>>, vector<32x5xf32>
    %cst_251 = arith.constant dense<0.000000e+00> : vector<1x5xf32>
    %435 = tpu.matmul %433, %434, %cst_251 {dimension_numbers = #tpu.dot_dimension_numbers<[1], [0], [0], [1], [0, 0, 1, 1], [], []>} : vector<1x32xf32>, vector<32x5xf32>, vector<1x5xf32> -> vector<1x5xf32>
    %c0_252 = arith.constant 0 : index
    %c0_253 = arith.constant 0 : index
    %436 = vector.load %arg39[%c0_252, %c0_253] : memref<1x5xf32, #tpu.memory_space<vmem>>, vector<1x5xf32>
    %437 = arith.addf %435, %436 : vector<1x5xf32>
    %438 = vector.shape_cast %437 : vector<1x5xf32> to vector<1x5xf32>
    %439 = vector.broadcast %438 : vector<1x5xf32> to vector<8x5xf32>
    %c0_254 = arith.constant 0 : index
    %c0_255 = arith.constant 0 : index
    %440 = vector.load %arg40[%c0_254, %c0_255] : memref<8x5xf32, #tpu.memory_space<vmem>>, vector<8x5xf32>
    tpu.vector_store %arg40[%c0_254, %c0_255], %439 {strides = array<i32>} : memref<8x5xf32, #tpu.memory_space<vmem>>, vector<8x5xf32>,
    return
  }
  func.func @transform_0(%arg0: i32) -> (i32, i32) {
    %c0_i32 = arith.constant 0 : i32
    %c0_i32_0 = arith.constant 0 : i32
    return %arg0, %c0_i32 : i32, i32
  }
  func.func @transform_1(%arg0: i32) -> (i32, i32, i32) {
    %c0_i32 = arith.constant 0 : i32
    %c0_i32_0 = arith.constant 0 : i32
    %c0_i32_1 = arith.constant 0 : i32
    %c0_i32_2 = arith.constant 0 : i32
    return %c0_i32, %c0_i32_0, %c0_i32_1 : i32, i32, i32
  }
  func.func @transform_2(%arg0: i32) -> (i32, i32) {
    %c0_i32 = arith.constant 0 : i32
    %c0_i32_0 = arith.constant 0 : i32
    %c0_i32_1 = arith.constant 0 : i32
    return %c0_i32, %c0_i32_0 : i32, i32
  }
  func.func @transform_3(%arg0: i32) -> (i32, i32) {
    %c0_i32 = arith.constant 0 : i32
    %c0_i32_0 = arith.constant 0 : i32
    %c0_i32_1 = arith.constant 0 : i32
    return %c0_i32, %c0_i32_0 : i32, i32
  }
  func.func @transform_4(%arg0: i32) -> (i32, i32) {
    %c0_i32 = arith.constant 0 : i32
    %c0_i32_0 = arith.constant 0 : i32
    %c0_i32_1 = arith.constant 0 : i32
    return %c0_i32, %c0_i32_0 : i32, i32
  }
  func.func @transform_5(%arg0: i32) -> (i32, i32) {
    %c0_i32 = arith.constant 0 : i32
    %c0_i32_0 = arith.constant 0 : i32
    %c0_i32_1 = arith.constant 0 : i32
    return %c0_i32, %c0_i32_0 : i32, i32
  }
  func.func @transform_6(%arg0: i32) -> (i32, i32) {
    %c0_i32 = arith.constant 0 : i32
    %c0_i32_0 = arith.constant 0 : i32
    %c0_i32_1 = arith.constant 0 : i32
    return %c0_i32, %c0_i32_0 : i32, i32
  }
  func.func @transform_7(%arg0: i32) -> (i32, i32) {
    %c0_i32 = arith.constant 0 : i32
    %c0_i32_0 = arith.constant 0 : i32
    %c0_i32_1 = arith.constant 0 : i32
    return %c0_i32, %c0_i32_0 : i32, i32
  }
  func.func @transform_8(%arg0: i32) -> (i32, i32) {
    %c0_i32 = arith.constant 0 : i32
    %c0_i32_0 = arith.constant 0 : i32
    %c0_i32_1 = arith.constant 0 : i32
    return %c0_i32, %c0_i32_0 : i32, i32
  }
  func.func @transform_9(%arg0: i32) -> (i32, i32) {
    %c0_i32 = arith.constant 0 : i32
    %c0_i32_0 = arith.constant 0 : i32
    %c0_i32_1 = arith.constant 0 : i32
    return %c0_i32, %c0_i32_0 : i32, i32
  }
  func.func @transform_10(%arg0: i32) -> (i32, i32) {
    %c0_i32 = arith.constant 0 : i32
    %c0_i32_0 = arith.constant 0 : i32
    %c0_i32_1 = arith.constant 0 : i32
    return %c0_i32, %c0_i32_0 : i32, i32
  }
  func.func @transform_11(%arg0: i32) -> (i32, i32, i32) {
    %c0_i32 = arith.constant 0 : i32
    %c0_i32_0 = arith.constant 0 : i32
    %c0_i32_1 = arith.constant 0 : i32
    %c0_i32_2 = arith.constant 0 : i32
    return %c0_i32, %c0_i32_0, %c0_i32_1 : i32, i32, i32
  }
  func.func @transform_12(%arg0: i32) -> (i32, i32, i32) {
    %c0_i32 = arith.constant 0 : i32
    %c0_i32_0 = arith.constant 0 : i32
    %c0_i32_1 = arith.constant 0 : i32
    %c0_i32_2 = arith.constant 0 : i32
    return %c0_i32, %c0_i32_0, %c0_i32_1 : i32, i32, i32
  }
  func.func @transform_13(%arg0: i32) -> (i32, i32, i32) {
    %c0_i32 = arith.constant 0 : i32
    %c0_i32_0 = arith.constant 0 : i32
    %c0_i32_1 = arith.constant 0 : i32
    %c0_i32_2 = arith.constant 0 : i32
    return %c0_i32, %c0_i32_0, %c0_i32_1 : i32, i32, i32
  }
  func.func @transform_14(%arg0: i32) -> (i32, i32, i32) {
    %c0_i32 = arith.constant 0 : i32
    %c0_i32_0 = arith.constant 0 : i32
    %c0_i32_1 = arith.constant 0 : i32
    %c0_i32_2 = arith.constant 0 : i32
    return %c0_i32, %c0_i32_0, %c0_i32_1 : i32, i32, i32
  }
  func.func @transform_15(%arg0: i32) -> (i32, i32, i32) {
    %c0_i32 = arith.constant 0 : i32
    %c0_i32_0 = arith.constant 0 : i32
    %c0_i32_1 = arith.constant 0 : i32
    %c0_i32_2 = arith.constant 0 : i32
    return %c0_i32, %c0_i32_0, %c0_i32_1 : i32, i32, i32
  }
  func.func @transform_16(%arg0: i32) -> (i32, i32, i32) {
    %c0_i32 = arith.constant 0 : i32
    %c0_i32_0 = arith.constant 0 : i32
    %c0_i32_1 = arith.constant 0 : i32
    %c0_i32_2 = arith.constant 0 : i32
    return %c0_i32, %c0_i32_0, %c0_i32_1 : i32, i32, i32
  }
  func.func @transform_17(%arg0: i32) -> (i32, i32, i32) {
    %c0_i32 = arith.constant 0 : i32
    %c0_i32_0 = arith.constant 0 : i32
    %c0_i32_1 = arith.constant 0 : i32
    %c0_i32_2 = arith.constant 0 : i32
    return %c0_i32, %c0_i32_0, %c0_i32_1 : i32, i32, i32
  }
  func.func @transform_18(%arg0: i32) -> (i32, i32, i32) {
    %c0_i32 = arith.constant 0 : i32
    %c0_i32_0 = arith.constant 0 : i32
    %c0_i32_1 = arith.constant 0 : i32
    %c0_i32_2 = arith.constant 0 : i32
    return %c0_i32, %c0_i32_0, %c0_i32_1 : i32, i32, i32
  }
  func.func @transform_19(%arg0: i32) -> (i32, i32, i32) {
    %c0_i32 = arith.constant 0 : i32
    %c0_i32_0 = arith.constant 0 : i32
    %c0_i32_1 = arith.constant 0 : i32
    %c0_i32_2 = arith.constant 0 : i32
    return %c0_i32, %c0_i32_0, %c0_i32_1 : i32, i32, i32
  }
  func.func @transform_20(%arg0: i32) -> (i32, i32, i32) {
    %c0_i32 = arith.constant 0 : i32
    %c0_i32_0 = arith.constant 0 : i32
    %c0_i32_1 = arith.constant 0 : i32
    %c0_i32_2 = arith.constant 0 : i32
    return %c0_i32, %c0_i32_0, %c0_i32_1 : i32, i32, i32
  }
  func.func @transform_21(%arg0: i32) -> (i32, i32, i32) {
    %c0_i32 = arith.constant 0 : i32
    %c0_i32_0 = arith.constant 0 : i32
    %c0_i32_1 = arith.constant 0 : i32
    %c0_i32_2 = arith.constant 0 : i32
    return %c0_i32, %c0_i32_0, %c0_i32_1 : i32, i32, i32
  }
  func.func @transform_22(%arg0: i32) -> (i32, i32, i32) {
    %c0_i32 = arith.constant 0 : i32
    %c0_i32_0 = arith.constant 0 : i32
    %c0_i32_1 = arith.constant 0 : i32
    %c0_i32_2 = arith.constant 0 : i32
    return %c0_i32, %c0_i32_0, %c0_i32_1 : i32, i32, i32
  }
  func.func @transform_23(%arg0: i32) -> (i32, i32) {
    %c0_i32 = arith.constant 0 : i32
    %c0_i32_0 = arith.constant 0 : i32
    %c0_i32_1 = arith.constant 0 : i32
    return %c0_i32, %c0_i32_0 : i32, i32
  }
  func.func @transform_24(%arg0: i32) -> (i32, i32) {
    %c0_i32 = arith.constant 0 : i32
    %c0_i32_0 = arith.constant 0 : i32
    %c0_i32_1 = arith.constant 0 : i32
    return %c0_i32, %c0_i32_0 : i32, i32
  }
  func.func @transform_25(%arg0: i32) -> (i32, i32) {
    %c0_i32 = arith.constant 0 : i32
    %c0_i32_0 = arith.constant 0 : i32
    %c0_i32_1 = arith.constant 0 : i32
    return %c0_i32, %c0_i32_0 : i32, i32
  }
  func.func @transform_26(%arg0: i32) -> (i32, i32) {
    %c0_i32 = arith.constant 0 : i32
    %c0_i32_0 = arith.constant 0 : i32
    %c0_i32_1 = arith.constant 0 : i32
    return %c0_i32, %c0_i32_0 : i32, i32
  }
  func.func @transform_27(%arg0: i32) -> (i32, i32) {
    %c0_i32 = arith.constant 0 : i32
    %c0_i32_0 = arith.constant 0 : i32
    %c0_i32_1 = arith.constant 0 : i32
    return %c0_i32, %c0_i32_0 : i32, i32
  }
  func.func @transform_28(%arg0: i32) -> (i32, i32) {
    %c0_i32 = arith.constant 0 : i32
    %c0_i32_0 = arith.constant 0 : i32
    %c0_i32_1 = arith.constant 0 : i32
    return %c0_i32, %c0_i32_0 : i32, i32
  }
  func.func @transform_29(%arg0: i32) -> (i32, i32, i32) {
    %c0_i32 = arith.constant 0 : i32
    %c0_i32_0 = arith.constant 0 : i32
    %c0_i32_1 = arith.constant 0 : i32
    %c0_i32_2 = arith.constant 0 : i32
    return %c0_i32, %c0_i32_0, %c0_i32_1 : i32, i32, i32
  }
  func.func @transform_30(%arg0: i32) -> (i32, i32) {
    %c0_i32 = arith.constant 0 : i32
    %c0_i32_0 = arith.constant 0 : i32
    %c0_i32_1 = arith.constant 0 : i32
    return %c0_i32, %c0_i32_0 : i32, i32
  }
  func.func @transform_31(%arg0: i32) -> (i32, i32) {
    %c0_i32 = arith.constant 0 : i32
    %c0_i32_0 = arith.constant 0 : i32
    %c0_i32_1 = arith.constant 0 : i32
    return %c0_i32, %c0_i32_0 : i32, i32
  }
  func.func @transform_32(%arg0: i32) -> (i32, i32) {
    %c0_i32 = arith.constant 0 : i32
    %c0_i32_0 = arith.constant 0 : i32
    %c0_i32_1 = arith.constant 0 : i32
    return %c0_i32, %c0_i32_0 : i32, i32
  }
  func.func @transform_33(%arg0: i32) -> (i32, i32) {
    %c0_i32 = arith.constant 0 : i32
    %c0_i32_0 = arith.constant 0 : i32
    %c0_i32_1 = arith.constant 0 : i32
    return %c0_i32, %c0_i32_0 : i32, i32
  }
  func.func @transform_34(%arg0: i32) -> (i32, i32) {
    %c0_i32 = arith.constant 0 : i32
    %c0_i32_0 = arith.constant 0 : i32
    %c0_i32_1 = arith.constant 0 : i32
    return %c0_i32, %c0_i32_0 : i32, i32
  }
  func.func @transform_35(%arg0: i32) -> (i32, i32) {
    %c0_i32 = arith.constant 0 : i32
    %c0_i32_0 = arith.constant 0 : i32
    %c0_i32_1 = arith.constant 0 : i32
    return %c0_i32, %c0_i32_0 : i32, i32
  }
  func.func @transform_36(%arg0: i32) -> (i32, i32) {
    %c0_i32 = arith.constant 0 : i32
    %c0_i32_0 = arith.constant 0 : i32
    %c0_i32_1 = arith.constant 0 : i32
    return %c0_i32, %c0_i32_0 : i32, i32
  }
  func.func @transform_37(%arg0: i32) -> (i32, i32) {
    %c0_i32 = arith.constant 0 : i32
    %c0_i32_0 = arith.constant 0 : i32
    %c0_i32_1 = arith.constant 0 : i32
    return %c0_i32, %c0_i32_0 : i32, i32
  }
  func.func @transform_38(%arg0: i32) -> (i32, i32) {
    %c0_i32 = arith.constant 0 : i32
    %c0_i32_0 = arith.constant 0 : i32
    %c0_i32_1 = arith.constant 0 : i32
    return %c0_i32, %c0_i32_0 : i32, i32
  }
  func.func @transform_39(%arg0: i32) -> (i32, i32) {
    %c0_i32 = arith.constant 0 : i32
    %c0_i32_0 = arith.constant 0 : i32
    return %arg0, %c0_i32 : i32, i32
  }
}

</mosaic_0001>

<bundles_post_ra>
// kernel: ctmixer_forward.1
= control target key start
LH: loop header
LB: loop body
LE: loop exit
PB: predicated region body
PF: predicated region fallthrough
CT: control target
= control target key end

     0   :  { %s8797_s6 = smov 1   ;;  %s8798_s10 = smov 2   ;;  %s11852_s0 = inlined_call_operand.smem [shape: u32[40], index: -1, kind: input, shape index: {}] }
   0x1   :  { %s8863_s5 = sld [smem:[%s11852_s0]]   ;;  %s8799_s14 = smov 3  }
   0x2   :  { %s8868_s9 = sld [smem:[%s11852_s0 + %s8797_s6]]   ;;  %s8800_s18 = smov 4  }
   0x3   :  { %s8873_s13 = sld [smem:[%s11852_s0 + %s8798_s10]]   ;;  %s8801_s22 = smov 5  }
   0x4   :  { %s8878_s17 = sld [smem:[%s11852_s0 + %s8799_s14]]   ;;  %s8802_s26 = smov 6  }
   0x5   :  { %s8883_s21 = sld [smem:[%s11852_s0 + %s8800_s18]]   ;;  %s8803_s30 = smov 7  }
   0x6   :  { %s8888_s25 = sld [smem:[%s11852_s0 + %s8801_s22]]   ;;  %s8804_s4 = smov 8  }
   0x7   :  { %s8893_s29 = sld [smem:[%s11852_s0 + %s8802_s26]]   ;;  %s8805_s10 = smov 9  }
   0x8   :  { %s8898_s3 = sld [smem:[%s11852_s0 + %s8803_s30]]   ;;  %s8806_s15 = smov 10  }
   0x9   :  { %s8903_s8 = sld [smem:[%s11852_s0 + %s8804_s4]]   ;;  %s8807_s20 = smov 11  }
   0xa   :  { %s8908_s14 = sld [smem:[%s11852_s0 + %s8805_s10]]   ;;  %s8808_s26 = smov 12  }
   0xb   :  { %s8913_s19 = sld [smem:[%s11852_s0 + %s8806_s15]]   ;;  %s8809_s1 = smov 13  }
   0xc   :  { %s8918_s24 = sld [smem:[%s11852_s0 + %s8807_s20]]   ;;  %s8810_s7 = smov 14  }
   0xd   :  { %s8923_s30 = sld [smem:[%s11852_s0 + %s8808_s26]]   ;;  %s8811_s15 = smov 15  }
   0xe   :  { %s8928_s6 = sld [smem:[%s11852_s0 + %s8809_s1]]   ;;  %s8812_s22 = smov 16  }
   0xf   :  { %s8933_s12 = sld [smem:[%s11852_s0 + %s8810_s7]]   ;;  %s8813_s28 = smov 17  }
  0x10   :  { %s8938_s20 = sld [smem:[%s11852_s0 + %s8811_s15]]   ;;  %s8814_s7 = smov 18  }
  0x11   :  { %s8943_s27 = sld [smem:[%s11852_s0 + %s8812_s22]]   ;;  %s8815_s15 = smov 19  }
  0x12   :  { %s8948_s4 = sld [smem:[%s11852_s0 + %s8813_s28]]   ;;  %s8816_s22 = smov 20  }
  0x13   :  { %s8817_s28 = smov 21  }
  0x15   :  { %12038 = sst [smem:[#allocation2_spill]] %s8933_s12 }
  0x16   :  { %12039 = sst [smem:[#allocation3_spill]] %s8938_s20 }
  0x17   :  { %12040 = sst [smem:[#allocation4_spill]] %s8943_s27 }
  0x18   :  { %12041 = sst [smem:[#allocation5_spill]] %s8948_s4 }
  0x19   :  { %s8953_s12 = sld [smem:[%s11852_s0 + %s8814_s7]]   ;;  %s8818_s7 = smov 22  }
  0x1a   :  { %s8958_s20 = sld [smem:[%s11852_s0 + %s8815_s15]]   ;;  %s8819_s15 = smov 23  }
  0x1b   :  { %s8963_s27 = sld [smem:[%s11852_s0 + %s8816_s22]]   ;;  %s8820_s22 = smov 24  }
  0x1c   :  { %s8968_s4 = sld [smem:[%s11852_s0 + %s8817_s28]]   ;;  %s8821_s28 = smov 25  }
  0x1f   :  { %12042 = sst [smem:[#allocation6_spill]] %s8953_s12 }
  0x20   :  { %12043 = sst [smem:[#allocation7_spill]] %s8958_s20 }
  0x21   :  { %12044 = sst [smem:[#allocation8_spill]] %s8963_s27 }
  0x22   :  { %12045 = sst [smem:[#allocation9_spill]] %s8968_s4 }
  0x23   :  { %s8973_s12 = sld [smem:[%s11852_s0 + %s8818_s7]]   ;;  %s8822_s7 = smov 26  }
  0x24   :  { %s8978_s20 = sld [smem:[%s11852_s0 + %s8819_s15]]   ;;  %s8823_s15 = smov 27  }
  0x25   :  { %s8983_s27 = sld [smem:[%s11852_s0 + %s8820_s22]]   ;;  %s8824_s22 = smov 28  }
  0x26   :  { %s8988_s4 = sld [smem:[%s11852_s0 + %s8821_s28]]   ;;  %s8825_s28 = smov 29  }
  0x29   :  { %12046 = sst [smem:[#allocation10_spill]] %s8973_s12 }
  0x2a   :  { %12047 = sst [smem:[#allocation11_spill]] %s8978_s20 }
  0x2b   :  { %12048 = sst [smem:[#allocation12_spill]] %s8983_s27 }
  0x2c   :  { %12049 = sst [smem:[#allocation13_spill]] %s8988_s4 }
  0x2d   :  { %s8993_s12 = sld [smem:[%s11852_s0 + %s8822_s7]]   ;;  %s8826_s7 = smov 30  }
  0x2e   :  { %s8998_s20 = sld [smem:[%s11852_s0 + %s8823_s15]]   ;;  %s8827_s15 = smov 31  }
  0x2f   :  { %s9003_s27 = sld [smem:[%s11852_s0 + %s8824_s22]]   ;;  %s8828_s22 = smov 32  }
  0x30   :  { %s9008_s4 = sld [smem:[%s11852_s0 + %s8825_s28]]   ;;  %s8829_s28 = smov 33  }
  0x33   :  { %12050 = sst [smem:[#allocation14_spill]] %s8993_s12 }
  0x34   :  { %12051 = sst [smem:[#allocation15_spill]] %s8998_s20 }
  0x35   :  { %12052 = sst [smem:[#allocation16_spill]] %s9003_s27 }
  0x36   :  { %12053 = sst [smem:[#allocation17_spill]] %s9008_s4 }
  0x37   :  { %s9013_s12 = sld [smem:[%s11852_s0 + %s8826_s7]]   ;;  %s8830_s7 = smov 34  }
  0x38   :  { %s9018_s20 = sld [smem:[%s11852_s0 + %s8827_s15]]   ;;  %s8831_s15 = smov 35  }
  0x39   :  { %s9023_s27 = sld [smem:[%s11852_s0 + %s8828_s22]]   ;;  %s8832_s22 = smov 36  }
  0x3a   :  { %s9028_s4 = sld [smem:[%s11852_s0 + %s8829_s28]]   ;;  %s8833_s28 = smov 37  }
  0x3d   :  { %12054 = sst [smem:[#allocation18_spill]] %s9013_s12 }
  0x3e   :  { %12055 = sst [smem:[#allocation19_spill]] %s9018_s20 }
  0x3f   :  { %12056 = sst [smem:[#allocation20_spill]] %s9023_s27 }
  0x40   :  { %12057 = sst [smem:[#allocation21_spill]] %s9028_s4 }
  0x41   :  { %s9033_s12 = sld [smem:[%s11852_s0 + %s8830_s7]]   ;;  %s8834_s7 = smov 38  }
  0x42   :  { %s9038_s20 = sld [smem:[%s11852_s0 + %s8831_s15]]   ;;  %s8835_s15 = smov 39  }
  0x43   :  { %s9043_s27 = sld [smem:[%s11852_s0 + %s8832_s22]]   ;;  %s9060_s22 = smov 0  }
  0x44   :  { %s9048_s4 = sld [smem:[%s11852_s0 + %s8833_s28]]  }
  0x47   :  { %12058 = sst [smem:[#allocation22_spill]] %s9033_s12 }
  0x48   :  { %12059 = sst [smem:[#allocation23_spill]] %s9038_s20 }
  0x49   :  { %s9053_s12 = sld [smem:[%s11852_s0 + %s8834_s7]]  }
  0x4a   :  { %s9058_s20 = sld [smem:[%s11852_s0 + %s8835_s15]]  }
  0x4b LB: > { %s9066_s23 = sadd.s32 4294967295, %s8795_s22   ;;  %p6891_p0 = scmp.ge.s32.totalorder %s8795_s22, 1  ;;  %s8795_s22 = sphi %s9060_s22, %s89_s22  }
  0x4c   : > { %p1078_p1 = scmp.lt.s32.totalorder %s8795_s22, 3 }
  0x4e   : > { %p1079_p2 = pnand %p6891_p0, %p1078_p1 }
  0x50   : > { %1082 = sbr.rel (%p1079_p2) target bundleno = 6506 (0x196a), region = 176 }
  0x57   : > { %v6913_v0 = vld [vmem:[%s8868_s9 + $0x80] sm:$0xff]  ;;  %vm1224_vm0 = vcmask 1045504   ;;  %s6892_s0 = sshll.u32 %s9066_s23, 3  ;;  %v8836_v2 = vmov 0   ;;  %v6914_v4 = vld [vmem:[%s8868_s9 + $0x88] sm:$0xff]  ;;  %vm1199_vm1 = vcmask 48128  }
  0x58   : > { %v6905_v1 = vld [vmem:[%s8868_s9 + $0x40] sm:$0xff]  ;;  %8350 = vset.pattern.permute.xlu1 %v8836_v2  ;;  %8349 = vset.pattern.permute.xlu0 %v8836_v2  ;;  %p1174_p3 = scmp.lt.s32.totalorder %s6892_s0, 15  ;;  %v6906_v5 = vld [vmem:[%s8868_s9 + $0x48] sm:$0xff]  ;;  %v6907_v12 = vld [vmem:[%s8868_s9 + $0x50] sm:$0xff]  ;;  %s8837_s1 = smov 32   ;;  %vm2154_vm4 = vcmask 130048  }
  0x59   : > { %v1191_v3 = vld [vmem:[%s8873_s13] sm:$0x3f]  ;;  %1501 = vperm.xlu1 %8350, %v6913_v0   ;;  %1427 = vperm.xlu0 %8349, %v6905_v1   ;;  %v6922_v6 = vld [vmem:[%s8868_s9 + $0xc8] sm:$0xff]  ;;  %v6915_v20 = vld [vmem:[%s8868_s9 + $0x90] sm:$0xff]  ;;  %s8838_s2 = smov 8   ;;  %s8839_s7 = smov 56  }
  0x5a   : > { %7498 = vmatprep.subr.msk.mxu0 %vm1224_vm0, %v1191_v3  ;;  %s12388_s0 = smov (!%p1174_p3, %s6892_s0), 15  ;;  %v6921_v9 = vld [vmem:[%s8868_s9 + $0xc0] sm:$0xff]  ;;  %v6930_v17 = vld [vmem:[%s8868_s9 + $0x108] sm:$0xff]  ;;  %v6908_v21 = vld [vmem:[%s8868_s9 + $0x58] sm:$0xff]  ;;  %s12009_s10 = smov 24   ;;  %vm2145_vm5 = vcmask 64512  }
  0x5b   : > { %7499 = vmatpush3.msk.msra.mxu0 %vm1224_vm0, %v1191_v3  ;;  %s6893_s26 = sshll.u32 %s12388_s0, 3  ;;  %v6929_v13 = vld [vmem:[%s8868_s9 + $0x100] sm:$0xff]  ;;  %v6938_v23 = vld [vmem:[%s8868_s9 + $0x148] sm:$0xff]  ;;  %v6923_v24 = vld [vmem:[%s8868_s9 + $0xd0] sm:$0xff]  ;;  %s12006_s11 = smov 16   ;;  %vm2163_vm6 = vcmask 195584  }
  0x5c   : > { %s1177_s28 = scalar_lea.vmem %s8863_s5, %s6893_s26  ;;  %v6937_v16 = vld [vmem:[%s8868_s9 + $0x140] sm:$0xff]  ;;  %v6916_v25 = vld [vmem:[%s8868_s9 + $0x98] sm:$0xff]  ;;  %v6946_v27 = vld [vmem:[%s8868_s9 + $0x188] sm:$0xff]  ;;  %s8842_s15 = smov 40   ;;  %vm2172_vm7 = vcmask 261120   ;;  %vm2181_vm8 = vcmask 326656  }
  0x5d   : > { %1506 = vperm.xlu1 %8350, %v6914_v4   ;;  %1432 = vperm.xlu0 %8349, %v6906_v5   ;;  %v1183_v7 = vld [vmem:[%s1177_s28] sm:$0xff]  ;;  %v1184_v8 = vld [vmem:[%s1177_s28 + $0x8] sm:$0xff]  ;;  %v1185_v10 = vld [vmem:[%s1177_s28 + $0x10] sm:$0xff]  ;;  %s8843_s16 = smov 48   ;;  %s8844_s18 = smov 64   ;;  %vm2190_vm9 = vcmask 392192  }
  0x5e   : > { %7500 = vmatprep.mubr.msk.f32.mxu0 %vm1199_vm1, %v1183_v7  ;;  %v1186_v11 = vld [vmem:[%s1177_s28 + $0x18] sm:$0xff]  ;;  %v1187_v14 = vld [vmem:[%s1177_s28 + $0x20] sm:$0xff]  ;;  %v1188_v15 = vld [vmem:[%s1177_s28 + $0x28] sm:$0xff]  ;;  %vm2199_vm10 = vcmask 457728   ;;  %vm2208_vm11 = vcmask 523264   ;;  %vm2233_vm12 = vcmask 588800  }
  0x5f   : > { %7501 = vmatmul.mubr.msk.f32.vlgmr.msra.gmra.mrb[0].mxu0 %vm1199_vm1, %v1184_v8  ;;  %v1189_v18 = vld [vmem:[%s1177_s28 + $0x30] sm:$0xff]  ;;  %v1190_v19 = vld [vmem:[%s1177_s28 + $0x38] sm:$0xff]  ;;  %v6945_v22 = vld [vmem:[%s8868_s9 + $0x180] sm:$0xff]  ;;  %s8845_s0 = smov 112   ;;  %s8846_s26 = smov 120   ;;  %vm2843_vm13 = vcmask 850944  }
  0x60   : > { %7503 = vmatprep.mubr.msk.f32.mxu0 %vm1199_vm1, %v1185_v10  ;;  %v6953_v26 = vld [vmem:[%s8868_s9 + $0x1c0] sm:$0xff]  ;;  %v6931_v28 = vld [vmem:[%s8868_s9 + $0x110] sm:$0xff]  ;;  %v6924_v29 = vld [vmem:[%s8868_s9 + $0xd8] sm:$0xff]  ;;  %s8847_s28 = smov 72   ;;  %vm2739_vm14 = vcmask 654336   ;;  %vm2773_vm15 = vcmask 916480  }
  0x61   : > { %1563 = vperm.xlu1 %8350, %v6922_v6   ;;  %1558 = vperm.xlu0 %8349, %v6921_v9   ;;  %v6961_v30 = vld [vmem:[%s8868_s9 + $0x200] sm:$0xff]  ;;  %v6954_v31 = vld [vmem:[%s8868_s9 + $0x1c8] sm:$0xff]  ;;  %v6932_v32 = vld [vmem:[%s8868_s9 + $0x118] sm:$0xff]  ;;  %vm2748_vm0 = vcmask 982016   ;;  %p1179_p4 = scmp.lt.s32.totalorder %s9066_s23, 1 }
  0x62   : > { %v6909_v33 = vld [vmem:[%s8868_s9 + $0x60] sm:$0xff]  ;;  %v6962_v34 = vld [vmem:[%s8868_s9 + $0x208] sm:$0xff]  ;;  %v6939_v35 = vld [vmem:[%s8868_s9 + $0x150] sm:$0xff] }
  0x63   : > { %7504 = vmatmul.mubr.msk.f32.gmra.mrb[2].mxu0 %vm1199_vm1, %v1186_v11  ;;  %v6917_v36 = vld [vmem:[%s8868_s9 + $0xa0] sm:$0xff]  ;;  %v6910_v37 = vld [vmem:[%s8868_s9 + $0x68] sm:$0xff]  ;;  %v6947_v38 = vld [vmem:[%s8868_s9 + $0x190] sm:$0xff]  ;;  %s12390_s23 = smov (!%p1179_p4, %s9066_s23), 1 }
  0x64   : > { %7506 = vmatprep.mubr.msk.f32.mxu0 %vm1199_vm1, %v1187_v14  ;;  %v6940_v39 = vld [vmem:[%s8868_s9 + $0x158] sm:$0xff]  ;;  %v6925_v40 = vld [vmem:[%s8868_s9 + $0xe0] sm:$0xff]  ;;  %v6918_v41 = vld [vmem:[%s8868_s9 + $0xa8] sm:$0xff] }
  0x65   : > { %1437 = vperm.xlu1 %8350, %v6907_v12   ;;  %1615 = vperm.xlu0 %8349, %v6929_v13   ;;  %v6955_v42 = vld [vmem:[%s8868_s9 + $0x1d0] sm:$0xff]  ;;  %v6948_v43 = vld [vmem:[%s8868_s9 + $0x198] sm:$0xff]  ;;  %v6933_v44 = vld [vmem:[%s8868_s9 + $0x120] sm:$0xff] }
  0x66   : > { %v6926_v45 = vld [vmem:[%s8868_s9 + $0xe8] sm:$0xff]  ;;  %v6963_v46 = vld [vmem:[%s8868_s9 + $0x210] sm:$0xff]  ;;  %v6956_v47 = vld [vmem:[%s8868_s9 + $0x1d8] sm:$0xff] }
  0x67   : > { %7507 = vmatmul.mubr.msk.f32.gmra.mrb[4].mxu0 %vm1199_vm1, %v1188_v15  ;;  %v6934_v48 = vld [vmem:[%s8868_s9 + $0x128] sm:$0xff]  ;;  %v6911_v49 = vld [vmem:[%s8868_s9 + $0x70] sm:$0xff]  ;;  %v6964_v50 = vld [vmem:[%s8868_s9 + $0x218] sm:$0xff] }
  0x68   : > { %7509 = vmatprep.mubr.msk.f32.mxu0 %vm1199_vm1, %v1189_v18  ;;  %v6941_v51 = vld [vmem:[%s8868_s9 + $0x160] sm:$0xff]  ;;  %v6919_v52 = vld [vmem:[%s8868_s9 + $0xb0] sm:$0xff]  ;;  %v6912_v53 = vld [vmem:[%s8868_s9 + $0x78] sm:$0xff] }
  0x69   : > { %1672 = vperm.xlu1 %8350, %v6937_v16   ;;  %1620 = vperm.xlu0 %8349, %v6930_v17   ;;  %v6949_v54 = vld [vmem:[%s8868_s9 + $0x1a0] sm:$0xff]  ;;  %v6942_v55 = vld [vmem:[%s8868_s9 + $0x168] sm:$0xff]  ;;  %v6927_v56 = vld [vmem:[%s8868_s9 + $0xf0] sm:$0xff] }
  0x6a   : > { %v6920_v57 = vld [vmem:[%s8868_s9 + $0xb8] sm:$0xff]  ;;  %v6957_v58 = vld [vmem:[%s8868_s9 + $0x1e0] sm:$0xff]  ;;  %v6950_v59 = vld [vmem:[%s8868_s9 + $0x1a8] sm:$0xff] }
  0x6b   : > { %7510 = vmatmul.mubr.msk.f32.gmra.mrb[6].mxu0 %vm1199_vm1, %v1190_v19  ;;  %v6935_v60 = vld [vmem:[%s8868_s9 + $0x130] sm:$0xff]  ;;  %v6928_v61 = vld [vmem:[%s8868_s9 + $0xf8] sm:$0xff]  ;;  %v6965_v62 = vld [vmem:[%s8868_s9 + $0x220] sm:$0xff] }
  0x6c   : > { %v6958_v63 = vld [vmem:[%s8868_s9 + $0x1e8] sm:$0xff]  ;;  %v6943_v0 = vld [vmem:[%s8868_s9 + $0x170] sm:$0xff]  ;;  %v6936_v1 = vld [vmem:[%s8868_s9 + $0x138] sm:$0xff] }
  0x6d   : > { %1511 = vperm.xlu1 %8350, %v6915_v20   ;;  %1442 = vperm.xlu0 %8349, %v6908_v21   ;;  %v6944_v2 = vld [vmem:[%s8868_s9 + $0x178] sm:$0xff]  ;;  %v6966_v3 = vld [vmem:[%s8868_s9 + $0x228] sm:$0xff]  ;;  %v6951_v5 = vld [vmem:[%s8868_s9 + $0x1b0] sm:$0xff] }
  0x6e   : > { %v6952_v4 = vld [vmem:[%s8868_s9 + $0x1b8] sm:$0xff]  ;;  %v6959_v7 = vld [vmem:[%s8868_s9 + $0x1f0] sm:$0xff]  ;;  %v1361_v10 = vld [vmem:[%s8868_s9 + $0x8] sm:$0xff] }
  0x6f   : > { %v6960_v6 = vld [vmem:[%s8868_s9 + $0x1f8] sm:$0xff]  ;;  %v6967_v9 = vld [vmem:[%s8868_s9 + $0x230] sm:$0xff]  ;;  %v1360_v11 = vld [vmem:[%s8868_s9] sm:$0xff] }
  0x70   : > { %v6968_v8 = vld [vmem:[%s8868_s9 + $0x238] sm:$0xff]  ;;  %v1362_v15 = vld [vmem:[%s8868_s9 + $0x10] sm:$0xff]  ;;  %v1365_v18 = vld [vmem:[%s8868_s9 + $0x28] sm:$0xff] }
  0x71   : > { %1729 = vperm.xlu1 %8350, %v6945_v22   ;;  %1677 = vperm.xlu0 %8349, %v6938_v23   ;;  %v1363_v14 = vld [vmem:[%s8868_s9 + $0x18] sm:$0xff]  ;;  %v1364_v19 = vld [vmem:[%s8868_s9 + $0x20] sm:$0xff]  ;;  %v1366_v22 = vld [vmem:[%s8868_s9 + $0x30] sm:$0xff] }
  0x72   : > { %v1367_v23 = vld [vmem:[%s8868_s9 + $0x38] sm:$0xff]  ;;  %vm10532_vm1 = vmpackc.low %vm2145_vm5, %vm2145_vm5 }
  0x75   : > { %1568 = vperm.xlu1 %8350, %v6923_v24   ;;  %1516 = vperm.xlu0 %8349, %v6916_v25  }
  0x79   : > { %1786 = vperm.xlu1 %8350, %v6953_v26   ;;  %1734 = vperm.xlu0 %8349, %v6946_v27  }
  0x7d   : > { %1625 = vperm.xlu1 %8350, %v6931_v28   ;;  %1573 = vperm.xlu0 %8349, %v6924_v29  }
  0x81   : > { %1843 = vperm.xlu1 %8350, %v6961_v30   ;;  %1791 = vperm.xlu0 %8349, %v6954_v31  }
  0x85   : > { %1630 = vperm.xlu1 %8350, %v6932_v32   ;;  %1447 = vperm.xlu0 %8349, %v6909_v33  }
  0x89   : > { %1848 = vperm.xlu1 %8350, %v6962_v34   ;;  %1682 = vperm.xlu0 %8349, %v6939_v35  }
  0x8d   : > { %1521 = vperm.xlu1 %8350, %v6917_v36   ;;  %1452 = vperm.xlu0 %8349, %v6910_v37  }
  0x91   : > { %1739 = vperm.xlu1 %8350, %v6947_v38   ;;  %1687 = vperm.xlu0 %8349, %v6940_v39  }
  0x95   : > { %1578 = vperm.xlu1 %8350, %v6925_v40   ;;  %1526 = vperm.xlu0 %8349, %v6918_v41  }
  0x99   : > { %1796 = vperm.xlu1 %8350, %v6955_v42   ;;  %1744 = vperm.xlu0 %8349, %v6948_v43  }
  0x9d   : > { %1635 = vperm.xlu1 %8350, %v6933_v44   ;;  %1583 = vperm.xlu0 %8349, %v6926_v45  }
  0xa1   : > { %1853 = vperm.xlu1 %8350, %v6963_v46   ;;  %1801 = vperm.xlu0 %8349, %v6956_v47  }
  0xa5   : > { %1640 = vperm.xlu1 %8350, %v6934_v48   ;;  %1457 = vperm.xlu0 %8349, %v6911_v49  }
  0xa9   : > { %1858 = vperm.xlu1 %8350, %v6964_v50   ;;  %1692 = vperm.xlu0 %8349, %v6941_v51   ;;  %v9218_v50 = vld [vmem:[%s8878_s17] ss:$0 sm:$0xff]  ;;  %v1349_v51 = vlaneseq }
  0xad   : > { %1531 = vperm.xlu1 %8350, %v6919_v52   ;;  %1462 = vperm.xlu0 %8349, %v6912_v53  }
  0xb1   : > { %1749 = vperm.xlu1 %8350, %v6949_v54   ;;  %1697 = vperm.xlu0 %8349, %v6942_v55   ;;  %v9221_v55 = vshrl.u32 %v1349_v51, 7 }
  0xb3   : > { %12092 = vst [vmem:[#allocation56_spill] sm:$0xff] %v9221_v55  ;;  %vm1351_vm2 = vcmp.lt.s32.totalorder %v9221_v55, 1  ;;  %vm1481_vm3 = vcmp.lt.s32.totalorder %v9221_v55, 7 }
  0xb5   : > { %1588 = vperm.xlu1 %8350, %v6927_v56   ;;  %1536 = vperm.xlu0 %8349, %v6920_v57  }
  0xb9   : > { %1806 = vperm.xlu1 %8350, %v6957_v58   ;;  %1754 = vperm.xlu0 %8349, %v6950_v59  }
  0xbd   : > { %1645 = vperm.xlu1 %8350, %v6935_v60   ;;  %1593 = vperm.xlu0 %8349, %v6928_v61  }
  0xc1   : > { %1863 = vperm.xlu1 %8350, %v6965_v62   ;;  %1811 = vperm.xlu0 %8349, %v6958_v63  }
  0xc5   : > { %1702 = vperm.xlu1 %8350, %v6943_v0   ;;  %1650 = vperm.xlu0 %8349, %v6936_v1  }
  0xc9   : > { %1707 = vperm.xlu1 %8350, %v6944_v2   ;;  %1868 = vperm.xlu0 %8349, %v6966_v3  }
  0xcd   : > { %1764 = vperm.xlu1 %8350, %v6952_v4   ;;  %1759 = vperm.xlu0 %8349, %v6951_v5  }
  0xd1   : > { %1821 = vperm.xlu1 %8350, %v6960_v6   ;;  %1816 = vperm.xlu0 %8349, %v6959_v7  }
  0xd5   : > { %1878 = vperm.xlu1 %8350, %v6968_v8   ;;  %1873 = vperm.xlu0 %8349, %v6967_v9  }
  0xd8   : > { %v9147_v12 = vpop.permute.xlu1 %1501  ;;  %v9149_v13 = vpop.permute.xlu0 %1427 }
  0xd9   : > { %12060 = vst [vmem:[#allocation24_spill] sm:$0xff] %v9147_v12  ;;  %12061 = vst [vmem:[#allocation25_spill] sm:$0xff] %v9149_v13  ;;  %1375 = vperm.xlu1 %8350, %v1361_v10   ;;  %1370 = vperm.xlu0 %8349, %v1360_v11  }
  0xdc   : > { %v9153_v16 = vpop.permute.xlu1 %1506  ;;  %v9155_v17 = vpop.permute.xlu0 %1432 }
  0xdd   : > { %12062 = vst [vmem:[#allocation26_spill] sm:$0xff] %v9153_v16  ;;  %12063 = vst [vmem:[#allocation27_spill] sm:$0xff] %v9155_v17  ;;  %1385 = vperm.xlu1 %8350, %v1363_v14   ;;  %1380 = vperm.xlu0 %8349, %v1362_v15  }
  0xe0   : > { %v9159_v20 = vpop.permute.xlu1 %1563  ;;  %v9161_v21 = vpop.permute.xlu0 %1558 }
  0xe1   : > { %1395 = vperm.xlu1 %8350, %v1365_v18   ;;  %1390 = vperm.xlu0 %8349, %v1364_v19   ;;  %12064 = vst [vmem:[#allocation28_spill] sm:$0xff] %v9159_v20  ;;  %12065 = vst [vmem:[#allocation29_spill] sm:$0xff] %v9161_v21 }
  0xe4   : > { %v9165_v24 = vpop.permute.xlu1 %1437  ;;  %v9167_v25 = vpop.permute.xlu0 %1615 }
  0xe5   : > { %1400 = vperm.xlu1 %8350, %v1366_v22   ;;  %1405 = vperm.xlu0 %8349, %v1367_v23   ;;  %12066 = vst [vmem:[#allocation30_spill] sm:$0xff] %v9165_v24  ;;  %12067 = vst [vmem:[#allocation31_spill] sm:$0xff] %v9167_v25 }
  0xe8   : > { %v9169_v26 = vpop.permute.xlu1 %1672  ;;  %v9171_v27 = vpop.permute.xlu0 %1620 }
  0xe9   : > { %12068 = vst [vmem:[#allocation32_spill] sm:$0xff] %v9169_v26  ;;  %12069 = vst [vmem:[#allocation33_spill] sm:$0xff] %v9171_v27 }
  0xec   : > { %v9173_v28 = vpop.permute.xlu1 %1511  ;;  %v9175_v29 = vpop.permute.xlu0 %1442 }
  0xed   : > { %12070 = vst [vmem:[#allocation34_spill] sm:$0xff] %v9173_v28  ;;  %12071 = vst [vmem:[#allocation35_spill] sm:$0xff] %v9175_v29 }
  0xf0   : > { %v9177_v30 = vpop.permute.xlu1 %1729  ;;  %v9179_v31 = vpop.permute.xlu0 %1677 }
  0xf1   : > { %12072 = vst [vmem:[#allocation36_spill] sm:$0xff] %v9177_v30  ;;  %12073 = vst [vmem:[#allocation37_spill] sm:$0xff] %v9179_v31 }
  0xf4   : > { %v9181_v32 = vpop.permute.xlu1 %1568  ;;  %v9183_v33 = vpop.permute.xlu0 %1516 }
  0xf5   : > { %12074 = vst [vmem:[#allocation38_spill] sm:$0xff] %v9181_v32  ;;  %12075 = vst [vmem:[#allocation39_spill] sm:$0xff] %v9183_v33 }
  0xf8   : > { %v9185_v34 = vpop.permute.xlu1 %1786  ;;  %v9187_v35 = vpop.permute.xlu0 %1734 }
  0xf9   : > { %12076 = vst [vmem:[#allocation40_spill] sm:$0xff] %v9185_v34  ;;  %12077 = vst [vmem:[#allocation41_spill] sm:$0xff] %v9187_v35 }
  0xfc   : > { %v9189_v36 = vpop.permute.xlu1 %1625  ;;  %v9191_v37 = vpop.permute.xlu0 %1573 }
  0xfd   : > { %12078 = vst [vmem:[#allocation42_spill] sm:$0xff] %v9189_v36  ;;  %12079 = vst [vmem:[#allocation43_spill] sm:$0xff] %v9191_v37 }
 0x100   : > { %v9193_v38 = vpop.permute.xlu1 %1843  ;;  %v9195_v39 = vpop.permute.xlu0 %1791 }
 0x101   : > { %12080 = vst [vmem:[#allocation44_spill] sm:$0xff] %v9193_v38  ;;  %12081 = vst [vmem:[#allocation45_spill] sm:$0xff] %v9195_v39 }
 0x104   : > { %v9197_v40 = vpop.permute.xlu1 %1630  ;;  %v9199_v41 = vpop.permute.xlu0 %1447 }
 0x105   : > { %12082 = vst [vmem:[#allocation46_spill] sm:$0xff] %v9197_v40  ;;  %12083 = vst [vmem:[#allocation47_spill] sm:$0xff] %v9199_v41 }
 0x108   : > { %v9201_v42 = vpop.permute.xlu1 %1848  ;;  %v9203_v43 = vpop.permute.xlu0 %1682 }
 0x109   : > { %12084 = vst [vmem:[#allocation48_spill] sm:$0xff] %v9201_v42  ;;  %12085 = vst [vmem:[#allocation49_spill] sm:$0xff] %v9203_v43 }
 0x10c   : > { %v9205_v44 = vpop.permute.xlu1 %1521  ;;  %v9207_v45 = vpop.permute.xlu0 %1452 }
 0x10d   : > { %12086 = vst [vmem:[#allocation50_spill] sm:$0xff] %v9205_v44  ;;  %12087 = vst [vmem:[#allocation51_spill] sm:$0xff] %v9207_v45 }
 0x110   : > { %v9209_v46 = vpop.permute.xlu1 %1739  ;;  %v9211_v47 = vpop.permute.xlu0 %1687 }
 0x111   : > { %12088 = vst [vmem:[#allocation52_spill] sm:$0xff] %v9209_v46  ;;  %12089 = vst [vmem:[#allocation53_spill] sm:$0xff] %v9211_v47 }
 0x114   : > { %v9213_v48 = vpop.permute.xlu1 %1578  ;;  %v9215_v49 = vpop.permute.xlu0 %1526 }
 0x115   : > { %12090 = vst [vmem:[#allocation54_spill] sm:$0xff] %v9213_v48  ;;  %12091 = vst [vmem:[#allocation55_spill] sm:$0xff] %v9215_v49 }
 0x118   : > { %v9223_v56 = vpop.permute.xlu1 %1796  ;;  %v9225_v57 = vpop.permute.xlu0 %1744 }
 0x119   : > { %12093 = vst [vmem:[#allocation57_spill] sm:$0xff] %v9223_v56  ;;  %12094 = vst [vmem:[#allocation58_spill] sm:$0xff] %v9225_v57 }
 0x11c   : > { %v9244_v5 = vpop.permute.xlu1 %1635  ;;  %v9246_v6 = vpop.permute.xlu0 %1583 }
 0x11d   : > { %12097 = vst [vmem:[#allocation61_spill] sm:$0xff] %v9244_v5  ;;  %12098 = vst [vmem:[#allocation62_spill] sm:$0xff] %v9246_v6 }
 0x132   : > { %v7502_v52 = vpop.f32.mrb[0].mxu0 }
 0x133   : > { %v1300_v53 = vadd.f32 %v7502_v52, %v9218_v50  ;;  %v1294_v54 = vpop.f32.mrb[1].mxu0 }
 0x134   : > { %v1295_v59 = vadd.f32 %v9218_v50, %v1294_v54  ;;  %v9277_v54 = vpop.permute.xlu0 %1801 }
 0x135   : > { %v9227_v58 = vmax.f32 %v1300_v53, 0.0  ;;  %v9275_v53 = vpop.permute.xlu1 %1853  ;;  %12102 = vst [vmem:[#allocation66_spill] sm:$0xff] %v9277_v54 }
 0x136   : > { %v7505_v60 = vpop.f32.mrb[2].mxu0  ;;  %v9230_v61 = vmax.f32 %v1295_v59, 0.0  ;;  %12101 = vst [vmem:[#allocation65_spill] sm:$0xff] %v9275_v53 }
 0x137   : > { %12095 = vst [vmem:[#allocation59_spill] sm:$0xff] %v9227_v58  ;;  %v1654_v62 = vmul.f32 %v9171_v27, %v9227_v58  ;;  %v1467_v63 = vmul.f32 %v9165_v24, %v9227_v58  ;;  %v1310_v0 = vadd.f32 %v7505_v60, %v9218_v50  ;;  %v1304_v1 = vpop.f32.mrb[3].mxu0  ;;  %v1342_v2 = vrot.slane %v9227_v58, 7 }
 0x138   : > { %12096 = vst [vmem:[#allocation60_spill] sm:$0xff] %v9230_v61  ;;  %v11859_v3 = vrot.slane %v9230_v61, 7  ;;  %v1824_v7 = vmul.f32 %v9185_v34, %v9227_v58  ;;  %v1305_v10 = vadd.f32 %v9218_v50, %v1304_v1  ;;  %v1466_v18 = vmul.f32 %v9155_v17, %v9230_v61 }
 0x139   : > { %1995 = vrot.lane.b32.xlu0 %v1654_v62, %s8837_s1  ;;  %1901 = vrot.lane.b32.xlu1 %v1467_v63, %s8838_s2  ;;  %v9256_v9 = vmax.f32 %v1310_v0, 0.0  ;;  %v11860_v51 = vrot.slane %v9230_v61, 1  ;;  %v1474_v52 = vrot.slane %v9227_v58, 1  ;;  %v1653_v60 = vmul.f32 %v9167_v25, %v9230_v61  ;;  %v9298_v1 = vpop.permute.xlu1 %1640 }
 0x13a   : > { %v9242_v4 = vpop.f32.mrb[4].mxu0  ;;  %v9254_v8 = vsel %vm1351_vm2, %v11859_v3, %v1342_v2  ;;  %v9269_v19 = vmax.f32 %v1305_v10, 0.0  ;;  %12103 = vst [vmem:[#allocation67_spill] sm:$0xff] %v9298_v1 }
 0x13b   : > { %12099 = vst [vmem:[#allocation63_spill] sm:$0xff] %v9256_v9  ;;  %v9259_v11 = vpop.f32.mrb[5].mxu0  ;;  %v1597_v14 = vmul.f32 %v9159_v20, %v9254_v8  ;;  %v1469_v23 = vmul.f32 %v9199_v41, %v9256_v9  ;;  %v9293_v63 = vsel %vm1481_vm3, %v11860_v51, %v1474_v52  ;;  %v11869_v58 = vrot.slane %v9256_v9, 7 }
 0x13c   : > { %12100 = vst [vmem:[#allocation64_spill] sm:$0xff] %v9269_v19  ;;  %v1468_v62 = vmul.f32 %v9175_v29, %v9269_v19  ;;  %v1475_v0 = vrot.slane %v9269_v19, 1  ;;  %v1540_v10 = vmul.f32 %v9153_v16, %v9293_v63 }
 0x13d   : > { %2089 = vrot.lane.b32.xlu1 %v1824_v7, %s8839_s7  ;;  %1963 = vrot.lane.b32.xlu0 %v1597_v14, %s12009_s10  ;;  %v9300_v7 = vpop.permute.xlu0 %1457  ;;  %v1825_v14 = vmul.f32 %v9195_v39, %v9269_v19 }
 0x13e   : > { %v9265_v15 = vpop.f32.mrb[6].mxu0  ;;  %12104 = vst [vmem:[#allocation68_spill] sm:$0xff] %v9300_v7 }
 0x13f   : > { %v1324_v22 = vpop.f32.mrb[7].mxu0 }
 0x140   : > { %v9280_v59 = vadd.f32 %v9218_v50, %v1324_v22  ;;  %v11862_v22 = vrot.slane %v9256_v9, 1 }
 0x141   : > { %1899 = vrot.lane.b32.xlu1 %v1466_v18, %s8838_s2  ;;  %1905 = vrot.lane.b32.xlu0 %v1469_v23, %s8838_s2  ;;  %v1487_v18 = vsel %vm1481_vm3, %v1474_v52, %v1475_v0  ;;  %v1710_v23 = vmul.f32 %v9169_v26, %v9293_v63  ;;  %v9316_v3 = vpop.permute.xlu0 %1692 }
 0x142   : > { %12106 = vst [vmem:[#allocation70_spill] sm:$0xff] %v9316_v3  ;;  %v1486_v52 = vsel %vm1481_vm3, %v1475_v0, %v11862_v22 }
 0x143   : > { %v1542_v51 = vmul.f32 %v9183_v33, %v1486_v52 }
 0x145   : > { %1993 = vrot.lane.b32.xlu1 %v1653_v60, %s8837_s1  ;;  %1903 = vrot.lane.b32.xlu0 %v1468_v62, %s8838_s2  ;;  %v1711_v60 = vmul.f32 %v9179_v31, %v1487_v18  ;;  %v9314_v62 = vpop.permute.xlu1 %1858  ;;  %v9337_v22 = vpop.permute.xlu0 %1462 }
 0x146   : > { %12105 = vst [vmem:[#allocation69_spill] sm:$0xff] %v9314_v62  ;;  %12108 = vst [vmem:[#allocation72_spill] sm:$0xff] %v9337_v22 }
 0x149   : > { %1931 = vrot.lane.b32.xlu1 %v1540_v10, %s12006_s11  ;;  %2091 = vrot.lane.b32.xlu0 %v1825_v14, %s8839_s7  ;;  %v1343_v10 = vrot.slane %v9269_v19, 7  ;;  %v1767_v14 = vmul.f32 %v9177_v30, %v9254_v8  ;;  %v9335_v0 = vpop.permute.xlu1 %1531 }
 0x14a   : > { %12107 = vst [vmem:[#allocation71_spill] sm:$0xff] %v9335_v0 }
 0x14d   : > { %2025 = vrot.lane.b32.xlu1 %v1710_v23, %s8842_s15  ;;  %2027 = vrot.lane.b32.xlu0 %v1711_v60, %s8842_s15  ;;  %v9331_v23 = vsel %vm1351_vm2, %v1342_v2, %v1343_v10  ;;  %v1656_v60 = vmul.f32 %v9197_v40, %v9256_v9  ;;  %v9348_v2 = vsel %vm1351_vm2, %v1343_v10, %v11869_v58  ;;  %v9357_v17 = vpop.permute.xlu1 %1749 }
 0x14e   : > { %v1768_v16 = vmul.f32 %v9187_v35, %v9331_v23  ;;  %v1599_v20 = vmul.f32 %v9191_v37, %v9348_v2  ;;  %12109 = vst [vmem:[#allocation73_spill] sm:$0xff] %v9357_v17  ;;  %v1315_v58 = vadd.f32 %v9218_v50, %v9259_v11  ;;  %v1598_v11 = vmul.f32 %v9181_v32, %v9331_v23 }
 0x151   : > { %2057 = vrot.lane.b32.xlu1 %v1767_v14, %s8843_s16  ;;  %1935 = vrot.lane.b32.xlu0 %v1542_v51, %s12006_s11  ;;  %v1826_v51 = vmul.f32 %v9223_v56, %v9256_v9  ;;  %v1320_v14 = vadd.f32 %v9242_v4, %v9218_v50  ;;  %v1712_v4 = vmul.f32 %v9203_v43, %v1486_v52  ;;  %v9372_v41 = vpop.permute.xlu1 %1588 }
 0x152   : > { %12112 = vst [vmem:[#allocation76_spill] sm:$0xff] %v9372_v41 }
 0x153   : > { %v9365_v10 = vmax.f32 %v1320_v14, 0.0 }
 0x155   : > { %1999 = vrot.lane.b32.xlu1 %v1656_v60, %s8837_s1  ;;  %2059 = vrot.lane.b32.xlu0 %v1768_v16, %s8843_s16  ;;  %v9359_v60 = vpop.permute.xlu0 %1697  ;;  %v1655_v16 = vmul.f32 %v9189_v36, %v9269_v19  ;;  %12111 = vst [vmem:[#allocation75_spill] sm:$0xff] %v9365_v10  ;;  %v1471_v14 = vmul.f32 %v9300_v7, %v9365_v10  ;;  %v9389_v19 = vpop.permute.xlu1 %1806 }
 0x156   : > { %12110 = vst [vmem:[#allocation74_spill] sm:$0xff] %v9359_v60  ;;  %12115 = vst [vmem:[#allocation79_spill] sm:$0xff] %v9389_v19 }
 0x159   : > { %2093 = vrot.lane.b32.xlu1 %v1826_v51, %s8839_s7  ;;  %1967 = vrot.lane.b32.xlu0 %v1599_v20, %s12009_s10  ;;  %v9374_v35 = vpop.permute.xlu0 %1536  ;;  %v1541_v20 = vmul.f32 %v9173_v28, %v1487_v18  ;;  %v9377_v51 = vmax.f32 %v1315_v58, 0.0 }
 0x15a   : > { %12113 = vst [vmem:[#allocation77_spill] sm:$0xff] %v9374_v35 }
 0x15b   : > { %12114 = vst [vmem:[#allocation78_spill] sm:$0xff] %v9377_v51  ;;  %v1827_v7 = vmul.f32 %v9277_v54, %v9377_v51 }
 0x15d   : > { %1997 = vrot.lane.b32.xlu1 %v1655_v16, %s8837_s1  ;;  %2029 = vrot.lane.b32.xlu0 %v1712_v4, %s8842_s15  ;;  %v1330_v16 = vadd.f32 %v9265_v15, %v9218_v50  ;;  %v1470_v4 = vmul.f32 %v9207_v45, %v9377_v51  ;;  %v9391_v58 = vpop.permute.xlu0 %1754  ;;  %v1477_v50 = vrot.slane %v9377_v51, 1  ;;  %v9403_v15 = vpop.permute.xlu1 %1645 }
 0x15e   : > { %12116 = vst [vmem:[#allocation80_spill] sm:$0xff] %v9391_v58  ;;  %12118 = vst [vmem:[#allocation82_spill] sm:$0xff] %v9403_v15 }
 0x161   : > { %1933 = vrot.lane.b32.xlu1 %v1541_v20, %s12006_s11  ;;  %1909 = vrot.lane.b32.xlu0 %v1471_v14, %s8838_s2  ;;  %v1881_v20 = vmul.f32 %v9193_v38, %v1487_v18  ;;  %v9396_v14 = vmax.f32 %v1330_v16, 0.0  ;;  %v9405_v43 = vpop.permute.xlu0 %1593  ;;  %v12120_v16 = vrot.slane %v9256_v9, 1  ;;  %v2218_v38 = vld [vmem:[%s8883_s21 + $0x8] sm:$0xff] }
 0x162   : > { %12119 = vst [vmem:[#allocation83_spill] sm:$0xff] %v9405_v43 }
 0x163   : > { %12117 = vst [vmem:[#allocation81_spill] sm:$0xff] %v9396_v14  ;;  %v1465_v18 = vmul.f32 %v9149_v13, %v9396_v14  ;;  %v9423_v13 = vpop.permute.xlu1 %1863 }
 0x164   : > { %12121 = vst [vmem:[#allocation84_spill] sm:$0xff] %v9423_v13 }
 0x165   : > { %1965 = vrot.lane.b32.xlu1 %v1598_v11, %s12009_s10  ;;  %1907 = vrot.lane.b32.xlu0 %v1470_v4, %s8838_s2  ;;  %v1882_v11 = vmul.f32 %v9201_v42, %v1486_v52  ;;  %v9415_v4 = vsel %vm1481_vm3, %v12120_v16, %v1477_v50  ;;  %v1769_v52 = vmul.f32 %v9209_v46, %v9348_v2  ;;  %v9425_v54 = vpop.permute.xlu0 %1811  ;;  %v2217_v46 = vld [vmem:[%s8883_s21] sm:$0xff] }
 0x166   : > { %12122 = vst [vmem:[#allocation85_spill] sm:$0xff] %v9425_v54 }
 0x169   : > { %2121 = vrot.lane.b32.xlu1 %v1881_v20, %s8844_s18  ;;  %2095 = vrot.lane.b32.xlu0 %v1827_v7, %s8839_s7  ;;  %v11891_v7 = vrot.slane %v9365_v10, 1  ;;  %v1713_v20 = vmul.f32 %v9211_v47, %v9415_v4 }
 0x16b   : > { %v9433_v16 = vsel %vm1481_vm3, %v1477_v50, %v11891_v7  ;;  %v11901_v50 = vrot.slane %v9365_v10, 7  ;;  %v9451_v7 = vpop.permute.xlu1 %1702 }
 0x16c   : > { %v1544_v47 = vmul.f32 %v9215_v49, %v9433_v16  ;;  %12124 = vst [vmem:[#allocation86_spill] sm:$0xff] %v9451_v7  ;;  %v9453_v49 = vpop.permute.xlu0 %1650 }
 0x16d   : > { %2123 = vrot.lane.b32.xlu1 %v1882_v11, %s8844_s18  ;;  %1897 = vrot.lane.b32.xlu0 %v1465_v18, %s8838_s2  ;;  %v1345_v11 = vrot.slane %v9377_v51, 7  ;;  %v1658_v18 = vmul.f32 %v9298_v1, %v9365_v10  ;;  %12125 = vst [vmem:[#allocation87_spill] sm:$0xff] %v9453_v49  ;;  %v1828_v1 = vmul.f32 %v9389_v19, %v9365_v10 }
 0x170   : > { %v9475_v19 = vpop.permute.xlu0 %1868 }
 0x171   : > { %2061 = vrot.lane.b32.xlu1 %v1769_v52, %s8843_s16  ;;  %2031 = vrot.lane.b32.xlu0 %v1713_v20, %s8842_s15  ;;  %v12123_v52 = vrot.slane %v9256_v9, 7  ;;  %v7957_v20 = vpack.c.bf16 %v2218_v38, %v2217_v46  ;;  %v9463_v38 = vsel %vm1351_vm2, %v1345_v11, %v11901_v50  ;;  %v2219_v46 = vld [vmem:[%s8883_s21 + $0x10] sm:$0xff]  ;;  %v1657_v9 = vmul.f32 %v9244_v5, %v9377_v51 }
 0x172   : > { %12127 = vst [vmem:[#allocation89_spill] sm:$0xff] %v9475_v19  ;;  %v1714_v50 = vmul.f32 %v9316_v3, %v9433_v16 }
 0x173   : > { %v9446_v45 = vsel %vm1351_vm2, %v12123_v52, %v1345_v11  ;;  %7958 = vmatprep.subr.bf16.mxu1 %v7957_v20  ;;  %v2222_v11 = vld [vmem:[%s8883_s21 + $0x28] sm:$0xff] }
 0x174   : > { %v1770_v52 = vmul.f32 %v9225_v57, %v9446_v45  ;;  %7960 = vmatpush3.bf16.msra.mxu1 %v7957_v20  ;;  %v1601_v57 = vmul.f32 %v9246_v6, %v9463_v38  ;;  %v9473_v20 = vpop.permute.xlu1 %1707  ;;  %v1883_v6 = vmul.f32 %v9275_v53, %v9415_v4 }
 0x175   : > { %2003 = vrot.lane.b32.xlu1 %v1658_v18, %s8837_s1  ;;  %1939 = vrot.lane.b32.xlu0 %v1544_v47, %s12006_s11  ;;  %v2220_v47 = vld [vmem:[%s8883_s21 + $0x18] sm:$0xff]  ;;  %12126 = vst [vmem:[#allocation88_spill] sm:$0xff] %v9473_v20 }
 0x176   : > { %v7961_v18 = vpack.c.bf16 %v2220_v47, %v2219_v46  ;;  %v1543_v46 = vmul.f32 %v9205_v44, %v9415_v4  ;;  %v9484_v47 = vmax.f32 %v9280_v59, 0.0  ;;  %v1600_v59 = vmul.f32 %v9213_v48, %v9446_v45 }
 0x177   : > { %v12131_v44 = vrot.slane %v9230_v61, 1 }
 0x178   : > { %7962 = vmatprep.subr.bf16.mxu1 %v7961_v18  ;;  %12128 = vst [vmem:[#allocation90_spill] sm:$0xff] %v9484_v47  ;;  %v1472_v51 = vmul.f32 %v9337_v22, %v9484_v47 }
 0x179   : > { %2097 = vrot.lane.b32.xlu1 %v1828_v1, %s8839_s7  ;;  %2063 = vrot.lane.b32.xlu0 %v1770_v52, %s8843_s16  ;;  %v2221_v1 = vld [vmem:[%s8883_s21 + $0x20] sm:$0xff] }
 0x17a   : > { %7964 = vmatpush3.bf16.msra.mxu1 %v7961_v18  ;;  %v7965_v52 = vpack.c.bf16 %v2222_v11, %v2221_v1  ;;  %v9493_v18 = vpop.permute.xlu0 %1759  ;;  %v2223_v1 = vld [vmem:[%s8883_s21 + $0x30] sm:$0xff]  ;;  %v2224_v11 = vld [vmem:[%s8883_s21 + $0x38] sm:$0xff] }
 0x17b   : > { %12130 = vst [vmem:[#allocation92_spill] sm:$0xff] %v9493_v18  ;;  %v7969_v3 = vpack.c.bf16 %v2224_v11, %v2223_v1  ;;  %v1479_v11 = vrot.slane %v9484_v47, 1 }
 0x17c   : > { %7966 = vmatprep.subr.bf16.mxu1 %v7965_v52 }
 0x17d   : > { %2001 = vrot.lane.b32.xlu1 %v1657_v9, %s8837_s1  ;;  %1971 = vrot.lane.b32.xlu0 %v1601_v57, %s12009_s10  ;;  %v1480_v9 = vrot.slane %v9396_v14, 1  ;;  %v9491_v57 = vpop.permute.xlu1 %1764 }
 0x17e   : > { %7968 = vmatpush3.bf16.msra.mxu1 %v7965_v52  ;;  %12129 = vst [vmem:[#allocation91_spill] sm:$0xff] %v9491_v57 }
 0x17f   : > { %v9505_v52 = vsel %vm1481_vm3, %v1480_v9, %v12131_v44  ;;  %7970 = vmatprep.subr.bf16.mxu1 %v7969_v3  ;;  %v12132_v44 = vrot.slane %v9230_v61, 7 }
 0x180   : > { %v1539_v1 = vmul.f32 %v9147_v12, %v9505_v52 }
 0x181   : > { %1937 = vrot.lane.b32.xlu1 %v1543_v46, %s12006_s11  ;;  %2033 = vrot.lane.b32.xlu0 %v1714_v50, %s8842_s15  ;;  %v1348_v50 = vrot.slane %v9396_v14, 7  ;;  %v2225_v46 = vld [vmem:[%s8883_s21 + $0x40] sm:$0xff] }
 0x182   : > { %7972 = vmatpush3.bf16.msra.mxu1 %v7969_v3  ;;  %v1884_v3 = vmul.f32 %v9314_v62, %v9433_v16  ;;  %v1771_v16 = vmul.f32 %v9357_v17, %v9463_v38 }
 0x183   : > { %7528 = vmatprep.subr.mxu1 %v2225_v46  ;;  %v9520_v22 = vsel %vm1351_vm2, %v1348_v50, %v12132_v44  ;;  %v12135_v44 = vrot.slane %v9365_v10, 1 }
 0x184   : > { %v1596_v4 = vmul.f32 %v9161_v21, %v9520_v22 }
 0x185   : > { %1969 = vrot.lane.b32.xlu1 %v1600_v59, %s12009_s10  ;;  %1911 = vrot.lane.b32.xlu0 %v1472_v51, %s8838_s2  ;;  %v9522_v59 = vpop.permute.xlu1 %1821  ;;  %v9524_v51 = vpop.permute.xlu0 %1816  ;;  %v1483_v53 = vsel %vm1481_vm3, %v12135_v44, %v1479_v11  ;;  %v12138_v44 = vrot.slane %v9365_v10, 7 }
 0x186   : > { %12133 = vst [vmem:[#allocation93_spill] sm:$0xff] %v9522_v59  ;;  %12134 = vst [vmem:[#allocation94_spill] sm:$0xff] %v9524_v51  ;;  %7529 = vmatpush3.msra.mxu1 %v2225_v46  ;;  %v1347_v46 = vrot.slane %v9484_v47, 7 }
 0x188   : > { %v9555_v62 = vsel %vm1351_vm2, %v12138_v44, %v1347_v46 }
 0x189   : > { %2125 = vrot.lane.b32.xlu1 %v1883_v6, %s8844_s18  ;;  %1929 = vrot.lane.b32.xlu0 %v1539_v1, %s12006_s11  ;;  %v9538_v12 = vpop.permute.xlu1 %1878  ;;  %v9540_v6 = vpop.permute.xlu0 %1873  ;;  %v1715_v1 = vmul.f32 %v9359_v60, %v1483_v53 }
 0x18a   : > { %12136 = vst [vmem:[#allocation95_spill] sm:$0xff] %v9538_v12  ;;  %12137 = vst [vmem:[#allocation96_spill] sm:$0xff] %v9540_v6 }
 0x18d   : > { %2127 = vrot.lane.b32.xlu1 %v1884_v3, %s8844_s18  ;;  %1961 = vrot.lane.b32.xlu0 %v1596_v4, %s12009_s10  ;;  %v1482_v3 = vsel %vm1481_vm3, %v1479_v11, %v1480_v9  ;;  %v1545_v4 = vmul.f32 %v9335_v0, %v1483_v53  ;;  %v9558_v21 = vpop.permute.xlu1 %1375  ;;  %v9560_v60 = vpop.permute.xlu0 %1370  ;;  %v1602_v9 = vmul.f32 %v9372_v41, %v9555_v62 }
 0x18e   : > { %v1546_v17 = vmul.f32 %v9374_v35, %v1482_v3  ;;  %12139 = vst [vmem:[#allocation97_spill] sm:$0xff] %v9558_v21  ;;  %12140 = vst [vmem:[#allocation98_spill] sm:$0xff] %v9560_v60  ;;  %v1772_v11 = vmul.f32 %v9391_v58, %v9555_v62  ;;  %v1716_v10 = vmul.f32 %v9451_v7, %v1482_v3 }
 0x18f   : > { %v1409_v30 = vmul.f32 %v9558_v21, %v9520_v22 }
 0x191   : > { %2065 = vrot.lane.b32.xlu1 %v1771_v16, %s8843_s16  ;;  %2035 = vrot.lane.b32.xlu0 %v1715_v1, %s8842_s15  ;;  %v9570_v16 = vsel %vm1351_vm2, %v1347_v46, %v1348_v50  ;;  %v9574_v1 = vpop.permute.xlu1 %1385  ;;  %v9576_v44 = vpop.permute.xlu0 %1380  ;;  %v1885_v50 = vmul.f32 %v9423_v13, %v1483_v53  ;;  %v1829_v46 = vmul.f32 %v9425_v54, %v9484_v47 }
 0x192   : > { %12141 = vst [vmem:[#allocation99_spill] sm:$0xff] %v9574_v1  ;;  %12142 = vst [vmem:[#allocation100_spill] sm:$0xff] %v9576_v44  ;;  %v1717_v53 = vmul.f32 %v9473_v20, %v9505_v52  ;;  %v1410_v24 = vmul.f32 %v9576_v44, %v9254_v8  ;;  %v1411_v8 = vmul.f32 %v9574_v1, %v9331_v23 }
 0x195   : > { %1941 = vrot.lane.b32.xlu1 %v1545_v4, %s12006_s11  ;;  %1943 = vrot.lane.b32.xlu0 %v1546_v17, %s12006_s11  ;;  %v1659_v17 = vmul.f32 %v9403_v15, %v9484_v47  ;;  %v1603_v4 = vmul.f32 %v9405_v43, %v9570_v16  ;;  %s8848_s11 = smov 80  }
 0x199   : > { %1973 = vrot.lane.b32.xlu1 %v1602_v9, %s12009_s10  ;;  %2067 = vrot.lane.b32.xlu0 %v1772_v11, %s8843_s16  ;;  %v9587_v9 = vpop.permute.xlu1 %1395  ;;  %v9589_v11 = vpop.permute.xlu0 %1390 }
 0x19a   : > { %12143 = vst [vmem:[#allocation101_spill] sm:$0xff] %v9587_v9  ;;  %12144 = vst [vmem:[#allocation102_spill] sm:$0xff] %v9589_v11 }
 0x19d   : > { %2005 = vrot.lane.b32.xlu1 %v1659_v17, %s8837_s1  ;;  %1975 = vrot.lane.b32.xlu0 %v1603_v4, %s12009_s10  ;;  %v1660_v17 = vmul.f32 %v9453_v49, %v9396_v14  ;;  %v9600_v4 = vpop.permute.xlu1 %1400  ;;  %v9602_v47 = vpop.permute.xlu0 %1405 }
 0x19e   : > { %12145 = vst [vmem:[#allocation103_spill] sm:$0xff] %v9600_v4  ;;  %12146 = vst [vmem:[#allocation104_spill] sm:$0xff] %v9602_v47 }
 0x1a1   : > { %2129 = vrot.lane.b32.xlu1 %v1885_v50, %s8844_s18  ;;  %2099 = vrot.lane.b32.xlu0 %v1829_v46, %s8839_s7  ;;  %v1886_v50 = vmul.f32 %v9475_v19, %v1482_v3  ;;  %v1774_v46 = vmul.f32 %v9491_v57, %v9520_v22  ;;  %v1831_v3 = vmul.f32 %v9522_v59, %v9230_v61 }
 0x1a5   : > { %2037 = vrot.lane.b32.xlu1 %v1716_v10, %s8842_s15  ;;  %2007 = vrot.lane.b32.xlu0 %v1660_v17, %s8837_s1  ;;  %v1773_v17 = vmul.f32 %v9493_v18, %v9570_v16  ;;  %v1888_v18 = vmul.f32 %v9538_v12, %v9293_v63 }
 0x1a9   : > { %2039 = vrot.lane.b32.xlu1 %v1717_v53, %s8842_s15  ;;  %2131 = vrot.lane.b32.xlu0 %v1886_v50, %s8844_s18  ;;  %v1830_v53 = vmul.f32 %v9524_v51, %v9396_v14 }
 0x1ab   : > { %v9609_v13 = vpop.permute.xlu0 %1995  ;;  %v1902_v10 = vpop.permute.xlu1 %1901 }
 0x1ac   : > { %v2148_v55 = vsel %vm2145_vm5, %v1410_v24, %v1902_v10 }
 0x1ad   : > { %2071 = vrot.lane.b32.xlu1 %v1774_v46, %s8843_s16  ;;  %2069 = vrot.lane.b32.xlu0 %v1773_v17, %s8843_s16  ;;  %v1887_v46 = vmul.f32 %v9540_v6, %v9505_v52 }
 0x1af   : > { %v9617_v19 = vpop.permute.xlu1 %2089  ;;  %v1964_v50 = vpop.permute.xlu0 %1963 }
 0x1b1   : > { %2103 = vrot.lane.b32.xlu1 %v1831_v3, %s8839_s7  ;;  %2101 = vrot.lane.b32.xlu0 %v1830_v53, %s8839_s7 }
 0x1b3   : > { %v1900_v58 = vpop.permute.xlu1 %1899  ;;  %v9627_v17 = vpop.permute.xlu0 %1905 }
 0x1b4   : > { %v2147_v40 = vsel %vm2145_vm5, %v1409_v30, %v1900_v58  ;;  %v1408_v30 = vmul.f32 %v9560_v60, %v9570_v16 }
 0x1b5   : > { %2135 = vrot.lane.b32.xlu1 %v1888_v18, %s8844_s18  ;;  %2133 = vrot.lane.b32.xlu0 %v1887_v46, %s8844_s18 }
 0x1b7   : > { %v9631_v61 = vpop.permute.xlu1 %1993  ;;  %v1904_v14 = vpop.permute.xlu0 %1903 }
 0x1bb   : > { %v1932_v51 = vpop.permute.xlu1 %1931  ;;  %v9633_v3 = vpop.permute.xlu0 %2091 }
 0x1bc   : > { %v2156_v56 = vsel %vm2154_vm4, %v2147_v40, %v1932_v51 }
 0x1bd   : > { %v2165_v25 = vsel %vm2163_vm6, %v2156_v56, %v1964_v50  ;;  %v2149_v56 = vsel %vm2145_vm5, %v1411_v8, %v1904_v14 }
 0x1be   : > { %v2174_v40 = vsel %vm2172_vm7, %v2165_v25, %v9609_v13 }
 0x1bf   : > { %v9635_v53 = vpop.permute.xlu1 %2025  ;;  %v2028_v59 = vpop.permute.xlu0 %2027 }
 0x1c0   : > { %v2183_v23 = vsel %vm2181_vm8, %v2174_v40, %v2028_v59  ;;  %v1413_v40 = vmul.f32 %v9587_v9, %v9446_v45 }
 0x1c3   : > { %v9637_v63 = vpop.permute.xlu1 %2057  ;;  %v1936_v12 = vpop.permute.xlu0 %1935 }
 0x1c7   : > { %v9639_v57 = vpop.permute.xlu1 %1999  ;;  %v2060_v52 = vpop.permute.xlu0 %2059 }
 0x1cb   : > { %v9641_v6 = vpop.permute.xlu1 %2093  ;;  %v1968_v18 = vpop.permute.xlu0 %1967 }
 0x1cf   : > { %v1998_v54 = vpop.permute.xlu1 %1997  ;;  %v2030_v46 = vpop.permute.xlu0 %2029 }
 0x1d3   : > { %v1934_v20 = vpop.permute.xlu1 %1933  ;;  %v9643_v7 = vpop.permute.xlu0 %1909 }
 0x1d4   : > { %v2157_v22 = vsel %vm2154_vm4, %v2148_v55, %v1934_v20 }
 0x1d7   : > { %v1966_v35 = vpop.permute.xlu1 %1965  ;;  %v9645_v0 = vpop.permute.xlu0 %1907 }
 0x1d8   : > { %v2166_v58 = vsel %vm2163_vm6, %v2157_v22, %v1966_v35  ;;  %v2158_v35 = vsel %vm2154_vm4, %v2149_v56, %v1936_v12 }
 0x1d9   : > { %v2175_v55 = vsel %vm2172_vm7, %v2166_v58, %v1998_v54  ;;  %v2167_v13 = vsel %vm2163_vm6, %v2158_v35, %v1968_v18 }
 0x1da   : > { %v2184_v14 = vsel %vm2181_vm8, %v2175_v55, %v2030_v46 }
 0x1db   : > { %v2122_v43 = vpop.permute.xlu1 %2121  ;;  %v9647_v41 = vpop.permute.xlu0 %2095 }
 0x1df   : > { %v2124_v15 = vpop.permute.xlu1 %2123  ;;  %v1898_v49 = vpop.permute.xlu0 %1897 }
 0x1e0   : > { %v2146_v24 = vsel %vm2145_vm5, %v1408_v30, %v1898_v49  ;;  %v2192_v49 = vsel %vm2190_vm9, %v2183_v23, %v2060_v52  ;;  %v2176_v52 = vsel %vm2172_vm7, %v2167_v13, %v9639_v57 }
 0x1e3   : > { %v2062_v48 = vpop.permute.xlu1 %2061  ;;  %v2032_v5 = vpop.permute.xlu0 %2031 }
 0x1e4   : > { %v2193_v12 = vsel %vm2190_vm9, %v2184_v14, %v2062_v48  ;;  %v2185_v46 = vsel %vm2181_vm8, %v2176_v52, %v2032_v5 }
 0x1e5   : > { %v2202_v57 = vsel %vm2199_vm10, %v2193_v12, %v9641_v6 }
 0x1e7   : > { %v9649_v42 = vpop.permute.xlu1 %2003  ;;  %v9651_v33 = vpop.permute.xlu0 %1939 }
 0x1eb   : > { %v9653_v28 = vpop.permute.xlu1 %2097  ;;  %v2064_v31 = vpop.permute.xlu0 %2063 }
 0x1ef   : > { %v9655_v26 = vpop.permute.xlu1 %2001  ;;  %v9657_v37 = vpop.permute.xlu0 %1971 }
 0x1f3   : > { %v1938_v32 = vpop.permute.xlu1 %1937  ;;  %v9659_v39 = vpop.permute.xlu0 %2033 }
 0x1f7   : > { %v1970_v29 = vpop.permute.xlu1 %1969  ;;  %v9664_v36 = vpop.permute.xlu0 %1911 }
 0x1fb   : > { %v2126_v27 = vpop.permute.xlu1 %2125  ;;  %v1930_v21 = vpop.permute.xlu0 %1929 }
 0x1fc   : > { %v2155_v20 = vsel %vm2154_vm4, %v2146_v24, %v1930_v21 }
 0x1ff   : > { %v2128_v51 = vpop.permute.xlu1 %2127  ;;  %v1962_v16 = vpop.permute.xlu0 %1961 }
 0x200   : > { %v2164_v10 = vsel %vm2163_vm6, %v2155_v20, %v1962_v16 }
 0x201   : > { %v2173_v25 = vsel %vm2172_vm7, %v2164_v10, %v9631_v61  ;;  %v1412_v61 = vmul.f32 %v9589_v11, %v9348_v2  ;;  %v2194_v2 = vsel %vm2190_vm9, %v2185_v46, %v2064_v31 }
 0x202   : > { %v2182_v21 = vsel %vm2181_vm8, %v2173_v25, %v9635_v53  ;;  %v2201_v53 = vsel %vm2199_vm10, %v2192_v49, %v9633_v3  ;;  %v2211_v3 = vsel %vm2208_vm11, %v2202_v57, %v2126_v27  ;;  %v2203_v31 = vsel %vm2199_vm10, %v2194_v2, %v9647_v41  ;;  %v2830_v57 = vld [vmem:[%s8893_s29 + $0x100] sm:$0xff] }
 0x203   : > { %v2066_v54 = vpop.permute.xlu1 %2065  ;;  %v2036_v50 = vpop.permute.xlu0 %2035  ;;  %v2191_v59 = vsel %vm2190_vm9, %v2182_v21, %v9637_v63  ;;  %v2150_v63 = vsel %vm2145_vm5, %v1412_v61, %v9627_v17  ;;  %v2210_v22 = vsel %vm2208_vm11, %v2201_v53, %v2124_v15  ;;  %v2212_v15 = vsel %vm2208_vm11, %v2203_v31, %v2128_v51 }
 0x204   : > { %v2200_v18 = vsel %vm2199_vm10, %v2191_v59, %v9617_v19  ;;  %v2159_v30 = vsel %vm2154_vm4, %v2150_v63, %v1938_v32  ;;  %v1414_v25 = vmul.f32 %v9600_v4, %v9463_v38 }
 0x205   : > { %v2209_v48 = vsel %vm2208_vm11, %v2200_v18, %v2122_v43  ;;  %v2168_v5 = vsel %vm2163_vm6, %v2159_v30, %v1970_v29 }
 0x206   : > { %7530 = vmatprep.mubr.msk.f32.mxu1 %vm2233_vm12, %v2209_v48  ;;  %v2177_v17 = vsel %vm2172_vm7, %v2168_v5, %v9655_v26  ;;  %v2151_v26 = vsel %vm2145_vm5, %v1413_v40, %v9645_v0  ;;  %v2152_v14 = vsel %vm2145_vm5, %v1414_v25, %v9643_v7  ;;  %v2833_v5 = vld [vmem:[%s8893_s29 + $0x118] sm:$0xff] }
 0x207   : > { %v1942_v19 = vpop.permute.xlu1 %1941  ;;  %7531 = vmatmul.mubr.msk.f32.vlgmr.msra.gmra.mrb[0].mxu1 %vm2233_vm12, %v2210_v22  ;;  %v1944_v43 = vpop.permute.xlu0 %1943  ;;  %v2186_v27 = vsel %vm2181_vm8, %v2177_v17, %v9659_v39  ;;  %v2160_v39 = vsel %vm2154_vm4, %v2151_v26, %v9651_v33 }
 0x208   : > { %7533 = vmatprep.mubr.msk.f32.mxu1 %vm2233_vm12, %v2211_v3  ;;  %v2195_v29 = vsel %vm2190_vm9, %v2186_v27, %v2066_v54  ;;  %v2169_v55 = vsel %vm2163_vm6, %v2160_v39, %v9657_v37  ;;  %v1415_v37 = vmul.f32 %v9602_v47, %v9555_v62  ;;  %v2161_v54 = vsel %vm2154_vm4, %v2152_v14, %v1942_v19  ;;  %v2831_v19 = vld [vmem:[%s8893_s29 + $0x108] sm:$0xff]  ;;  %v9773_v3 = vld [vmem:[%s8888_s25] ss:$0 sm:$0xff] }
 0x209   : > { %v2204_v24 = vsel %vm2199_vm10, %v2195_v29, %v9653_v28  ;;  %v2178_v16 = vsel %vm2172_vm7, %v2169_v55, %v9649_v42  ;;  %v8005_v30 = vpack.c.bf16 %v2831_v19, %v2830_v57  ;;  %v2834_v27 = vld [vmem:[%s8893_s29 + $0x120] sm:$0xff] }
 0x20a   : > { %v2187_v28 = vsel %vm2181_vm8, %v2178_v16, %v2036_v50  ;;  %v2153_v49 = vsel %vm2145_vm5, %v1415_v37, %v9664_v36  ;;  %v12147_v16 = vld [vmem:[#allocation31_spill] sm:$0xff] }
 0x20b   : > { %v1974_v6 = vpop.permute.xlu1 %1973  ;;  %v2068_v58 = vpop.permute.xlu0 %2067  ;;  %7534 = vmatmul.mubr.msk.f32.gmra.mrb[2].mxu1 %vm2233_vm12, %v2212_v15  ;;  %v2162_v21 = vsel %vm2154_vm4, %v2153_v49, %v1944_v43  ;;  %8006 = vmatprep.subr.bf16.mxu1 %v8005_v30  ;;  %v2832_v43 = vld [vmem:[%s8893_s29 + $0x110] sm:$0xff]  ;;  %v12150_v49 = vld [vmem:[#allocation57_spill] sm:$0xff] }
 0x20c   : > { %v2196_v0 = vsel %vm2190_vm9, %v2187_v28, %v2068_v58  ;;  %v2170_v62 = vsel %vm2163_vm6, %v2161_v54, %v1974_v6  ;;  %8008 = vmatpush3.bf16.msra.mxu1 %v8005_v30  ;;  %v8009_v31 = vpack.c.bf16 %v2833_v5, %v2832_v43  ;;  %v12157_v30 = vld [vmem:[#allocation38_spill] sm:$0xff]  ;;  %v12158_v5 = vld [vmem:[#allocation43_spill] sm:$0xff] }
 0x20e   : > { %8010 = vmatprep.subr.bf16.mxu1 %v8009_v31 }
 0x20f   : > { %v2006_v32 = vpop.permute.xlu1 %2005  ;;  %v1976_v8 = vpop.permute.xlu0 %1975 }
 0x210   : > { %v2171_v12 = vsel %vm2163_vm6, %v2162_v21, %v1976_v8  ;;  %v2179_v61 = vsel %vm2172_vm7, %v2170_v62, %v2006_v32  ;;  %8012 = vmatpush3.bf16.msra.mxu1 %v8009_v31  ;;  %v2835_v32 = vld [vmem:[%s8893_s29 + $0x128] sm:$0xff] }
 0x211   : > { %v8013_v8 = vpack.c.bf16 %v2835_v32, %v2834_v27  ;;  %v2836_v32 = vld [vmem:[%s8893_s29 + $0x130] sm:$0xff] }
 0x213   : > { %v2130_v41 = vpop.permute.xlu1 %2129  ;;  %v2100_v56 = vpop.permute.xlu0 %2099  ;;  %8014 = vmatprep.subr.bf16.mxu1 %v8013_v8 }
 0x214   : > { %v2213_v51 = vsel %vm2208_vm11, %v2204_v24, %v2130_v41  ;;  %v2205_v10 = vsel %vm2199_vm10, %v2196_v0, %v2100_v56  ;;  %8016 = vmatpush3.bf16.msra.mxu1 %v8013_v8  ;;  %v12161_v8 = vld [vmem:[#allocation34_spill] sm:$0xff] }
 0x215   : > { %7536 = vmatprep.mubr.msk.f32.mxu1 %vm2233_vm12, %v2213_v51 }
 0x217   : > { %v2038_v20 = vpop.permute.xlu1 %2037  ;;  %v2008_v45 = vpop.permute.xlu0 %2007 }
 0x218   : > { %v2180_v59 = vsel %vm2172_vm7, %v2171_v12, %v2008_v45  ;;  %v2188_v7 = vsel %vm2181_vm8, %v2179_v61, %v2038_v20  ;;  %v12153_v61 = vld [vmem:[#allocation46_spill] sm:$0xff] }
 0x21b   : > { %v2040_v35 = vpop.permute.xlu1 %2039  ;;  %v2132_v23 = vpop.permute.xlu0 %2131 }
 0x21c   : > { %v2214_v33 = vsel %vm2208_vm11, %v2205_v10, %v2132_v23  ;;  %v2189_v36 = vsel %vm2181_vm8, %v2180_v59, %v2040_v35  ;;  %v12148_v35 = vld [vmem:[#allocation33_spill] sm:$0xff]  ;;  %v12152_v59 = vld [vmem:[#allocation42_spill] sm:$0xff] }
 0x21d   : > { %7537 = vmatmul.mubr.msk.f32.gmra.mrb[4].mxu1 %vm2233_vm12, %v2214_v33 }
 0x21f   : > { %v2072_v13 = vpop.permute.xlu1 %2071  ;;  %v2070_v42 = vpop.permute.xlu0 %2069 }
 0x220   : > { %v2198_v52 = vsel %vm2190_vm9, %v2189_v36, %v2072_v13  ;;  %v2197_v18 = vsel %vm2190_vm9, %v2188_v7, %v2070_v42  ;;  %v12154_v7 = vld [vmem:[#allocation35_spill] sm:$0xff] }
 0x223   : > { %v2104_v50 = vpop.permute.xlu1 %2103  ;;  %v2102_v38 = vpop.permute.xlu0 %2101 }
 0x224   : > { %v2207_v53 = vsel %vm2199_vm10, %v2198_v52, %v2104_v50  ;;  %v2206_v48 = vsel %vm2199_vm10, %v2197_v18, %v2102_v38  ;;  %v12151_v50 = vld [vmem:[#allocation30_spill] sm:$0xff]  ;;  %v12155_v18 = vld [vmem:[#allocation36_spill] sm:$0xff] }
 0x227   : > { %v2136_v46 = vpop.permute.xlu1 %2135  ;;  %v2134_v22 = vpop.permute.xlu0 %2133 }
 0x228   : > { %v2216_v63 = vsel %vm2208_vm11, %v2207_v53, %v2136_v46  ;;  %v2215_v2 = vsel %vm2208_vm11, %v2206_v48, %v2134_v22  ;;  %v12156_v22 = vld [vmem:[#allocation45_spill] sm:$0xff] }
 0x229   : > { %7539 = vmatprep.mubr.msk.f32.mxu1 %vm2233_vm12, %v2215_v2 }
 0x22a   : > { %7540 = vmatmul.mubr.msk.f32.gmra.mrb[6].mxu1 %vm2233_vm12, %v2216_v63 }
 0x2da   : > { %v7532_v15 = vpop.f32.mrb[0].mxu1 }
 0x2db   : > { %v2330_v6 = vadd.f32 %v7532_v15, %v9773_v3  ;;  %v2324_v17 = vpop.f32.mrb[1].mxu1  ;;  %v12159_v15 = vld [vmem:[#allocation32_spill] sm:$0xff] }
 0x2dc   : > { %v2325_v58 = vadd.f32 %v9773_v3, %v2324_v17  ;;  %v12160_v17 = vld [vmem:[#allocation37_spill] sm:$0xff] }
 0x2dd   : > { %v2364_v29 = vmax.f32 %v2330_v6, 0.0 }
 0x2de   : > { %v9781_v40 = vmax.f32 %v2325_v58, 0.0  ;;  %v7535_v41 = vpop.f32.mrb[2].mxu1 }
 0x2df   : > { %v2372_v24 = vrot.slane %v2364_v29, 7  ;;  %v2404_v26 = vrot.slane %v2364_v29, 1  ;;  %v2340_v51 = vadd.f32 %v7535_v41, %v9773_v3  ;;  %v2334_v56 = vpop.f32.mrb[3].mxu1  ;;  %v2459_v39 = vmul.f32 %v2364_v29, %v9185_v34 }
 0x2e0   : > { %v12004_v55 = vrot.slane %v9781_v40, 7  ;;  %v12003_v20 = vrot.slane %v9781_v40, 1  ;;  %v2335_v45 = vadd.f32 %v9773_v3, %v2334_v56  ;;  %v2435_v28 = vmul.f32 %v9781_v40, %v12147_v16 }
 0x2e1   : > { %v9790_v0 = vmax.f32 %v2340_v51, 0.0  ;;  %2675 = vrot.lane.b32.xlu1 %v2459_v39, %s12009_s10  ;;  %v2436_v10 = vmul.f32 %v2364_v29, %v12148_v35  ;;  %v2397_v62 = vmul.f32 %v2364_v29, %v12151_v50  ;;  %v2837_v29 = vld [vmem:[%s8893_s29 + $0x138] sm:$0xff] }
 0x2e2   : > { %v2365_v23 = vmax.f32 %v2335_v45, 0.0  ;;  %v9798_v37 = vsel %vm1351_vm2, %v12004_v55, %v2372_v24  ;;  %v9804_v13 = vsel %vm1481_vm3, %v12003_v20, %v2404_v26  ;;  %v12162_v39 = vld [vmem:[#allocation39_spill] sm:$0xff]  ;;  %v12170_v20 = vld [vmem:[#allocation52_spill] sm:$0xff] }
 0x2e3   : > { %v2374_v25 = vrot.slane %v9790_v0, 7  ;;  %v8351_v42 = vpack.i.bf16 %v2436_v10, %v2435_v28  ;;  %v2461_v14 = vmul.f32 %v9790_v0, %v12150_v49  ;;  %v12005_v21 = vrot.slane %v9790_v0, 1  ;;  %v12163_v28 = vld [vmem:[#allocation41_spill] sm:$0xff] }
 0x2e4   : > { %v2373_v54 = vrot.slane %v2365_v23, 7  ;;  %v2405_v12 = vrot.slane %v2365_v23, 1  ;;  %v2437_v38 = vmul.f32 %v2365_v23, %v12152_v59  ;;  %v2438_v36 = vmul.f32 %v9790_v0, %v12153_v61  ;;  %v12203_v59 = vld [vmem:[#allocation77_spill] sm:$0xff] }
 0x2e5   : > { %8352 = vrot.lane.b32.xlu1 %v8351_v42, %s8837_s1  ;;  %2679 = vrot.lane.b32.xlu0 %v2461_v14, %s12009_s10  ;;  %v2398_v52 = vmul.f32 %v2365_v23, %v12154_v7  ;;  %v2451_v53 = vmul.f32 %v9798_v37, %v12155_v18  ;;  %v2460_v2 = vmul.f32 %v2365_v23, %v12156_v22  ;;  %v12181_v18 = vld [vmem:[#allocation79_spill] sm:$0xff]  ;;  %v2807_v22 = vld [vmem:[%s8893_s29 + $0x48] sm:$0xff]  ;;  %v12206_v7 = vld [vmem:[#allocation88_spill] sm:$0xff] }
 0x2e6   : > { %v9821_v46 = vsel %vm1351_vm2, %v2372_v24, %v2373_v54  ;;  %v9827_v48 = vsel %vm1351_vm2, %v2373_v54, %v2374_v25  ;;  %v9831_v63 = vsel %vm1481_vm3, %v2404_v26, %v2405_v12  ;;  %v8356_v57 = vpack.i.bf16 %v2438_v36, %v2437_v38  ;;  %v2838_v24 = vld [vmem:[%s8893_s29 + $0x140] sm:$0xff]  ;;  %v2839_v26 = vld [vmem:[%s8893_s29 + $0x148] sm:$0xff]  ;;  %v2840_v54 = vld [vmem:[%s8893_s29 + $0x150] sm:$0xff] }
 0x2e7   : > { %v8361_v19 = vpack.i.bf16 %v2398_v52, %v2397_v62  ;;  %v2429_v43 = vmul.f32 %v9821_v46, %v12157_v30  ;;  %v2430_v31 = vmul.f32 %v9827_v48, %v12158_v5  ;;  %v2443_v6 = vmul.f32 %v9804_v13, %v12159_v15  ;;  %v2814_v36 = vld [vmem:[%s8893_s29 + $0x80] sm:$0xff]  ;;  %v2815_v52 = vld [vmem:[%s8893_s29 + $0x88] sm:$0xff] }
 0x2e8   : > { %v2444_v58 = vmul.f32 %v9831_v63, %v12160_v17  ;;  %v9846_v27 = vsel %vm1481_vm3, %v2405_v12, %v12005_v21  ;;  %v9854_v41 = vmul.f32 %v9831_v63, %v12161_v8  ;;  %v2452_v10 = vmul.f32 %v9821_v46, %v12163_v28  ;;  %v2841_v12 = vld [vmem:[%s8893_s29 + $0x158] sm:$0xff]  ;;  %v12189_v15 = vld [vmem:[#allocation72_spill] sm:$0xff] }
 0x2e9   : > { %2643 = vrot.lane.b32.xlu1 %v2451_v53, %s8845_s0  ;;  %2677 = vrot.lane.b32.xlu0 %v2460_v2, %s12009_s10  ;;  %v8371_v51 = vpack.i.bf16 %v2430_v31, %v2429_v43  ;;  %v9860_v45 = vmul.f32 %v9846_v27, %v12162_v39  ;;  %v8017_v42 = vpack.c.bf16 %v2837_v29, %v2836_v32  ;;  %v2798_v53 = vld [vmem:[%s8893_s29] sm:$0xff]  ;;  %v2799_v31 = vld [vmem:[%s8893_s29 + $0x8] sm:$0xff]  ;;  %v12171_v39 = vrot.slane %v9790_v0, 1 }
 0x2ea   : > { %v8366_v56 = vpack.i.bf16 %v2444_v58, %v2443_v6  ;;  %v8021_v14 = vpack.c.bf16 %v2839_v26, %v2838_v24  ;;  %v8025_v38 = vpack.c.bf16 %v2841_v12, %v2840_v54  ;;  %v7975_v58 = vpack.c.bf16 %v2799_v31, %v2798_v53  ;;  %v12164_v29 = vld [vmem:[#allocation48_spill] sm:$0xff]  ;;  %v12165_v12 = vld [vmem:[#allocation67_spill] sm:$0xff] }
 0x2eb   : > { %8018 = vmatprep.subr.bf16.mxu1 %v8017_v42  ;;  %v2468_v24 = vmul.f32 %v9846_v27, %v12164_v29  ;;  %v2801_v53 = vld [vmem:[%s8893_s29 + $0x18] sm:$0xff]  ;;  %v2453_v55 = vmul.f32 %v9827_v48, %v12170_v20  ;;  %v2802_v20 = vld [vmem:[%s8893_s29 + $0x20] sm:$0xff] }
 0x2ec   : > { %8020 = vmatpush3.bf16.msra.mxu1 %v8017_v42  ;;  %v12200_v29 = vld [vmem:[#allocation76_spill] sm:$0xff] }
 0x2ed   : > { %8357 = vrot.lane.b32.xlu1 %v8356_v57, %s8837_s1  ;;  %2645 = vrot.lane.b32.xlu0 %v2452_v10, %s8845_s0  ;;  %v7973_v57 = vpack.c.bf16 %v2815_v52, %v2814_v36  ;;  %v2800_v10 = vld [vmem:[%s8893_s29 + $0x10] sm:$0xff]  ;;  %v2842_v52 = vld [vmem:[%s8893_s29 + $0x160] sm:$0xff] }
 0x2ee   : > { %8022 = vmatprep.subr.bf16.mxu1 %v8021_v14  ;;  %v7979_v54 = vpack.c.bf16 %v2801_v53, %v2800_v10  ;;  %v12175_v10 = vld [vmem:[#allocation54_spill] sm:$0xff] }
 0x2ef   : > { %7974 = vmatprep.subr.bf16.mxu0 %v7973_v57  ;;  %v12167_v57 = vld [vmem:[#allocation61_spill] sm:$0xff] }
 0x2f0   : > { %v7538_v62 = vpop.f32.mrb[4].mxu1  ;;  %8024 = vmatpush3.bf16.msra.mxu1 %v8021_v14  ;;  %7976 = vmatpush3.bf16.msra.mxu0 %v7975_v58  ;;  %v12169_v58 = vld [vmem:[#allocation44_spill] sm:$0xff] }
 0x2f1   : > { %v2350_v2 = vadd.f32 %v7538_v62, %v9773_v3  ;;  %v2344_v43 = vpop.f32.mrb[5].mxu1  ;;  %8362 = vrot.lane.b32.xlu1 %v8361_v19, %s8842_s15  ;;  %8372 = vrot.lane.b32.xlu0 %v8371_v51, %s8846_s26  ;;  %v2816_v19 = vld [vmem:[%s8893_s29 + $0x90] sm:$0xff]  ;;  %v2817_v51 = vld [vmem:[%s8893_s29 + $0x98] sm:$0xff] }
 0x2f2   : > { %v2345_v6 = vadd.f32 %v9773_v3, %v2344_v43  ;;  %8026 = vmatprep.subr.bf16.mxu1 %v8025_v38  ;;  %v12166_v62 = vld [vmem:[#allocation47_spill] sm:$0xff]  ;;  %v7977_v23 = vpack.c.bf16 %v2817_v51, %v2816_v19 }
 0x2f3   : > { %v9878_v32 = vmax.f32 %v2350_v2, 0.0  ;;  %v2399_v36 = vmul.f32 %v9790_v0, %v12166_v62 }
 0x2f4   : > { %v9882_v26 = vmax.f32 %v2345_v6, 0.0  ;;  %v12168_v6 = vld [vmem:[#allocation51_spill] sm:$0xff]  ;;  %8028 = vmatpush3.bf16.msra.mxu1 %v8025_v38  ;;  %v12172_v38 = vld [vmem:[#allocation49_spill] sm:$0xff]  ;;  %7978 = vmatprep.subr.bf16.mxu0 %v7977_v23 }
 0x2f5   : > { %8367 = vrot.lane.b32.xlu1 %v8366_v56, %s8847_s28  ;;  %2709 = vrot.lane.b32.xlu0 %v2468_v24, %s8844_s18  ;;  %v2440_v14 = vmul.f32 %v9878_v32, %v12165_v12  ;;  %v2467_v24 = vmul.f32 %v9831_v63, %v12169_v58  ;;  %v9923_v19 = vmul.f32 %v9846_v27, %v12172_v38  ;;  %v12174_v0 = vrot.slane %v9878_v32, 7  ;;  %v2820_v38 = vld [vmem:[%s8893_s29 + $0xb0] sm:$0xff]  ;;  %v2821_v23 = vld [vmem:[%s8893_s29 + $0xb8] sm:$0xff] }
 0x2f6   : > { %v2375_v2 = vrot.slane %v9882_v26, 7  ;;  %v2407_v43 = vrot.slane %v9882_v26, 1  ;;  %v2439_v31 = vmul.f32 %v9882_v26, %v12167_v57  ;;  %v2400_v56 = vmul.f32 %v9882_v26, %v12168_v6  ;;  %7566 = vmatprep.subr.mxu1 %v2842_v52  ;;  %7980 = vmatpush3.bf16.msra.mxu0 %v7979_v54  ;;  %v12192_v6 = vld [vmem:[#allocation26_spill] sm:$0xff] }
 0x2f7   : > { %v12177_v27 = vrot.slane %v9878_v32, 1 }
 0x2f8   : > { %v8381_v42 = vpack.i.bf16 %v2440_v14, %v2439_v31  ;;  %v8386_v21 = vpack.i.bf16 %v2400_v56, %v2399_v36  ;;  %v9911_v5 = vsel %vm1351_vm2, %v2374_v25, %v2375_v2  ;;  %v9917_v63 = vsel %vm1481_vm3, %v12171_v39, %v2407_v43  ;;  %v12173_v25 = vld [vmem:[#allocation53_spill] sm:$0xff]  ;;  %7567 = vmatpush3.msra.mxu1 %v2842_v52  ;;  %v12188_v52 = vld [vmem:[#allocation82_spill] sm:$0xff] }
 0x2f9   : > { %2707 = vrot.lane.b32.xlu1 %v2467_v24, %s8844_s18  ;;  %2647 = vrot.lane.b32.xlu0 %v2453_v55, %s8845_s0  ;;  %v9927_v51 = vmul.f32 %v9917_v63, %v12173_v25  ;;  %v9933_v39 = vsel %vm1351_vm2, %v2375_v2, %v12174_v0  ;;  %v9937_v14 = vmul.f32 %v9911_v5, %v12175_v10  ;;  %v12176_v55 = vld [vmem:[#allocation62_spill] sm:$0xff]  ;;  %v12179_v24 = vld [vmem:[#allocation55_spill] sm:$0xff]  ;;  %v2819_v10 = vld [vmem:[%s8893_s29 + $0xa8] sm:$0xff] }
 0x2fa   : > { %v9941_v36 = vmul.f32 %v9933_v39, %v12176_v55  ;;  %v9947_v53 = vsel %vm1481_vm3, %v2407_v43, %v12177_v27  ;;  %v12178_v2 = vld [vmem:[#allocation50_spill] sm:$0xff]  ;;  %v2818_v55 = vld [vmem:[%s8893_s29 + $0xa0] sm:$0xff]  ;;  %v2803_v27 = vld [vmem:[%s8893_s29 + $0x28] sm:$0xff] }
 0x2fb   : > { %v9953_v56 = vmul.f32 %v9917_v63, %v12178_v2  ;;  %v9957_v0 = vmul.f32 %v9947_v53, %v12179_v24  ;;  %v7981_v43 = vpack.c.bf16 %v2819_v10, %v2818_v55  ;;  %v12180_v24 = vpack.i.bf16 %v9860_v45, %v9854_v41  ;;  %v2804_v55 = vld [vmem:[%s8893_s29 + $0x30] sm:$0xff]  ;;  %v2805_v2 = vld [vmem:[%s8893_s29 + $0x38] sm:$0xff] }
 0x2fc   : > { %v7983_v25 = vpack.c.bf16 %v2803_v27, %v2802_v20  ;;  %v7985_v10 = vpack.c.bf16 %v2821_v23, %v2820_v38  ;;  %v2463_v41 = vmul.f32 %v9878_v32, %v12181_v18  ;;  %v7987_v20 = vpack.c.bf16 %v2805_v2, %v2804_v55  ;;  %v12183_v38 = vld [vmem:[#allocation66_spill] sm:$0xff]  ;;  %v12185_v23 = vld [vmem:[#allocation68_spill] sm:$0xff]  ;;  %v12186_v2 = vld [vmem:[#allocation25_spill] sm:$0xff] }
 0x2fd   : > { %v7541_v31 = vpop.f32.mrb[6].mxu1  ;;  %8377 = vrot.lane.b32.xlu1 %v12180_v24, %s8848_s11  ;;  %8382 = vrot.lane.b32.xlu0 %v8381_v42, %s8837_s1  ;;  %v12182_v42 = vld [vmem:[#allocation27_spill] sm:$0xff] }
 0x2fe   : > { %v2360_v54 = vadd.f32 %v7541_v31, %v9773_v3  ;;  %v2354_v30 = vpop.f32.mrb[7].mxu1  ;;  %7982 = vmatprep.subr.bf16.mxu0 %v7981_v43  ;;  %v2396_v24 = vmul.f32 %v9781_v40, %v12182_v42  ;;  %v2462_v31 = vmul.f32 %v9882_v26, %v12183_v38  ;;  %v9996_v43 = vmul.f32 %v9878_v32, %v12185_v23  ;;  %v12187_v55 = vld [vmem:[#allocation87_spill] sm:$0xff] }
 0x2ff   : > { %v2355_v58 = vadd.f32 %v9773_v3, %v2354_v30  ;;  %7984 = vmatpush3.bf16.msra.mxu0 %v7983_v25  ;;  %v12184_v3 = vld [vmem:[#allocation28_spill] sm:$0xff] }
 0x300   : > { %v9980_v45 = vmax.f32 %v2360_v54, 0.0  ;;  %v9992_v30 = vmul.f32 %v9798_v37, %v12184_v3  ;;  %7986 = vmatprep.subr.bf16.mxu0 %v7985_v10  ;;  %v12191_v10 = vrot.slane %v9781_v40, 1 }
 0x301   : > { %v9984_v27 = vmax.f32 %v2355_v58, 0.0  ;;  %2683 = vrot.lane.b32.xlu1 %v2463_v41, %s12009_s10  ;;  %8387 = vrot.lane.b32.xlu0 %v8386_v21, %s8842_s15 }
 0x302   : > { %v2378_v25 = vrot.slane %v9980_v45, 7  ;;  %v2410_v58 = vrot.slane %v9980_v45, 1  ;;  %v2395_v54 = vmul.f32 %v9980_v45, %v12186_v2  ;;  %v10004_v21 = vmul.f32 %v9980_v45, %v12187_v55 }
 0x303   : > { %v2377_v26 = vrot.slane %v9984_v27, 7  ;;  %v2409_v41 = vrot.slane %v9984_v27, 1  ;;  %v10010_v17 = vmul.f32 %v9984_v27, %v12188_v52  ;;  %v10014_v8 = vmul.f32 %v9984_v27, %v12189_v15  ;;  %7988 = vmatpush3.bf16.msra.mxu0 %v7987_v20  ;;  %v12194_v15 = vld [vmem:[#allocation24_spill] sm:$0xff]  ;;  %v12195_v20 = vld [vmem:[#allocation58_spill] sm:$0xff] }
 0x304   : > { %v8391_v38 = vpack.i.bf16 %v2396_v24, %v2395_v54  ;;  %v12190_v2 = vrot.slane %v9781_v40, 7  ;;  %v10026_v57 = vsel %vm1481_vm3, %v2410_v58, %v12191_v10  ;;  %v10030_v52 = vmul.f32 %v9804_v13, %v12192_v6  ;;  %v12193_v24 = vld [vmem:[#allocation29_spill] sm:$0xff] }
 0x305   : > { %2681 = vrot.lane.b32.xlu1 %v2462_v31, %s12009_s10  ;;  %v10039_v18 = vmul.f32 %v10026_v57, %v12194_v15  ;;  %v2454_v31 = vmul.f32 %v9911_v5, %v12195_v20  ;;  %v10060_v10 = vsel %vm1351_vm2, %v2377_v26, %v2378_v25  ;;  %v2450_v49 = vmul.f32 %v10026_v57, %v12206_v7  ;;  %v2827_v7 = vld [vmem:[%s8893_s29 + $0xe8] sm:$0xff] }
 0x306   : > { %v10020_v55 = vsel %vm1351_vm2, %v2378_v25, %v12190_v2  ;;  %8392 = vrot.lane.b32.xlu0 %v8391_v38, %s8842_s15  ;;  %v12197_v2 = vrot.slane %v9878_v32, 1  ;;  %v12201_v25 = vld [vmem:[#allocation83_spill] sm:$0xff] }
 0x307   : > { %v2427_v54 = vmul.f32 %v10020_v55, %v12193_v24  ;;  %v12196_v24 = vrot.slane %v9878_v32, 7  ;;  %v8416_v20 = vpack.i.bf16 %v10030_v52, %v10039_v18  ;;  %v12199_v32 = vld [vmem:[#allocation74_spill] sm:$0xff]  ;;  %v2822_v18 = vld [vmem:[%s8893_s29 + $0xc0] sm:$0xff]  ;;  %v2823_v52 = vld [vmem:[%s8893_s29 + $0xc8] sm:$0xff] }
 0x308   : > { %v10056_v15 = vsel %vm1481_vm3, %v12197_v2, %v2409_v41  ;;  %v7989_v6 = vpack.c.bf16 %v2823_v52, %v2822_v18  ;;  %v2812_v52 = vld [vmem:[%s8893_s29 + $0x70] sm:$0xff] }
 0x309   : > { %v10050_v12 = vsel %vm1351_vm2, %v12196_v24, %v2377_v26  ;;  %v8411_v38 = vpack.i.bf16 %v9992_v30, %v2427_v54  ;;  %v12198_v24 = vld [vmem:[#allocation70_spill] sm:$0xff]  ;;  %v10071_v2 = vmul.f32 %v10056_v15, %v12199_v32  ;;  %v10079_v26 = vmul.f32 %v10060_v10, %v12201_v25  ;;  %v2806_v54 = vld [vmem:[%s8893_s29 + $0x40] sm:$0xff]  ;;  %2649 = vrot.lane.b32.xlu1 %v2454_v31, %s8845_s0 }
 0x30a   : > { %v10067_v23 = vmul.f32 %v9947_v53, %v12198_v24  ;;  %v10075_v28 = vmul.f32 %v10050_v12, %v12200_v29  ;;  %v10083_v30 = vsel %vm1481_vm3, %v2409_v41, %v2410_v58  ;;  %v12202_v24 = vld [vmem:[#allocation71_spill] sm:$0xff]  ;;  %v2824_v58 = vld [vmem:[%s8893_s29 + $0xd0] sm:$0xff]  ;;  %v12204_v31 = vpack.i.bf16 %v9927_v51, %v9923_v19  ;;  %7990 = vmatprep.subr.bf16.mxu0 %v7989_v6  ;;  %v12211_v6 = vld [vmem:[#allocation73_spill] sm:$0xff] }
 0x30b   : > { %v2425_v29 = vmul.f32 %v10056_v15, %v12202_v24  ;;  %v2426_v25 = vmul.f32 %v10083_v30, %v12203_v59  ;;  %v2825_v41 = vld [vmem:[%s8893_s29 + $0xd8] sm:$0xff]  ;;  %v12207_v59 = vld [vmem:[#allocation65_spill] sm:$0xff]  ;;  %v7991_v33 = vpack.c.bf16 %v2807_v22, %v2806_v54  ;;  %v2808_v51 = vld [vmem:[%s8893_s29 + $0x50] sm:$0xff] }
 0x30c   : > { %v8431_v32 = vpack.i.bf16 %v10071_v2, %v10067_v23  ;;  %8397 = vrot.lane.b32.xlu0 %v12204_v31, %s8847_s28  ;;  %v8436_v23 = vpack.i.bf16 %v10079_v26, %v10075_v28  ;;  %v12205_v2 = vld [vmem:[#allocation86_spill] sm:$0xff]  ;;  %v2469_v61 = vmul.f32 %v9917_v63, %v12207_v59  ;;  %v7993_v19 = vpack.c.bf16 %v2825_v41, %v2824_v58  ;;  %v2809_v28 = vld [vmem:[%s8893_s29 + $0x58] sm:$0xff]  ;;  %v2826_v31 = vld [vmem:[%s8893_s29 + $0xe0] sm:$0xff] }
 0x30d   : > { %v2449_v24 = vmul.f32 %v10083_v30, %v12205_v2  ;;  %v8446_v62 = vpack.i.bf16 %v2426_v25, %v2425_v29  ;;  %v12208_v26 = vpack.i.bf16 %v9941_v36, %v9937_v14  ;;  %7992 = vmatpush3.bf16.msra.mxu0 %v7991_v33  ;;  %v7995_v22 = vpack.c.bf16 %v2809_v28, %v2808_v51  ;;  %v2811_v25 = vld [vmem:[%s8893_s29 + $0x68] sm:$0xff]  ;;  %v2828_v14 = vld [vmem:[%s8893_s29 + $0xf0] sm:$0xff]  ;;  %v2829_v36 = vld [vmem:[%s8893_s29 + $0xf8] sm:$0xff] }
 0x30e   : > { %7994 = vmatprep.subr.bf16.mxu0 %v7993_v19  ;;  %v7997_v63 = vpack.c.bf16 %v2827_v7, %v2826_v31  ;;  %v8001_v18 = vpack.c.bf16 %v2829_v36, %v2828_v14  ;;  %v2813_v7 = vld [vmem:[%s8893_s29 + $0x78] sm:$0xff]  ;;  %v12214_v41 = vpack.i.bf16 %v10014_v8, %v9996_v43  ;;  %v12216_v51 = vld [vmem:[#allocation80_spill] sm:$0xff]  ;;  %v12218_v43 = vld [vmem:[#allocation89_spill] sm:$0xff] }
 0x30f   : > { %v8441_v3 = vpack.i.bf16 %v2450_v49, %v2449_v24  ;;  %8402 = vrot.lane.b32.xlu1 %v12208_v26, %s8846_s26  ;;  %v12209_v49 = vld [vmem:[#allocation69_spill] sm:$0xff]  ;;  %v2810_v24 = vld [vmem:[%s8893_s29 + $0x60] sm:$0xff]  ;;  %v8003_v54 = vpack.c.bf16 %v2813_v7, %v2812_v52  ;;  %v12222_v26 = vld [vmem:[#allocation94_spill] sm:$0xff] }
 0x310   : > { %2711 = vrot.lane.b32.xlu0 %v2469_v61, %s8844_s18  ;;  %v2470_v29 = vmul.f32 %v9947_v53, %v12209_v49  ;;  %v12210_v61 = vpack.i.bf16 %v9957_v0, %v9953_v56  ;;  %v2455_v53 = vmul.f32 %v9933_v39, %v12211_v6  ;;  %v7999_v33 = vpack.c.bf16 %v2811_v25, %v2810_v24  ;;  %v12213_v0 = vld [vmem:[#allocation85_spill] sm:$0xff] }
 0x311   : > { %7996 = vmatpush3.bf16.msra.mxu0 %v7995_v22  ;;  %v12212_v56 = vpack.i.bf16 %v10004_v21, %v10010_v17  ;;  %v2464_v58 = vmul.f32 %v9984_v27, %v12213_v0  ;;  %v2456_v17 = vmul.f32 %v10050_v12, %v12216_v51  ;;  %v12217_v27 = vld [vmem:[#allocation84_spill] sm:$0xff]  ;;  %v2472_v21 = vmul.f32 %v10083_v30, %v12218_v43 }
 0x312   : > { %7998 = vmatprep.subr.bf16.mxu0 %v7997_v63  ;;  %v2471_v8 = vmul.f32 %v10056_v15, %v12217_v27  ;;  %v12221_v15 = vld [vmem:[#allocation95_spill] sm:$0xff]  ;;  %v2465_v31 = vmul.f32 %v9980_v45, %v12222_v26 }
 0x313   : > { %2713 = vrot.lane.b32.xlu1 %v2470_v29, %s8844_s18  ;;  %v2474_v30 = vmul.f32 %v9804_v13, %v12221_v15 }
 0x314   : > { %8407 = vrot.lane.b32.xlu0 %v12210_v61, %s8848_s11 }
 0x315   : > { %8000 = vmatpush3.bf16.msra.mxu0 %v7999_v33 }
 0x316   : > { %8002 = vmatprep.subr.bf16.mxu0 %v8001_v18 }
 0x317   : > { %2651 = vrot.lane.b32.xlu1 %v2455_v53, %s8845_s0 }
 0x318   : > { %8412 = vrot.lane.b32.xlu0 %v8411_v38, %s8846_s26  ;;  %v12215_v38 = vld [vmem:[#allocation91_spill] sm:$0xff] }
 0x319   : > { %8004 = vmatpush3.bf16.msra.mxu0 %v8003_v54  ;;  %v2458_v19 = vmul.f32 %v10020_v55, %v12215_v38 }
 0x31b   : > { %8422 = vrot.lane.b32.xlu1 %v12212_v56, %s8837_s1  ;;  %s12238_s1 = sld [smem:[#allocation2_spill]] }
 0x31c   : > { %8417 = vrot.lane.b32.xlu0 %v8416_v20, %s8848_s11  ;;  %v12219_v20 = vld [vmem:[#allocation93_spill] sm:$0xff] }
 0x31d   : > { %v2466_v28 = vmul.f32 %v9781_v40, %v12219_v20 }
 0x31f   : > { %8427 = vrot.lane.b32.xlu1 %v12214_v41, %s8842_s15 }
 0x320   : > { %2685 = vrot.lane.b32.xlu0 %v2464_v58, %s12009_s10 }
 0x323   : > { %2657 = vrot.lane.b32.xlu1 %v2458_v19, %s8845_s0 }
 0x324   : > { %2653 = vrot.lane.b32.xlu0 %v2456_v17, %s8845_s0 }
 0x327   : > { %8432 = vrot.lane.b32.xlu1 %v8431_v32, %s8847_s28  ;;  %v12220_v32 = vld [vmem:[#allocation92_spill] sm:$0xff] }
 0x328   : > { %8437 = vrot.lane.b32.xlu0 %v8436_v23, %s8846_s26  ;;  %v2457_v23 = vmul.f32 %v10060_v10, %v12220_v32 }
 0x32b   : > { %2715 = vrot.lane.b32.xlu1 %v2471_v8, %s8844_s18 }
 0x32c   : > { %2717 = vrot.lane.b32.xlu0 %v2472_v21, %s8844_s18 }
 0x32f   : > { %8447 = vrot.lane.b32.xlu1 %v8446_v62, %s8848_s11  ;;  %v12223_v62 = vld [vmem:[#allocation96_spill] sm:$0xff] }
 0x330   : > { %8442 = vrot.lane.b32.xlu0 %v8441_v3, %s8847_s28  ;;  %v2473_v40 = vmul.f32 %v10026_v57, %v12223_v62 }
 0x333   : > { %2689 = vrot.lane.b32.xlu1 %v2466_v28, %s12009_s10 }
 0x334   : > { %2655 = vrot.lane.b32.xlu0 %v2457_v23, %s8845_s0 }
 0x337   : > { %2721 = vrot.lane.b32.xlu1 %v2474_v30, %s8844_s18 }
 0x338   : > { %2687 = vrot.lane.b32.xlu0 %v2465_v31, %s12009_s10  ;;  %s8849_s10 = smov 96  }
 0x33c   : > { %2719 = vrot.lane.b32.xlu0 %v2473_v40, %s8844_s18 }
 0x353   : > { %v2676_v3 = vpop.permute.xlu1 %2675 }
 0x357   : > { %v8353_v29 = vpop.permute.xlu1 %8352  ;;  %v2680_v22 = vpop.permute.xlu0 %2679 }
 0x35b   : > { %v2644_v63 = vpop.permute.xlu1 %2643  ;;  %v2678_v24 = vpop.permute.xlu0 %2677 }
 0x35c   : > { %v2782_v57 = vsel %vm2163_vm6, %v2644_v63, %v2676_v3 }
 0x35f   : > { %v10179_v25 = vpop.permute.xlu1 %8357  ;;  %v10181_v13 = vpop.permute.xlu0 %2645 }
 0x360   : > { %v2783_v18 = vsel %vm2163_vm6, %v10181_v13, %v2678_v24 }
 0x363   : > { %v10183_v14 = vpop.permute.xlu1 %8362  ;;  %v10185_v45 = vpop.permute.xlu0 %8372 }
 0x367   : > { %v8368_v36 = vpop.permute.xlu1 %8367  ;;  %v2710_v61 = vpop.permute.xlu0 %2709 }
 0x368   : > { %v2791_v7 = vsel %vm2208_vm11, %v2783_v18, %v2710_v61  ;;  %v8355_v18 = vunpack.i.h.bf16 %v8353_v29 }
 0x36b   : > { %v2708_v53 = vpop.permute.xlu1 %2707  ;;  %v10188_v33 = vpop.permute.xlu0 %2647 }
 0x36c   : > { %v2790_v52 = vsel %vm2208_vm11, %v2782_v57, %v2708_v53  ;;  %v2784_v23 = vsel %vm2163_vm6, %v10188_v33, %v2680_v22  ;;  %v8354_v22 = vunpack.i.l.bf16 %v8353_v29  ;;  %v8374_v29 = vunpack.i.l.bf16 %v10185_v45 }
 0x36d   : > { %7568 = vmatprep.mubr.msk.f32.mxu1 %vm2843_vm13, %v2790_v52 }
 0x36e   : > { %7569 = vmatmul.mubr.msk.f32.vlgmr.msra.gmra.mrb[8].mxu1 %vm2843_vm13, %v2791_v7 }
 0x36f   : > { %v10196_v54 = vpop.permute.xlu1 %8377  ;;  %v10198_v56 = vpop.permute.xlu0 %8382 }
 0x373   : > { %v10200_v58 = vpop.permute.xlu1 %2683  ;;  %v10202_v41 = vpop.permute.xlu0 %8387 }
 0x377   : > { %v2682_v19 = vpop.permute.xlu1 %2681 }
 0x378   : > { %v8393_v17 = vpop.permute.xlu0 %8392 }
 0x379   : > { %v8395_v15 = vunpack.i.h.bf16 %v8393_v17 }
 0x37b   : > { %v10204_v8 = vpop.permute.xlu1 %2649 }
 0x37c   : > { %v2785_v40 = vsel %vm2163_vm6, %v10204_v8, %v2682_v19 }
 0x37e   : > { %v10206_v21 = vpop.permute.xlu0 %8397 }
 0x37f   : > { %v8399_v51 = vunpack.i.l.bf16 %v10206_v21 }
 0x381   : > { %v10208_v28 = vpop.permute.xlu1 %8402 }
 0x382   : > { %v2712_v30 = vpop.permute.xlu0 %2711 }
 0x383   : > { %v2792_v31 = vsel %vm2208_vm11, %v2784_v23, %v2712_v30  ;;  %v8369_v23 = vunpack.i.l.bf16 %v8368_v36  ;;  %v8394_v30 = vunpack.i.l.bf16 %v8393_v17  ;;  %v8359_v17 = vunpack.i.l.bf16 %v10179_v25 }
 0x384   : > { %7571 = vmatprep.mubr.msk.f32.mxu1 %vm2843_vm13, %v2792_v31  ;;  %v2387_v31 = vmul.f32 %v10060_v10, %v9560_v60 }
 0x385   : > { %v2714_v3 = vpop.permute.xlu1 %2713 }
 0x386   : > { %v2793_v24 = vsel %vm2208_vm11, %v2785_v40, %v2714_v3  ;;  %v10217_v61 = vpop.permute.xlu0 %8407  ;;  %v2731_v10 = vsel %vm2181_vm8, %v2387_v31, %v8394_v30  ;;  %v8379_v31 = vunpack.i.l.bf16 %v10196_v54 }
 0x387   : > { %7572 = vmatmul.mubr.msk.f32.gmra.mrb[10].mxu1 %vm2843_vm13, %v2793_v24  ;;  %v8370_v24 = vunpack.i.h.bf16 %v8368_v36 }
 0x389   : > { %v10220_v57 = vpop.permute.xlu1 %2651 }
 0x38a   : > { %v8413_v53 = vpop.permute.xlu0 %8412 }
 0x38b   : > { %v8415_v52 = vunpack.i.h.bf16 %v8413_v53  ;;  %v8414_v7 = vunpack.i.l.bf16 %v8413_v53 }
 0x38d   : > { %v10224_v19 = vpop.permute.xlu1 %8422  ;;  %v2757_v40 = vsel %vm2172_vm7, %v8414_v7, %v8354_v22  ;;  %v2758_v3 = vsel %vm2172_vm7, %v8415_v52, %v8355_v18  ;;  %v12224_v18 = vld [vmem:[#allocation97_spill] sm:$0xff] }
 0x38e   : > { %v8418_v38 = vpop.permute.xlu0 %8417  ;;  %v2765_v62 = vsel %vm2233_vm12, %v2757_v40, %v8369_v23  ;;  %v2766_v22 = vsel %vm2233_vm12, %v2758_v3, %v8370_v24  ;;  %v2388_v36 = vmul.f32 %v10020_v55, %v12224_v18  ;;  %v8400_v24 = vunpack.i.h.bf16 %v10206_v21 }
 0x38f   : > { %v8420_v53 = vunpack.i.h.bf16 %v8418_v38  ;;  %v8419_v32 = vunpack.i.l.bf16 %v8418_v38  ;;  %v2774_v43 = vsel %vm2773_vm15, %v2765_v62, %v2644_v63  ;;  %v8364_v38 = vunpack.i.l.bf16 %v10183_v14 }
 0x390   : > { %2932 = vmatprep.mubr.f32.mxu0 %v2774_v43  ;;  %v8375_v62 = vunpack.i.h.bf16 %v10185_v45  ;;  %v2732_v43 = vsel %vm2181_vm8, %v2388_v36, %v8395_v15  ;;  %v2775_v55 = vsel %vm2773_vm15, %v2766_v22, %v10181_v13  ;;  %v8360_v15 = vunpack.i.h.bf16 %v10179_v25 }
 0x391   : > { %v10237_v23 = vpop.permute.xlu1 %8427  ;;  %v2740_v40 = vsel %vm2739_vm14, %v2731_v10, %v8419_v32  ;;  %v2741_v3 = vsel %vm2739_vm14, %v2732_v43, %v8420_v53  ;;  %v2759_v32 = vsel %vm2172_vm7, %v8374_v29, %v8359_v17  ;;  %v8365_v10 = vunpack.i.h.bf16 %v10183_v14 }
 0x392   : > { %v2686_v63 = vpop.permute.xlu0 %2685  ;;  %v2749_v30 = vsel %vm2748_vm0, %v2740_v40, %v8414_v7  ;;  %v2767_v45 = vsel %vm2233_vm12, %v2759_v32, %v8399_v51  ;;  %v2389_v7 = vmul.f32 %v9798_v37, %v9576_v44  ;;  %v8380_v13 = vunpack.i.h.bf16 %v10196_v54 }
 0x393   : > { %2933 = vmatmul.mubr.f32.vlgmr.msra.gmra.mrb[8].mxu0 %v2749_v30  ;;  %v2750_v53 = vsel %vm2748_vm0, %v2741_v3, %v8415_v52  ;;  %v2390_v21 = vmul.f32 %v9821_v46, %v9574_v1  ;;  %v8404_v51 = vunpack.i.l.bf16 %v10208_v28  ;;  %v2776_v37 = vsel %vm2773_vm15, %v2767_v45, %v10188_v33 }
 0x394   : > { %2937 = vmatprep.mubr.f32.mxu0 %v2775_v55  ;;  %v2733_v17 = vsel %vm2181_vm8, %v2389_v7, %v8364_v38  ;;  %v2760_v14 = vsel %vm2172_vm7, %v8375_v62, %v8360_v15  ;;  %v8384_v52 = vunpack.i.l.bf16 %v10198_v56  ;;  %v8389_v40 = vunpack.i.l.bf16 %v10202_v41 }
 0x395   : > { %v10255_v36 = vpop.permute.xlu1 %2657  ;;  %v2742_v25 = vsel %vm2739_vm14, %v2733_v17, %v8379_v31  ;;  %v2768_v54 = vsel %vm2233_vm12, %v2760_v14, %v8400_v24  ;;  %v2734_v46 = vsel %vm2181_vm8, %v2390_v21, %v8365_v10  ;;  %v8405_v30 = vunpack.i.h.bf16 %v10208_v28 }
 0x396   : > { %v2654_v22 = vpop.permute.xlu0 %2653  ;;  %v2751_v33 = vsel %vm2748_vm0, %v2742_v25, %v8374_v29  ;;  %v2743_v31 = vsel %vm2739_vm14, %v2734_v46, %v8380_v13  ;;  %v8409_v3 = vunpack.i.l.bf16 %v10217_v61  ;;  %v2777_v32 = vsel %vm2773_vm15, %v2768_v54, %v10204_v8 }
 0x397   : > { %2938 = vmatmul.mubr.f32.gmra.mrb[10].mxu0 %v2750_v53  ;;  %v2761_v24 = vsel %vm2172_vm7, %v8404_v51, %v8384_v52  ;;  %v2391_v45 = vmul.f32 %v9827_v48, %v9589_v11  ;;  %v8385_v28 = vunpack.i.h.bf16 %v10198_v56  ;;  %v2392_v29 = vmul.f32 %v9911_v5, %v9587_v9 }
 0x398   : > { %2942 = vmatprep.mubr.f32.mxu0 %v2776_v37  ;;  %v8390_v10 = vunpack.i.h.bf16 %v10202_v41  ;;  %v2786_v8 = vsel %vm2163_vm6, %v10220_v57, %v10200_v58  ;;  %v2752_v53 = vsel %vm2748_vm0, %v2743_v31, %v8375_v62  ;;  %v8410_v56 = vunpack.i.h.bf16 %v10217_v61 }
 0x399   : > { %v8433_v38 = vpop.permute.xlu1 %8432  ;;  %v2735_v48 = vsel %vm2181_vm8, %v2391_v45, %v8389_v40  ;;  %v2787_v17 = vsel %vm2163_vm6, %v2654_v22, %v2686_v63  ;;  %v2762_v5 = vsel %vm2172_vm7, %v8405_v30, %v8385_v28  ;;  %v8424_v54 = vunpack.i.l.bf16 %v10224_v19 }
 0x39a   : > { %v8434_v43 = vunpack.i.l.bf16 %v8433_v38  ;;  %v10272_v55 = vpop.permute.xlu0 %8437  ;;  %v8435_v7 = vunpack.i.h.bf16 %v8433_v38  ;;  %v2744_v62 = vsel %vm2739_vm14, %v2735_v48, %v8409_v3  ;;  %v2736_v14 = vsel %vm2181_vm8, %v2392_v29, %v8390_v10 }
 0x39b   : > { %2943 = vmatmul.mubr.f32.gmra.mrb[12].mxu0 %v2751_v33  ;;  %v8439_v25 = vunpack.i.l.bf16 %v10272_v55  ;;  %v8429_v52 = vunpack.i.l.bf16 %v10237_v23  ;;  %v2753_v38 = vsel %vm2748_vm0, %v2744_v62, %v8404_v51  ;;  %v8440_v46 = vunpack.i.h.bf16 %v10272_v55  ;;  %v3109_v62 = vld [vmem:[%s8903_s8] sm:$0xff] }
 0x39c   : > { %2947 = vmatprep.mubr.f32.mxu0 %v2777_v32  ;;  %v2769_v15 = vsel %vm2233_vm12, %v2761_v24, %v8434_v43  ;;  %v2770_v61 = vsel %vm2233_vm12, %v2762_v5, %v8435_v7  ;;  %v2393_v24 = vmul.f32 %v9933_v39, %v9600_v4  ;;  %v8425_v45 = vunpack.i.h.bf16 %v10224_v19  ;;  %7580 = vmatprep.subr.mxu1 %v3109_v62 }
 0x39d   : > { %v2716_v13 = vpop.permute.xlu1 %2715  ;;  %v2778_v58 = vsel %vm2773_vm15, %v2769_v15, %v10220_v57  ;;  %v2745_v57 = vsel %vm2739_vm14, %v2736_v14, %v8410_v56  ;;  %v2779_v31 = vsel %vm2773_vm15, %v2770_v61, %v2654_v22  ;;  %v2763_v32 = vsel %vm2172_vm7, %v8439_v25, %v8424_v54  ;;  %7581 = vmatpush3.msra.mxu1 %v3109_v62 }
 0x39e   : > { %v2794_v21 = vsel %vm2208_vm11, %v2786_v8, %v2716_v13  ;;  %v2718_v37 = vpop.permute.xlu0 %2717  ;;  %v8430_v28 = vunpack.i.h.bf16 %v10237_v23  ;;  %v2754_v55 = vsel %vm2748_vm0, %v2745_v57, %v8405_v30  ;;  %v2737_v15 = vsel %vm2181_vm8, %v2393_v24, %v8429_v52  ;;  %v6986_v57 = vld [vmem:[%s8898_s3] ss:$0 sm:$0xff] }
 0x39f   : > { %v2795_v41 = vsel %vm2208_vm11, %v2787_v17, %v2718_v37  ;;  %2948 = vmatmul.mubr.f32.gmra.mrb[14].mxu0 %v2752_v53  ;;  %7574 = vmatprep.mubr.msk.f32.mxu1 %vm2843_vm13, %v2794_v21  ;;  %v2764_v39 = vsel %vm2172_vm7, %v8440_v46, %v8425_v45  ;;  %v2394_v23 = vmul.f32 %v10050_v12, %v9602_v47 }
 0x3a0   : > { %2952 = vmatprep.mubr.f32.mxu0 %v2778_v58  ;;  %7575 = vmatmul.mubr.msk.f32.gmra.mrb[12].mxu1 %vm2843_vm13, %v2795_v41 }
 0x3a1   : > { %v8448_v63 = vpop.permute.xlu1 %8447  ;;  %v2738_v53 = vsel %vm2181_vm8, %v2394_v23, %v8430_v28  ;;  %v12226_v28 = vld [vmem:[#allocation59_spill] sm:$0xff] }
 0x3a2   : > { %v8443_v40 = vpop.permute.xlu0 %8442  ;;  %v8449_v43 = vunpack.i.l.bf16 %v8448_v63  ;;  %v8450_v29 = vunpack.i.h.bf16 %v8448_v63 }
 0x3a3   : > { %v8444_v33 = vunpack.i.l.bf16 %v8443_v40  ;;  %2953 = vmatmul.mubr.f32.gmra.mrb[16].mxu0 %v2753_v38  ;;  %v8445_v3 = vunpack.i.h.bf16 %v8443_v40 }
 0x3a4   : > { %2957 = vmatprep.mubr.f32.mxu0 %v2779_v31  ;;  %v2746_v8 = vsel %vm2739_vm14, %v2737_v15, %v8449_v43  ;;  %v2747_v56 = vsel %vm2739_vm14, %v2738_v53, %v8450_v29  ;;  %v12225_v43 = vld [vmem:[#allocation60_spill] sm:$0xff] }
 0x3a5   : > { %v2771_v51 = vsel %vm2233_vm12, %v2763_v32, %v8444_v33  ;;  %v2690_v22 = vpop.permute.xlu1 %2689  ;;  %v2772_v19 = vsel %vm2233_vm12, %v2764_v39, %v8445_v3  ;;  %v2755_v30 = vsel %vm2748_vm0, %v2746_v8, %v8439_v25  ;;  %v2756_v5 = vsel %vm2748_vm0, %v2747_v56, %v8440_v46 }
 0x3a6   : > { %v2656_v7 = vpop.permute.xlu0 %2655  ;;  %v2781_v48 = vsel %vm2773_vm15, %v2772_v19, %v10255_v36  ;;  %v2789_v12 = vsel %vm2163_vm6, %v10255_v36, %v2690_v22  ;;  %v12227_v19 = vld [vmem:[#allocation64_spill] sm:$0xff] }
 0x3a7   : > { %2958 = vmatmul.mubr.f32.gmra.mrb[18].mxu0 %v2754_v55  ;;  %v2780_v10 = vsel %vm2773_vm15, %v2771_v51, %v2656_v7 }
 0x3a8   : > { %2962 = vmatprep.mubr.f32.mxu0 %v2780_v10 }
 0x3a9   : > { %v2722_v17 = vpop.permute.xlu1 %2721 }
 0x3aa   : > { %v2688_v13 = vpop.permute.xlu0 %2687  ;;  %v2797_v58 = vsel %vm2208_vm11, %v2789_v12, %v2722_v17 }
 0x3ab   : > { %2963 = vmatmul.mubr.f32.gmra.mrb[20].mxu0 %v2755_v30  ;;  %v2788_v21 = vsel %vm2163_vm6, %v2656_v7, %v2688_v13 }
 0x3ac   : > { %2967 = vmatprep.mubr.f32.mxu0 %v2781_v48 }
 0x3ae   : > { %v2720_v37 = vpop.permute.xlu0 %2719 }
 0x3af   : > { %v2796_v41 = vsel %vm2208_vm11, %v2788_v21, %v2720_v37  ;;  %2968 = vmatmul.mubr.f32.gmra.mrb[22].mxu0 %v2756_v5  ;;  %v12228_v37 = vld [vmem:[#allocation63_spill] sm:$0xff] }
 0x3b0   : > { %7577 = vmatprep.mubr.msk.f32.mxu1 %vm2843_vm13, %v2796_v41 }
 0x3b1   : > { %7578 = vmatmul.mubr.msk.f32.gmra.mrb[14].mxu1 %vm2843_vm13, %v2797_v58 }
 0x441   : > { %v7570_v25 = vpop.f32.mrb[8].mxu1 }
 0x442   : > { %v3039_v61 = vpop.f32.mrb[9].mxu1 }
 0x45a   : > { %v7573_v63 = vpop.f32.mrb[10].mxu1 }
 0x45b   : > { %v3049_v14 = vpop.f32.mrb[11].mxu1 }
 0x466   : > { %v7235_v54 = vpop.f32.mrb[8].mxu0 }
 0x467   : > { %v7236_v52 = vpop.f32.mrb[9].mxu0 }
 0x468   : > { %v7237_v36 = vadd.f32 %v7236_v52, %v7235_v54 }
 0x46a   : > { %v3040_v40 = vadd.f32 %v7237_v36, %v3039_v61  ;;  %v7238_v38 = vpop.f32.mrb[10].mxu0 }
 0x46b   : > { %v7239_v46 = vpop.f32.mrb[11].mxu0 }
 0x46c   : > { %v3078_v33 = vadd.f32 %v3040_v40, %v12225_v43  ;;  %v7240_v31 = vadd.f32 %v7239_v46, %v7238_v38  ;;  %v12230_v43 = vld [vmem:[#allocation75_spill] sm:$0xff] }
 0x46e   : > { %v3093_v3 = vadd.f32 %v6986_v57, %v3078_v33  ;;  %v3045_v32 = vadd.f32 %v7570_v25, %v7240_v31  ;;  %v7241_v24 = vpop.f32.mrb[12].mxu0 }
 0x46f   : > { %v7242_v45 = vpop.f32.mrb[13].mxu0 }
 0x470   : > { %v3101_v51 = vmax.f32 %v3093_v3, 0.0  ;;  %v3079_v7 = vadd.f32 %v3045_v32, %v12226_v28  ;;  %v7243_v55 = vadd.f32 %v7242_v45, %v7241_v24 }
 0x472   : > { %v3094_v15 = vadd.f32 %v6986_v57, %v3079_v7  ;;  %v3050_v29 = vadd.f32 %v7243_v55, %v3049_v14  ;;  %v7244_v22 = vpop.f32.mrb[14].mxu0  ;;  %7582 = vmatprep.mubr.msk.f32.mxu1 %vm2145_vm5, %v3101_v51  ;;  %v12229_v14 = vld [vmem:[#allocation78_spill] sm:$0xff] }
 0x473   : > { %v7245_v10 = vpop.f32.mrb[15].mxu0  ;;  %v7576_v8 = vpop.f32.mrb[12].mxu1 }
 0x474   : > { %v3102_v39 = vmax.f32 %v3094_v15, 0.0  ;;  %v3080_v23 = vadd.f32 %v3050_v29, %v12227_v19  ;;  %v7246_v13 = vadd.f32 %v7245_v10, %v7244_v22  ;;  %v3059_v30 = vpop.f32.mrb[13].mxu1  ;;  %v12231_v29 = vld [vmem:[#allocation81_spill] sm:$0xff]  ;;  %v12232_v10 = vld [vmem:[#allocation90_spill] sm:$0xff] }
 0x476   : > { %v3095_v53 = vadd.f32 %v6986_v57, %v3080_v23  ;;  %v3055_v48 = vadd.f32 %v7573_v63, %v7246_v13  ;;  %v7247_v56 = vpop.f32.mrb[16].mxu0  ;;  %7583 = vmatmul.mubr.msk.f32.vlgmr.msra.gmra.mrb[16].mxu1 %vm2145_vm5, %v3102_v39 }
 0x477   : > { %v7248_v17 = vpop.f32.mrb[17].mxu0 }
 0x478   : > { %v3103_v21 = vmax.f32 %v3095_v53, 0.0  ;;  %v3081_v5 = vadd.f32 %v3055_v48, %v12228_v37  ;;  %v7249_v12 = vadd.f32 %v7248_v17, %v7247_v56  ;;  %v3247_v48 = vld [vmem:[%s8913_s19 + $0x8] sm:$0xff] }
 0x47a   : > { %v3096_v41 = vadd.f32 %v6986_v57, %v3081_v5  ;;  %v3060_v58 = vadd.f32 %v7249_v12, %v3059_v30  ;;  %v7250_v62 = vpop.f32.mrb[18].mxu0  ;;  %7585 = vmatprep.mubr.msk.f32.mxu1 %vm2145_vm5, %v3103_v21  ;;  %v6987_v30 = vld [vmem:[%s8908_s14] ss:$0 sm:$0xff] }
 0x47b   : > { %v7251_v25 = vpop.f32.mrb[19].mxu0  ;;  %v3246_v21 = vld [vmem:[%s8913_s19] sm:$0xff] }
 0x47c   : > { %v3104_v61 = vmax.f32 %v3096_v41, 0.0  ;;  %v3082_v54 = vadd.f32 %v3060_v58, %v12229_v14  ;;  %v7252_v52 = vadd.f32 %v7251_v25, %v7250_v62  ;;  %v3248_v25 = vld [vmem:[%s8913_s19 + $0x10] sm:$0xff] }
 0x47e   : > { %v3097_v36 = vadd.f32 %v6986_v57, %v3082_v54  ;;  %v3065_v63 = vadd.f32 %v7576_v8, %v7252_v52  ;;  %v7253_v40 = vpop.f32.mrb[20].mxu0  ;;  %7586 = vmatmul.mubr.msk.f32.gmra.mrb[18].mxu1 %vm2145_vm5, %v3104_v61  ;;  %v3249_v54 = vld [vmem:[%s8913_s19 + $0x18] sm:$0xff] }
 0x47f   : > { %v7254_v38 = vpop.f32.mrb[21].mxu0 }
 0x480   : > { %v3105_v46 = vmax.f32 %v3097_v36, 0.0  ;;  %v3083_v33 = vadd.f32 %v3065_v63, %v12230_v43  ;;  %v7255_v31 = vadd.f32 %v7254_v38, %v7253_v40  ;;  %v3251_v38 = vld [vmem:[%s8913_s19 + $0x28] sm:$0xff] }
 0x482   : > { %v3098_v3 = vadd.f32 %v6986_v57, %v3083_v33  ;;  %v7256_v32 = vpop.f32.mrb[22].mxu0  ;;  %7588 = vmatprep.mubr.msk.f32.mxu1 %vm2145_vm5, %v3105_v46  ;;  %v3250_v33 = vld [vmem:[%s8913_s19 + $0x20] sm:$0xff] }
 0x483   : > { %v7257_v24 = vpop.f32.mrb[23].mxu0 }
 0x484   : > { %v3106_v45 = vmax.f32 %v3098_v3, 0.0  ;;  %v7258_v51 = vadd.f32 %v7257_v24, %v7256_v32  ;;  %v7579_v28 = vpop.f32.mrb[14].mxu1 }
 0x485   : > { %v3069_v7 = vpop.f32.mrb[15].mxu1 }
 0x486   : > { %v3075_v55 = vadd.f32 %v7579_v28, %v7258_v51  ;;  %v3070_v15 = vadd.f32 %v7255_v31, %v3069_v7  ;;  %7589 = vmatmul.mubr.msk.f32.gmra.mrb[20].mxu1 %vm2145_vm5, %v3106_v45  ;;  %v3253_v7 = vld [vmem:[%s8913_s19 + $0x38] sm:$0xff] }
 0x488   : > { %v3085_v22 = vadd.f32 %v3075_v55, %v12231_v29  ;;  %v3084_v8 = vadd.f32 %v3070_v15, %v12232_v10  ;;  %v3252_v29 = vld [vmem:[%s8913_s19 + $0x30] sm:$0xff] }
 0x48a   : > { %v3100_v39 = vadd.f32 %v6986_v57, %v3085_v22  ;;  %v3099_v19 = vadd.f32 %v6986_v57, %v3084_v8 }
 0x48c   : > { %v3108_v23 = vmax.f32 %v3100_v39, 0.0  ;;  %v3107_v13 = vmax.f32 %v3099_v19, 0.0 }
 0x48e   : > { %7591 = vmatprep.mubr.msk.f32.mxu1 %vm2145_vm5, %v3107_v13  ;;  %v3398_v13 = vld [vmem:[%s8928_s6 + $0x8] sm:$0xff] }
 0x48f   : > { %7592 = vmatmul.mubr.msk.f32.gmra.mrb[22].mxu1 %vm2145_vm5, %v3108_v23  ;;  %v3397_v23 = vld [vmem:[%s8928_s6] sm:$0xff] }
 0x549   : > { %v7584_v53 = vpop.f32.mrb[16].mxu1 }
 0x54a   : > { %v10358_v56 = vadd.f32 %v7584_v53, %v6987_v30  ;;  %v3207_v17 = vpop.f32.mrb[17].mxu1  ;;  %v8029_v53 = vpack.c.bf16 %v3398_v13, %v3397_v23 }
 0x54b   : > { %v10361_v37 = vadd.f32 %v6987_v30, %v3207_v17 }
 0x54c   : > { %v10364_v5 = vadd.f32 %v3247_v48, %v10358_v56  ;;  %8030 = vmatprep.subr.bf16.mxu0 %v8029_v53 }
 0x54d   : > { %v10367_v57 = vadd.f32 %v3246_v21, %v10361_v37  ;;  %8032 = vmatpush3.bf16.msra.mxu0 %v8029_v53 }
 0x54e   : > { %v3267_v12 = vsel %vm2172_vm7, %v10364_v5, 0.0 }
 0x54f   : > { %3268 = vadd.xlane.f32.xlu1 %v3267_v12  ;;  %v3264_v41 = vsel %vm2172_vm7, %v10367_v57, 0.0 }
 0x550   : > { %3265 = vadd.xlane.f32.xlu0 %v3264_v41 }
 0x551   : > { %v7587_v58 = vpop.f32.mrb[18].mxu1 }
 0x552   : > { %v3217_v62 = vpop.f32.mrb[19].mxu1  ;;  %v10374_v61 = vadd.f32 %v7587_v58, %v6987_v30 }
 0x553   : > { %v10376_v14 = vadd.f32 %v6987_v30, %v3217_v62 }
 0x554   : > { %12233 = vst [vmem:[#allocation60_spill] sm:$0xff] %v10374_v61  ;;  %v10383_v36 = vadd.f32 %v3249_v54, %v10374_v61 }
 0x555   : > { %v10380_v52 = vadd.f32 %v3248_v25, %v10376_v14 }
 0x556   : > { %v3273_v3 = vsel %vm2172_vm7, %v10383_v36, 0.0 }
 0x557   : > { %v3270_v63 = vsel %vm2172_vm7, %v10380_v52, 0.0 }
 0x558   : > { %3271 = vadd.xlane.f32.xlu0 %v3270_v63 }
 0x559   : > { %v7590_v40 = vpop.f32.mrb[20].mxu1 }
 0x55a   : > { %v10388_v46 = vadd.f32 %v7590_v40, %v6987_v30  ;;  %v3227_v43 = vpop.f32.mrb[21].mxu1 }
 0x55b   : > { %v10391_v31 = vadd.f32 %v6987_v30, %v3227_v43 }
 0x55c   : > { %12234 = vst [vmem:[#allocation59_spill] sm:$0xff] %v10388_v46  ;;  %v10396_v32 = vadd.f32 %v3251_v38, %v10388_v46  ;;  %3274 = vadd.xlane.f32.xlu0 %v3273_v3 }
 0x55d   : > { %12235 = vst [vmem:[#allocation64_spill] sm:$0xff] %v10391_v31  ;;  %v10399_v24 = vadd.f32 %v3250_v33, %v10391_v31 }
 0x55e   : > { %v3279_v45 = vsel %vm2172_vm7, %v10396_v32, 0.0 }
 0x55f   : > { %v3276_v51 = vsel %vm2172_vm7, %v10399_v24, 0.0 }
 0x560   : > { %3280 = vadd.xlane.f32.xlu0 %v3279_v45  ;;  %3277 = vadd.xlane.f32.xlu1 %v3276_v51 }
 0x562   : > { %v7593_v28 = vpop.f32.mrb[22].mxu1 }
 0x563   : > { %v10406_v55 = vadd.f32 %v7593_v28, %v6987_v30  ;;  %v3237_v15 = vpop.f32.mrb[23].mxu1 }
 0x564   : > { %v10409_v22 = vadd.f32 %v6987_v30, %v3237_v15 }
 0x565   : > { %12236 = vst [vmem:[#allocation63_spill] sm:$0xff] %v10406_v55  ;;  %v10412_v10 = vadd.f32 %v3253_v7, %v10406_v55 }
 0x566   : > { %12237 = vst [vmem:[#allocation78_spill] sm:$0xff] %v10409_v22  ;;  %v10415_v8 = vadd.f32 %v3252_v29, %v10409_v22 }
 0x567   : > { %v3285_v39 = vsel %vm2172_vm7, %v10412_v10, 0.0 }
 0x568   : > { %3286 = vadd.xlane.f32.xlu0 %v3285_v39  ;;  %v3282_v19 = vsel %vm2172_vm7, %v10415_v8, 0.0 }
 0x569   : > { %3283 = vadd.xlane.f32.xlu1 %v3282_v19 }
 0x5dc   : > { %v3269_v30 = vpop.xlane.xlu1 %3268 }
 0x5dd   : > { %v3290_v48 = vmul.f32 0.03125, %v3269_v30  ;;  %v3266_v17 = vpop.xlane.xlu0 %3265 }
 0x5de   : > { %v3289_v21 = vmul.f32 0.03125, %v3266_v17 }
 0x5df   : > { %v10424_v12 = vsub.f32 %v10364_v5, %v3290_v48 }
 0x5e0   : > { %v10427_v41 = vsub.f32 %v10367_v57, %v3289_v21 }
 0x5e1   : > { %v3306_v58 = vmul.f32 %v10424_v12, %v10424_v12 }
 0x5e2   : > { %v3305_v62 = vmul.f32 %v10427_v41, %v10427_v41 }
 0x5e3   : > { %v3316_v25 = vsel %vm2172_vm7, %v3306_v58, 0.0 }
 0x5e4   : > { %3317 = vadd.xlane.f32.xlu0 %v3316_v25  ;;  %v3313_v54 = vsel %vm2172_vm7, %v3305_v62, 0.0 }
 0x5e5   : > { %v3272_v63 = vpop.xlane.xlu0 %3271  ;;  %3314 = vadd.xlane.f32.xlu1 %v3313_v54 }
 0x5e6   : > { %v3291_v40 = vmul.f32 0.03125, %v3272_v63 }
 0x5e8   : > { %v10436_v38 = vsub.f32 %v10380_v52, %v3291_v40 }
 0x5e9   : > { %v3275_v43 = vpop.xlane.xlu0 %3274 }
 0x5ea   : > { %v3292_v33 = vmul.f32 0.03125, %v3275_v43  ;;  %v3307_v3 = vmul.f32 %v10436_v38, %v10436_v38 }
 0x5ec   : > { %v10441_v45 = vsub.f32 %v10383_v36, %v3292_v33  ;;  %v3319_v51 = vsel %vm2172_vm7, %v3307_v3, 0.0 }
 0x5ed   : > { %v3281_v28 = vpop.xlane.xlu0 %3280  ;;  %3320 = vadd.xlane.f32.xlu1 %v3319_v51  ;;  %v3278_v7 = vpop.xlane.xlu1 %3277  ;;  %v3399_v51 = vld [vmem:[%s8928_s6 + $0x10] sm:$0xff] }
 0x5ee   : > { %v3294_v15 = vmul.f32 0.03125, %v3281_v28  ;;  %v3293_v29 = vmul.f32 0.03125, %v3278_v7  ;;  %v3308_v39 = vmul.f32 %v10441_v45, %v10441_v45  ;;  %v3400_v28 = vld [vmem:[%s8928_s6 + $0x18] sm:$0xff] }
 0x5ef   : > { %v8033_v7 = vpack.c.bf16 %v3400_v28, %v3399_v51 }
 0x5f0   : > { %v10447_v19 = vsub.f32 %v10396_v32, %v3294_v15  ;;  %v10450_v23 = vsub.f32 %v10399_v24, %v3293_v29  ;;  %v3322_v13 = vsel %vm2172_vm7, %v3308_v39, 0.0 }
 0x5f1   : > { %3323 = vadd.xlane.f32.xlu0 %v3322_v13  ;;  %8034 = vmatprep.subr.bf16.mxu0 %v8033_v7 }
 0x5f2   : > { %v3310_v53 = vmul.f32 %v10447_v19, %v10447_v19  ;;  %v3309_v30 = vmul.f32 %v10450_v23, %v10450_v23  ;;  %8036 = vmatpush3.bf16.msra.mxu0 %v8033_v7 }
 0x5f4   : > { %v3328_v48 = vsel %vm2172_vm7, %v3310_v53, 0.0  ;;  %v3325_v17 = vsel %vm2172_vm7, %v3309_v30, 0.0 }
 0x5f5   : > { %3329 = vadd.xlane.f32.xlu0 %v3328_v48  ;;  %v3287_v21 = vpop.xlane.xlu0 %3286  ;;  %3326 = vadd.xlane.f32.xlu1 %v3325_v17 }
 0x5f6   : > { %v3296_v58 = vmul.f32 0.03125, %v3287_v21  ;;  %v3284_v62 = vpop.xlane.xlu1 %3283 }
 0x5f7   : > { %v3295_v25 = vmul.f32 0.03125, %v3284_v62 }
 0x5f8   : > { %v10460_v54 = vsub.f32 %v10412_v10, %v3296_v58 }
 0x5f9   : > { %v10463_v63 = vsub.f32 %v10415_v8, %v3295_v25 }
 0x5fa   : > { %v3312_v40 = vmul.f32 %v10460_v54, %v10460_v54 }
 0x5fb   : > { %v3311_v43 = vmul.f32 %v10463_v63, %v10463_v63 }
 0x5fc   : > { %v3334_v33 = vsel %vm2172_vm7, %v3312_v40, 0.0  ;;  %v6996_v40 = vld [vmem:[%s8918_s24] ss:$0 sm:$0xff] }
 0x5fd   : > { %3335 = vadd.xlane.f32.xlu0 %v3334_v33  ;;  %v3331_v3 = vsel %vm2172_vm7, %v3311_v43, 0.0 }
 0x5fe   : > { %3332 = vadd.xlane.f32.xlu1 %v3331_v3 }
 0x671   : > { %v3318_v15 = vpop.xlane.xlu0 %3317 }
 0x672   : > { %v3338_v29 = vmul.f32 0.03125, %v3318_v15  ;;  %v3315_v39 = vpop.xlane.xlu1 %3314 }
 0x673   : > { %v3337_v13 = vmul.f32 0.03125, %v3315_v39 }
 0x674   : > { %v3346_v53 = vadd.f32 1e-05, %v3338_v29 }
 0x675   : > { %v3345_v30 = vadd.f32 1e-05, %v3337_v13  ;;  %v6997_v13 = vld [vmem:[%s8923_s30] ss:$0 sm:$0xff] }
 0x676   : > { %8611 = vrsqrt.f32 %v3346_v53 }
 0x677   : > { %8613 = vrsqrt.f32 %v3345_v30 }
 0x67a   : > { %v3321_v48 = vpop.xlane.xlu1 %3320 }
 0x67b   : > { %v3339_v17 = vmul.f32 0.03125, %v3321_v48 }
 0x67d   : > { %v3347_v21 = vadd.f32 1e-05, %v3339_v17 }
 0x67e   : > { %v3324_v58 = vpop.xlane.xlu0 %3323 }
 0x67f   : > { %8615 = vrsqrt.f32 %v3347_v21  ;;  %v3340_v62 = vmul.f32 0.03125, %v3324_v58 }
 0x680   : > { %v8612_v25 = vpop.eup %8611 }
 0x681   : > { %v8614_v43 = vpop.eup %8613  ;;  %v3362_v33 = vmul.f32 %v8612_v25, %v10424_v12  ;;  %v3348_v3 = vadd.f32 1e-05, %v3340_v62 }
 0x682   : > { %v3330_v51 = vpop.xlane.xlu0 %3329  ;;  %v3327_v28 = vpop.xlane.xlu1 %3326  ;;  %v3361_v7 = vmul.f32 %v8614_v43, %v10427_v41 }
 0x683   : > { %v3376_v15 = vmul.f32 %v6996_v40, %v3362_v33  ;;  %8617 = vrsqrt.f32 %v3348_v3  ;;  %v3342_v29 = vmul.f32 0.03125, %v3330_v51  ;;  %v3341_v39 = vmul.f32 0.03125, %v3327_v28 }
 0x684   : > { %v3375_v53 = vmul.f32 %v6996_v40, %v3361_v7 }
 0x685   : > { %v3350_v30 = vadd.f32 1e-05, %v3342_v29  ;;  %v3349_v48 = vadd.f32 1e-05, %v3341_v39  ;;  %v3390_v21 = vadd.f32 %v6997_v13, %v3376_v15 }
 0x686   : > { %v3389_v17 = vadd.f32 %v6997_v13, %v3375_v53 }
 0x687   : > { %8619 = vrsqrt.f32 %v3350_v30 }
 0x688   : > { %8621 = vrsqrt.f32 %v3349_v48  ;;  %7602 = vmatprep.mubr.msk.f32.mxu0 %vm2172_vm7, %v3389_v17 }
 0x689   : > { %v8616_v12 = vpop.eup %8615  ;;  %7603 = vmatmul.mubr.msk.f32.vlgmr.msra.gmra.mrb[24].mxu0 %vm2172_vm7, %v3390_v21 }
 0x68a   : > { %v3336_v58 = vpop.xlane.xlu0 %3335  ;;  %v3363_v41 = vmul.f32 %v8616_v12, %v10436_v38 }
 0x68b   : > { %v3344_v62 = vmul.f32 0.03125, %v3336_v58  ;;  %v3333_v25 = vpop.xlane.xlu1 %3332 }
 0x68c   : > { %v3343_v43 = vmul.f32 0.03125, %v3333_v25  ;;  %v3377_v33 = vmul.f32 %v6996_v40, %v3363_v41 }
 0x68d   : > { %v8618_v3 = vpop.eup %8617  ;;  %v3352_v51 = vadd.f32 1e-05, %v3344_v62 }
 0x68e   : > { %v3351_v28 = vadd.f32 1e-05, %v3343_v43  ;;  %v3391_v7 = vadd.f32 %v6997_v13, %v3377_v33  ;;  %v3364_v29 = vmul.f32 %v8618_v3, %v10441_v45  ;;  %v6998_v3 = vld [vmem:[%s12238_s1] ss:$0 sm:$0xff]  ;;  %s12257_s1 = sld [smem:[#allocation11_spill]] }
 0x68f   : > { %8623 = vrsqrt.f32 %v3352_v51 }
 0x690   : > { %8625 = vrsqrt.f32 %v3351_v28  ;;  %7605 = vmatprep.mubr.msk.f32.mxu0 %vm2172_vm7, %v3391_v7  ;;  %v3378_v15 = vmul.f32 %v6996_v40, %v3364_v29 }
 0x691   : > { %v8620_v39 = vpop.eup %8619 }
 0x692   : > { %v8622_v53 = vpop.eup %8621  ;;  %v3392_v30 = vadd.f32 %v6997_v13, %v3378_v15  ;;  %v3366_v38 = vmul.f32 %v8620_v39, %v10447_v19 }
 0x693   : > { %v3365_v48 = vmul.f32 %v8622_v53, %v10450_v23 }
 0x694   : > { %7606 = vmatmul.mubr.msk.f32.gmra.mrb[26].mxu0 %vm2172_vm7, %v3392_v30  ;;  %v3380_v17 = vmul.f32 %v6996_v40, %v3366_v38 }
 0x695   : > { %v3379_v21 = vmul.f32 %v6996_v40, %v3365_v48 }
 0x696   : > { %v3394_v12 = vadd.f32 %v6997_v13, %v3380_v17 }
 0x697   : > { %v3393_v58 = vadd.f32 %v6997_v13, %v3379_v21 }
 0x699   : > { %v8624_v45 = vpop.eup %8623  ;;  %7608 = vmatprep.mubr.msk.f32.mxu0 %vm2172_vm7, %v3393_v58 }
 0x69a   : > { %v8626_v41 = vpop.eup %8625  ;;  %7609 = vmatmul.mubr.msk.f32.gmra.mrb[28].mxu0 %vm2172_vm7, %v3394_v12  ;;  %v3368_v62 = vmul.f32 %v8624_v45, %v10460_v54 }
 0x69b   : > { %v3367_v25 = vmul.f32 %v8626_v41, %v10463_v63 }
 0x69c   : > { %v3382_v19 = vmul.f32 %v6996_v40, %v3368_v62 }
 0x69d   : > { %v3381_v43 = vmul.f32 %v6996_v40, %v3367_v25 }
 0x69e   : > { %v3396_v33 = vadd.f32 %v6997_v13, %v3382_v19 }
 0x69f   : > { %v3395_v23 = vadd.f32 %v6997_v13, %v3381_v43 }
 0x6a1   : > { %7611 = vmatprep.mubr.msk.f32.mxu0 %vm2172_vm7, %v3395_v23 }
 0x6a2   : > { %7612 = vmatmul.mubr.msk.f32.gmra.mrb[30].mxu0 %vm2172_vm7, %v3396_v33 }
 0x75c   : > { %v7604_v51 = vpop.f32.mrb[24].mxu0 }
 0x75d   : > { %v10492_v28 = vadd.f32 %v7604_v51, %v6998_v3  ;;  %v3498_v7 = vpop.f32.mrb[25].mxu0 }
 0x75e   : > { %v10494_v29 = vadd.f32 %v6998_v3, %v3498_v7 }
 0x760   : > { %7630 = vmatprep.mubr.msk.f32.mxu1 %vm2145_vm5, %v10494_v29  ;;  %v10500_v54 = vpack.i.bf16 %v10492_v28, %v10494_v29 }
 0x762   : > { %8452 = vrot.lane.b32.xlu1 %v10500_v54, %s8849_s10 }
 0x767   : > { %v7607_v63 = vpop.f32.mrb[26].mxu0 }
 0x768   : > { %v10503_v40 = vadd.f32 %v7607_v63, %v6998_v3  ;;  %v3508_v13 = vpop.f32.mrb[27].mxu0 }
 0x769   : > { %v10505_v15 = vadd.f32 %v6998_v3, %v3508_v13 }
 0x76b   : > { %v10509_v39 = vpack.i.bf16 %v10503_v40, %v10505_v15 }
 0x76d   : > { %v7610_v53 = vpop.f32.mrb[28].mxu0  ;;  %8457 = vrot.lane.b32.xlu0 %v10509_v39, %s8849_s10 }
 0x76e   : > { %v10512_v30 = vadd.f32 %v7610_v53, %v6998_v3  ;;  %v3518_v38 = vpop.f32.mrb[29].mxu0 }
 0x76f   : > { %v10514_v48 = vadd.f32 %v6998_v3, %v3518_v38 }
 0x771   : > { %v10518_v17 = vpack.i.bf16 %v10512_v30, %v10514_v48 }
 0x773   : > { %8462 = vrot.lane.b32.xlu1 %v10518_v17, %s8849_s10 }
 0x775   : > { %v7613_v21 = vpop.f32.mrb[30].mxu0 }
 0x776   : > { %v10521_v12 = vadd.f32 %v7613_v21, %v6998_v3  ;;  %v3528_v58 = vpop.f32.mrb[31].mxu0 }
 0x777   : > { %v10523_v45 = vadd.f32 %v6998_v3, %v3528_v58 }
 0x779   : > { %v10527_v41 = vpack.i.bf16 %v10521_v12, %v10523_v45 }
 0x77b   : > { %8467 = vrot.lane.b32.xlu1 %v10527_v41, %s8849_s10  ;;  %s8850_s10 = smov 88  }
 0x7d4   : > { %v8453_v62 = vpop.permute.xlu1 %8452 }
 0x7d5   : > { %v8455_v25 = vunpack.i.h.bf16 %v8453_v62  ;;  %v8454_v19 = vunpack.i.l.bf16 %v8453_v62 }
 0x7d7   : > { %v8037_v23 = vpack.c.bf16 %v8455_v25, %v8454_v19 }
 0x7d9   : > { %8039 = vmatprep.subr.msk.bf16.mxu1 %vm10532_vm1, %v8037_v23 }
 0x7da   : > { %8042 = vmatpush3.bf16.xpose.msk.msra.mxu1 %vm10532_vm1, %v8037_v23 }
 0x7df   : > { %v8458_v33 = vpop.permute.xlu0 %8457 }
 0x7e0   : > { %v8460_v3 = vunpack.i.h.bf16 %v8458_v33  ;;  %v8459_v51 = vunpack.i.l.bf16 %v8458_v33 }
 0x7e2   : > { %v8043_v7 = vpack.c.bf16 %v8460_v3, %v8459_v51 }
 0x7e4   : > { %8045 = vmatprep.subr.msk.bf16.mxu1 %vm10532_vm1, %v8043_v7 }
 0x7e5   : > { %v8463_v63 = vpop.permute.xlu1 %8462  ;;  %8048 = vmatpush3.bf16.xpose.msk.msra.mxu1 %vm10532_vm1, %v8043_v7 }
 0x7e6   : > { %v8465_v13 = vunpack.i.h.bf16 %v8463_v63  ;;  %v8464_v53 = vunpack.i.l.bf16 %v8463_v63 }
 0x7e8   : > { %v8049_v38 = vpack.c.bf16 %v8465_v13, %v8464_v53 }
 0x7ea   : > { %8051 = vmatprep.subr.msk.bf16.mxu1 %vm10532_vm1, %v8049_v38 }
 0x7ed   : > { %v8468_v21 = vpop.permute.xlu1 %8467  ;;  %8054 = vmatpush3.bf16.xpose.msk.msra.mxu1 %vm10532_vm1, %v8049_v38 }
 0x7ee   : > { %v8470_v58 = vunpack.i.h.bf16 %v8468_v21  ;;  %v8469_v62 = vunpack.i.l.bf16 %v8468_v21 }
 0x7f0   : > { %v8055_v25 = vpack.c.bf16 %v8470_v58, %v8469_v62 }
 0x7f2   : > { %8057 = vmatprep.subr.msk.bf16.mxu1 %vm10532_vm1, %v8055_v25 }
 0x7f5   : > { %8060 = vmatpush3.bf16.xpose.msk.msra.mxu1 %vm10532_vm1, %v8055_v25 }
 0x7fc   : > { %7631 = vmatmul.mubr.msk.f32.vlgmr.msra.gmra.mrb[24].mxu1 %vm2145_vm5, %v10492_v28 }
 0x7fd   : > { %7633 = vmatprep.mubr.msk.f32.mxu1 %vm2145_vm5, %v10505_v15 }
 0x800   : > { %7634 = vmatmul.mubr.msk.f32.gmra.mrb[26].mxu1 %vm2145_vm5, %v10503_v40 }
 0x801   : > { %7636 = vmatprep.mubr.msk.f32.mxu1 %vm2145_vm5, %v10514_v48 }
 0x804   : > { %7637 = vmatmul.mubr.msk.f32.gmra.mrb[28].mxu1 %vm2145_vm5, %v10512_v30 }
 0x805   : > { %7639 = vmatprep.mubr.msk.f32.mxu1 %vm2145_vm5, %v10523_v45 }
 0x808   : > { %7640 = vmatmul.mubr.msk.f32.gmra.mrb[30].mxu1 %vm2145_vm5, %v10521_v12 }
 0x8cf   : > { %v7632_v19 = vpop.f32.mrb[24].mxu1 }
 0x8d0   : > { %v3659_v23 = vpop.f32.mrb[25].mxu1  ;;  %v3701_v33 = vsel %vm2208_vm11, %v7632_v19, -inf }
 0x8d1   : > { %3702 = vmax.xlane.f32.xlu1 %v3701_v33  ;;  %v3698_v3 = vsel %vm2208_vm11, %v3659_v23, -inf }
 0x8d2   : > { %3699 = vmax.xlane.f32.xlu0 %v3698_v3 }
 0x8d3   : > { %v10568_v51 = vpop.f32.mrb[26].mxu1 }
 0x8d4   : > { %v3669_v7 = vpop.f32.mrb[27].mxu1  ;;  %v3707_v63 = vsel %vm2208_vm11, %v10568_v51, -inf }
 0x8d5   : > { %v3704_v38 = vsel %vm2208_vm11, %v3669_v7, -inf }
 0x8d6   : > { %3708 = vmax.xlane.f32.xlu0 %v3707_v63 }
 0x8d7   : > { %v7638_v13 = vpop.f32.mrb[28].mxu1 }
 0x8d8   : > { %v10572_v53 = vpop.f32.mrb[29].mxu1  ;;  %v3713_v62 = vsel %vm2208_vm11, %v7638_v13, -inf }
 0x8d9   : > { %v3710_v33 = vsel %vm2208_vm11, %v10572_v53, -inf }
 0x8da   : > { %3705 = vmax.xlane.f32.xlu0 %v3704_v38 }
 0x8db   : > { %v10575_v21 = vpop.f32.mrb[30].mxu1 }
 0x8dc   : > { %v10577_v58 = vpop.f32.mrb[31].mxu1  ;;  %v3719_v25 = vsel %vm2208_vm11, %v10575_v21, -inf }
 0x8dd   : > { %v3716_v3 = vsel %vm2208_vm11, %v10577_v58, -inf }
 0x8de   : > { %3714 = vmax.xlane.f32.xlu0 %v3713_v62 }
 0x8e2   : > { %8472 = vrot.lane.b32.xlu1 %v10500_v54, %s8844_s18  ;;  %3720 = vmax.xlane.f32.xlu0 %v3719_v25 }
 0x8f8   : > { %8477 = vrot.lane.b32.xlu0 %v10509_v39, %s8844_s18 }
 0x906   : > { %3711 = vmax.xlane.f32.xlu1 %v3710_v33 }
 0x917   : > { %8482 = vrot.lane.b32.xlu1 %v10518_v17, %s8844_s18 }
 0x93b   : > { %3717 = vmax.xlane.f32.xlu1 %v3716_v3 }
 0x94c   : > { %8487 = vrot.lane.b32.xlu1 %v10527_v41, %s8844_s18  ;;  %s12253_s18 = sld [smem:[#allocation7_spill]] }
 0x95e   : > { %v3703_v63 = vpop.xlane.xlu1 %3702 }
 0x95f   : > { %v3723_v38 = vsub.f32 %v7632_v19, %v3703_v63  ;;  %v3700_v62 = vpop.xlane.xlu0 %3699 }
 0x960   : > { %v3722_v25 = vsub.f32 %v3659_v23, %v3700_v62 }
 0x961   : > { %v3732_v47 = vmul.f32 1.442695, %v3723_v38 }
 0x962   : > { %v3730_v4 = vmul.f32 1.442695, %v3722_v25  ;;  %v8473_v2 = vpop.permute.xlu1 %8472 }
 0x963   : > { %8627 = vpow2.f32 %v3732_v47  ;;  %v8475_v9 = vunpack.i.h.bf16 %v8473_v2  ;;  %v8474_v33 = vunpack.i.l.bf16 %v8473_v2  ;;  %v3709_v27 = vpop.xlane.xlu0 %3708 }
 0x964   : > { %8629 = vpow2.f32 %v3730_v4  ;;  %v3725_v38 = vsub.f32 %v10568_v51, %v3709_v27 }
 0x965   : > { %v8061_v6 = vpack.c.bf16 %v8475_v9, %v8474_v33 }
 0x966   : > { %v3736_v25 = vmul.f32 1.442695, %v3725_v38 }
 0x967   : > { %8062 = vmatprep.subr.bf16.mxu0 %v8061_v6  ;;  %v3706_v11 = vpop.xlane.xlu0 %3705 }
 0x968   : > { %v3724_v49 = vsub.f32 %v3669_v7, %v3706_v11  ;;  %8064 = vmatpush3.bf16.msra.mxu0 %v8061_v6 }
 0x96a   : > { %v3734_v3 = vmul.f32 1.442695, %v3724_v49 }
 0x96b   : > { %v3715_v59 = vpop.xlane.xlu0 %3714 }
 0x96c   : > { %8631 = vpow2.f32 %v3734_v3  ;;  %v3727_v1 = vsub.f32 %v7638_v13, %v3715_v59 }
 0x96d   : > { %v10594_v19 = vpop.eup %8627 }
 0x96e   : > { %v10596_v23 = vpop.eup %8629  ;;  %v3740_v63 = vmul.f32 1.442695, %v3727_v1  ;;  %v3749_v47 = vsel %vm2208_vm11, %v10594_v19, 0.0 }
 0x96f   : > { %3750 = vadd.xlane.f32.xlu0 %v3749_v47  ;;  %v3721_v2 = vpop.xlane.xlu0 %3720  ;;  %v3746_v9 = vsel %vm2208_vm11, %v10596_v23, 0.0 }
 0x970   : > { %8633 = vpow2.f32 %v3740_v63  ;;  %3747 = vadd.xlane.f32.xlu1 %v3746_v9  ;;  %v3729_v62 = vsub.f32 %v10575_v21, %v3721_v2 }
 0x971   : > { %8635 = vpow2.f32 %v3736_v25 }
 0x972   : > { %v3744_v63 = vmul.f32 1.442695, %v3729_v62 }
 0x973   : > { %v8478_v11 = vpop.permute.xlu0 %8477 }
 0x974   : > { %v8480_v4 = vunpack.i.h.bf16 %v8478_v11  ;;  %v8479_v49 = vunpack.i.l.bf16 %v8478_v11 }
 0x976   : > { %v10602_v6 = vpop.eup %8631  ;;  %v8065_v59 = vpack.c.bf16 %v8480_v4, %v8479_v49 }
 0x977   : > { %v3752_v7 = vsel %vm2208_vm11, %v10602_v6, 0.0 }
 0x978   : > { %3753 = vadd.xlane.f32.xlu0 %v3752_v7  ;;  %8066 = vmatprep.subr.bf16.mxu0 %v8065_v59 }
 0x979   : > { %8068 = vmatpush3.bf16.msra.mxu0 %v8065_v59 }
 0x97a   : > { %v10606_v1 = vpop.eup %8633 }
 0x97b   : > { %v3761_v13 = vsel %vm2208_vm11, %v10606_v1, 0.0  ;;  %v8636_v59 = vpop.eup %8635 }
 0x97c   : > { %3762 = vadd.xlane.f32.xlu0 %v3761_v13 }
 0x981   : > { %8492 = vrot.lane.b32.xlu1 %v10500_v54, %s8850_s10 }
 0x993   : > { %v3712_v33 = vpop.xlane.xlu1 %3711 }
 0x994   : > { %v3726_v3 = vsub.f32 %v10572_v53, %v3712_v33  ;;  %v3755_v53 = vsel %vm2208_vm11, %v8636_v59, 0.0 }
 0x996   : > { %v3738_v47 = vmul.f32 1.442695, %v3726_v3 }
 0x997   : > { %v8483_v9 = vpop.permute.xlu1 %8482 }
 0x998   : > { %8637 = vpow2.f32 %v3738_v47  ;;  %v8485_v11 = vunpack.i.h.bf16 %v8483_v9  ;;  %v8484_v4 = vunpack.i.l.bf16 %v8483_v9 }
 0x999   : > { %8639 = vpow2.f32 %v3744_v63 }
 0x99a   : > { %v8069_v49 = vpack.c.bf16 %v8485_v11, %v8484_v4 }
 0x99c   : > { %8070 = vmatprep.subr.bf16.mxu0 %v8069_v49 }
 0x99d   : > { %8072 = vmatpush3.bf16.msra.mxu0 %v8069_v49 }
 0x9a2   : > { %v10615_v7 = vpop.eup %8637 }
 0x9a3   : > { %v3758_v27 = vsel %vm2208_vm11, %v10615_v7, 0.0  ;;  %v10619_v51 = vpop.eup %8639 }
 0x9a4   : > { %3759 = vadd.xlane.f32.xlu0 %v3758_v27  ;;  %v3767_v21 = vsel %vm2208_vm11, %v10619_v51, 0.0 }
 0x9a5   : > { %3756 = vadd.xlane.f32.xlu1 %v3755_v53 }
 0x9a8   : > { %3768 = vadd.xlane.f32.xlu0 %v3767_v21 }
 0x9b6   : > { %8502 = vrot.lane.b32.xlu1 %v10518_v17, %s8850_s10 }
 0x9ba   : > { %8507 = vrot.lane.b32.xlu1 %v10527_v41, %s8850_s10 }
 0x9be   : > { %3939 = vrot.lane.b32.xlu1 %v10494_v29, %s8846_s26 }
 0x9c2   : > { %3941 = vrot.lane.b32.xlu1 %v10492_v28, %s8846_s26 }
 0x9c6   : > { %3945 = vrot.lane.b32.xlu1 %v10503_v40, %s8846_s26 }
 0x9c8   : > { %v3718_v2 = vpop.xlane.xlu1 %3717 }
 0x9c9   : > { %v3728_v13 = vsub.f32 %v10577_v58, %v3718_v2 }
 0x9ca   : > { %3949 = vrot.lane.b32.xlu1 %v10512_v30, %s8846_s26 }
 0x9cb   : > { %v3742_v38 = vmul.f32 1.442695, %v3728_v13 }
 0x9cc   : > { %v8488_v62 = vpop.permute.xlu1 %8487 }
 0x9cd   : > { %8641 = vpow2.f32 %v3742_v38  ;;  %v8490_v25 = vunpack.i.h.bf16 %v8488_v62  ;;  %v8489_v33 = vunpack.i.l.bf16 %v8488_v62 }
 0x9ce   : > { %3953 = vrot.lane.b32.xlu1 %v10521_v12, %s8846_s26 }
 0x9cf   : > { %v8073_v3 = vpack.c.bf16 %v8490_v25, %v8489_v33 }
 0x9d1   : > { %8074 = vmatprep.subr.bf16.mxu0 %v8073_v3 }
 0x9d2   : > { %8076 = vmatpush3.bf16.msra.mxu0 %v8073_v3 }
 0x9d7   : > { %v8642_v63 = vpop.eup %8641 }
 0x9d8   : > { %v3764_v47 = vsel %vm2208_vm11, %v8642_v63, 0.0 }
 0x9d9   : > { %3765 = vadd.xlane.f32.xlu0 %v3764_v47 }
 0x9ef   : > { %8497 = vrot.lane.b32.xlu0 %v10509_v39, %s8850_s10  ;;  %s12258_s10 = sld [smem:[#allocation12_spill]] }
 0x9f3   : > { %3943 = vrot.lane.b32.xlu0 %v10505_v15, %s8846_s26 }
 0x9f7   : > { %3947 = vrot.lane.b32.xlu0 %v10514_v48, %s8846_s26 }
 0x9fb   : > { %3951 = vrot.lane.b32.xlu0 %v10523_v45, %s8846_s26  ;;  %s12255_s26 = sld [smem:[#allocation5_spill]] }
 0x9fc   : > { %v3751_v58 = vpop.xlane.xlu0 %3750 }
 0x9fd   : > { %8643 = vrcp.f32 %v3751_v58  ;;  %v3748_v9 = vpop.xlane.xlu1 %3747 }
 0x9fe   : > { %8645 = vrcp.f32 %v3748_v9 }
 0xa01   : > { %v8493_v11 = vpop.permute.xlu1 %8492 }
 0xa02   : > { %v8495_v4 = vunpack.i.h.bf16 %v8493_v11  ;;  %v8494_v49 = vunpack.i.l.bf16 %v8493_v11 }
 0xa04   : > { %v8077_v27 = vpack.c.bf16 %v8495_v4, %v8494_v49 }
 0xa05   : > { %v3754_v53 = vpop.xlane.xlu0 %3753 }
 0xa06   : > { %8647 = vrcp.f32 %v3754_v53  ;;  %8079 = vmatprep.subr.msk.bf16.mxu0 %vm10532_vm1, %v8077_v27 }
 0xa07   : > { %v8644_v21 = vpop.eup %8643 }
 0xa08   : > { %v8646_v2 = vpop.eup %8645  ;;  %v3779_v38 = vmul.f32 %v8644_v21, %v10594_v19 }
 0xa09   : > { %v3778_v13 = vmul.f32 %v8646_v2, %v10596_v23  ;;  %v3763_v33 = vpop.xlane.xlu0 %3762 }
 0xa0b   : > { %7658 = vmatprep.mubr.msk.f32.mxu0 %vm2208_vm11, %v3778_v13 }
 0xa0c   : > { %7659 = vmatmul.mubr.msk.f32.vlgmr.msra.gmra.mrb[32].mxu0 %vm2208_vm11, %v3779_v38 }
 0xa0d   : > { %8082 = vmatpush3.bf16.xpose.msk.msra.mxu0 %vm10532_vm1, %v8077_v27 }
 0xa10   : > { %v8648_v62 = vpop.eup %8647 }
 0xa11   : > { %v3780_v25 = vmul.f32 %v8648_v62, %v10602_v6 }
 0xa13   : > { %7661 = vmatprep.mubr.msk.f32.mxu0 %vm2208_vm11, %v3780_v25 }
 0xa31   : > { %v3760_v3 = vpop.xlane.xlu0 %3759 }
 0xa32   : > { %8649 = vrcp.f32 %v3760_v3  ;;  %v3757_v47 = vpop.xlane.xlu1 %3756 }
 0xa33   : > { %8651 = vrcp.f32 %v3757_v47 }
 0xa34   : > { %8653 = vrcp.f32 %v3763_v33 }
 0xa35   : > { %v3769_v4 = vpop.xlane.xlu0 %3768 }
 0xa36   : > { %8655 = vrcp.f32 %v3769_v4  ;;  %v8503_v27 = vpop.permute.xlu1 %8502 }
 0xa37   : > { %v8505_v21 = vunpack.i.h.bf16 %v8503_v27  ;;  %v8504_v2 = vunpack.i.l.bf16 %v8503_v27 }
 0xa3a   : > { %v8508_v62 = vpop.permute.xlu1 %8507 }
 0xa3b   : > { %v8510_v3 = vunpack.i.h.bf16 %v8508_v62  ;;  %v8509_v47 = vunpack.i.l.bf16 %v8508_v62 }
 0xa3c   : > { %v8650_v23 = vpop.eup %8649 }
 0xa3d   : > { %v8652_v19 = vpop.eup %8651  ;;  %v3782_v11 = vmul.f32 %v8650_v23, %v10615_v7  ;;  %v8089_v7 = vpack.c.bf16 %v8505_v21, %v8504_v2 }
 0xa3e   : > { %v3781_v58 = vmul.f32 %v8652_v19, %v8636_v59  ;;  %v8654_v9 = vpop.eup %8653  ;;  %v3940_v19 = vpop.permute.xlu1 %3939 }
 0xa3f   : > { %v3783_v6 = vmul.f32 %v8654_v9, %v10606_v1 }
 0xa40   : > { %7662 = vmatmul.mubr.msk.f32.gmra.mrb[34].mxu0 %vm2208_vm11, %v3781_v58  ;;  %v8656_v25 = vpop.eup %8655  ;;  %v8095_v58 = vpack.c.bf16 %v8510_v3, %v8509_v47 }
 0xa41   : > { %7664 = vmatprep.mubr.msk.f32.mxu0 %vm2208_vm11, %v3782_v11  ;;  %v3785_v23 = vmul.f32 %v8656_v25, %v10619_v51 }
 0xa42   : > { %v3942_v9 = vpop.permute.xlu1 %3941 }
 0xa44   : > { %7665 = vmatmul.mubr.msk.f32.gmra.mrb[36].mxu0 %vm2208_vm11, %v3783_v6 }
 0xa46   : > { %v3946_v51 = vpop.permute.xlu1 %3945 }
 0xa4a   : > { %v3950_v6 = vpop.permute.xlu1 %3949 }
 0xa66   : > { %v3766_v49 = vpop.xlane.xlu0 %3765 }
 0xa67   : > { %8657 = vrcp.f32 %v3766_v49  ;;  %v3954_v49 = vpop.permute.xlu1 %3953 }
 0xa6a   : > { %v8498_v53 = vpop.permute.xlu0 %8497 }
 0xa6b   : > { %v8500_v59 = vunpack.i.h.bf16 %v8498_v53  ;;  %v8499_v13 = vunpack.i.l.bf16 %v8498_v53 }
 0xa6d   : > { %v8083_v38 = vpack.c.bf16 %v8500_v59, %v8499_v13 }
 0xa6f   : > { %8085 = vmatprep.subr.msk.bf16.mxu0 %vm10532_vm1, %v8083_v38 }
 0xa70   : > { %8088 = vmatpush3.bf16.xpose.msk.msra.mxu0 %vm10532_vm1, %v8083_v38 }
 0xa71   : > { %v8658_v1 = vpop.eup %8657  ;;  %8091 = vmatprep.subr.msk.bf16.mxu0 %vm10532_vm1, %v8089_v7 }
 0xa72   : > { %v3784_v33 = vmul.f32 %v8658_v1, %v8642_v63  ;;  %v3944_v63 = vpop.permute.xlu0 %3943 }
 0xa74   : > { %7667 = vmatprep.mubr.msk.f32.mxu0 %vm2208_vm11, %v3784_v33 }
 0xa75   : > { %7668 = vmatmul.mubr.msk.f32.gmra.mrb[38].mxu0 %vm2208_vm11, %v3785_v23 }
 0xa76   : > { %7686 = vmatprep.mubr.msk.f32.mxu0 %vm2145_vm5, %v3940_v19  ;;  %v3948_v11 = vpop.permute.xlu0 %3947 }
 0xa78   : > { %8094 = vmatpush3.bf16.xpose.msk.msra.mxu0 %vm10532_vm1, %v8089_v7 }
 0xa79   : > { %8097 = vmatprep.subr.msk.bf16.mxu0 %vm10532_vm1, %v8095_v58 }
 0xa7a   : > { %v3952_v4 = vpop.permute.xlu0 %3951 }
 0xa80   : > { %8100 = vmatpush3.bf16.xpose.msk.msra.mxu0 %vm10532_vm1, %v8095_v58 }
 0xa87   : > { %7687 = vmatmul.mubr.msk.f32.vlgmr.msra.gmra.mrb[40].mxu0 %vm2145_vm5, %v3942_v9 }
 0xa88   : > { %7689 = vmatprep.mubr.msk.f32.mxu0 %vm2145_vm5, %v3944_v63 }
 0xa8b   : > { %7690 = vmatmul.mubr.msk.f32.gmra.mrb[42].mxu0 %vm2145_vm5, %v3946_v51 }
 0xa8c   : > { %7692 = vmatprep.mubr.msk.f32.mxu0 %vm2145_vm5, %v3948_v11 }
 0xa8f   : > { %7693 = vmatmul.mubr.msk.f32.gmra.mrb[44].mxu0 %vm2145_vm5, %v3950_v6 }
 0xa90   : > { %7695 = vmatprep.mubr.msk.f32.mxu0 %vm2145_vm5, %v3952_v4 }
 0xa93   : > { %7696 = vmatmul.mubr.msk.f32.gmra.mrb[46].mxu0 %vm2145_vm5, %v3954_v49 }
 0xadf   : > { %v10686_v27 = vpop.f32.mrb[32].mxu0 }
 0xae0   : > { %v10688_v53 = vpop.f32.mrb[33].mxu0 }
 0xb13   : > { %v10690_v21 = vpop.f32.mrb[34].mxu0 }
 0xb14   : > { %v10692_v2 = vpop.f32.mrb[35].mxu0 }
 0xb17   : > { %v10694_v59 = vpop.f32.mrb[36].mxu0 }
 0xb18   : > { %v10696_v13 = vpop.f32.mrb[37].mxu0 }
 0xb48   : > { %v10698_v38 = vpop.f32.mrb[38].mxu0 }
 0xb49   : > { %v10700_v7 = vpop.f32.mrb[39].mxu0 }
 0xb5a   : > { %v7688_v62 = vpop.f32.mrb[40].mxu0 }
 0xb5b   : > { %v4069_v25 = vpop.f32.mrb[41].mxu0  ;;  %v4111_v1 = vsel %vm2208_vm11, %v7688_v62, -inf }
 0xb5c   : > { %4112 = vmax.xlane.f32.xlu1 %v4111_v1  ;;  %v4108_v33 = vsel %vm2208_vm11, %v4069_v25, -inf }
 0xb5d   : > { %4109 = vmax.xlane.f32.xlu0 %v4108_v33 }
 0xb5e   : > { %v10704_v3 = vpop.f32.mrb[42].mxu0 }
 0xb5f   : > { %v4079_v47 = vpop.f32.mrb[43].mxu0  ;;  %v4117_v23 = vsel %vm2208_vm11, %v10704_v3, -inf }
 0xb60   : > { %v4114_v9 = vsel %vm2208_vm11, %v4079_v47, -inf }
 0xb61   : > { %4118 = vmax.xlane.f32.xlu0 %v4117_v23 }
 0xb62   : > { %v7694_v19 = vpop.f32.mrb[44].mxu0 }
 0xb63   : > { %v10708_v58 = vpop.f32.mrb[45].mxu0  ;;  %v4123_v11 = vsel %vm2208_vm11, %v7694_v19, -inf }
 0xb64   : > { %v4120_v4 = vsel %vm2208_vm11, %v10708_v58, -inf }
 0xb65   : > { %4115 = vmax.xlane.f32.xlu0 %v4114_v9 }
 0xb66   : > { %v7697_v63 = vpop.f32.mrb[46].mxu0 }
 0xb67   : > { %v10711_v51 = vpop.f32.mrb[47].mxu0  ;;  %v4129_v6 = vsel %vm2208_vm11, %v7697_v63, -inf }
 0xb68   : > { %v4126_v49 = vsel %vm2208_vm11, %v10711_v51, -inf }
 0xb69   : > { %4124 = vmax.xlane.f32.xlu0 %v4123_v11 }
 0xb6d   : > { %8512 = vrot.lane.b32.xlu1 %v10500_v54, %s8839_s7  ;;  %4130 = vmax.xlane.f32.xlu0 %v4129_v6 }
 0xb83   : > { %8517 = vrot.lane.b32.xlu0 %v10509_v39, %s8839_s7 }
 0xb91   : > { %4121 = vmax.xlane.f32.xlu1 %v4120_v4 }
 0xba2   : > { %8522 = vrot.lane.b32.xlu1 %v10518_v17, %s8839_s7 }
 0xbc6   : > { %4127 = vmax.xlane.f32.xlu1 %v4126_v49 }
 0xbd7   : > { %8527 = vrot.lane.b32.xlu1 %v10527_v41, %s8839_s7  ;;  %s8851_s7 = smov 104  }
 0xbe9   : > { %v4113_v1 = vpop.xlane.xlu1 %4112 }
 0xbea   : > { %v4133_v33 = vsub.f32 %v7688_v62, %v4113_v1  ;;  %v4110_v23 = vpop.xlane.xlu0 %4109 }
 0xbeb   : > { %v4132_v9 = vsub.f32 %v4069_v25, %v4110_v23 }
 0xbec   : > { %v4142_v11 = vmul.f32 1.442695, %v4133_v33 }
 0xbed   : > { %v4140_v6 = vmul.f32 1.442695, %v4132_v9  ;;  %v8513_v44 = vpop.permute.xlu1 %8512 }
 0xbee   : > { %8659 = vpow2.f32 %v4142_v11  ;;  %v8515_v60 = vunpack.i.h.bf16 %v8513_v44  ;;  %v8514_v4 = vunpack.i.l.bf16 %v8513_v44  ;;  %v4119_v0 = vpop.xlane.xlu0 %4118 }
 0xbef   : > { %8661 = vpow2.f32 %v4140_v6  ;;  %v4135_v9 = vsub.f32 %v10704_v3, %v4119_v0 }
 0xbf0   : > { %v8101_v18 = vpack.c.bf16 %v8515_v60, %v8514_v4 }
 0xbf1   : > { %v4146_v6 = vmul.f32 1.442695, %v4135_v9 }
 0xbf2   : > { %8102 = vmatprep.subr.bf16.mxu1 %v8101_v18  ;;  %v4116_v26 = vpop.xlane.xlu0 %4115 }
 0xbf3   : > { %v4134_v20 = vsub.f32 %v4079_v47, %v4116_v26  ;;  %8104 = vmatpush3.bf16.msra.mxu1 %v8101_v18 }
 0xbf5   : > { %v4144_v49 = vmul.f32 1.442695, %v4134_v20 }
 0xbf6   : > { %v4125_v16 = vpop.xlane.xlu0 %4124 }
 0xbf7   : > { %8663 = vpow2.f32 %v4144_v49  ;;  %v4137_v42 = vsub.f32 %v7694_v19, %v4125_v16 }
 0xbf8   : > { %v10727_v62 = vpop.eup %8659 }
 0xbf9   : > { %v10729_v25 = vpop.eup %8661  ;;  %v4150_v1 = vmul.f32 1.442695, %v4137_v42  ;;  %v4159_v33 = vsel %vm2208_vm11, %v10727_v62, 0.0 }
 0xbfa   : > { %4160 = vadd.xlane.f32.xlu0 %v4159_v33  ;;  %v4131_v44 = vpop.xlane.xlu0 %4130  ;;  %v4156_v60 = vsel %vm2208_vm11, %v10729_v25, 0.0 }
 0xbfb   : > { %8665 = vpow2.f32 %v4150_v1  ;;  %4157 = vadd.xlane.f32.xlu1 %v4156_v60  ;;  %v4139_v11 = vsub.f32 %v7697_v63, %v4131_v44 }
 0xbfc   : > { %8667 = vpow2.f32 %v4146_v6 }
 0xbfd   : > { %v4154_v1 = vmul.f32 1.442695, %v4139_v11 }
 0xbfe   : > { %v8518_v26 = vpop.permute.xlu0 %8517 }
 0xbff   : > { %v8520_v20 = vunpack.i.h.bf16 %v8518_v26  ;;  %v8519_v18 = vunpack.i.l.bf16 %v8518_v26 }
 0xc01   : > { %v10735_v47 = vpop.eup %8663  ;;  %v8105_v16 = vpack.c.bf16 %v8520_v20, %v8519_v18 }
 0xc02   : > { %v4162_v19 = vsel %vm2208_vm11, %v10735_v47, 0.0 }
 0xc03   : > { %4163 = vadd.xlane.f32.xlu0 %v4162_v19  ;;  %8106 = vmatprep.subr.bf16.mxu1 %v8105_v16 }
 0xc04   : > { %8108 = vmatpush3.bf16.msra.mxu1 %v8105_v16 }
 0xc05   : > { %v10739_v42 = vpop.eup %8665 }
 0xc06   : > { %v4171_v23 = vsel %vm2208_vm11, %v10739_v42, 0.0  ;;  %v8668_v16 = vpop.eup %8667 }
 0xc07   : > { %4172 = vadd.xlane.f32.xlu0 %v4171_v23 }
 0xc0c   : > { %8532 = vrot.lane.b32.xlu1 %v10500_v54, %s8848_s11 }
 0xc1e   : > { %v4122_v4 = vpop.xlane.xlu1 %4121 }
 0xc1f   : > { %v4136_v49 = vsub.f32 %v10708_v58, %v4122_v4  ;;  %v4165_v58 = vsel %vm2208_vm11, %v8668_v16, 0.0 }
 0xc21   : > { %v4148_v33 = vmul.f32 1.442695, %v4136_v49 }
 0xc22   : > { %v8523_v60 = vpop.permute.xlu1 %8522 }
 0xc23   : > { %8669 = vpow2.f32 %v4148_v33  ;;  %v8525_v26 = vunpack.i.h.bf16 %v8523_v60  ;;  %v8524_v20 = vunpack.i.l.bf16 %v8523_v60 }
 0xc24   : > { %8671 = vpow2.f32 %v4154_v1 }
 0xc25   : > { %v8109_v18 = vpack.c.bf16 %v8525_v26, %v8524_v20 }
 0xc27   : > { %8110 = vmatprep.subr.bf16.mxu1 %v8109_v18 }
 0xc28   : > { %8112 = vmatpush3.bf16.msra.mxu1 %v8109_v18 }
 0xc2d   : > { %v10747_v19 = vpop.eup %8669 }
 0xc2e   : > { %v4168_v0 = vsel %vm2208_vm11, %v10747_v19, 0.0  ;;  %v10751_v3 = vpop.eup %8671 }
 0xc2f   : > { %4169 = vadd.xlane.f32.xlu0 %v4168_v0  ;;  %v4177_v63 = vsel %vm2208_vm11, %v10751_v3, 0.0 }
 0xc30   : > { %4166 = vadd.xlane.f32.xlu1 %v4165_v58 }
 0xc33   : > { %4178 = vadd.xlane.f32.xlu0 %v4177_v63 }
 0xc41   : > { %8542 = vrot.lane.b32.xlu1 %v10518_v17, %s8848_s11 }
 0xc45   : > { %8547 = vrot.lane.b32.xlu1 %v10527_v41, %s8848_s11 }
 0xc49   : > { %4349 = vrot.lane.b32.xlu1 %v10494_v29, %s8845_s0 }
 0xc4d   : > { %4351 = vrot.lane.b32.xlu1 %v10492_v28, %s8845_s0 }
 0xc51   : > { %4355 = vrot.lane.b32.xlu1 %v10503_v40, %s8845_s0 }
 0xc53   : > { %v4128_v44 = vpop.xlane.xlu1 %4127 }
 0xc54   : > { %v4138_v23 = vsub.f32 %v10711_v51, %v4128_v44 }
 0xc55   : > { %4359 = vrot.lane.b32.xlu1 %v10512_v30, %s8845_s0 }
 0xc56   : > { %v4152_v9 = vmul.f32 1.442695, %v4138_v23 }
 0xc57   : > { %v8528_v11 = vpop.permute.xlu1 %8527 }
 0xc58   : > { %8673 = vpow2.f32 %v4152_v9  ;;  %v8530_v6 = vunpack.i.h.bf16 %v8528_v11  ;;  %v8529_v4 = vunpack.i.l.bf16 %v8528_v11 }
 0xc59   : > { %4363 = vrot.lane.b32.xlu1 %v10521_v12, %s8845_s0 }
 0xc5a   : > { %v8113_v49 = vpack.c.bf16 %v8530_v6, %v8529_v4 }
 0xc5c   : > { %8114 = vmatprep.subr.bf16.mxu1 %v8113_v49 }
 0xc5d   : > { %8116 = vmatpush3.bf16.msra.mxu1 %v8113_v49 }
 0xc62   : > { %v8674_v1 = vpop.eup %8673 }
 0xc63   : > { %v4174_v33 = vsel %vm2208_vm11, %v8674_v1, 0.0 }
 0xc64   : > { %4175 = vadd.xlane.f32.xlu0 %v4174_v33 }
 0xc7a   : > { %8537 = vrot.lane.b32.xlu0 %v10509_v39, %s8848_s11  ;;  %s12241_s11 = smov 16  }
 0xc7e   : > { %4353 = vrot.lane.b32.xlu0 %v10505_v15, %s8845_s0 }
 0xc82   : > { %4357 = vrot.lane.b32.xlu0 %v10514_v48, %s8845_s0 }
 0xc86   : > { %4361 = vrot.lane.b32.xlu0 %v10523_v45, %s8845_s0  ;;  %s12254_s0 = sld [smem:[#allocation13_spill]] }
 0xc87   : > { %v4161_v51 = vpop.xlane.xlu0 %4160 }
 0xc88   : > { %8675 = vrcp.f32 %v4161_v51  ;;  %v4158_v60 = vpop.xlane.xlu1 %4157 }
 0xc89   : > { %8677 = vrcp.f32 %v4158_v60 }
 0xc8c   : > { %v8533_v26 = vpop.permute.xlu1 %8532 }
 0xc8d   : > { %v8535_v20 = vunpack.i.h.bf16 %v8533_v26  ;;  %v8534_v18 = vunpack.i.l.bf16 %v8533_v26 }
 0xc8f   : > { %v8117_v0 = vpack.c.bf16 %v8535_v20, %v8534_v18 }
 0xc90   : > { %v4164_v58 = vpop.xlane.xlu0 %4163 }
 0xc91   : > { %8679 = vrcp.f32 %v4164_v58  ;;  %8119 = vmatprep.subr.msk.bf16.mxu1 %vm10532_vm1, %v8117_v0 }
 0xc92   : > { %v8676_v63 = vpop.eup %8675 }
 0xc93   : > { %v8678_v44 = vpop.eup %8677  ;;  %v4189_v9 = vmul.f32 %v8676_v63, %v10727_v62 }
 0xc94   : > { %v4188_v23 = vmul.f32 %v8678_v44, %v10729_v25  ;;  %v4173_v4 = vpop.xlane.xlu0 %4172 }
 0xc96   : > { %7714 = vmatprep.mubr.msk.f32.mxu1 %vm2208_vm11, %v4188_v23 }
 0xc97   : > { %7715 = vmatmul.mubr.msk.f32.vlgmr.msra.gmra.mrb[32].mxu1 %vm2208_vm11, %v4189_v9 }
 0xc98   : > { %8122 = vmatpush3.bf16.xpose.msk.msra.mxu1 %vm10532_vm1, %v8117_v0 }
 0xc9b   : > { %v8680_v11 = vpop.eup %8679 }
 0xc9c   : > { %v4190_v6 = vmul.f32 %v8680_v11, %v10735_v47 }
 0xc9e   : > { %7717 = vmatprep.mubr.msk.f32.mxu1 %vm2208_vm11, %v4190_v6 }
 0xcbc   : > { %v4170_v49 = vpop.xlane.xlu0 %4169 }
 0xcbd   : > { %8681 = vrcp.f32 %v4170_v49  ;;  %v4167_v33 = vpop.xlane.xlu1 %4166 }
 0xcbe   : > { %8683 = vrcp.f32 %v4167_v33 }
 0xcbf   : > { %8685 = vrcp.f32 %v4173_v4 }
 0xcc0   : > { %v4179_v20 = vpop.xlane.xlu0 %4178 }
 0xcc1   : > { %8687 = vrcp.f32 %v4179_v20  ;;  %v8543_v0 = vpop.permute.xlu1 %8542 }
 0xcc2   : > { %v8545_v63 = vunpack.i.h.bf16 %v8543_v0  ;;  %v8544_v44 = vunpack.i.l.bf16 %v8543_v0 }
 0xcc5   : > { %v8548_v11 = vpop.permute.xlu1 %8547 }
 0xcc6   : > { %v8550_v49 = vunpack.i.h.bf16 %v8548_v11  ;;  %v8549_v33 = vunpack.i.l.bf16 %v8548_v11 }
 0xcc7   : > { %v8682_v25 = vpop.eup %8681 }
 0xcc8   : > { %v8684_v62 = vpop.eup %8683  ;;  %v4192_v26 = vmul.f32 %v8682_v25, %v10747_v19  ;;  %v8129_v19 = vpack.c.bf16 %v8545_v63, %v8544_v44 }
 0xcc9   : > { %v4191_v51 = vmul.f32 %v8684_v62, %v8668_v16  ;;  %v8686_v60 = vpop.eup %8685  ;;  %v4350_v62 = vpop.permute.xlu1 %4349 }
 0xcca   : > { %v4193_v47 = vmul.f32 %v8686_v60, %v10739_v42 }
 0xccb   : > { %7718 = vmatmul.mubr.msk.f32.gmra.mrb[34].mxu1 %vm2208_vm11, %v4191_v51  ;;  %v8688_v6 = vpop.eup %8687  ;;  %v8135_v51 = vpack.c.bf16 %v8550_v49, %v8549_v33 }
 0xccc   : > { %7720 = vmatprep.mubr.msk.f32.mxu1 %vm2208_vm11, %v4192_v26  ;;  %v4195_v25 = vmul.f32 %v8688_v6, %v10751_v3 }
 0xccd   : > { %v4352_v60 = vpop.permute.xlu1 %4351 }
 0xccf   : > { %7721 = vmatmul.mubr.msk.f32.gmra.mrb[36].mxu1 %vm2208_vm11, %v4193_v47 }
 0xcd1   : > { %v4356_v3 = vpop.permute.xlu1 %4355 }
 0xcd5   : > { %v4360_v47 = vpop.permute.xlu1 %4359 }
 0xcf1   : > { %v4176_v18 = vpop.xlane.xlu0 %4175 }
 0xcf2   : > { %8689 = vrcp.f32 %v4176_v18  ;;  %v4364_v18 = vpop.permute.xlu1 %4363 }
 0xcf5   : > { %v8538_v58 = vpop.permute.xlu0 %8537 }
 0xcf6   : > { %v8540_v16 = vunpack.i.h.bf16 %v8538_v58  ;;  %v8539_v23 = vunpack.i.l.bf16 %v8538_v58 }
 0xcf8   : > { %v8123_v9 = vpack.c.bf16 %v8540_v16, %v8539_v23 }
 0xcfa   : > { %8125 = vmatprep.subr.msk.bf16.mxu1 %vm10532_vm1, %v8123_v9 }
 0xcfb   : > { %8128 = vmatpush3.bf16.xpose.msk.msra.mxu1 %vm10532_vm1, %v8123_v9 }
 0xcfc   : > { %v8690_v42 = vpop.eup %8689  ;;  %8131 = vmatprep.subr.msk.bf16.mxu1 %vm10532_vm1, %v8129_v19 }
 0xcfd   : > { %v4194_v4 = vmul.f32 %v8690_v42, %v8674_v1  ;;  %v4354_v1 = vpop.permute.xlu0 %4353 }
 0xcff   : > { %7723 = vmatprep.mubr.msk.f32.mxu1 %vm2208_vm11, %v4194_v4 }
 0xd00   : > { %7724 = vmatmul.mubr.msk.f32.gmra.mrb[38].mxu1 %vm2208_vm11, %v4195_v25 }
 0xd01   : > { %7742 = vmatprep.mubr.msk.f32.mxu1 %vm2145_vm5, %v4350_v62  ;;  %v4358_v26 = vpop.permute.xlu0 %4357 }
 0xd03   : > { %8134 = vmatpush3.bf16.xpose.msk.msra.mxu1 %vm10532_vm1, %v8129_v19 }
 0xd04   : > { %8137 = vmatprep.subr.msk.bf16.mxu1 %vm10532_vm1, %v8135_v51 }
 0xd05   : > { %v4362_v20 = vpop.permute.xlu0 %4361 }
 0xd0b   : > { %8140 = vmatpush3.bf16.xpose.msk.msra.mxu1 %vm10532_vm1, %v8135_v51 }
 0xd12   : > { %7743 = vmatmul.mubr.msk.f32.vlgmr.msra.gmra.mrb[40].mxu1 %vm2145_vm5, %v4352_v60 }
 0xd13   : > { %7745 = vmatprep.mubr.msk.f32.mxu1 %vm2145_vm5, %v4354_v1 }
 0xd16   : > { %7746 = vmatmul.mubr.msk.f32.gmra.mrb[42].mxu1 %vm2145_vm5, %v4356_v3 }
 0xd17   : > { %7748 = vmatprep.mubr.msk.f32.mxu1 %vm2145_vm5, %v4358_v26 }
 0xd1a   : > { %7749 = vmatmul.mubr.msk.f32.gmra.mrb[44].mxu1 %vm2145_vm5, %v4360_v47 }
 0xd1b   : > { %7751 = vmatprep.mubr.msk.f32.mxu1 %vm2145_vm5, %v4362_v20 }
 0xd1e   : > { %7752 = vmatmul.mubr.msk.f32.gmra.mrb[46].mxu1 %vm2145_vm5, %v4364_v18 }
 0xd6a   : > { %v10818_v0 = vpop.f32.mrb[32].mxu1 }
 0xd6b   : > { %v10820_v58 = vpop.f32.mrb[33].mxu1 }
 0xd9e   : > { %v10822_v63 = vpop.f32.mrb[34].mxu1 }
 0xd9f   : > { %v10824_v44 = vpop.f32.mrb[35].mxu1 }
 0xda2   : > { %v10826_v16 = vpop.f32.mrb[36].mxu1 }
 0xda3   : > { %v10828_v23 = vpop.f32.mrb[37].mxu1 }
 0xdd3   : > { %v10830_v9 = vpop.f32.mrb[38].mxu1 }
 0xdd4   : > { %v10832_v19 = vpop.f32.mrb[39].mxu1 }
 0xde5   : > { %v7744_v11 = vpop.f32.mrb[40].mxu1 }
 0xde6   : > { %v4479_v6 = vpop.f32.mrb[41].mxu1  ;;  %v4521_v42 = vsel %vm2208_vm11, %v7744_v11, -inf }
 0xde7   : > { %4522 = vmax.xlane.f32.xlu1 %v4521_v42  ;;  %v4518_v4 = vsel %vm2208_vm11, %v4479_v6, -inf }
 0xde8   : > { %4519 = vmax.xlane.f32.xlu0 %v4518_v4 }
 0xde9   : > { %v10836_v49 = vpop.f32.mrb[42].mxu1 }
 0xdea   : > { %v4489_v33 = vpop.f32.mrb[43].mxu1  ;;  %v4527_v25 = vsel %vm2208_vm11, %v10836_v49, -inf }
 0xdeb   : > { %v4524_v60 = vsel %vm2208_vm11, %v4489_v33, -inf }
 0xdec   : > { %4528 = vmax.xlane.f32.xlu0 %v4527_v25 }
 0xded   : > { %v7750_v62 = vpop.f32.mrb[44].mxu1 }
 0xdee   : > { %v10840_v51 = vpop.f32.mrb[45].mxu1  ;;  %v4533_v26 = vsel %vm2208_vm11, %v7750_v62, -inf }
 0xdef   : > { %v4530_v20 = vsel %vm2208_vm11, %v10840_v51, -inf }
 0xdf0   : > { %4525 = vmax.xlane.f32.xlu0 %v4524_v60 }
 0xdf1   : > { %v7753_v1 = vpop.f32.mrb[46].mxu1 }
 0xdf2   : > { %v10843_v3 = vpop.f32.mrb[47].mxu1  ;;  %v4539_v47 = vsel %vm2208_vm11, %v7753_v1, -inf }
 0xdf3   : > { %v4536_v18 = vsel %vm2208_vm11, %v10843_v3, -inf }
 0xdf4   : > { %4534 = vmax.xlane.f32.xlu0 %v4533_v26 }
 0xdf8   : > { %8552 = vrot.lane.b32.xlu1 %v10500_v54, %s8843_s16  ;;  %4540 = vmax.xlane.f32.xlu0 %v4539_v47 }
 0xe0e   : > { %8557 = vrot.lane.b32.xlu0 %v10509_v39, %s8843_s16 }
 0xe1c   : > { %4531 = vmax.xlane.f32.xlu1 %v4530_v20 }
 0xe2d   : > { %8562 = vrot.lane.b32.xlu1 %v10518_v17, %s8843_s16 }
 0xe51   : > { %4537 = vmax.xlane.f32.xlu1 %v4536_v18 }
 0xe62   : > { %8567 = vrot.lane.b32.xlu1 %v10527_v41, %s8843_s16  ;;  %s12244_s16 = sld [smem:[#allocation4_spill]] }
 0xe74   : > { %v4523_v42 = vpop.xlane.xlu1 %4522 }
 0xe75   : > { %v4543_v4 = vsub.f32 %v7744_v11, %v4523_v42  ;;  %v4520_v25 = vpop.xlane.xlu0 %4519 }
 0xe76   : > { %v4542_v60 = vsub.f32 %v4479_v6, %v4520_v25 }
 0xe77   : > { %v4552_v26 = vmul.f32 1.442695, %v4543_v4 }
 0xe78   : > { %v4550_v47 = vmul.f32 1.442695, %v4542_v60  ;;  %v8553_v34 = vpop.permute.xlu1 %8552 }
 0xe79   : > { %8691 = vpow2.f32 %v4552_v26  ;;  %v8555_v35 = vunpack.i.h.bf16 %v8553_v34  ;;  %v8554_v20 = vunpack.i.l.bf16 %v8553_v34  ;;  %v4529_v50 = vpop.xlane.xlu0 %4528 }
 0xe7a   : > { %8693 = vpow2.f32 %v4550_v47  ;;  %v4545_v60 = vsub.f32 %v10836_v49, %v4529_v50 }
 0xe7b   : > { %v8141_v55 = vpack.c.bf16 %v8555_v35, %v8554_v20 }
 0xe7c   : > { %v4556_v47 = vmul.f32 1.442695, %v4545_v60 }
 0xe7d   : > { %8142 = vmatprep.subr.bf16.mxu0 %v8141_v55  ;;  %v4526_v22 = vpop.xlane.xlu0 %4525 }
 0xe7e   : > { %v4544_v46 = vsub.f32 %v4489_v33, %v4526_v22  ;;  %8144 = vmatpush3.bf16.msra.mxu0 %v8141_v55 }
 0xe80   : > { %v4554_v18 = vmul.f32 1.442695, %v4544_v46 }
 0xe81   : > { %v4535_v31 = vpop.xlane.xlu0 %4534 }
 0xe82   : > { %8695 = vpow2.f32 %v4554_v18  ;;  %v4547_v61 = vsub.f32 %v7750_v62, %v4535_v31 }
 0xe83   : > { %v10859_v11 = vpop.eup %8691 }
 0xe84   : > { %v10861_v6 = vpop.eup %8693  ;;  %v4560_v42 = vmul.f32 1.442695, %v4547_v61  ;;  %v4569_v4 = vsel %vm2208_vm11, %v10859_v11, 0.0 }
 0xe85   : > { %4570 = vadd.xlane.f32.xlu0 %v4569_v4  ;;  %v4541_v34 = vpop.xlane.xlu0 %4540  ;;  %v4566_v35 = vsel %vm2208_vm11, %v10861_v6, 0.0 }
 0xe86   : > { %8697 = vpow2.f32 %v4560_v42  ;;  %4567 = vadd.xlane.f32.xlu1 %v4566_v35  ;;  %v4549_v26 = vsub.f32 %v7753_v1, %v4541_v34 }
 0xe87   : > { %8699 = vpow2.f32 %v4556_v47 }
 0xe88   : > { %v4564_v42 = vmul.f32 1.442695, %v4549_v26 }
 0xe89   : > { %v8558_v55 = vpop.permute.xlu0 %8557 }
 0xe8a   : > { %v8560_v46 = vunpack.i.h.bf16 %v8558_v55  ;;  %v8559_v22 = vunpack.i.l.bf16 %v8558_v55 }
 0xe8c   : > { %v10867_v33 = vpop.eup %8695  ;;  %v8145_v31 = vpack.c.bf16 %v8560_v46, %v8559_v22 }
 0xe8d   : > { %v4572_v62 = vsel %vm2208_vm11, %v10867_v33, 0.0 }
 0xe8e   : > { %4573 = vadd.xlane.f32.xlu0 %v4572_v62  ;;  %8146 = vmatprep.subr.bf16.mxu0 %v8145_v31 }
 0xe8f   : > { %8148 = vmatpush3.bf16.msra.mxu0 %v8145_v31 }
 0xe90   : > { %v10871_v61 = vpop.eup %8697 }
 0xe91   : > { %v4581_v25 = vsel %vm2208_vm11, %v10871_v61, 0.0  ;;  %v10879_v31 = vpop.eup %8699 }
 0xe92   : > { %4582 = vadd.xlane.f32.xlu0 %v4581_v25 }
 0xe97   : > { %8572 = vrot.lane.b32.xlu1 %v10500_v54, %s8847_s28 }
 0xea9   : > { %v4532_v20 = vpop.xlane.xlu1 %4531 }
 0xeaa   : > { %v4546_v18 = vsub.f32 %v10840_v51, %v4532_v20  ;;  %v4575_v51 = vsel %vm2208_vm11, %v10879_v31, 0.0 }
 0xeac   : > { %v4558_v4 = vmul.f32 1.442695, %v4546_v18 }
 0xead   : > { %v8563_v35 = vpop.permute.xlu1 %8562 }
 0xeae   : > { %8701 = vpow2.f32 %v4558_v4  ;;  %v8565_v55 = vunpack.i.h.bf16 %v8563_v35  ;;  %v8564_v46 = vunpack.i.l.bf16 %v8563_v35 }
 0xeaf   : > { %8703 = vpow2.f32 %v4564_v42 }
 0xeb0   : > { %v8149_v22 = vpack.c.bf16 %v8565_v55, %v8564_v46 }
 0xeb2   : > { %8150 = vmatprep.subr.bf16.mxu0 %v8149_v22 }
 0xeb3   : > { %8152 = vmatpush3.bf16.msra.mxu0 %v8149_v22 }
 0xeb8   : > { %v10881_v62 = vpop.eup %8701 }
 0xeb9   : > { %v4578_v50 = vsel %vm2208_vm11, %v10881_v62, 0.0  ;;  %v10885_v49 = vpop.eup %8703 }
 0xeba   : > { %4579 = vadd.xlane.f32.xlu0 %v4578_v50  ;;  %v4587_v1 = vsel %vm2208_vm11, %v10885_v49, 0.0 }
 0xebb   : > { %4576 = vadd.xlane.f32.xlu1 %v4575_v51 }
 0xebe   : > { %4588 = vadd.xlane.f32.xlu0 %v4587_v1 }
 0xecc   : > { %8582 = vrot.lane.b32.xlu1 %v10518_v17, %s8847_s28 }
 0xed0   : > { %8587 = vrot.lane.b32.xlu1 %v10527_v41, %s8847_s28 }
 0xed4   : > { %4759 = vrot.lane.b32.xlu1 %v10494_v29, %s8851_s7 }
 0xed8   : > { %4761 = vrot.lane.b32.xlu1 %v10492_v28, %s8851_s7 }
 0xedc   : > { %4765 = vrot.lane.b32.xlu1 %v10503_v40, %s8851_s7 }
 0xede   : > { %v4538_v34 = vpop.xlane.xlu1 %4537 }
 0xedf   : > { %v4548_v25 = vsub.f32 %v10843_v3, %v4538_v34 }
 0xee0   : > { %4769 = vrot.lane.b32.xlu1 %v10512_v30, %s8851_s7 }
 0xee1   : > { %v4562_v60 = vmul.f32 1.442695, %v4548_v25 }
 0xee2   : > { %v8568_v26 = vpop.permute.xlu1 %8567 }
 0xee3   : > { %8705 = vpow2.f32 %v4562_v60  ;;  %v8570_v47 = vunpack.i.h.bf16 %v8568_v26  ;;  %v8569_v20 = vunpack.i.l.bf16 %v8568_v26 }
 0xee4   : > { %4773 = vrot.lane.b32.xlu1 %v10521_v12, %s8851_s7 }
 0xee5   : > { %v8153_v18 = vpack.c.bf16 %v8570_v47, %v8569_v20 }
 0xee7   : > { %8154 = vmatprep.subr.bf16.mxu0 %v8153_v18 }
 0xee8   : > { %8156 = vmatpush3.bf16.msra.mxu0 %v8153_v18 }
 0xeed   : > { %v8706_v29 = vpop.eup %8705 }
 0xeee   : > { %v4584_v28 = vsel %vm2208_vm11, %v8706_v29, 0.0 }
 0xeef   : > { %4585 = vadd.xlane.f32.xlu0 %v4584_v28 }
 0xf05   : > { %8577 = vrot.lane.b32.xlu0 %v10509_v39, %s8847_s28  ;;  %s12256_s28 = sld [smem:[#allocation6_spill]] }
 0xf09   : > { %4763 = vrot.lane.b32.xlu0 %v10505_v15, %s8851_s7 }
 0xf0d   : > { %4767 = vrot.lane.b32.xlu0 %v10514_v48, %s8851_s7 }
 0xf11   : > { %4771 = vrot.lane.b32.xlu0 %v10523_v45, %s8851_s7  ;;  %s12263_s7 = sld [smem:[#allocation9_spill]] }
 0xf12   : > { %v4571_v40 = vpop.xlane.xlu0 %4570 }
 0xf13   : > { %8707 = vrcp.f32 %v4571_v40  ;;  %v4568_v30 = vpop.xlane.xlu1 %4567 }
 0xf14   : > { %8709 = vrcp.f32 %v4568_v30 }
 0xf17   : > { %v8573_v12 = vpop.permute.xlu1 %8572 }
 0xf18   : > { %v8575_v3 = vunpack.i.h.bf16 %v8573_v12  ;;  %v8574_v42 = vunpack.i.l.bf16 %v8573_v12 }
 0xf1a   : > { %v8157_v4 = vpack.c.bf16 %v8575_v3, %v8574_v42 }
 0xf1b   : > { %v4574_v35 = vpop.xlane.xlu0 %4573 }
 0xf1c   : > { %8711 = vrcp.f32 %v4574_v35  ;;  %8159 = vmatprep.subr.msk.bf16.mxu0 %vm10532_vm1, %v8157_v4 }
 0xf1d   : > { %v8708_v55 = vpop.eup %8707 }
 0xf1e   : > { %v8710_v46 = vpop.eup %8709  ;;  %v4599_v48 = vmul.f32 %v8708_v55, %v10859_v11 }
 0xf1f   : > { %v4598_v15 = vmul.f32 %v8710_v46, %v10861_v6  ;;  %v4583_v50 = vpop.xlane.xlu0 %4582 }
 0xf21   : > { %7770 = vmatprep.mubr.msk.f32.mxu0 %vm2208_vm11, %v4598_v15 }
 0xf22   : > { %7771 = vmatmul.mubr.msk.f32.vlgmr.msra.gmra.mrb[48].mxu0 %vm2208_vm11, %v4599_v48 }
 0xf23   : > { %8162 = vmatpush3.bf16.xpose.msk.msra.mxu0 %vm10532_vm1, %v8157_v4 }
 0xf26   : > { %v8712_v45 = vpop.eup %8711 }
 0xf27   : > { %v4600_v22 = vmul.f32 %v8712_v45, %v10867_v33 }
 0xf29   : > { %7773 = vmatprep.mubr.msk.f32.mxu0 %vm2208_vm11, %v4600_v22 }
 0xf47   : > { %v4580_v51 = vpop.xlane.xlu0 %4579 }
 0xf48   : > { %8713 = vrcp.f32 %v4580_v51  ;;  %v4577_v1 = vpop.xlane.xlu1 %4576 }
 0xf49   : > { %8715 = vrcp.f32 %v4577_v1 }
 0xf4a   : > { %8717 = vrcp.f32 %v4583_v50 }
 0xf4b   : > { %v4589_v26 = vpop.xlane.xlu0 %4588 }
 0xf4c   : > { %8719 = vrcp.f32 %v4589_v26  ;;  %v8583_v20 = vpop.permute.xlu1 %8582 }
 0xf4d   : > { %v8585_v28 = vunpack.i.h.bf16 %v8583_v20  ;;  %v8584_v40 = vunpack.i.l.bf16 %v8583_v20 }
 0xf50   : > { %v8588_v3 = vpop.permute.xlu1 %8587 }
 0xf51   : > { %v8590_v35 = vunpack.i.h.bf16 %v8588_v3  ;;  %v8589_v55 = vunpack.i.l.bf16 %v8588_v3 }
 0xf52   : > { %v8714_v6 = vpop.eup %8713 }
 0xf53   : > { %v8716_v11 = vpop.eup %8715  ;;  %v4602_v60 = vmul.f32 %v8714_v6, %v10881_v62  ;;  %v8169_v62 = vpack.c.bf16 %v8585_v28, %v8584_v40  ;;  %v8175_v48 = vpack.c.bf16 %v8590_v35, %v8589_v55 }
 0xf54   : > { %v4601_v34 = vmul.f32 %v8716_v11, %v10879_v31  ;;  %v8718_v25 = vpop.eup %8717  ;;  %v4760_v15 = vpop.permute.xlu1 %4759 }
 0xf55   : > { %v4603_v33 = vmul.f32 %v8718_v25, %v10871_v61 }
 0xf56   : > { %7774 = vmatmul.mubr.msk.f32.gmra.mrb[50].mxu0 %vm2208_vm11, %v4601_v34  ;;  %v8720_v42 = vpop.eup %8719 }
 0xf57   : > { %7776 = vmatprep.mubr.msk.f32.mxu0 %vm2208_vm11, %v4602_v60  ;;  %v4605_v46 = vmul.f32 %v8720_v42, %v10885_v49 }
 0xf58   : > { %v4762_v45 = vpop.permute.xlu1 %4761 }
 0xf5a   : > { %7777 = vmatmul.mubr.msk.f32.gmra.mrb[52].mxu0 %vm2208_vm11, %v4603_v33 }
 0xf5c   : > { %v4766_v49 = vpop.permute.xlu1 %4765 }
 0xf60   : > { %v4770_v50 = vpop.permute.xlu1 %4769 }
 0xf64   : > { %v4774_v1 = vpop.permute.xlu1 %4773 }
 0xf7c   : > { %v4586_v47 = vpop.xlane.xlu0 %4585 }
 0xf7d   : > { %8721 = vrcp.f32 %v4586_v47 }
 0xf80   : > { %v8578_v18 = vpop.permute.xlu0 %8577 }
 0xf81   : > { %v8580_v31 = vunpack.i.h.bf16 %v8578_v18  ;;  %v8579_v30 = vunpack.i.l.bf16 %v8578_v18 }
 0xf83   : > { %v8163_v12 = vpack.c.bf16 %v8580_v31, %v8579_v30 }
 0xf85   : > { %8165 = vmatprep.subr.msk.bf16.mxu0 %vm10532_vm1, %v8163_v12 }
 0xf86   : > { %8168 = vmatpush3.bf16.xpose.msk.msra.mxu0 %vm10532_vm1, %v8163_v12 }
 0xf87   : > { %v8722_v61 = vpop.eup %8721  ;;  %8171 = vmatprep.subr.msk.bf16.mxu0 %vm10532_vm1, %v8169_v62 }
 0xf88   : > { %v4604_v4 = vmul.f32 %v8722_v61, %v8706_v29  ;;  %v4764_v29 = vpop.permute.xlu0 %4763 }
 0xf8a   : > { %7779 = vmatprep.mubr.msk.f32.mxu0 %vm2208_vm11, %v4604_v4 }
 0xf8b   : > { %7780 = vmatmul.mubr.msk.f32.gmra.mrb[54].mxu0 %vm2208_vm11, %v4605_v46 }
 0xf8c   : > { %7798 = vmatprep.mubr.msk.f32.mxu0 %vm2145_vm5, %v4760_v15  ;;  %v4768_v22 = vpop.permute.xlu0 %4767 }
 0xf8e   : > { %8174 = vmatpush3.bf16.xpose.msk.msra.mxu0 %vm10532_vm1, %v8169_v62 }
 0xf8f   : > { %8177 = vmatprep.subr.msk.bf16.mxu0 %vm10532_vm1, %v8175_v48 }
 0xf90   : > { %v4772_v51 = vpop.permute.xlu0 %4771 }
 0xf96   : > { %8180 = vmatpush3.bf16.xpose.msk.msra.mxu0 %vm10532_vm1, %v8175_v48 }
 0xf9d   : > { %7799 = vmatmul.mubr.msk.f32.vlgmr.msra.gmra.mrb[56].mxu0 %vm2145_vm5, %v4762_v45 }
 0xf9e   : > { %7801 = vmatprep.mubr.msk.f32.mxu0 %vm2145_vm5, %v4764_v29 }
 0xfa1   : > { %7802 = vmatmul.mubr.msk.f32.gmra.mrb[58].mxu0 %vm2145_vm5, %v4766_v49 }
 0xfa2   : > { %7804 = vmatprep.mubr.msk.f32.mxu0 %vm2145_vm5, %v4768_v22 }
 0xfa5   : > { %7805 = vmatmul.mubr.msk.f32.gmra.mrb[60].mxu0 %vm2145_vm5, %v4770_v50 }
 0xfa6   : > { %7807 = vmatprep.mubr.msk.f32.mxu0 %vm2145_vm5, %v4772_v51 }
 0xfa9   : > { %7808 = vmatmul.mubr.msk.f32.gmra.mrb[62].mxu0 %vm2145_vm5, %v4774_v1 }
 0xff5   : > { %v10946_v43 = vpop.f32.mrb[48].mxu0 }
 0xff6   : > { %v10948_v6 = vpop.f32.mrb[49].mxu0 }
0x1029   : > { %v10950_v11 = vpop.f32.mrb[50].mxu0 }
0x102a   : > { %v10952_v34 = vpop.f32.mrb[51].mxu0 }
0x102d   : > { %v10954_v25 = vpop.f32.mrb[52].mxu0 }
0x102e   : > { %v10956_v60 = vpop.f32.mrb[53].mxu0 }
0x105e   : > { %v10958_v33 = vpop.f32.mrb[54].mxu0 }
0x105f   : > { %v10960_v26 = vpop.f32.mrb[55].mxu0 }
0x1070   : > { %v7800_v47 = vpop.f32.mrb[56].mxu0 }
0x1071   : > { %v4889_v20 = vpop.f32.mrb[57].mxu0  ;;  %v4931_v18 = vsel %vm2208_vm11, %v7800_v47, -inf }
0x1072   : > { %4932 = vmax.xlane.f32.xlu1 %v4931_v18  ;;  %v4928_v28 = vsel %vm2208_vm11, %v4889_v20, -inf }
0x1073   : > { %4929 = vmax.xlane.f32.xlu0 %v4928_v28 }
0x1074   : > { %v7803_v40 = vpop.f32.mrb[58].mxu0 }
0x1075   : > { %v4899_v31 = vpop.f32.mrb[59].mxu0  ;;  %v4937_v3 = vsel %vm2208_vm11, %v7803_v40, -inf }
0x1076   : > { %v4934_v30 = vsel %vm2208_vm11, %v4899_v31, -inf }
0x1077   : > { %4935 = vmax.xlane.f32.xlu0 %v4934_v30 }
0x1078   : > { %v7806_v12 = vpop.f32.mrb[60].mxu0 }
0x1079   : > { %v4909_v62 = vpop.f32.mrb[61].mxu0  ;;  %v4943_v35 = vsel %vm2208_vm11, %v7806_v12, -inf }
0x107a   : > { %v4940_v42 = vsel %vm2208_vm11, %v4909_v62, -inf }
0x107b   : > { %4938 = vmax.xlane.f32.xlu0 %v4937_v3  ;;  %4941 = vmax.xlane.f32.xlu1 %v4940_v42 }
0x107c   : > { %v7809_v61 = vpop.f32.mrb[62].mxu0 }
0x107d   : > { %v4919_v4 = vpop.f32.mrb[63].mxu0  ;;  %v4949_v46 = vsel %vm2208_vm11, %v7809_v61, -inf }
0x107e   : > { %v4946_v55 = vsel %vm2208_vm11, %v4919_v4, -inf }
0x107f   : > { %4944 = vmax.xlane.f32.xlu0 %v4943_v35  ;;  %4947 = vmax.xlane.f32.xlu1 %v4946_v55 }
0x1083   : > { %4950 = vmax.xlane.f32.xlu0 %v4949_v46 }
0x1090   : > { %8592 = vrot.lane.b32.xlu1 %v10500_v54, %s8842_s15 }
0x10ff   : > { %v4933_v15 = vpop.xlane.xlu1 %4932 }
0x1100   : > { %v4953_v48 = vsub.f32 %v7800_v47, %v4933_v15  ;;  %v4930_v45 = vpop.xlane.xlu0 %4929 }
0x1101   : > { %v4952_v29 = vsub.f32 %v4889_v20, %v4930_v45 }
0x1102   : > { %v4962_v49 = vmul.f32 1.442695, %v4953_v48 }
0x1103   : > { %v4960_v22 = vmul.f32 1.442695, %v4952_v29 }
0x1104   : > { %8723 = vpow2.f32 %v4962_v49  ;;  %v4936_v50 = vpop.xlane.xlu0 %4935 }
0x1105   : > { %8725 = vpow2.f32 %v4960_v22  ;;  %v4954_v51 = vsub.f32 %v4899_v31, %v4936_v50 }
0x1107   : > { %v4964_v1 = vmul.f32 1.442695, %v4954_v51 }
0x1108   : > { %v4939_v18 = vpop.xlane.xlu0 %4938  ;;  %v4942_v28 = vpop.xlane.xlu1 %4941 }
0x1109   : > { %8727 = vpow2.f32 %v4964_v1  ;;  %v4955_v30 = vsub.f32 %v7803_v40, %v4939_v18  ;;  %v4956_v3 = vsub.f32 %v4909_v62, %v4942_v28 }
0x110b   : > { %v4966_v42 = vmul.f32 1.442695, %v4955_v30  ;;  %v4968_v35 = vmul.f32 1.442695, %v4956_v3 }
0x110c   : > { %v4945_v55 = vpop.xlane.xlu0 %4944  ;;  %v4948_v54 = vpop.xlane.xlu1 %4947 }
0x110d   : > { %8729 = vpow2.f32 %v4966_v42  ;;  %v4957_v47 = vsub.f32 %v7806_v12, %v4945_v55  ;;  %v4958_v48 = vsub.f32 %v4919_v4, %v4948_v54 }
0x110e   : > { %v10972_v46 = vpop.eup %8723  ;;  %8731 = vpow2.f32 %v4968_v35 }
0x110f   : > { %v10974_v20 = vpop.eup %8725  ;;  %v4970_v15 = vmul.f32 1.442695, %v4957_v47  ;;  %v4979_v31 = vsel %vm2208_vm11, %v10972_v46, 0.0  ;;  %v4972_v50 = vmul.f32 1.442695, %v4958_v48 }
0x1110   : > { %4980 = vadd.xlane.f32.xlu0 %v4979_v31  ;;  %v4951_v45 = vpop.xlane.xlu0 %4950  ;;  %v8593_v40 = vpop.permute.xlu1 %8592  ;;  %v4976_v62 = vsel %vm2208_vm11, %v10974_v20, 0.0 }
0x1111   : > { %8733 = vpow2.f32 %v4970_v15  ;;  %v4959_v29 = vsub.f32 %v7809_v61, %v4951_v45  ;;  %v8595_v49 = vunpack.i.h.bf16 %v8593_v40  ;;  %v8594_v12 = vunpack.i.l.bf16 %v8593_v40  ;;  %4977 = vadd.xlane.f32.xlu1 %v4976_v62 }
0x1113   : > { %v10980_v22 = vpop.eup %8727  ;;  %v4974_v51 = vmul.f32 1.442695, %v4959_v29  ;;  %v8181_v1 = vpack.c.bf16 %v8595_v49, %v8594_v12 }
0x1114   : > { %v4982_v4 = vsel %vm2208_vm11, %v10980_v22, 0.0 }
0x1115   : > { %8735 = vpow2.f32 %v4974_v51  ;;  %4983 = vadd.xlane.f32.xlu1 %v4982_v4  ;;  %8182 = vmatprep.subr.bf16.mxu1 %v8181_v1 }
0x1116   : > { %8184 = vmatpush3.bf16.msra.mxu1 %v8181_v1  ;;  %8737 = vpow2.f32 %v4972_v50 }
0x1117   : > { %v10984_v18 = vpop.eup %8729 }
0x1118   : > { %v10986_v28 = vpop.eup %8731  ;;  %v4985_v61 = vsel %vm2208_vm11, %v10984_v18, 0.0 }
0x1119   : > { %4986 = vadd.xlane.f32.xlu0 %v4985_v61  ;;  %v4988_v30 = vsel %vm2208_vm11, %v10986_v28, 0.0 }
0x111a   : > { %4989 = vadd.xlane.f32.xlu1 %v4988_v30 }
0x111b   : > { %v10992_v3 = vpop.eup %8733 }
0x111c   : > { %v4991_v42 = vsel %vm2208_vm11, %v10992_v3, 0.0 }
0x111d   : > { %4992 = vadd.xlane.f32.xlu0 %v4991_v42 }
0x111f   : > { %v10996_v35 = vpop.eup %8735 }
0x1120   : > { %v4997_v55 = vsel %vm2208_vm11, %v10996_v35, 0.0  ;;  %v11000_v54 = vpop.eup %8737 }
0x1121   : > { %4998 = vadd.xlane.f32.xlu0 %v4997_v55  ;;  %v4994_v47 = vsel %vm2208_vm11, %v11000_v54, 0.0 }
0x1125   : > { %4995 = vadd.xlane.f32.xlu0 %v4994_v47 }
0x112b   : > { %8602 = vrot.lane.b32.xlu1 %v10518_v17, %s8842_s15 }
0x112f   : > { %8607 = vrot.lane.b32.xlu1 %v10527_v41, %s8842_s15 }
0x1133   : > { %5177 = vrot.lane.b32.xlu1 %v10820_v58, %s8838_s2 }
0x1137   : > { %5179 = vrot.lane.b32.xlu1 %v10818_v0, %s8838_s2 }
0x113b   : > { %5211 = vrot.lane.b32.xlu1 %v10946_v43, %s12241_s11  ;;  %8597 = vrot.lane.b32.xlu0 %v10509_v39, %s8842_s15  ;;  %s12243_s15 = smov 24  }
0x113f   : > { %5183 = vrot.lane.b32.xlu1 %v10822_v63, %s8838_s2  ;;  %5209 = vrot.lane.b32.xlu0 %v10948_v6, %s12241_s11 }
0x1143   : > { %5215 = vrot.lane.b32.xlu1 %v10950_v11, %s12241_s11  ;;  %5181 = vrot.lane.b32.xlu0 %v10824_v44, %s8838_s2 }
0x1147   : > { %5187 = vrot.lane.b32.xlu1 %v10826_v16, %s8838_s2  ;;  %5213 = vrot.lane.b32.xlu0 %v10952_v34, %s12241_s11 }
0x114b   : > { %5219 = vrot.lane.b32.xlu1 %v10954_v25, %s12241_s11  ;;  %5185 = vrot.lane.b32.xlu0 %v10828_v23, %s8838_s2 }
0x114f   : > { %5191 = vrot.lane.b32.xlu1 %v10830_v9, %s8838_s2  ;;  %5217 = vrot.lane.b32.xlu0 %v10956_v60, %s12241_s11 }
0x1153   : > { %5223 = vrot.lane.b32.xlu1 %v10958_v33, %s12241_s11  ;;  %5189 = vrot.lane.b32.xlu0 %v10832_v19, %s8838_s2  ;;  %s12242_s2 = sld [smem:[#allocation3_spill]] }
0x1157   : > { %5221 = vrot.lane.b32.xlu0 %v10960_v26, %s12241_s11  ;;  %s12265_s11 = sld [smem:[#allocation21_spill]] }
0x1159   : > { %v5289_v61 = vld [vmem:[%s12242_s2] sm:$0xff]  ;;  %v5291_v30 = vld [vmem:[%s12242_s2 + $0x10] sm:$0xff]  ;;  %v5292_v55 = vld [vmem:[%s12242_s2 + $0x18] sm:$0xff] }
0x115a   : > { %v8201_v47 = vpack.c.bf16 %v5292_v55, %v5291_v30 }
0x119d   : > { %v4981_v17 = vpop.xlane.xlu0 %4980 }
0x119e   : > { %v4978_v39 = vpop.xlane.xlu1 %4977 }
0x119f   : > { %8739 = vrcp.f32 %v4978_v39 }
0x11a0   : > { %8741 = vrcp.f32 %v4981_v17 }
0x11a2   : > { %v4984_v41 = vpop.xlane.xlu1 %4983 }
0x11a3   : > { %8743 = vrcp.f32 %v4984_v41 }
0x11a6   : > { %v4987_v0 = vpop.xlane.xlu0 %4986 }
0x11a7   : > { %v4990_v16 = vpop.xlane.xlu1 %4989  ;;  %8745 = vrcp.f32 %v4987_v0 }
0x11a8   : > { %8747 = vrcp.f32 %v4990_v16 }
0x11a9   : > { %v8740_v58 = vpop.eup %8739 }
0x11aa   : > { %v4993_v63 = vpop.xlane.xlu0 %4992  ;;  %v5008_v44 = vmul.f32 %v8740_v58, %v10974_v20  ;;  %v8742_v31 = vpop.eup %8741 }
0x11ab   : > { %v8603_v9 = vpop.permute.xlu1 %8602  ;;  %8749 = vrcp.f32 %v4993_v63  ;;  %v5009_v40 = vmul.f32 %v8742_v31, %v10972_v46 }
0x11ac   : > { %7826 = vmatprep.mubr.msk.f32.mxu1 %vm2208_vm11, %v5008_v44  ;;  %v8605_v19 = vunpack.i.h.bf16 %v8603_v9  ;;  %v8604_v11 = vunpack.i.l.bf16 %v8603_v9 }
0x11ad   : > { %v8744_v45 = vpop.eup %8743 }
0x11ae   : > { %v4999_v23 = vpop.xlane.xlu0 %4998  ;;  %v8189_v26 = vpack.c.bf16 %v8605_v19, %v8604_v11  ;;  %v5010_v29 = vmul.f32 %v8744_v45, %v10980_v22 }
0x11af   : > { %v8608_v60 = vpop.permute.xlu1 %8607 }
0x11b0   : > { %v8610_v15 = vunpack.i.h.bf16 %v8608_v60  ;;  %v8609_v48 = vunpack.i.l.bf16 %v8608_v60 }
0x11b1   : > { %v8746_v62 = vpop.eup %8745 }
0x11b2   : > { %v4996_v43 = vpop.xlane.xlu0 %4995  ;;  %v8193_v20 = vpack.c.bf16 %v8610_v15, %v8609_v48  ;;  %v8748_v49 = vpop.eup %8747  ;;  %v5011_v12 = vmul.f32 %v8746_v62, %v10984_v18 }
0x11b3   : > { %8751 = vrcp.f32 %v4996_v43  ;;  %v5012_v51 = vmul.f32 %v8748_v49, %v10986_v28  ;;  %v5290_v28 = vld [vmem:[%s12242_s2 + $0x8] sm:$0xff]  ;;  %v5178_v63 = vpop.permute.xlu1 %5177 }
0x11b4   : > { %8753 = vrcp.f32 %v4999_v23  ;;  %v8197_v42 = vpack.c.bf16 %v5290_v28, %v5289_v61 }
0x11b5   : > { %v8750_v50 = vpop.eup %8749 }
0x11b6   : > { %v8598_v6 = vpop.permute.xlu0 %8597  ;;  %v5013_v46 = vmul.f32 %v8750_v50, %v10992_v3 }
0x11b7   : > { %v8600_v34 = vunpack.i.h.bf16 %v8598_v6  ;;  %v8599_v25 = vunpack.i.l.bf16 %v8598_v6  ;;  %v5180_v44 = vpop.permute.xlu1 %5179 }
0x11b8   : > { %v5266_v45 = vsel %vm2145_vm5, %v10686_v27, %v5180_v44 }
0x11b9   : > { %v8185_v33 = vpack.c.bf16 %v8600_v34, %v8599_v25 }
0x11ba   : > { %v5210_v23 = vpop.permute.xlu0 %5209 }
0x11bb   : > { %8186 = vmatprep.subr.bf16.mxu1 %v8185_v33  ;;  %v5212_v16 = vpop.permute.xlu1 %5211 }
0x11bc   : > { %8188 = vmatpush3.bf16.msra.mxu1 %v8185_v33 }
0x11bd   : > { %8190 = vmatprep.subr.bf16.mxu1 %v8189_v26  ;;  %v8752_v1 = vpop.eup %8751 }
0x11be   : > { %v8754_v22 = vpop.eup %8753  ;;  %v5014_v4 = vmul.f32 %v8752_v1, %v11000_v54  ;;  %v5182_v43 = vpop.permute.xlu0 %5181 }
0x11bf   : > { %v5015_v18 = vmul.f32 %v8754_v22, %v10996_v35  ;;  %v5184_v9 = vpop.permute.xlu1 %5183  ;;  %v5267_v50 = vsel %vm2145_vm5, %v10692_v2, %v5182_v43 }
0x11c0   : > { %8192 = vmatpush3.bf16.msra.mxu1 %v8189_v26  ;;  %v5268_v27 = vsel %vm2145_vm5, %v10690_v21, %v5184_v9 }
0x11c1   : > { %8194 = vmatprep.subr.bf16.mxu1 %v8193_v20 }
0x11c2   : > { %v5214_v19 = vpop.permute.xlu0 %5213 }
0x11c3   : > { %v5216_v6 = vpop.permute.xlu1 %5215 }
0x11c4   : > { %8196 = vmatpush3.bf16.msra.mxu1 %v8193_v20  ;;  %v5265_v20 = vsel %vm2145_vm5, %v10688_v53, %v5178_v63 }
0x11c5   : > { %8198 = vmatprep.subr.bf16.mxu1 %v8197_v42 }
0x11c6   : > { %v5186_v34 = vpop.permute.xlu0 %5185 }
0x11c7   : > { %7827 = vmatmul.mubr.msk.f32.vlgmr.msra.gmra.mrb[48].mxu1 %vm2208_vm11, %v5009_v40  ;;  %v5188_v11 = vpop.permute.xlu1 %5187  ;;  %v5273_v40 = vsel %vm2154_vm4, %v5265_v20, %v5210_v23  ;;  %v5269_v2 = vsel %vm2145_vm5, %v10696_v13, %v5186_v34 }
0x11c8   : > { %7829 = vmatprep.mubr.msk.f32.mxu1 %vm2208_vm11, %v5010_v29  ;;  %8200 = vmatpush3.bf16.msra.mxu1 %v8197_v42  ;;  %v5274_v29 = vsel %vm2154_vm4, %v5266_v45, %v5212_v16  ;;  %v5270_v21 = vsel %vm2145_vm5, %v10694_v59, %v5188_v11 }
0x11c9   : > { %8202 = vmatprep.subr.bf16.mxu1 %v8201_v47 }
0x11ca   : > { %v5218_v60 = vpop.permute.xlu0 %5217 }
0x11cb   : > { %7830 = vmatmul.mubr.msk.f32.gmra.mrb[50].mxu1 %vm2208_vm11, %v5011_v12  ;;  %v5220_v25 = vpop.permute.xlu1 %5219  ;;  %v5277_v61 = vsel %vm2154_vm4, %v5269_v2, %v5218_v60 }
0x11cc   : > { %7832 = vmatprep.mubr.msk.f32.mxu1 %vm2208_vm11, %v5012_v51  ;;  %8204 = vmatpush3.bf16.msra.mxu1 %v8201_v47  ;;  %v5275_v51 = vsel %vm2154_vm4, %v5267_v50, %v5214_v19  ;;  %v5278_v30 = vsel %vm2154_vm4, %v5270_v21, %v5220_v25 }
0x11ce   : > { %v5190_v26 = vpop.permute.xlu0 %5189 }
0x11cf   : > { %7833 = vmatmul.mubr.msk.f32.gmra.mrb[52].mxu1 %vm2208_vm11, %v5013_v46  ;;  %v5192_v33 = vpop.permute.xlu1 %5191  ;;  %v5276_v46 = vsel %vm2154_vm4, %v5268_v27, %v5216_v6  ;;  %v5271_v13 = vsel %vm2145_vm5, %v10700_v7, %v5190_v26 }
0x11d0   : > { %7835 = vmatprep.mubr.msk.f32.mxu1 %vm2208_vm11, %v5014_v4  ;;  %v5272_v59 = vsel %vm2145_vm5, %v10698_v38, %v5192_v33 }
0x11d2   : > { %v5222_v48 = vpop.permute.xlu0 %5221 }
0x11d3   : > { %7836 = vmatmul.mubr.msk.f32.gmra.mrb[54].mxu1 %vm2208_vm11, %v5015_v18  ;;  %v5224_v15 = vpop.permute.xlu1 %5223 }
0x129a   : > { %v7828_v3 = vpop.f32.mrb[48].mxu1 }
0x129b   : > { %5243 = vrot.lane.b32.xlu1 %v7828_v3, %s12243_s15  ;;  %v5130_v54 = vpop.f32.mrb[49].mxu1  ;;  %v5279_v3 = vsel %vm2154_vm4, %v5271_v13, %v5222_v48 }
0x129c   : > { %5241 = vrot.lane.b32.xlu0 %v5130_v54, %s12243_s15 }
0x129e   : > { %v7831_v39 = vpop.f32.mrb[50].mxu1 }
0x129f   : > { %5247 = vrot.lane.b32.xlu1 %v7831_v39, %s12243_s15  ;;  %v5140_v35 = vpop.f32.mrb[51].mxu1  ;;  %v5280_v39 = vsel %vm2154_vm4, %v5272_v59, %v5224_v15 }
0x12a0   : > { %5245 = vrot.lane.b32.xlu0 %v5140_v35, %s12243_s15 }
0x12a2   : > { %v7834_v17 = vpop.f32.mrb[52].mxu1 }
0x12a3   : > { %5251 = vrot.lane.b32.xlu1 %v7834_v17, %s12243_s15  ;;  %v5150_v41 = vpop.f32.mrb[53].mxu1 }
0x12a4   : > { %5249 = vrot.lane.b32.xlu0 %v5150_v41, %s12243_s15  ;;  %v7111_v41 = vld [vmem:[%s12244_s16] ss:$0 sm:$0xff]  ;;  %s12267_s16 = sld [smem:[#allocation14_spill]] }
0x12a6   : > { %v7837_v0 = vpop.f32.mrb[54].mxu1 }
0x12a7   : > { %5255 = vrot.lane.b32.xlu1 %v7837_v0, %s12243_s15  ;;  %v5160_v58 = vpop.f32.mrb[55].mxu1 }
0x12a8   : > { %5253 = vrot.lane.b32.xlu0 %v5160_v58, %s12243_s15  ;;  %s12266_s15 = sld [smem:[#allocation8_spill]] }
0x130d   : > { %v5244_v31 = vpop.permute.xlu1 %5243 }
0x130e   : > { %v5242_v62 = vpop.permute.xlu0 %5241  ;;  %v5282_v12 = vsel %vm2163_vm6, %v5274_v29, %v5244_v31 }
0x130f   : > { %v5281_v49 = vsel %vm2163_vm6, %v5273_v40, %v5242_v62 }
0x1310   : > { %7846 = vmatprep.mubr.msk.f32.mxu1 %vm2172_vm7, %v5281_v49 }
0x1311   : > { %7847 = vmatmul.mubr.msk.f32.vlgmr.msra.gmra.mrb[56].mxu1 %vm2172_vm7, %v5282_v12  ;;  %v5248_v53 = vpop.permute.xlu1 %5247 }
0x1312   : > { %v5246_v1 = vpop.permute.xlu0 %5245  ;;  %v5284_v4 = vsel %vm2163_vm6, %v5276_v46, %v5248_v53 }
0x1313   : > { %v5283_v22 = vsel %vm2163_vm6, %v5275_v51, %v5246_v1 }
0x1314   : > { %7849 = vmatprep.mubr.msk.f32.mxu1 %vm2172_vm7, %v5283_v22 }
0x1315   : > { %7850 = vmatmul.mubr.msk.f32.gmra.mrb[58].mxu1 %vm2172_vm7, %v5284_v4  ;;  %v5252_v18 = vpop.permute.xlu1 %5251 }
0x1316   : > { %v5250_v28 = vpop.permute.xlu0 %5249  ;;  %v5286_v55 = vsel %vm2163_vm6, %v5278_v30, %v5252_v18 }
0x1317   : > { %v5285_v42 = vsel %vm2163_vm6, %v5277_v61, %v5250_v28 }
0x1318   : > { %7852 = vmatprep.mubr.msk.f32.mxu1 %vm2172_vm7, %v5285_v42 }
0x1319   : > { %7853 = vmatmul.mubr.msk.f32.gmra.mrb[60].mxu1 %vm2172_vm7, %v5286_v55  ;;  %v5256_v47 = vpop.permute.xlu1 %5255 }
0x131a   : > { %v5254_v54 = vpop.permute.xlu0 %5253  ;;  %v5288_v17 = vsel %vm2163_vm6, %v5280_v39, %v5256_v47 }
0x131b   : > { %v5287_v35 = vsel %vm2163_vm6, %v5279_v3, %v5254_v54 }
0x131c   : > { %7855 = vmatprep.mubr.msk.f32.mxu1 %vm2172_vm7, %v5287_v35 }
0x131d   : > { %7856 = vmatmul.mubr.msk.f32.gmra.mrb[62].mxu1 %vm2172_vm7, %v5288_v17 }
0x13e4   : > { %v7848_v7 = vpop.f32.mrb[56].mxu1 }
0x13e5   : > { %v5423_v0 = vadd.f32 %v7848_v7, %v10364_v5  ;;  %v5383_v58 = vpop.f32.mrb[57].mxu1 }
0x13e6   : > { %v5422_v38 = vadd.f32 %v5383_v58, %v10367_v57 }
0x13e7   : > { %v11113_v63 = vadd.f32 %v7111_v41, %v5423_v0 }
0x13e8   : > { %v11115_v44 = vadd.f32 %v7111_v41, %v5422_v38  ;;  %v7851_v16 = vpop.f32.mrb[58].mxu1 }
0x13e9   : > { %12245 = vst [vmem:[#allocation75_spill] sm:$0xff] %v11113_v63  ;;  %v5425_v23 = vadd.f32 %v7851_v16, %v10383_v36  ;;  %v5393_v9 = vpop.f32.mrb[59].mxu1  ;;  %v5450_v43 = vsel %vm2172_vm7, %v11113_v63, 0.0 }
0x13ea   : > { %12246 = vst [vmem:[#allocation81_spill] sm:$0xff] %v11115_v44  ;;  %v5424_v6 = vadd.f32 %v5393_v9, %v10380_v52  ;;  %5451 = vadd.xlane.f32.xlu1 %v5450_v43  ;;  %v5447_v5 = vsel %vm2172_vm7, %v11115_v44, 0.0 }
0x13eb   : > { %5448 = vadd.xlane.f32.xlu0 %v5447_v5  ;;  %v11125_v11 = vadd.f32 %v7111_v41, %v5425_v23 }
0x13ec   : > { %v11123_v19 = vadd.f32 %v7111_v41, %v5424_v6  ;;  %v7854_v57 = vpop.f32.mrb[60].mxu1 }
0x13ed   : > { %12248 = vst [vmem:[#allocation105_spill] sm:$0xff] %v11125_v11  ;;  %v5403_v34 = vpop.f32.mrb[61].mxu1  ;;  %v5427_v25 = vadd.f32 %v7854_v57, %v10396_v32  ;;  %v5456_v15 = vsel %vm2172_vm7, %v11125_v11, 0.0 }
0x13ee   : > { %12247 = vst [vmem:[#allocation90_spill] sm:$0xff] %v11123_v19  ;;  %v5426_v36 = vadd.f32 %v5403_v34, %v10399_v24  ;;  %v5453_v60 = vsel %vm2172_vm7, %v11123_v19, 0.0  ;;  %v5579_v34 = vld [vmem:[%s12253_s18] sm:$0xff] }
0x13ef   : > { %5454 = vadd.xlane.f32.xlu0 %v5453_v60  ;;  %v11135_v48 = vadd.f32 %v7111_v41, %v5427_v25  ;;  %v5580_v25 = vld [vmem:[%s12253_s18 + $0x8] sm:$0xff]  ;;  %v5581_v60 = vld [vmem:[%s12253_s18 + $0x10] sm:$0xff] }
0x13f0   : > { %v11131_v52 = vadd.f32 %v7111_v41, %v5426_v36  ;;  %v7857_v33 = vpop.f32.mrb[62].mxu1  ;;  %v8205_v36 = vpack.c.bf16 %v5580_v25, %v5579_v34 }
0x13f1   : > { %v5413_v26 = vpop.f32.mrb[63].mxu1  ;;  %12250 = vst [vmem:[#allocation107_spill] sm:$0xff] %v11135_v48  ;;  %v5429_v20 = vadd.f32 %v7857_v33, %v10412_v10  ;;  %v5462_v40 = vsel %vm2172_vm7, %v11135_v48, 0.0  ;;  %v5582_v33 = vld [vmem:[%s12253_s18 + $0x18] sm:$0xff] }
0x13f2   : > { %12249 = vst [vmem:[#allocation106_spill] sm:$0xff] %v11131_v52  ;;  %v5428_v31 = vadd.f32 %v5413_v26, %v10415_v8  ;;  %v5459_v32 = vsel %vm2172_vm7, %v11131_v52, 0.0  ;;  %8206 = vmatprep.subr.bf16.mxu0 %v8205_v36  ;;  %v8209_v26 = vpack.c.bf16 %v5582_v33, %v5581_v60 }
0x13f3   : > { %5457 = vadd.xlane.f32.xlu0 %v5456_v15  ;;  %5460 = vadd.xlane.f32.xlu1 %v5459_v32  ;;  %v11143_v45 = vadd.f32 %v7111_v41, %v5429_v20  ;;  %v5977_v15 = vld [vmem:[%s12254_s0] sm:$0xff]  ;;  %v5978_v20 = vld [vmem:[%s12254_s0 + $0x8] sm:$0xff] }
0x13f4   : > { %v11141_v24 = vadd.f32 %v7111_v41, %v5428_v31  ;;  %8208 = vmatpush3.bf16.msra.mxu0 %v8205_v36  ;;  %v8221_v31 = vpack.c.bf16 %v5978_v20, %v5977_v15  ;;  %v7132_v20 = vld [vmem:[%s12257_s1] ss:$0 sm:$0xff]  ;;  %s12270_s1 = sld [smem:[#allocation17_spill]] }
0x13f5   : > { %12252 = vst [vmem:[#allocation109_spill] sm:$0xff] %v11143_v45  ;;  %v5468_v10 = vsel %vm2172_vm7, %v11143_v45, 0.0  ;;  %8210 = vmatprep.subr.bf16.mxu0 %v8209_v26 }
0x13f6   : > { %12251 = vst [vmem:[#allocation108_spill] sm:$0xff] %v11141_v24  ;;  %v5465_v62 = vsel %vm2172_vm7, %v11141_v24, 0.0 }
0x13f7   : > { %5463 = vadd.xlane.f32.xlu0 %v5462_v40  ;;  %5466 = vadd.xlane.f32.xlu1 %v5465_v62 }
0x13f8   : > { %8212 = vmatpush3.bf16.msra.mxu0 %v8209_v26 }
0x13f9   : > { %8222 = vmatprep.subr.bf16.mxu0 %v8221_v31 }
0x13fb   : > { %5469 = vadd.xlane.f32.xlu0 %v5468_v10 }
0x1477   : > { %v5452_v8 = vpop.xlane.xlu1 %5451 }
0x1478   : > { %v5472_v29 = vmul.f32 0.03125, %v5452_v8  ;;  %v5449_v49 = vpop.xlane.xlu0 %5448 }
0x1479   : > { %v5471_v12 = vmul.f32 0.03125, %v5449_v49 }
0x147a   : > { %v11152_v50 = vsub.f32 %v11113_v63, %v5472_v29  ;;  %v12305_v63 = vld [vmem:[#allocation97_spill] sm:$0xff] }
0x147b   : > { %v11155_v53 = vsub.f32 %v11115_v44, %v5471_v12  ;;  %v12304_v44 = vld [vmem:[#allocation72_spill] sm:$0xff] }
0x147c   : > { %v5455_v27 = vpop.xlane.xlu0 %5454  ;;  %v5488_v51 = vmul.f32 %v11152_v50, %v11152_v50 }
0x147d   : > { %v5473_v1 = vmul.f32 0.03125, %v5455_v27  ;;  %v5487_v46 = vmul.f32 %v11155_v53, %v11155_v53 }
0x147e   : > { %v5498_v22 = vsel %vm2172_vm7, %v5488_v51, 0.0 }
0x147f   : > { %v11163_v4 = vsub.f32 %v11123_v19, %v5473_v1  ;;  %5499 = vadd.xlane.f32.xlu0 %v5498_v22  ;;  %v5495_v2 = vsel %vm2172_vm7, %v5487_v46, 0.0  ;;  %v12300_v19 = vld [vmem:[#allocation94_spill] sm:$0xff] }
0x1480   : > { %v5458_v18 = vpop.xlane.xlu0 %5457  ;;  %v5461_v21 = vpop.xlane.xlu1 %5460  ;;  %5496 = vadd.xlane.f32.xlu1 %v5495_v2 }
0x1481   : > { %v5474_v61 = vmul.f32 0.03125, %v5458_v18  ;;  %v5475_v28 = vmul.f32 0.03125, %v5461_v21  ;;  %v5489_v30 = vmul.f32 %v11163_v4, %v11163_v4 }
0x1483   : > { %v11169_v42 = vsub.f32 %v11125_v11, %v5474_v61  ;;  %v11172_v55 = vsub.f32 %v11131_v52, %v5475_v28  ;;  %v5501_v13 = vsel %vm2172_vm7, %v5489_v30, 0.0  ;;  %v12289_v52 = vld [vmem:[#allocation48_spill] sm:$0xff] }
0x1484   : > { %v5464_v47 = vpop.xlane.xlu0 %5463  ;;  %5502 = vadd.xlane.f32.xlu1 %v5501_v13  ;;  %v5467_v59 = vpop.xlane.xlu1 %5466 }
0x1485   : > { %v5476_v3 = vmul.f32 0.03125, %v5464_v47  ;;  %v5477_v54 = vmul.f32 0.03125, %v5467_v59  ;;  %v5490_v39 = vmul.f32 %v11169_v42, %v11169_v42  ;;  %v5491_v35 = vmul.f32 %v11172_v55, %v11172_v55  ;;  %v7112_v47 = vld [vmem:[%s12255_s26] ss:$0 sm:$0xff]  ;;  %s12268_s26 = sld [smem:[#allocation15_spill]] }
0x1487   : > { %v11180_v17 = vsub.f32 %v11135_v48, %v5476_v3  ;;  %v11183_v7 = vsub.f32 %v11141_v24, %v5477_v54  ;;  %v5504_v41 = vsel %vm2172_vm7, %v5490_v39, 0.0  ;;  %v5507_v0 = vsel %vm2172_vm7, %v5491_v35, 0.0 }
0x1488   : > { %5505 = vadd.xlane.f32.xlu0 %v5504_v41  ;;  %v5470_v58 = vpop.xlane.xlu0 %5469  ;;  %5508 = vadd.xlane.f32.xlu1 %v5507_v0  ;;  %v7113_v0 = vld [vmem:[%s12256_s28] ss:$0 sm:$0xff]  ;;  %s12269_s28 = sld [smem:[#allocation16_spill]] }
0x1489   : > { %v5478_v38 = vmul.f32 0.03125, %v5470_v58  ;;  %v5492_v16 = vmul.f32 %v11180_v17, %v11180_v17  ;;  %v5493_v23 = vmul.f32 %v11183_v7, %v11183_v7 }
0x148b   : > { %v11192_v9 = vsub.f32 %v11143_v45, %v5478_v38  ;;  %v5510_v43 = vsel %vm2172_vm7, %v5492_v16, 0.0  ;;  %v5513_v6 = vsel %vm2172_vm7, %v5493_v23, 0.0  ;;  %v5979_v23 = vld [vmem:[%s12254_s0 + $0x10] sm:$0xff] }
0x148c   : > { %5511 = vadd.xlane.f32.xlu0 %v5510_v43  ;;  %5514 = vadd.xlane.f32.xlu1 %v5513_v6  ;;  %v5980_v43 = vld [vmem:[%s12254_s0 + $0x18] sm:$0xff] }
0x148d   : > { %v5494_v5 = vmul.f32 %v11192_v9, %v11192_v9  ;;  %v8225_v25 = vpack.c.bf16 %v5980_v43, %v5979_v23 }
0x148f   : > { %v5516_v57 = vsel %vm2172_vm7, %v5494_v5, 0.0 }
0x1490   : > { %5517 = vadd.xlane.f32.xlu0 %v5516_v57 }
0x150c   : > { %v5500_v32 = vpop.xlane.xlu0 %5499 }
0x150d   : > { %v5520_v40 = vmul.f32 0.03125, %v5500_v32  ;;  %v5497_v62 = vpop.xlane.xlu1 %5496 }
0x150e   : > { %v5519_v10 = vmul.f32 0.03125, %v5497_v62 }
0x150f   : > { %v5528_v8 = vadd.f32 1e-05, %v5520_v40 }
0x1510   : > { %v5527_v29 = vadd.f32 1e-05, %v5519_v10 }
0x1511   : > { %8755 = vrsqrt.f32 %v5528_v8  ;;  %v5503_v49 = vpop.xlane.xlu1 %5502 }
0x1512   : > { %8757 = vrsqrt.f32 %v5527_v29  ;;  %v5521_v12 = vmul.f32 0.03125, %v5503_v49  ;;  %v5946_v29 = vmul.f32 %v7132_v20, %v10361_v37 }
0x1514   : > { %v5529_v27 = vadd.f32 1e-05, %v5521_v12 }
0x1515   : > { %v5506_v51 = vpop.xlane.xlu0 %5505  ;;  %v5509_v1 = vpop.xlane.xlu1 %5508 }
0x1516   : > { %8759 = vrsqrt.f32 %v5529_v27  ;;  %v5522_v46 = vmul.f32 0.03125, %v5506_v51  ;;  %v5523_v22 = vmul.f32 0.03125, %v5509_v1  ;;  %v5947_v51 = vmul.f32 %v7132_v20, %v10358_v56 }
0x1518   : > { %v5530_v2 = vadd.f32 1e-05, %v5522_v46  ;;  %v5531_v18 = vadd.f32 1e-05, %v5523_v22  ;;  %v5948_v22 = vmul.f32 %v7132_v20, %v10376_v14 }
0x1519   : > { %v5512_v21 = vpop.xlane.xlu0 %5511  ;;  %v5515_v61 = vpop.xlane.xlu1 %5514 }
0x151a   : > { %8761 = vrsqrt.f32 %v5530_v2  ;;  %v5524_v28 = vmul.f32 0.03125, %v5512_v21  ;;  %v5525_v30 = vmul.f32 0.03125, %v5515_v61 }
0x151b   : > { %v8756_v13 = vpop.eup %8755  ;;  %8763 = vrsqrt.f32 %v5531_v18  ;;  %v12259_v18 = vld [vmem:[#allocation60_spill] sm:$0xff] }
0x151c   : > { %v8758_v59 = vpop.eup %8757  ;;  %v5544_v3 = vmul.f32 %v8756_v13, %v11152_v50  ;;  %v5532_v54 = vadd.f32 1e-05, %v5524_v28  ;;  %v5533_v39 = vadd.f32 1e-05, %v5525_v30  ;;  %v5949_v21 = vmul.f32 %v7132_v20, %v12259_v18  ;;  %v12260_v13 = vld [vmem:[#allocation64_spill] sm:$0xff] }
0x151d   : > { %v5518_v35 = vpop.xlane.xlu0 %5517  ;;  %v5543_v41 = vmul.f32 %v8758_v59, %v11155_v53  ;;  %v5950_v56 = vmul.f32 %v7132_v20, %v12260_v13  ;;  %v12261_v59 = vld [vmem:[#allocation59_spill] sm:$0xff] }
0x151e   : > { %v5558_v58 = vmul.f32 %v7112_v47, %v5544_v3  ;;  %8765 = vrsqrt.f32 %v5532_v54  ;;  %v5526_v38 = vmul.f32 0.03125, %v5518_v35  ;;  %v5951_v3 = vmul.f32 %v7132_v20, %v12261_v59 }
0x151f   : > { %8767 = vrsqrt.f32 %v5533_v39  ;;  %v5557_v16 = vmul.f32 %v7112_v47, %v5543_v41  ;;  %v12262_v39 = vld [vmem:[#allocation78_spill] sm:$0xff] }
0x1520   : > { %v8760_v6 = vpop.eup %8759  ;;  %v5534_v5 = vadd.f32 1e-05, %v5526_v38  ;;  %v5572_v50 = vadd.f32 %v7113_v0, %v5558_v58  ;;  %v5952_v35 = vmul.f32 %v7132_v20, %v12262_v39  ;;  %v12264_v58 = vld [vmem:[#allocation63_spill] sm:$0xff] }
0x1521   : > { %v5571_v57 = vadd.f32 %v7113_v0, %v5557_v16  ;;  %v5545_v34 = vmul.f32 %v8760_v6, %v11163_v4  ;;  %v5953_v38 = vmul.f32 %v7132_v20, %v12264_v58  ;;  %v7114_v20 = vld [vmem:[%s12266_s15] ss:$0 sm:$0xff]  ;;  %s12335_s15 = sld [smem:[#allocation19_spill]] }
0x1522   : > { %8769 = vrsqrt.f32 %v5534_v5 }
0x1523   : > { %7866 = vmatprep.mubr.msk.f32.mxu0 %vm2172_vm7, %v5571_v57  ;;  %v5559_v53 = vmul.f32 %v7112_v47, %v5545_v34  ;;  %v5791_v34 = vld [vmem:[%s12263_s7] sm:$0xff] }
0x1524   : > { %v8762_v36 = vpop.eup %8761  ;;  %7867 = vmatmul.mubr.msk.f32.vlgmr.msra.gmra.mrb[64].mxu0 %vm2172_vm7, %v5572_v50  ;;  %v5792_v50 = vld [vmem:[%s12263_s7 + $0x8] sm:$0xff] }
0x1525   : > { %v8764_v60 = vpop.eup %8763  ;;  %v5573_v33 = vadd.f32 %v7113_v0, %v5559_v53  ;;  %8224 = vmatpush3.bf16.msra.mxu0 %v8221_v31  ;;  %v5546_v26 = vmul.f32 %v8762_v36, %v11169_v42  ;;  %v7133_v42 = vld [vmem:[%s12258_s10] ss:$0 sm:$0xff]  ;;  %v5793_v53 = vld [vmem:[%s12263_s7 + $0x10] sm:$0xff]  ;;  %v5794_v36 = vld [vmem:[%s12263_s7 + $0x18] sm:$0xff]  ;;  %s12330_s10 = sld [smem:[#allocation18_spill]] }
0x1526   : > { %v5547_v15 = vmul.f32 %v8764_v60, %v11172_v55  ;;  %8226 = vmatprep.subr.bf16.mxu0 %v8225_v25  ;;  %v5962_v2 = vadd.f32 %v7133_v42, %v5947_v51  ;;  %v5963_v30 = vadd.f32 %v7133_v42, %v5948_v22  ;;  %v5964_v14 = vadd.f32 %v7133_v42, %v5949_v21  ;;  %v6521_v22 = vld [vmem:[%s12265_s11 + $0x10] sm:$0xff]  ;;  %v6523_v21 = vld [vmem:[%s12265_s11 + $0x20] sm:$0xff] }
0x1527   : > { %7869 = vmatprep.mubr.msk.f32.mxu0 %vm2172_vm7, %v5573_v33  ;;  %v5560_v4 = vmul.f32 %v7112_v47, %v5546_v26  ;;  %v5967_v23 = vadd.f32 %v7133_v42, %v5952_v35  ;;  %v5968_v6 = vadd.f32 %v7133_v42, %v5953_v38  ;;  %v8217_v60 = vpack.c.bf16 %v5794_v36, %v5793_v53  ;;  %v6519_v33 = vld [vmem:[%s12265_s11] sm:$0xff]  ;;  %v6520_v26 = vld [vmem:[%s12265_s11 + $0x8] sm:$0xff] }
0x1528   : > { %v8766_v32 = vpop.eup %8765  ;;  %v5561_v40 = vmul.f32 %v7112_v47, %v5547_v15  ;;  %v5971_v54 = vmax.f32 %v5963_v30, 0.0  ;;  %v5972_v41 = vmax.f32 %v5964_v14, 0.0  ;;  %v11249_v15 = vpack.c.bf16 %v6520_v26, %v6519_v33  ;;  %v6526_v14 = vld [vmem:[%s12265_s11 + $0x38] sm:$0xff]  ;;  %v11271_v53 = vld [vmem:[%s12268_s26] ss:$0 sm:$0xff]  ;;  %s12376_s26 = sld [smem:[#allocation10_spill]] }
0x1529   : > { %v8768_v62 = vpop.eup %8767  ;;  %v5574_v10 = vadd.f32 %v7113_v0, %v5560_v4  ;;  %v5548_v8 = vmul.f32 %v8766_v32, %v11180_v17  ;;  %8228 = vmatpush3.bf16.msra.mxu0 %v8225_v25  ;;  %v5961_v17 = vadd.f32 %v7133_v42, %v5946_v29  ;;  %v5975_v5 = vmax.f32 %v5967_v23, 0.0 }
0x152a   : > { %v5575_v31 = vadd.f32 %v7113_v0, %v5561_v40  ;;  %v5549_v49 = vmul.f32 %v8768_v62, %v11183_v7  ;;  %v5976_v57 = vmax.f32 %v5968_v6, 0.0  ;;  %v8213_v25 = vpack.c.bf16 %v5792_v50, %v5791_v34 }
0x152b   : > { %7870 = vmatmul.mubr.msk.f32.gmra.mrb[66].mxu0 %vm2172_vm7, %v5574_v10  ;;  %v5562_v55 = vmul.f32 %v7112_v47, %v5548_v8  ;;  %v5969_v28 = vmax.f32 %v5961_v17, 0.0 }
0x152c   : > { %v8770_v12 = vpop.eup %8769  ;;  %7872 = vmatprep.mubr.msk.f32.mxu0 %vm2172_vm7, %v5575_v31  ;;  %v5563_v27 = vmul.f32 %v7112_v47, %v5549_v49  ;;  %8214 = vmatprep.subr.bf16.mxu1 %v8213_v25 }
0x152d   : > { %v5576_v1 = vadd.f32 %v7113_v0, %v5562_v55  ;;  %v5550_v46 = vmul.f32 %v8770_v12, %v11192_v9  ;;  %v5970_v9 = vmax.f32 %v5962_v2, 0.0  ;;  %8216 = vmatpush3.bf16.msra.mxu1 %v8213_v25  ;;  %v11268_v25 = vld [vmem:[%s12267_s16] ss:$0 sm:$0xff]  ;;  %s12336_s16 = sld [smem:[#allocation20_spill]] }
0x152e   : > { %v5577_v37 = vadd.f32 %v7113_v0, %v5563_v27  ;;  %8218 = vmatprep.subr.bf16.mxu1 %v8217_v60 }
0x152f   : > { %7873 = vmatmul.mubr.msk.f32.gmra.mrb[68].mxu0 %vm2172_vm7, %v5576_v1  ;;  %v5564_v7 = vmul.f32 %v7112_v47, %v5550_v46  ;;  %v5965_v47 = vadd.f32 %v7133_v42, %v5950_v56  ;;  %v6524_v56 = vld [vmem:[%s12265_s11 + $0x28] sm:$0xff] }
0x1530   : > { %7875 = vmatprep.mubr.msk.f32.mxu0 %vm2172_vm7, %v5577_v37  ;;  %v6522_v37 = vld [vmem:[%s12265_s11 + $0x18] sm:$0xff]  ;;  %v11261_v58 = vpack.c.bf16 %v6524_v56, %v6523_v21 }
0x1531   : > { %v5578_v61 = vadd.f32 %v7113_v0, %v5564_v7  ;;  %v5966_v0 = vadd.f32 %v7133_v42, %v5951_v3  ;;  %v5973_v16 = vmax.f32 %v5965_v47, 0.0  ;;  %8220 = vmatpush3.bf16.msra.mxu1 %v8217_v60  ;;  %v11259_v39 = vpack.c.bf16 %v6522_v37, %v6521_v22 }
0x1532   : > { %8230 = vmatprep.subr.bf16.mxu1 %v11249_v15 }
0x1533   : > { %7876 = vmatmul.mubr.msk.f32.gmra.mrb[70].mxu0 %vm2172_vm7, %v5578_v61  ;;  %v5974_v43 = vmax.f32 %v5966_v0, 0.0 }
0x1534   : > { %7906 = vmatprep.mubr.msk.f32.mxu0 %vm2172_vm7, %v5969_v28 }
0x1537   : > { %7907 = vmatmul.mubr.msk.f32.vlgmr.msra.gmra.mrb[72].mxu0 %vm2172_vm7, %v5970_v9  ;;  %v6525_v9 = vld [vmem:[%s12265_s11 + $0x30] sm:$0xff] }
0x1538   : > { %7909 = vmatprep.mubr.msk.f32.mxu0 %vm2172_vm7, %v5971_v54  ;;  %v11263_v38 = vpack.c.bf16 %v6526_v14, %v6525_v9 }
0x153b   : > { %7910 = vmatmul.mubr.msk.f32.gmra.mrb[74].mxu0 %vm2172_vm7, %v5972_v41 }
0x153c   : > { %7912 = vmatprep.mubr.msk.f32.mxu0 %vm2172_vm7, %v5973_v16 }
0x153f   : > { %7913 = vmatmul.mubr.msk.f32.gmra.mrb[76].mxu0 %vm2172_vm7, %v5974_v43 }
0x1540   : > { %7915 = vmatprep.mubr.msk.f32.mxu0 %vm2172_vm7, %v5975_v5 }
0x1543   : > { %7916 = vmatmul.mubr.msk.f32.gmra.mrb[78].mxu0 %vm2172_vm7, %v5976_v57 }
0x15f7   : > { %v7868_v4 = vpop.f32.mrb[64].mxu0 }
0x15f8   : > { %v5686_v32 = vadd.f32 %v7868_v4, %v7114_v20  ;;  %v5680_v40 = vpop.f32.mrb[65].mxu0 }
0x15f9   : > { %v5681_v62 = vadd.f32 %v7114_v20, %v5680_v40 }
0x15fa   : > { %v5728_v10 = vmul.f32 0.044715, %v5686_v32  ;;  %v5720_v16 = vmul.f32 0.5, %v5686_v32 }
0x15fb   : > { %v5727_v8 = vmul.f32 0.044715, %v5681_v62  ;;  %v5719_v36 = vmul.f32 0.5, %v5681_v62 }
0x15fc   : > { %v5736_v29 = vmul.f32 %v5728_v10, %v5686_v32 }
0x15fd   : > { %v5735_v31 = vmul.f32 %v5727_v8, %v5681_v62 }
0x15fe   : > { %v5744_v49 = vmul.f32 %v5736_v29, %v5686_v32  ;;  %v7871_v42 = vpop.f32.mrb[66].mxu0 }
0x15ff   : > { %v5743_v55 = vmul.f32 %v5735_v31, %v5681_v62  ;;  %v5696_v12 = vadd.f32 %v7871_v42, %v7114_v20  ;;  %v5690_v27 = vpop.f32.mrb[67].mxu0 }
0x1600   : > { %v5752_v51 = vadd.f32 %v5744_v49, %v5686_v32  ;;  %v5691_v1 = vadd.f32 %v7114_v20, %v5690_v27 }
0x1601   : > { %v5751_v46 = vadd.f32 %v5743_v55, %v5681_v62  ;;  %v5730_v17 = vmul.f32 0.044715, %v5696_v12  ;;  %v11273_v26 = vmul.f32 0.5, %v5696_v12 }
0x1602   : > { %v5760_v7 = vmul.f32 0.7978846, %v5752_v51  ;;  %v5729_v2 = vmul.f32 0.044715, %v5691_v1  ;;  %v7874_v18 = vpop.f32.mrb[68].mxu0  ;;  %v11276_v8 = vmul.f32 0.5, %v5691_v1 }
0x1603   : > { %v5738_v61 = vmul.f32 %v5730_v17, %v5696_v12  ;;  %v5706_v28 = vadd.f32 %v7874_v18, %v7114_v20  ;;  %v5700_v30 = vpop.f32.mrb[69].mxu0  ;;  %v5759_v13 = vmul.f32 0.7978846, %v5751_v46 }
0x1604   : > { %8771 = vtanh.f32 %v5760_v7  ;;  %v5737_v59 = vmul.f32 %v5729_v2, %v5691_v1  ;;  %v5701_v3 = vadd.f32 %v7114_v20, %v5700_v30 }
0x1605   : > { %v5746_v54 = vmul.f32 %v5738_v61, %v5696_v12  ;;  %v5732_v47 = vmul.f32 0.044715, %v5706_v28  ;;  %8773 = vtanh.f32 %v5759_v13  ;;  %v11279_v55 = vmul.f32 0.5, %v5706_v28 }
0x1606   : > { %v5745_v35 = vmul.f32 %v5737_v59, %v5691_v1  ;;  %v5731_v41 = vmul.f32 0.044715, %v5701_v3  ;;  %v7877_v0 = vpop.f32.mrb[70].mxu0  ;;  %v11286_v46 = vmul.f32 0.5, %v5701_v3 }
0x1607   : > { %v5754_v23 = vadd.f32 %v5746_v54, %v5696_v12  ;;  %v5740_v43 = vmul.f32 %v5732_v47, %v5706_v28  ;;  %v5716_v6 = vadd.f32 %v7877_v0, %v7114_v20  ;;  %v5710_v5 = vpop.f32.mrb[71].mxu0  ;;  %v11283_v12 = vld [vmem:[%s12269_s28] ss:$0 sm:$0xff]  ;;  %s12377_s28 = sld [smem:[#allocation22_spill]] }
0x1608   : > { %v5753_v57 = vadd.f32 %v5745_v35, %v5691_v1  ;;  %v5739_v34 = vmul.f32 %v5731_v41, %v5701_v3  ;;  %v11265_v50 = vadd.f32 %v7114_v20, %v5710_v5 }
0x1609   : > { %v5748_v60 = vmul.f32 %v5740_v43, %v5706_v28  ;;  %v5734_v33 = vmul.f32 0.044715, %v5716_v6  ;;  %v5762_v4 = vmul.f32 0.7978846, %v5754_v23  ;;  %v11289_v22 = vmul.f32 0.5, %v5716_v6 }
0x160a   : > { %v5747_v32 = vmul.f32 %v5739_v34, %v5701_v3  ;;  %v5733_v40 = vmul.f32 0.044715, %v11265_v50  ;;  %v7908_v10 = vpop.f32.mrb[72].mxu0  ;;  %v5761_v29 = vmul.f32 0.7978846, %v5753_v57  ;;  %v11293_v21 = vmul.f32 0.5, %v11265_v50 }
0x160b   : > { %v5756_v20 = vadd.f32 %v5748_v60, %v5706_v28  ;;  %v5742_v31 = vmul.f32 %v5734_v33, %v5716_v6  ;;  %v6084_v49 = vadd.f32 %v7908_v10, %v11268_v25  ;;  %v6078_v42 = vpop.f32.mrb[73].mxu0  ;;  %8775 = vtanh.f32 %v5762_v4  ;;  %v11306_v23 = vld [vmem:[%s12270_s1 + $0x1] ss:$0 sm:$0xff]  ;;  %v12271_v33 = vld [vmem:[#allocation30_spill] sm:$0xff]  ;;  %v12272_v4 = vld [vmem:[#allocation33_spill] sm:$0xff] }
0x160c   : > { %v5755_v62 = vadd.f32 %v5747_v32, %v5701_v3  ;;  %v5741_v27 = vmul.f32 %v5733_v40, %v11265_v50  ;;  %v6079_v51 = vadd.f32 %v11268_v25, %v6078_v42  ;;  %8777 = vtanh.f32 %v5761_v29  ;;  %v11318_v40 = vld [vmem:[%s12270_s1 + $0x4] ss:$0 sm:$0xff] }
0x160d   : > { %v5750_v17 = vmul.f32 %v5742_v31, %v5716_v6  ;;  %v6125_v1 = vmul.f32 %v11271_v53, %v6084_v49  ;;  %v5764_v9 = vmul.f32 0.7978846, %v5756_v20  ;;  %v12273_v29 = vld [vmem:[#allocation40_spill] sm:$0xff]  ;;  %v12274_v49 = vld [vmem:[#allocation27_spill] sm:$0xff] }
0x160e   : > { %v8772_v37 = vpop.eup %8771  ;;  %v6124_v7 = vmul.f32 %v11271_v53, %v6079_v51  ;;  %v7911_v2 = vpop.f32.mrb[74].mxu0  ;;  %v5763_v18 = vmul.f32 0.7978846, %v5755_v62  ;;  %v5749_v14 = vmul.f32 %v5741_v27, %v11265_v50 }
0x160f   : > { %v8774_v61 = vpop.eup %8773  ;;  %v5776_v28 = vadd.f32 1.0, %v8772_v37  ;;  %v6140_v30 = vadd.f32 %v11283_v12, %v6125_v1  ;;  %v6094_v13 = vadd.f32 %v7911_v2, %v11268_v25  ;;  %v6088_v56 = vpop.f32.mrb[75].mxu0  ;;  %v11300_v35 = vadd.f32 %v5750_v17, %v5716_v6  ;;  %v12275_v17 = vld [vmem:[#allocation31_spill] sm:$0xff] }
0x1610   : > { %v6139_v59 = vadd.f32 %v11283_v12, %v6124_v7  ;;  %v6089_v3 = vadd.f32 %v11268_v25, %v6088_v56  ;;  %v5775_v54 = vadd.f32 1.0, %v8774_v61  ;;  %8779 = vtanh.f32 %v5763_v18  ;;  %v12276_v7 = vld [vmem:[#allocation56_spill] sm:$0xff] }
0x1611   : > { %v5784_v47 = vmul.f32 %v5776_v28, %v5720_v16  ;;  %v11302_v41 = vmax.f32 %v6140_v30, 0.0  ;;  %v6127_v0 = vmul.f32 %v11271_v53, %v6094_v13  ;;  %v11331_v27 = vadd.f32 %v5749_v14, %v11265_v50  ;;  %v11359_v18 = vld [vmem:[%s12270_s1 + $0x2] ss:$0 sm:$0xff]  ;;  %v11362_v61 = vld [vmem:[%s12270_s1 + $0x3] ss:$0 sm:$0xff]  ;;  %v12278_v28 = vld [vmem:[#allocation93_spill] sm:$0xff] }
0x1612   : > { %v11308_v43 = vmax.f32 %v6139_v59, 0.0  ;;  %v6126_v5 = vmul.f32 %v11271_v53, %v6089_v3  ;;  %v7914_v57 = vpop.f32.mrb[76].mxu0  ;;  %v5783_v34 = vmul.f32 %v5775_v54, %v5719_v36  ;;  %v11323_v36 = vld [vmem:[%s12270_s1 + $0x7] ss:$0 sm:$0xff]  ;;  %8781 = vtanh.f32 %v5764_v9  ;;  %v12279_v59 = vld [vmem:[#allocation26_spill] sm:$0xff] }
0x1613   : > { %v6156_v60 = vrot.slane %v11302_v41, 7  ;;  %v6196_v16 = vmul.f32 %v11302_v41, %v12271_v33  ;;  %v12024_v6 = vrot.slane %v11302_v41, 1  ;;  %v6283_v32 = vmul.f32 %v11302_v41, %v12272_v4  ;;  %v6098_v10 = vpop.f32.mrb[77].mxu0  ;;  %v12280_v54 = vld [vmem:[#allocation28_spill] sm:$0xff] }
0x1614   : > { %v6354_v20 = vmul.f32 %v11302_v41, %v12273_v29  ;;  %v12026_v31 = vrot.slane %v11308_v43, 7  ;;  %v6195_v42 = vmul.f32 %v11308_v43, %v12274_v49  ;;  %v12025_v62 = vrot.slane %v11308_v43, 1  ;;  %7886 = vmatprep.mubr.msk.f32.mxu1 %vm2172_vm7, %v5783_v34 }
0x1615   : > { %v11334_v51 = vmul.f32 %v11306_v23, %v6196_v16  ;;  %v6282_v1 = vmul.f32 %v11308_v43, %v12275_v17  ;;  %7887 = vmatmul.mubr.msk.f32.vlgmr.msra.gmra.mrb[64].mxu1 %vm2172_vm7, %v5784_v47  ;;  %v11340_v37 = vmul.f32 %v11318_v40, %v6283_v32  ;;  %v6361_v30 = vmul.f32 %v11308_v43, %v12278_v28  ;;  %v8776_v56 = vpop.eup %8775 }
0x1616   : > { %v11348_v50 = vsel %vm1351_vm2, %v12026_v31, %v6156_v60  ;;  %v11356_v2 = vsel %vm1481_vm3, %v12025_v62, %v12024_v6  ;;  %v7917_v13 = vpop.f32.mrb[78].mxu0  ;;  %8232 = vmatpush3.bf16.msra.mxu1 %v11249_v15  ;;  %v11368_v9 = vmul.f32 %v11323_v36, %v6354_v20  ;;  %v11371_v14 = vmul.f32 %v11306_v23, %v6195_v42  ;;  %v8778_v33 = vpop.eup %8777 }
0x1617   : > { %12277 = vst [vmem:[#allocation60_spill] sm:$0xff] %v11356_v2  ;;  %v6235_v3 = vmul.f32 %v11356_v2, %v12279_v59  ;;  %v6259_v47 = vmul.f32 %v11348_v50, %v12280_v54  ;;  %v6108_v34 = vpop.f32.mrb[79].mxu0  ;;  %8234 = vmatprep.subr.bf16.mxu1 %v11259_v39  ;;  %v6142_v16 = vadd.f32 %v11283_v12, %v6127_v0 }
0x1618   : > { %v6141_v15 = vadd.f32 %v11283_v12, %v6126_v5  ;;  %v6104_v4 = vadd.f32 %v7914_v57, %v11268_v25  ;;  %v6099_v32 = vadd.f32 %v11268_v25, %v6098_v10  ;;  %v11385_v49 = vmul.f32 %v11318_v40, %v6282_v1 }
0x1619   : > { %v6251_v29 = vmul.f32 %v11359_v18, %v6235_v3  ;;  %v6275_v20 = vmul.f32 %v11362_v61, %v6259_v47  ;;  %v6114_v42 = vadd.f32 %v7917_v13, %v11268_v25  ;;  %v11389_v17 = vmul.f32 %v11323_v36, %v6361_v30  ;;  %v12282_v3 = vld [vmem:[#allocation47_spill] sm:$0xff]  ;;  %v12283_v47 = vld [vmem:[#allocation46_spill] sm:$0xff] }
0x161a   : > { %v11391_v28 = vmax.f32 %v6142_v16, 0.0  ;;  %v11393_v0 = vmax.f32 %v6141_v15, 0.0  ;;  %v6109_v5 = vadd.f32 %v11268_v25, %v6108_v34  ;;  %8236 = vmatpush3.bf16.msra.mxu1 %v11259_v39  ;;  %v6129_v10 = vmul.f32 %v11271_v53, %v6104_v4  ;;  %v8780_v30 = vpop.eup %8779  ;;  %v12284_v34 = vld [vmem:[#allocation57_spill] sm:$0xff]  ;;  %v12285_v4 = vld [vmem:[#allocation35_spill] sm:$0xff] }
0x161b   : > { %12281 = vst [vmem:[#allocation64_spill] sm:$0xff] %v11389_v17  ;;  %v11397_v57 = vadd.f32 %v6275_v20, %v6251_v29  ;;  %v6128_v1 = vmul.f32 %v11271_v53, %v6099_v32  ;;  %v6131_v59 = vmul.f32 %v11271_v53, %v6114_v42  ;;  %8238 = vmatprep.subr.bf16.mxu1 %v11261_v58  ;;  %v12286_v42 = vld [vmem:[#allocation45_spill] sm:$0xff] }
0x161c   : > { %v6158_v13 = vrot.slane %v11391_v28, 7  ;;  %v6198_v54 = vmul.f32 %v11391_v28, %v12282_v3  ;;  %v12029_v25 = vrot.slane %v11391_v28, 1  ;;  %v6285_v39 = vmul.f32 %v11391_v28, %v12283_v47 }
0x161d   : > { %v6356_v16 = vmul.f32 %v11391_v28, %v12284_v34  ;;  %v6157_v15 = vrot.slane %v11393_v0, 7  ;;  %v6197_v32 = vmul.f32 %v11393_v0, %v12285_v4  ;;  %v12030_v29 = vrot.slane %v11393_v0, 1  ;;  %v8782_v34 = vpop.eup %8781 }
0x161e   : > { %v11416_v20 = vmul.f32 %v11306_v23, %v6198_v54  ;;  %v6355_v3 = vmul.f32 %v11393_v0, %v12286_v42  ;;  %v6130_v6 = vmul.f32 %v11271_v53, %v6109_v5  ;;  %v5777_v47 = vadd.f32 1.0, %v8778_v33  ;;  %8240 = vmatpush3.bf16.msra.mxu1 %v11261_v58  ;;  %v12287_v42 = vld [vmem:[#allocation42_spill] sm:$0xff] }
0x161f   : > { %v11423_v62 = vmul.f32 %v11318_v40, %v6285_v39  ;;  %v11427_v4 = vsel %vm1351_vm2, %v6157_v15, %v6158_v13  ;;  %v11433_v54 = vsel %vm1351_vm2, %v6156_v60, %v6157_v15  ;;  %v6284_v53 = vmul.f32 %v11393_v0, %v12287_v42  ;;  %8242 = vmatprep.subr.bf16.mxu1 %v11263_v38  ;;  %v12288_v60 = vld [vmem:[#allocation41_spill] sm:$0xff]  ;;  %v11455_v15 = vld [vmem:[%s12270_s1 + $0x6] ss:$0 sm:$0xff] }
0x1620   : > { %v11439_v58 = vmul.f32 %v11323_v36, %v6356_v16  ;;  %v11442_v33 = vmul.f32 %v11306_v23, %v6197_v32  ;;  %v11450_v5 = vsel %vm1481_vm3, %v12030_v29, %v12029_v25  ;;  %v6331_v39 = vmul.f32 %v11433_v54, %v12288_v60 }
0x1621   : > { %v6371_v42 = vmul.f32 %v11323_v36, %v6355_v3  ;;  %v6144_v16 = vadd.f32 %v11283_v12, %v6129_v10  ;;  %v6143_v32 = vadd.f32 %v11283_v12, %v6128_v1  ;;  %v6146_v31 = vadd.f32 %v11283_v12, %v6131_v59 }
0x1622   : > { %v6347_v24 = vmul.f32 %v11455_v15, %v6331_v39  ;;  %v6145_v45 = vadd.f32 %v11283_v12, %v6130_v6  ;;  %v5785_v25 = vmul.f32 %v5777_v47, %v11276_v8  ;;  %v5778_v29 = vadd.f32 1.0, %v8776_v56  ;;  %8244 = vmatpush3.bf16.msra.mxu1 %v11263_v38  ;;  %v12290_v6 = vld [vmem:[#allocation68_spill] sm:$0xff] }
0x1623   : > { %v11466_v60 = vmul.f32 %v11318_v40, %v6284_v53  ;;  %v11470_v3 = vmul.f32 %v11450_v5, %v12289_v52  ;;  %v11472_v10 = vmax.f32 %v6144_v16, 0.0  ;;  %v11474_v1 = vmax.f32 %v6143_v32, 0.0  ;;  %v12291_v52 = vld [vmem:[#allocation67_spill] sm:$0xff]  ;;  %v12294_v32 = vld [vmem:[#allocation61_spill] sm:$0xff] }
0x1624   : > { %v11476_v59 = vadd.f32 %v6371_v42, %v6347_v24  ;;  %v11478_v39 = vmax.f32 %v6146_v31, 0.0  ;;  %7889 = vmatprep.mubr.msk.f32.mxu1 %vm2172_vm7, %v5785_v25  ;;  %v5786_v8 = vmul.f32 %v5778_v29, %v11273_v26  ;;  %v5779_v38 = vadd.f32 1.0, %v8780_v30  ;;  %v12292_v16 = vld [vmem:[#allocation79_spill] sm:$0xff] }
0x1625   : > { %v6160_v12 = vrot.slane %v11472_v10, 7  ;;  %v6200_v56 = vmul.f32 %v11472_v10, %v12290_v6  ;;  %v6287_v47 = vmul.f32 %v11472_v10, %v12291_v52  ;;  %v11487_v53 = vmax.f32 %v6145_v45, 0.0  ;;  %v12293_v42 = vld [vmem:[#allocation51_spill] sm:$0xff]  ;;  %v12295_v45 = vld [vmem:[#allocation66_spill] sm:$0xff] }
0x1626   : > { %v6358_v24 = vmul.f32 %v11472_v10, %v12292_v16  ;;  %v6159_v31 = vrot.slane %v11474_v1, 7  ;;  %v6199_v25 = vmul.f32 %v11474_v1, %v12293_v42  ;;  %7890 = vmatmul.mubr.msk.f32.gmra.mrb[66].mxu1 %vm2172_vm7, %v5786_v8  ;;  %v5780_v26 = vadd.f32 1.0, %v8782_v34 }
0x1627   : > { %v6286_v6 = vmul.f32 %v11474_v1, %v12294_v32  ;;  %v6357_v52 = vmul.f32 %v11474_v1, %v12295_v45  ;;  %v11502_v16 = vmul.f32 %v11306_v23, %v6200_v56  ;;  %v11505_v48 = vmul.f32 %v11318_v40, %v6287_v47  ;;  %v12299_v45 = vld [vmem:[#allocation25_spill] sm:$0xff] }
0x1628   : > { %v11509_v8 = vsel %vm1351_vm2, %v6159_v31, %v6160_v12  ;;  %v11513_v34 = vsel %vm1351_vm2, %v6158_v13, %v6159_v31  ;;  %v11516_v42 = vmul.f32 %v11323_v36, %v6358_v24  ;;  %v11519_v32 = vmul.f32 %v11306_v23, %v6199_v25 }
0x1629   : > { %12296 = vst [vmem:[#allocation59_spill] sm:$0xff] %v11502_v16  ;;  %12297 = vst [vmem:[#allocation78_spill] sm:$0xff] %v11505_v48  ;;  %v6162_v56 = vrot.slane %v11478_v39, 7  ;;  %v6194_v47 = vmul.f32 %v11478_v39, %v12299_v45  ;;  %v11525_v30 = vmul.f32 %v11318_v40, %v6286_v6  ;;  %v6360_v13 = vmul.f32 %v11478_v39, %v12300_v19  ;;  %v12302_v45 = vld [vmem:[#allocation87_spill] sm:$0xff]  ;;  %v12311_v48 = vld [vmem:[#allocation85_spill] sm:$0xff] }
0x162a   : > { %12298 = vst [vmem:[#allocation63_spill] sm:$0xff] %v11519_v32  ;;  %v6161_v24 = vrot.slane %v11487_v53, 7  ;;  %v11532_v31 = vmul.f32 %v11323_v36, %v6357_v52  ;;  %v12301_v25 = vrot.slane %v11308_v43, 7  ;;  %v11542_v6 = vmul.f32 %v11478_v39, %v12302_v45  ;;  %v11559_v45 = vld [vmem:[%s12270_s1] ss:$0 sm:$0xff] }
0x162b   : > { %v6201_v29 = vmul.f32 %v11487_v53, %v12304_v44  ;;  %v6210_v17 = vmul.f32 %v11306_v23, %v6194_v47  ;;  %v12306_v52 = vrot.slane %v11308_v43, 1  ;;  %v12307_v16 = vrot.slane %v11478_v39, 1  ;;  %v12309_v43 = vld [vmem:[#allocation82_spill] sm:$0xff] }
0x162c   : > { %v11538_v11 = vsel %vm1351_vm2, %v6162_v56, %v12301_v25  ;;  %12303 = vst [vmem:[#allocation30_spill] sm:$0xff] %v11542_v6  ;;  %v11562_v6 = vmul.f32 %v11323_v36, %v6360_v13  ;;  %v11570_v44 = vsel %vm1351_vm2, %v6160_v12, %v6161_v24  ;;  %v6288_v47 = vmul.f32 %v11487_v53, %v12309_v43 }
0x162d   : > { %v6172_v19 = vmul.f32 %v11538_v11, %v12305_v63  ;;  %v11555_v25 = vsel %vm1481_vm3, %v12307_v16, %v12306_v52  ;;  %v11566_v63 = vsel %vm1351_vm2, %v6161_v24, %v6162_v56  ;;  %v11576_v52 = vmul.f32 %v11306_v23, %v6201_v29  ;;  %v12312_v24 = vld [vmem:[#allocation98_spill] sm:$0xff]  ;;  %v12317_v29 = vld [vmem:[#allocation29_spill] sm:$0xff] }
0x162e   : > { %12308 = vst [vmem:[#allocation33_spill] sm:$0xff] %v11562_v6  ;;  %v6359_v13 = vmul.f32 %v11487_v53, %v12311_v48  ;;  %v5787_v6 = vmul.f32 %v5779_v38, %v11286_v46  ;;  %v5788_v56 = vmul.f32 %v5780_v26, %v11279_v55  ;;  %v5765_v32 = vmul.f32 0.7978846, %v11331_v27  ;;  %v12315_v27 = vld [vmem:[#allocation24_spill] sm:$0xff]  ;;  %v12316_v38 = vld [vmem:[#allocation34_spill] sm:$0xff] }
0x162f   : > { %v6187_v16 = vmul.f32 %v11559_v45, %v6172_v19  ;;  %12310 = vst [vmem:[#allocation40_spill] sm:$0xff] %v11576_v52  ;;  %v5766_v12 = vmul.f32 0.7978846, %v11300_v35  ;;  %v6171_v43 = vmul.f32 %v11566_v63, %v12312_v24  ;;  %v11588_v23 = vmul.f32 %v11318_v40, %v6288_v47  ;;  %v12318_v47 = vld [vmem:[#allocation32_spill] sm:$0xff]  ;;  %v12319_v24 = vld [vmem:[#allocation37_spill] sm:$0xff] }
0x1630   : > { %7892 = vmatprep.mubr.msk.f32.mxu1 %vm2172_vm7, %v5787_v6  ;;  %v12313_v48 = vrot.slane %v11393_v0, 1  ;;  %v12314_v46 = vrot.slane %v11302_v41, 1  ;;  %v6234_v35 = vmul.f32 %v11555_v25, %v12315_v27  ;;  %8783 = vtanh.f32 %v5765_v32  ;;  %v11605_v0 = vld [vmem:[%s12270_s1 + $0x5] ss:$0 sm:$0xff]  ;;  %v11621_v52 = vld [vmem:[%s12270_s1 + $0x8] ss:$0 sm:$0xff] }
0x1631   : > { %v6403_v19 = vadd.f32 %v11371_v14, %v6187_v16  ;;  %7893 = vmatmul.mubr.msk.f32.gmra.mrb[68].mxu1 %vm2172_vm7, %v5788_v56  ;;  %v6186_v14 = vmul.f32 %v11559_v45, %v6171_v43  ;;  %v6258_v6 = vmul.f32 %v11538_v11, %v12317_v29  ;;  %8785 = vtanh.f32 %v5766_v12  ;;  %v12320_v56 = vld [vmem:[#allocation36_spill] sm:$0xff] }
0x1632   : > { %v6231_v55 = vsel %vm1481_vm3, %v12314_v46, %v12313_v48  ;;  %v6250_v41 = vmul.f32 %v11359_v18, %v6234_v35  ;;  %v6306_v16 = vmul.f32 %v11356_v2, %v12318_v47  ;;  %v6330_v43 = vmul.f32 %v11348_v50, %v12320_v56  ;;  %v12321_v46 = vld [vmem:[#allocation44_spill] sm:$0xff] }
0x1633   : > { %v6236_v26 = vmul.f32 %v6231_v55, %v12316_v38  ;;  %v6307_v48 = vmul.f32 %v6231_v55, %v12319_v24  ;;  %v6274_v32 = vmul.f32 %v11362_v61, %v6258_v6  ;;  %v6378_v27 = vmul.f32 %v6231_v55, %v12321_v46  ;;  %v12322_v2 = vld [vmem:[#allocation100_spill] sm:$0xff] }
0x1634   : > { %v6402_v38 = vadd.f32 %v6210_v17, %v6186_v14  ;;  %v11616_v29 = vmul.f32 %v11323_v36, %v6359_v13  ;;  %v6322_v12 = vmul.f32 %v11605_v0, %v6306_v16  ;;  %v6435_v47 = vadd.f32 %v11397_v57, %v6403_v19 }
0x1635   : > { %v6323_v35 = vmul.f32 %v11605_v0, %v6307_v48  ;;  %v6346_v24 = vmul.f32 %v11455_v15, %v6330_v43  ;;  %v6410_v6 = vadd.f32 %v6274_v32, %v6250_v41  ;;  %v6395_v56 = vmul.f32 %v11621_v52, %v11470_v3  ;;  %v12325_v48 = vld [vmem:[#allocation50_spill] sm:$0xff]  ;;  %v12327_v43 = vld [vmem:[#allocation49_spill] sm:$0xff] }
0x1636   : > { %v6173_v17 = vmul.f32 %v11348_v50, %v12322_v2  ;;  %v6394_v36 = vmul.f32 %v11621_v52, %v6378_v27  ;;  %v6418_v13 = vadd.f32 %v6322_v12, %v11385_v49  ;;  %v12323_v14 = vrot.slane %v11474_v1, 1  ;;  %v12328_v27 = vld [vmem:[#allocation53_spill] sm:$0xff] }
0x1637   : > { %v6419_v55 = vadd.f32 %v6323_v35, %v11340_v37  ;;  %v12324_v16 = vrot.slane %v11391_v28, 1  ;;  %v6426_v19 = vadd.f32 %v11368_v9, %v6346_v24  ;;  %v6434_v41 = vadd.f32 %v6410_v6, %v6402_v38  ;;  %v12326_v37 = vld [vmem:[#allocation38_spill] sm:$0xff]  ;;  %v12329_v9 = vld [vmem:[#allocation52_spill] sm:$0xff]  ;;  %v12331_v6 = vld [vmem:[#allocation99_spill] sm:$0xff] }
0x1638   : > { %v6188_v3 = vmul.f32 %v11559_v45, %v6173_v17  ;;  %v6252_v50 = vmul.f32 %v11359_v18, %v6236_v26  ;;  %v6260_v32 = vmul.f32 %v11433_v54, %v12326_v37  ;;  %v6308_v28 = vmul.f32 %v11450_v5, %v12327_v43 }
0x1639   : > { %v6229_v57 = vsel %vm1481_vm3, %v12324_v16, %v12323_v14  ;;  %v6443_v2 = vadd.f32 %v11476_v59, %v6419_v55  ;;  %v6442_v46 = vadd.f32 %v6426_v19, %v6418_v13  ;;  %v6332_v38 = vmul.f32 %v11427_v4, %v12329_v9  ;;  %v12332_v16 = vld [vmem:[#allocation65_spill] sm:$0xff] }
0x163a   : > { %v11643_v49 = vmul.f32 %v6229_v57, %v12325_v48  ;;  %v6309_v12 = vmul.f32 %v6229_v57, %v12328_v27  ;;  %v6404_v35 = vadd.f32 %v11334_v51, %v6188_v3  ;;  %v6276_v59 = vmul.f32 %v11362_v61, %v6260_v32  ;;  %v8784_v55 = vpop.eup %8783 }
0x163b   : > { %v6451_v26 = vadd.f32 %v6443_v2, %v6435_v47  ;;  %v6324_v24 = vmul.f32 %v11605_v0, %v6308_v28  ;;  %v6174_v17 = vmul.f32 %v11433_v54, %v12331_v6  ;;  %v6450_v14 = vadd.f32 %v6442_v46, %v6434_v41  ;;  %v8786_v47 = vpop.eup %8785  ;;  %v11667_v28 = vld [vmem:[%s12330_s10] ss:$0 sm:$0xff]  ;;  %v12339_v6 = vld [vmem:[#allocation43_spill] sm:$0xff]  ;;  %s12386_s10 = sld [smem:[#allocation23_spill]] }
0x163c   : > { %v6348_v13 = vmul.f32 %v11455_v15, %v6332_v38  ;;  %v6380_v19 = vmul.f32 %v6229_v57, %v12332_v16  ;;  %v12333_v48 = vrot.slane %v11472_v10, 1  ;;  %v12334_v37 = vrot.slane %v11474_v1, 1  ;;  %v12337_v38 = vld [vmem:[#allocation39_spill] sm:$0xff] }
0x163d   : > { %v5781_v3 = vadd.f32 1.0, %v8784_v55  ;;  %v6459_v2 = vadd.f32 %v6451_v26, %v6395_v56  ;;  %v6412_v32 = vadd.f32 %v6276_v59, %v6252_v50  ;;  %v6420_v54 = vadd.f32 %v6324_v24, %v11466_v60  ;;  %v12338_v59 = vld [vmem:[#allocation55_spill] sm:$0xff] }
0x163e   : > { %v6228_v51 = vsel %vm1481_vm3, %v12334_v37, %v12333_v48  ;;  %v5782_v43 = vadd.f32 1.0, %v8786_v47  ;;  %v6458_v41 = vadd.f32 %v6450_v14, %v6394_v36  ;;  %v6428_v57 = vadd.f32 %v11439_v58, %v6348_v13  ;;  %v11678_v36 = vld [vmem:[%s12335_s15] ss:$0 sm:$0xff]  ;;  %v12340_v13 = vld [vmem:[#allocation58_spill] sm:$0xff]  ;;  %v12341_v37 = vld [vmem:[#allocation69_spill] sm:$0xff]  ;;  %s6894_s15 = sshll.u32 %s12390_s23, 3 }
0x163f   : > { %v6189_v46 = vmul.f32 %v11559_v45, %v6174_v17  ;;  %v5789_v1 = vmul.f32 %v5781_v3, %v11293_v21  ;;  %v6474_v27 = vadd.f32 %v11667_v28, %v6459_v2  ;;  %v6436_v9 = vadd.f32 %v6412_v32, %v6404_v35  ;;  %v11690_v17 = vld [vmem:[%s12336_s16] ss:$0 sm:$0xff]  ;;  %s1182_s16 = scalar_lea.vmem %s9058_s20, %s6894_s15 }
0x1640   : > { %v6237_v56 = vmul.f32 %v11450_v5, %v12337_v38  ;;  %v5790_v50 = vmul.f32 %v5782_v43, %v11289_v22  ;;  %v6473_v60 = vadd.f32 %v11667_v28, %v6458_v41  ;;  %v6396_v26 = vmul.f32 %v11621_v52, %v6380_v19 }
0x1641   : > { %v6444_v58 = vadd.f32 %v6428_v57, %v6420_v54  ;;  %7895 = vmatprep.mubr.msk.f32.mxu1 %vm2172_vm7, %v5789_v1  ;;  %v6489_v21 = vmul.f32 %v11678_v36, %v6474_v27  ;;  %v6239_v24 = vmul.f32 %v6228_v51, %v12338_v59  ;;  %v6261_v5 = vmul.f32 %v11427_v4, %v12339_v6  ;;  %v12343_v27 = vld [vmem:[#allocation102_spill] sm:$0xff] }
0x1642   : > { %v6253_v35 = vmul.f32 %v11359_v18, %v6237_v56  ;;  %7896 = vmatmul.mubr.msk.f32.gmra.mrb[70].mxu1 %vm2172_vm7, %v5790_v50  ;;  %v6488_v22 = vmul.f32 %v11678_v36, %v6473_v60  ;;  %v6325_v14 = vmul.f32 %v11605_v0, %v6309_v12  ;;  %v6333_v16 = vmul.f32 %v11513_v34, %v12340_v13  ;;  %v12342_v12 = vld [vmem:[#allocation70_spill] sm:$0xff] }
0x1643   : > { %v6452_v55 = vadd.f32 %v6444_v58, %v6436_v9  ;;  %v6504_v19 = vadd.f32 %v11690_v17, %v6489_v21  ;;  %v6277_v48 = vmul.f32 %v11362_v61, %v6261_v5  ;;  %v6381_v47 = vmul.f32 %v6228_v51, %v12341_v37  ;;  %v12346_v21 = vld [vmem:[#allocation54_spill] sm:$0xff]  ;;  %v12348_v5 = vld [vmem:[#allocation73_spill] sm:$0xff] }
0x1644   : > { %v6405_v3 = vadd.f32 %v11442_v33, %v6189_v46  ;;  %v6503_v2 = vadd.f32 %v11690_v17, %v6488_v22  ;;  %v6349_v54 = vmul.f32 %v11455_v15, %v6333_v16  ;;  %v6421_v43 = vadd.f32 %v6325_v14, %v11423_v62 }
0x1645   : > { %v6460_v32 = vadd.f32 %v6452_v55, %v6396_v26  ;;  %v6512_v41 = vmax.f32 %v6504_v19, 0.0  ;;  %v6310_v57 = vmul.f32 %v6228_v51, %v12342_v12  ;;  %v6413_v1 = vadd.f32 %v6277_v48, %v6253_v35  ;;  %v12349_v55 = vld [vmem:[#allocation84_spill] sm:$0xff]  ;;  %v12350_v48 = vld [vmem:[#allocation101_spill] sm:$0xff] }
0x1646   : > { %v6175_v9 = vmul.f32 %v11427_v4, %v12343_v27  ;;  %v6511_v38 = vmax.f32 %v6503_v2, 0.0  ;;  %v6429_v50 = vadd.f32 %v11532_v31, %v6349_v54  ;;  %v12344_v33 = vrot.slane %v11487_v53, 1 }
0x1647   : > { %v6475_v56 = vadd.f32 %v11667_v28, %v6460_v32  ;;  %v12345_v46 = vrot.slane %v11472_v10, 1  ;;  %v6397_v62 = vmul.f32 %v11621_v52, %v6381_v47  ;;  %v6437_v26 = vadd.f32 %v6413_v1, %v6405_v3  ;;  %v12347_v10 = vld [vmem:[#allocation74_spill] sm:$0xff]  ;;  %v12351_v47 = vld [vmem:[#allocation71_spill] sm:$0xff] }
0x1648   : > { %v6190_v51 = vmul.f32 %v11559_v45, %v6175_v9  ;;  %v6254_v4 = vmul.f32 %v11359_v18, %v11643_v49  ;;  %7934 = vmatprep.mubr.msk.f32.mxu1 %vm2208_vm11, %v6511_v38  ;;  %v6445_v31 = vadd.f32 %v6429_v50, %v6421_v43  ;;  %v6262_v59 = vmul.f32 %v11513_v34, %v12346_v21  ;;  %v12354_v38 = vld [vmem:[#allocation62_spill] sm:$0xff] }
0x1649   : > { %v6227_v60 = vsel %vm1481_vm3, %v12345_v46, %v12344_v33  ;;  %v6490_v58 = vmul.f32 %v11678_v36, %v6475_v56  ;;  %7935 = vmatmul.mubr.msk.f32.vlgmr.msra.gmra.mrb[64].mxu1 %vm2208_vm11, %v6512_v41  ;;  %v6326_v6 = vmul.f32 %v11605_v0, %v6310_v57  ;;  %v6334_v22 = vmul.f32 %v11509_v8, %v12348_v5  ;;  %v12355_v56 = vld [vmem:[#allocation86_spill] sm:$0xff]  ;;  %v12361_v5 = vld [vmem:[#allocation77_spill] sm:$0xff] }
0x164a   : > { %v6311_v35 = vmul.f32 %v6227_v60, %v12347_v10  ;;  %v6382_v14 = vmul.f32 %v6227_v60, %v12349_v55  ;;  %v6406_v49 = vadd.f32 %v11416_v20, %v6190_v51  ;;  %v6453_v16 = vadd.f32 %v6445_v31, %v6437_v26  ;;  %v12357_v26 = vld [vmem:[#allocation89_spill] sm:$0xff]  ;;  %v12359_v31 = vld [vmem:[#allocation78_spill] sm:$0xff] }
0x164b   : > { %v6505_v13 = vadd.f32 %v11690_v17, %v6490_v58  ;;  %v6278_v19 = vmul.f32 %v11362_v61, %v6262_v59  ;;  %v6176_v37 = vmul.f32 %v11513_v34, %v12350_v48  ;;  %v6240_v3 = vmul.f32 %v6227_v60, %v12351_v47  ;;  %v12360_v59 = vld [vmem:[#allocation103_spill] sm:$0xff] }
0x164c   : > { %v6350_v2 = vmul.f32 %v11455_v15, %v6334_v22  ;;  %v6422_v32 = vadd.f32 %v6326_v6, %v11525_v30  ;;  %v12352_v54 = vrot.slane %v11478_v39, 1  ;;  %v12353_v43 = vmov %v12344_v33 }
0x164d   : > { %v6513_v41 = vmax.f32 %v6505_v13, 0.0  ;;  %v6461_v12 = vadd.f32 %v6453_v16, %v6397_v62  ;;  %v6414_v57 = vadd.f32 %v6278_v19, %v6254_v4  ;;  %v6191_v1 = vmul.f32 %v11559_v45, %v6176_v37  ;;  %v12356_v62 = vld [vmem:[#allocation80_spill] sm:$0xff]  ;;  %v12358_v4 = vld [vmem:[#allocation63_spill] sm:$0xff] }
0x164e   : > { %v6226_v20 = vsel %vm1481_vm3, %v12353_v43, %v12352_v54  ;;  %v6398_v34 = vmul.f32 %v11621_v52, %v6382_v14  ;;  %v6430_v27 = vadd.f32 %v11516_v42, %v6350_v2  ;;  %v6255_v9 = vmul.f32 %v11359_v18, %v6239_v24  ;;  %v12362_v16 = vld [vmem:[#allocation76_spill] sm:$0xff] }
0x164f   : > { %v6263_v30 = vmul.f32 %v11509_v8, %v12354_v38  ;;  %7937 = vmatprep.mubr.msk.f32.mxu1 %vm2208_vm11, %v6513_v41  ;;  %v6476_v39 = vadd.f32 %v11667_v28, %v6461_v12  ;;  %v6438_v53 = vadd.f32 %v6414_v57, %v6406_v49  ;;  %v6312_v50 = vmul.f32 %v6226_v20, %v12355_v56  ;;  %v12363_v43 = vld [vmem:[#allocation92_spill] sm:$0xff]  ;;  %v12364_v12 = vld [vmem:[#allocation59_spill] sm:$0xff] }
0x1650   : > { %v6327_v33 = vmul.f32 %v11605_v0, %v6311_v35  ;;  %v6446_v46 = vadd.f32 %v6430_v27, %v6422_v32  ;;  %v6335_v42 = vmul.f32 %v11570_v44, %v12356_v62  ;;  %v6383_v24 = vmul.f32 %v6226_v20, %v12357_v26  ;;  %v12366_v38 = vld [vmem:[#allocation104_spill] sm:$0xff] }
0x1651   : > { %v6279_v60 = vmul.f32 %v11362_v61, %v6263_v30  ;;  %v6491_v51 = vmul.f32 %v11678_v36, %v6476_v39  ;;  %v6407_v58 = vadd.f32 %v12358_v4, %v6191_v1  ;;  %v6177_v10 = vmul.f32 %v11509_v8, %v12360_v59  ;;  %v12370_v4 = vld [vmem:[#allocation91_spill] sm:$0xff]  ;;  %v12372_v59 = vld [vmem:[#allocation40_spill] sm:$0xff] }
0x1652   : > { %v6423_v21 = vadd.f32 %v6327_v33, %v12359_v31  ;;  %v6454_v6 = vadd.f32 %v6446_v46, %v6438_v53  ;;  %v6241_v35 = vmul.f32 %v6226_v20, %v12361_v5  ;;  %v6351_v22 = vmul.f32 %v11455_v15, %v6335_v42  ;;  %v12369_v42 = vld [vmem:[#allocation88_spill] sm:$0xff] }
0x1653   : > { %v6415_v55 = vadd.f32 %v6279_v60, %v6255_v9  ;;  %v6506_v14 = vadd.f32 %v11690_v17, %v6491_v51  ;;  %v6192_v49 = vmul.f32 %v11559_v45, %v6177_v10  ;;  %v6256_v13 = vmul.f32 %v11359_v18, %v6240_v3 }
0x1654   : > { %v6264_v19 = vmul.f32 %v11570_v44, %v12362_v16  ;;  %v6462_v48 = vadd.f32 %v6454_v6, %v6398_v34  ;;  %v6431_v37 = vadd.f32 %v11616_v29, %v6351_v22  ;;  %v6328_v8 = vmul.f32 %v11605_v0, %v6312_v50  ;;  %v12365_v34 = vld [vmem:[#allocation96_spill] sm:$0xff]  ;;  %v12367_v50 = vld [vmem:[#allocation83_spill] sm:$0xff] }
0x1655   : > { %v6439_v47 = vadd.f32 %v6415_v55, %v6407_v58  ;;  %v6514_v2 = vmax.f32 %v6506_v14, 0.0  ;;  %v6399_v32 = vmul.f32 %v11621_v52, %v6383_v24  ;;  %v6336_v20 = vmul.f32 %v11566_v63, %v12363_v43  ;;  %v12374_v55 = vld [vmem:[#allocation60_spill] sm:$0xff] }
0x1656   : > { %v6280_v54 = vmul.f32 %v11362_v61, %v6264_v19  ;;  %v6477_v41 = vadd.f32 %v11667_v28, %v6462_v48  ;;  %v6447_v3 = vadd.f32 %v6431_v37, %v6423_v21  ;;  %v6408_v57 = vadd.f32 %v12364_v12, %v6192_v49 }
0x1657   : > { %v6424_v1 = vadd.f32 %v6328_v8, %v11588_v23  ;;  %7938 = vmatmul.mubr.msk.f32.gmra.mrb[66].mxu1 %vm2208_vm11, %v6514_v2  ;;  %v6352_v29 = vmul.f32 %v11455_v15, %v6336_v20  ;;  %v6384_v27 = vmul.f32 %v11555_v25, %v12365_v34  ;;  %v6178_v30 = vmul.f32 %v11570_v44, %v12366_v38  ;;  %v12368_v23 = vld [vmem:[#allocation33_spill] sm:$0xff] }
0x1658   : > { %v6416_v9 = vadd.f32 %v6280_v54, %v6256_v13  ;;  %v6492_v39 = vmul.f32 %v11678_v36, %v6477_v41  ;;  %v6455_v53 = vadd.f32 %v6447_v3, %v6439_v47  ;;  %v6257_v56 = vmul.f32 %v11359_v18, %v6241_v35  ;;  %v12371_v18 = vld [vmem:[#allocation30_spill] sm:$0xff]  ;;  %v12379_v34 = vld [vmem:[#allocation81_spill] sm:$0xff] }
0x1659   : > { %v6265_v33 = vmul.f32 %v11566_v63, %v12367_v50  ;;  %v6432_v46 = vadd.f32 %v12368_v23, %v6352_v29  ;;  %v6193_v62 = vmul.f32 %v11559_v45, %v6178_v30  ;;  %v6313_v26 = vmul.f32 %v11555_v25, %v12369_v42  ;;  %v7165_v30 = vld [vmem:[%s12377_s28] ss:$0 sm:$0xff]  ;;  %v12380_v50 = vld [vmem:[#allocation105_spill] sm:$0xff]  ;;  %v12381_v23 = vld [vmem:[#allocation90_spill] sm:$0xff] }
0x165a   : > { %v6440_v60 = vadd.f32 %v6416_v9, %v6408_v57  ;;  %v6507_v24 = vadd.f32 %v11690_v17, %v6492_v39  ;;  %v6463_v51 = vadd.f32 %v6455_v53, %v6399_v32  ;;  %v6337_v58 = vmul.f32 %v11538_v11, %v12370_v4  ;;  %v12378_v57 = vld [vmem:[#allocation75_spill] sm:$0xff] }
0x165b   : > { %v6281_v44 = vmul.f32 %v11362_v61, %v6265_v33  ;;  %v6305_v31 = vmul.f32 %v11318_v40, %v12371_v18  ;;  %v6448_v63 = vadd.f32 %v6432_v46, %v6424_v1  ;;  %v6329_v21 = vmul.f32 %v11605_v0, %v6313_v26  ;;  %v12373_v40 = vld [vmem:[#allocation95_spill] sm:$0xff]  ;;  %v12375_v0 = vld [vmem:[#allocation64_spill] sm:$0xff] }
0x165c   : > { %v6409_v10 = vadd.f32 %v12372_v59, %v6193_v62  ;;  %v6515_v45 = vmax.f32 %v6507_v24, 0.0  ;;  %v6478_v6 = vadd.f32 %v11667_v28, %v6463_v51  ;;  %v6353_v25 = vmul.f32 %v11455_v15, %v6337_v58 }
0x165d   : > { %v6417_v5 = vadd.f32 %v6281_v44, %v6257_v56  ;;  %v6400_v35 = vmul.f32 %v11621_v52, %v6384_v27  ;;  %v6456_v61 = vadd.f32 %v6448_v63, %v6440_v60  ;;  %v6425_v22 = vadd.f32 %v6329_v21, %v6305_v31  ;;  %v12382_v31 = vld [vmem:[#allocation107_spill] sm:$0xff]  ;;  %v12383_v21 = vld [vmem:[#allocation106_spill] sm:$0xff] }
0x165e   : > { %7940 = vmatprep.mubr.msk.f32.mxu1 %vm2208_vm11, %v6515_v45  ;;  %v6493_v11 = vmul.f32 %v11678_v36, %v6478_v6  ;;  %v6385_v14 = vmul.f32 %v12374_v55, %v12373_v40  ;;  %v6433_v49 = vadd.f32 %v12375_v0, %v6353_v25  ;;  %v12384_v40 = vld [vmem:[#allocation109_spill] sm:$0xff]  ;;  %vm8853_vm2 = vmmov 0  }
0x165f   : > { %v6441_v13 = vadd.f32 %v6417_v5, %v6409_v10  ;;  %v6464_v16 = vadd.f32 %v6456_v61, %v6400_v35  ;;  %vm6793_vm3 = vcmask 39936  }
0x1660   : > { %v6508_v19 = vadd.f32 %v11690_v17, %v6493_v11  ;;  %v6449_v48 = vadd.f32 %v6433_v49, %v6425_v22  ;;  %v6401_v47 = vmul.f32 %v11621_v52, %v6385_v14  ;;  %v7123_v52 = vld [vmem:[%s12376_s26] ss:$0 sm:$0xff] }
0x1661   : > { %v6479_v15 = vadd.f32 %v11667_v28, %v6464_v16  ;;  %v8251_v1 = vadd.f32 %v7123_v52, %v12378_v57  ;;  %v8254_v27 = vadd.f32 %v7123_v52, %v12379_v34  ;;  %v8257_v33 = vadd.f32 %v7123_v52, %v12380_v50  ;;  %v12385_v14 = vld [vmem:[#allocation108_spill] sm:$0xff] }
0x1662   : > { %v6516_v37 = vmax.f32 %v6508_v19, 0.0  ;;  %v6457_v8 = vadd.f32 %v6449_v48, %v6441_v13  ;;  %v8260_v46 = vadd.f32 %v7123_v52, %v12381_v23  ;;  %v8263_v63 = vadd.f32 %v7123_v52, %v12382_v31 }
0x1663   : > { %v6494_v2 = vmul.f32 %v11678_v36, %v6479_v15  ;;  %v8258_v62 = vadd.f32 %v8257_v33, %v7165_v30  ;;  %v8266_v59 = vadd.f32 %v7123_v52, %v12383_v21  ;;  %v8269_v55 = vadd.f32 %v7123_v52, %v12384_v40 }
0x1664   : > { %7941 = vmatmul.mubr.msk.f32.gmra.mrb[68].mxu1 %vm2208_vm11, %v6516_v37  ;;  %v6465_v32 = vadd.f32 %v6457_v8, %v6401_v47  ;;  %v8261_v42 = vadd.f32 %v8260_v46, %v7165_v30  ;;  %v8264_v45 = vadd.f32 %v8263_v63, %v7165_v30  ;;  %v8272_v0 = vadd.f32 %v7123_v52, %v12385_v14 }
0x1665   : > { %v6509_v54 = vadd.f32 %v11690_v17, %v6494_v2  ;;  %v8267_v6 = vadd.f32 %v8266_v59, %v7165_v30  ;;  %v8270_v16 = vadd.f32 %v8269_v55, %v7165_v30 }
0x1666   : > { %v6480_v43 = vadd.f32 %v11667_v28, %v6465_v32  ;;  %v8273_v19 = vadd.f32 %v8272_v0, %v7165_v30 }
0x1667   : > { %v6517_v20 = vmax.f32 %v6509_v54, 0.0 }
0x1668   : > { %v6495_v41 = vmul.f32 %v11678_v36, %v6480_v43 }
0x1669   : > { %7943 = vmatprep.mubr.msk.f32.mxu1 %vm2208_vm11, %v6517_v20 }
0x166a   : > { %v6510_v3 = vadd.f32 %v11690_v17, %v6495_v41 }
0x166c   : > { %v6518_v12 = vmax.f32 %v6510_v3, 0.0 }
0x166e   : > { %7944 = vmatmul.mubr.msk.f32.gmra.mrb[70].mxu1 %vm2208_vm11, %v6518_v12 }
0x171c   : > { %v7936_v29 = vpop.f32.mrb[64].mxu1 }
0x171d   : > { %v8252_v9 = vadd.f32 %v8251_v1, %v7936_v29  ;;  %v6624_v38 = vpop.f32.mrb[65].mxu1 }
0x171e   : > { %v8255_v28 = vadd.f32 %v8254_v27, %v6624_v38  ;;  %v6711_v38 = vld [vmem:[%s9048_s4] sm:$0xff] }
0x171f   : > { %v8253_v39 = vadd.f32 %v8252_v9, %v7165_v30 }
0x1720   : > { %v8256_v53 = vadd.f32 %v8255_v28, %v7165_v30  ;;  %v6712_v30 = vld [vmem:[%s9048_s4 + $0x8] sm:$0xff]  ;;  %v6713_v28 = vld [vmem:[%s9048_s4 + $0x10] sm:$0xff] }
0x1721   : > { %v6672_v36 = vsel %vm2172_vm7, %v8253_v39, 0.0  ;;  %v8852_v39 = vmov 0.0|0.0  }
0x1722   : > { %v6671_v56 = vsel %vm2172_vm7, %v8256_v53, 0.0  ;;  %8245 = vmatprep.subr.bf16.mxu0 %v8852_v39  ;;  %v8246_v53 = vpack.c.bf16 %v6712_v30, %v6711_v38 }
0x1723   : > { %v6673_v17 = vadd.f32 %v6672_v36, %v6671_v56  ;;  %v6714_v36 = vld [vmem:[%s9048_s4 + $0x18] sm:$0xff]  ;;  %v8854_v56 = vmov 0.0  }
0x1724   : > { %7954 = vmatprep.mubr.msk.f32.mxu0 %vm8853_vm2, %v8854_v56  ;;  %8247 = vmatpush3.bf16.msra.mxu0 %v8246_v53 }
0x1725   : > { %8248 = vmatprep.subr.bf16.mxu0 %v8852_v39 }
0x172a   : > { %v7939_v60 = vpop.f32.mrb[66].mxu1 }
0x172b   : > { %v6634_v26 = vpop.f32.mrb[67].mxu1  ;;  %v8259_v24 = vadd.f32 %v8258_v62, %v7939_v60  ;;  %v6694_v60 = vld [vmem:[%s12386_s10] sm:$0x1] }
0x172c   : > { %v8262_v51 = vadd.f32 %v8261_v42, %v6634_v26  ;;  %v6695_v42 = vld [vmem:[%s9043_s27] sm:$0x1] }
0x172d   : > { %v6676_v58 = vsel %vm2172_vm7, %v8259_v24, 0.0 }
0x172e   : > { %v6674_v44 = vsel %vm2172_vm7, %v8262_v51, 0.0  ;;  %v6715_v51 = vld [vmem:[%s9053_s12] sm:$0x1] }
0x172f   : > { %v6675_v4 = vadd.f32 %v6674_v44, %v6673_v17  ;;  %v8249_v17 = vpack.c.bf16 %v6714_v36, %v6713_v28  ;;  %v6791_v44 = vsub.s32 0, %v12276_v7 }
0x1731   : > { %v6677_v18 = vadd.f32 %v6676_v58, %v6675_v4  ;;  %8250 = vmatpush3.bf16.msra.mxu0 %v8249_v17 }
0x1737   : > { %v7942_v10 = vpop.f32.mrb[68].mxu1 }
0x1738   : > { %v6644_v25 = vpop.f32.mrb[69].mxu1  ;;  %v8265_v5 = vadd.f32 %v8264_v45, %v7942_v10 }
0x1739   : > { %v8268_v35 = vadd.f32 %v8267_v6, %v6644_v25 }
0x173a   : > { %v6680_v11 = vsel %vm2172_vm7, %v8265_v5, 0.0 }
0x173b   : > { %v6678_v61 = vsel %vm2172_vm7, %v8268_v35, 0.0 }
0x173c   : > { %v6679_v22 = vadd.f32 %v6678_v61, %v6677_v18 }
0x173e   : > { %v6681_v49 = vadd.f32 %v6680_v11, %v6679_v22 }
0x1741   : > { %v7945_v13 = vpop.f32.mrb[70].mxu1 }
0x1742   : > { %v6654_v48 = vpop.f32.mrb[71].mxu1  ;;  %v8271_v15 = vadd.f32 %v8270_v16, %v7945_v13 }
0x1743   : > { %v8274_v37 = vadd.f32 %v8273_v19, %v6654_v48 }
0x1744   : > { %v6684_v2 = vsel %vm2172_vm7, %v8271_v15, 0.0 }
0x1745   : > { %v6682_v47 = vsel %vm2172_vm7, %v8274_v37, 0.0 }
0x1746   : > { %v6683_v8 = vadd.f32 %v6682_v47, %v6681_v49 }
0x1748   : > { %v6685_v32 = vadd.f32 %v6684_v2, %v6683_v8 }
0x174a   : > { %v6686_v54 = vrot.slane %v6685_v32, 4 }
0x174c   : > { %v6687_v43 = vadd.f32 %v6686_v54, %v6685_v32 }
0x174e   : > { %v6688_v20 = vrot.slane %v6687_v43, 2 }
0x1750   : > { %v6689_v41 = vadd.f32 %v6688_v20, %v6687_v43 }
0x1752   : > { %v6690_v3 = vrot.slane %v6689_v41, 1 }
0x1754   : > { %v6691_v12 = vadd.f32 %v6690_v3, %v6689_v41 }
0x1756   : > { %v6693_v52 = vmul.f32 0.015625, %v6691_v12 }
0x1758   : > { %v6696_v57 = vsel %vm2172_vm7, %v6693_v52, 0.0 }
0x1759   : > { %6697 = vadd.xlane.f32.xlu1 %v6696_v57 }
0x17e6   : > { %v6698_v1 = vpop.xlane.xlu1 %6697 }
0x17e7   : > { %v6699_v29 = vmul.f32 0.03125, %v6698_v1 }
0x17e9   : > { %v6700_v34 = vsub.f32 %v6693_v52, %v6699_v29 }
0x17eb   : > { %v6701_v27 = vmul.f32 %v6700_v34, %v6700_v34 }
0x17ed   : > { %v6702_v9 = vsel %vm2172_vm7, %v6701_v27, 0.0 }
0x17ee   : > { %6703 = vadd.xlane.f32.xlu0 %v6702_v9 }
0x187b   : > { %v6704_v50 = vpop.xlane.xlu0 %6703 }
0x187c   : > { %v6705_v33 = vmul.f32 0.03125, %v6704_v50 }
0x187e   : > { %v6706_v23 = vadd.f32 1e-05, %v6705_v33 }
0x1880   : > { %8787 = vrsqrt.f32 %v6706_v23 }
0x188a   : > { %v8788_v46 = vpop.eup %8787 }
0x188b   : > { %v6708_v62 = vmul.f32 %v8788_v46, %v6700_v34 }
0x188d   : > { %v6709_v26 = vmul.f32 %v6708_v62, %v6694_v60 }
0x188f   : > { %v6710_v24 = vadd.f32 %v6709_v26, %v6695_v42 }
0x1891   : > { %7955 = vmatmul.mubr.msk.f32.vlgmr.msra.gmra.mrb[80].mxu0 %vm2172_vm7, %v6710_v24 }
0x1964   : > { %v6785_v4 = vpop.f32.mrb[80].mxu0 }
0x1965   : > { %v6786_v58 = vadd.f32 %v6785_v4, %v6715_v51  ;;  %v7956_v18 = vpop.f32.mrb[81].mxu0 }
0x1967   : > { %v6792_v31 = vrot.slane %v6786_v58, %v6791_v44 }
0x1969   : > { %6794 = vst.msk [vmem:[%s1182_s16] sm:$0xff] %vm6793_vm3, %v6792_v31 }
0x196a PF: > { %s89_s22 = sadd.s32 1, %s8795_s22  }
0x196b   : > { %p86_p5 = scmp.ge.s32.totalorder %s89_s22, 4  }
0x196d   :  { %88 = sbr.rel (!%p86_p5) target bundleno = 75 (0x4b), region = 261 }

</bundles_post_ra>
